<compile_context>
chip_gen: v7x
topology: tpu7x:2x2x1
jax: 0.10.0
libtpu: 0.0.40
codegen_flags: <defaults>
</compile_context>

<pallas_src>
import math
import functools

import numpy as np
import jax
import jax.numpy as jnp
from jax.experimental import pallas as pl
from jax.experimental.pallas import tpu as pltpu

# Set to jnp.bfloat16 on v5e/v6e/v7x for 2x MXU throughput and half the operand bytes
# (softmax math and accumulation stay f32).  Kept f32 so the self-check stays at 1e-4.
MATMUL_DTYPE = jnp.float32
# approx=True uses the EUP fast-path reciprocal (frees VALU slots at ~1e-4 rel. error).
APPROX_RECIPROCAL = False


# ----------------------------- tiled linear projection -----------------------------

def _linear_kernel(x_ref, w_ref, b_ref, o_ref):
    acc = jnp.dot(x_ref[...].astype(MATMUL_DTYPE), w_ref[...].astype(MATMUL_DTYPE),
                  preferred_element_type=jnp.float32)
    o_ref[...] = (acc + b_ref[...]).astype(o_ref.dtype)


def pallas_linear(x2d, w, b, *, block_rows=512):
    """Row-tiled (tokens, Din) @ (Din, Dout) + b, pipelined over a 'parallel' row grid."""
    N, Din = x2d.shape
    Dout = w.shape[1]
    tm = min(block_rows, N)
    return pl.pallas_call(
        _linear_kernel,
        out_shape=jax.ShapeDtypeStruct((N, Dout), x2d.dtype),
        grid=(pl.cdiv(N, tm),),
        in_specs=[pl.BlockSpec((tm, Din), lambda i: (i, 0)),
                  pl.BlockSpec((Din, Dout), lambda i: (0, 0)),
                  pl.BlockSpec((1, Dout), lambda i: (0, 0))],
        out_specs=pl.BlockSpec((tm, Dout), lambda i: (i, 0)),
        compiler_params=pltpu.CompilerParams(
            dimension_semantics=("parallel",),
            vmem_limit_bytes=32 * 1024 * 1024),
    )(x2d, w, b.reshape(1, Dout))


# ----------------------------- block-row attention kernel -----------------------------

def _attn_row_kernel(bias_ref, q_ref, km1_ref, k0_ref, kp1_ref,
                     vm1_ref, v0_ref, vp1_ref, o_ref):
    # q_ref:   (1, 1, vb, nh, bs2, dh)        one row of query blocks (head-major)
    # k*/v*:   (1, 1, vb+2, nh, bs2, dh)      padded block-rows i-1 / i / i+1
    # bias:    (nh, bs2, 9*bs2)               resident positional bias (key order dx,dy,token)
    # o_ref:   (1, 1, vb, bs2, nh*dh)         lane-packed output row
    _, _, vb, nh, bs2, dh = q_ref.shape
    f32 = jnp.float32
    scale = 1.0 / math.sqrt(dh)

    i = pl.program_id(1)                     # block-row index (width / hb direction)
    last_row = pl.num_programs(1) - 1
    jj = jax.lax.broadcasted_iota(jnp.int32, (vb, 1, 1, 1), 0)   # block-column index in row

    q3 = q_ref[0, 0].astype(MATMUL_DTYPE).reshape(vb * nh, bs2, dh)
    k_rows = [km1_ref[0, 0], k0_ref[0, 0], kp1_ref[0, 0]]        # (vb+2, nh, bs2, dh) each
    v_rows = [vm1_ref[0, 0], v0_ref[0, 0], vp1_ref[0, 0]]

    # ---- pass 1: scores for each of the 9 neighbour-block offsets --------------------
    # One batched MXU contraction per offset over the merged (block, head) batch axis.
    scores = []
    for dx in range(3):
        for dy in range(3):
            kc = k_rows[dx][dy:dy + vb].astype(MATMUL_DTYPE).reshape(vb * nh, bs2, dh)
            s = jnp.einsum('bqd,bkd->bqk', q3, kc,
                           preferred_element_type=f32)           # (vb*nh, bs2, bs2)
            c0 = (3 * dx + dy) * bs2
            s = s.reshape(vb, nh, bs2, bs2) * scale + bias_ref[:, :, c0:c0 + bs2]
            # Boundary cutoff: mask offsets whose neighbour block lies outside the image
            # (replaces the precomputed (hb, vb, ...) cutoff tensor of the reference).
            cut = []
            if dx == 0:
                cut.append(i == 0)
            if dx == 2:
                cut.append(i == last_row)
            if dy == 0:
                cut.append(jj == 0)
            if dy == 2:
                cut.append(jj == vb - 1)
            if cut:
                invalid = functools.reduce(jnp.logical_or, cut)
                s = jnp.where(invalid, -jnp.inf, s)
            scores.append(s)

    # ---- pass 2: exact softmax over all 9*bs2 keys, then PV accumulation -------------
    m = functools.reduce(jnp.maximum,
                         [jnp.max(s, axis=-1, keepdims=True) for s in scores])
    l = jnp.zeros((vb, nh, bs2, 1), f32)
    acc = jnp.zeros((vb * nh, bs2, dh), f32)
    for idx, s in enumerate(scores):
        dx, dy = divmod(idx, 3)
        p = jnp.exp(s - m)                                       # (vb, nh, bs2, bs2)
        l = l + jnp.sum(p, axis=-1, keepdims=True)
        vc = v_rows[dx][dy:dy + vb].astype(MATMUL_DTYPE).reshape(vb * nh, bs2, dh)
        acc = acc + jnp.einsum('bqk,bkd->bqd',
                               p.reshape(vb * nh, bs2, bs2).astype(MATMUL_DTYPE), vc,
                               preferred_element_type=f32)

    inv_l = pl.reciprocal(l, approx=APPROX_RECIPROCAL)           # multiply instead of divide
    out = acc.reshape(vb, nh, bs2, dh) * inv_l
    # Lane-packed (bs2, nh*dh) output block; per-head slice stores avoid an in-kernel
    # (nh <-> bs2) relayout.
    for h in range(nh):
        o_ref[0, 0, :, :, h * dh:(h + 1) * dh] = out[:, h].astype(o_ref.dtype)


def pallas_block_row_attention(q, k_pad, v_pad, pos_bias):
    # q:     (B, hb, vb, nh, bs2, dh)
    # k_pad: (B, hb+2, vb+2, nh, bs2, dh)  (one-block zero ring; same for v_pad)
    # pos_bias: (nh, bs2, 9*bs2)
    B, hb, vb, nh, bs2, dh = q.shape
    C = nh * dh

    q_spec = pl.BlockSpec((1, 1, vb, nh, bs2, dh), lambda b, i: (b, i, 0, 0, 0, 0))
    bias_spec = pl.BlockSpec(pos_bias.shape, lambda b, i: (0, 0, 0))   # fetched once, resident
    out_spec = pl.BlockSpec((1, 1, vb, bs2, C), lambda b, i: (b, i, 0, 0, 0))

    def shifted_row_spec(d):
        # 3x3 neighbourhood: the same padded array is passed three times with shifted rows.
        return pl.BlockSpec((1, 1, vb + 2, nh, bs2, dh),
                            lambda b, i, d=d: (b, i + d, 0, 0, 0, 0))

    kv_specs = [shifted_row_spec(d) for d in range(3)]

    return pl.pallas_call(
        _attn_row_kernel,
        out_shape=jax.ShapeDtypeStruct((B, hb, vb, bs2, C), q.dtype),
        grid=(B, hb),
        in_specs=[bias_spec, q_spec] + kv_specs + kv_specs,
        out_specs=out_spec,
        compiler_params=pltpu.CompilerParams(
            dimension_semantics=("parallel", "parallel"),        # no cross-step accumulation
            vmem_limit_bytes=32 * 1024 * 1024),                  # fits the v7x 64 MiB budget
    )(pos_bias, q, k_pad, k_pad, k_pad, v_pad, v_pad, v_pad)


# ----------------------------- bias tables / params -----------------------------

def _pce_table(n_heads, bs, alpha, beta, threshold):
    pce = np.zeros((n_heads, 4 * bs, 4 * bs), np.float32)
    for xx in range(4 * bs):
        for yy in range(4 * bs):
            val = beta * (abs(xx - 2 * bs) ** alpha + abs(yy - 2 * bs) ** alpha)
            pce[:, xx, yy] = val if val < threshold else np.inf
    return pce


def build_pos_bias(n_heads, block_size, alpha=2.0, beta=1.0 / 16, threshold=math.inf):
    """Per-head positional bias, key axis ordered (dx, dy, in-block token) to match the
    kernel's neighbourhood gather.  Boundary cutoff is applied in-kernel, not here."""
    bs = block_size
    pce = _pce_table(n_heads, bs, alpha, beta, threshold)
    tab = np.zeros((n_heads, bs * bs, 9 * bs * bs), np.float32)
    for x0 in range(bs):
        for y0 in range(bs):
            qi = bs * x0 + y0
            for dx in range(3):
                for dy in range(3):
                    for xl in range(bs):
                        for yl in range(bs):
                            kf = bs * bs * (3 * dx + dy) + bs * xl + yl
                            tab[:, qi, kf] = pce[:, dx * bs + xl + bs - x0,
                                                 dy * bs + yl + bs - y0]
    return jnp.asarray(-tab)


def build_reference_bias(n_heads, bs, hb, vb, alpha, beta, threshold):
    """-(mask + cutoff) exactly as the PyTorch module builds it (torch key ordering)."""
    pce = _pce_table(n_heads, bs, alpha, beta, threshold)
    mask = np.zeros((n_heads, bs * bs, 9 * bs * bs), np.float32)
    for x0 in range(bs):
        for y0 in range(bs):
            for x1 in range(3 * bs):
                for y1 in range(3 * bs):
                    mask[:, bs * x0 + y0, 3 * bs * x1 + y1] = pce[:, x1 + bs - x0, y1 + bs - y0]
    cut = np.zeros((hb, vb, n_heads, bs * bs, 3 * bs, 3 * bs), np.float32)
    cut[0, :, :, :, 0:bs, :] = np.inf
    cut[-1, :, :, :, 2 * bs:, :] = np.inf
    cut[:, 0, :, :, :, 0:bs] = np.inf
    cut[:, -1, :, :, :, 2 * bs:] = np.inf
    cut = cut.reshape(hb, vb, n_heads, bs * bs, 9 * bs * bs)
    return jnp.asarray(-(mask[None, None] + cut))


def make_params(key, n_heads, d_head, d_input, d_output):
    k1, k2 = jax.random.split(key)
    w_in = jax.random.normal(k1, (d_input, 3 * n_heads * d_head), jnp.float32) \
        * (1.0 / math.sqrt(d_input))
    b_in = jnp.full((3 * n_heads * d_head,), 0.01, jnp.float32)
    w_out = jax.random.normal(k2, (n_heads * d_head, d_output), jnp.float32) \
        * (1.0 / math.sqrt(n_heads * d_head))
    b_out = jnp.full((d_output,), 0.01, jnp.float32)
    return w_in, b_in, w_out, b_out


# ----------------------------- forward passes -----------------------------

def attention_convolution_2d(x, w_in, b_in, w_out, b_out, pos_bias,
                             *, n_heads, d_head, d_output, block_size):
    """Pallas forward pass (same semantics as the PyTorch module)."""
    B, d_input, H, W = x.shape
    bs = block_size
    vb = H // bs
    hb = W // bs
    nh, dh = n_heads, d_head
    C = nh * dh

    # NCHW -> (B, hb, vb, bs, bs, C_in)   (mirrors the torch transpose/reshape chain)
    xt = jnp.transpose(x, (0, 3, 2, 1)).reshape(B, hb, bs, vb, bs, d_input)
    xt = jnp.transpose(xt, (0, 1, 3, 2, 4, 5))

    # in-projection (row-tiled Pallas matmul)
    qkv = pallas_linear(xt.reshape(-1, d_input), w_in, b_in)
    qkv = qkv.reshape(B, hb, vb, bs * bs, 3, nh, dh)
    q = qkv[..., 0, :, :]                       # (B, hb, vb, bs2, nh, dh)
    k = qkv[..., 1, :, :]
    v = qkv[..., 2, :, :]

    # head-major block layout for the kernel's merged (block, head) batched matmuls;
    # the K/V transposes fuse into the zero-pad copy XLA must materialise anyway.
    q = jnp.transpose(q, (0, 1, 2, 4, 3, 5))    # (B, hb, vb, nh, bs2, dh)
    k = jnp.transpose(k, (0, 1, 2, 4, 3, 5))
    v = jnp.transpose(v, (0, 1, 2, 4, 3, 5))
    pad = ((0, 0), (1, 1), (1, 1), (0, 0), (0, 0), (0, 0))
    k_pad = jnp.pad(k, pad)                     # (B, hb+2, vb+2, nh, bs2, dh)
    v_pad = jnp.pad(v, pad)

    attn = pallas_block_row_attention(q, k_pad, v_pad, pos_bias)   # (B, hb, vb, bs2, C)

    # out-projection (row-tiled Pallas matmul), then back to NCHW
    out = pallas_linear(attn.reshape(-1, C), w_out, b_out)
    out = out.reshape(B, hb, vb, bs, bs, d_output)
    out = jnp.transpose(out, (0, 1, 3, 2, 4, 5)).reshape(B, hb * bs, vb * bs, d_output)
    return jnp.transpose(out, (0, 3, 2, 1))


def reference_forward(x, w_in, b_in, w_out, b_out, *, n_heads, d_head, d_output, block_size,
                      alpha=2.0, beta=1.0 / 16, threshold=math.inf):
    """Pure-JAX transcription of the PyTorch module (9x KV gather, torch key ordering)."""
    B, d_input, H, W = x.shape
    bs = block_size
    vb = H // bs
    hb = W // bs
    nh, dh = n_heads, d_head
    C = nh * dh

    xt = jnp.transpose(x, (0, 3, 2, 1)).reshape(B, hb, bs, vb, bs, d_input)
    xt = jnp.transpose(xt, (0, 1, 3, 2, 4, 5))
    qkv = xt.reshape(-1, d_input) @ w_in + b_in
    qkv = qkv.reshape(B, hb, vb, bs, bs, 3 * C)
    q, kv = qkv[..., :C], qkv[..., C:]

    kv = jnp.pad(kv, ((0, 0), (1, 1), (1, 1), (0, 0), (0, 0), (0, 0)))
    kv = jnp.concatenate([kv[:, 0:-2], kv[:, 1:-1], kv[:, 2:]], axis=3)
    kv = jnp.concatenate([kv[:, :, 0:-2], kv[:, :, 1:-1], kv[:, :, 2:]], axis=4)
    kv = kv.reshape(B, hb, vb, 9 * bs * bs, 2 * C)

    q = q.reshape(B, hb, vb, bs * bs, nh, dh).transpose(0, 1, 2, 4, 3, 5)
    k = kv[..., :C].reshape(B, hb, vb, 9 * bs * bs, nh, dh).transpose(0, 1, 2, 4, 3, 5)
    v = kv[..., C:].reshape(B, hb, vb, 9 * bs * bs, nh, dh).transpose(0, 1, 2, 4, 3, 5)

    bias = build_reference_bias(nh, bs, hb, vb, alpha, beta, threshold)
    s = jnp.einsum('bijhqd,bijhkd->bijhqk', q, k) / math.sqrt(dh) + bias[None]
    p = jax.nn.softmax(s, axis=-1)
    o = jnp.einsum('bijhqk,bijhkd->bijhqd', p, v)

    o = jnp.transpose(o, (0, 1, 2, 4, 3, 5)).reshape(-1, C) @ w_out + b_out
    o = o.reshape(B, hb, vb, bs, bs, d_output)
    o = jnp.transpose(o, (0, 1, 3, 2, 4, 5)).reshape(B, hb * bs, vb * bs, d_output)
    return jnp.transpose(o, (0, 3, 2, 1))


# ---------------------------------- main ----------------------------------

if __name__ == "__main__":
    n_heads, d_head = 2, 8
    d_input, d_output = 4, 4
    block_size, height, width = 2, 16, 16
    batch = 2

    key = jax.random.PRNGKey(0)
    kx, kp = jax.random.split(key)
    x = jax.random.normal(kx, (batch, d_input, height, width), jnp.float32)
    w_in, b_in, w_out, b_out = make_params(kp, n_heads, d_head, d_input, d_output)
    pos_bias = build_pos_bias(n_heads, block_size)

    fwd = jax.jit(functools.partial(
        attention_convolution_2d,
        n_heads=n_heads, d_head=d_head, d_output=d_output, block_size=block_size))
    out = jax.block_until_ready(fwd(x, w_in, b_in, w_out, b_out, pos_bias))
    assert out.shape == (batch, d_output, height, width)

    ref = reference_forward(x, w_in, b_in, w_out, b_out,
                            n_heads=n_heads, d_head=d_head, d_output=d_output,
                            block_size=block_size)
    np.testing.assert_allclose(np.asarray(out), np.asarray(ref), rtol=1e-4, atol=1e-4)
    print("KERNEL_OK")
</pallas_src>

<mosaic_0001>
module attributes {stable_mosaic.version = 11 : i64} {
  func.func @_linear_kernel(%arg0: i32, %arg1: memref<512x4xf32, #tpu.memory_space<vmem>>, %arg2: memref<4x48xf32, #tpu.memory_space<vmem>>, %arg3: memref<1x48xf32, #tpu.memory_space<vmem>>, %arg4: memref<512x48xf32, #tpu.memory_space<vmem>>) attributes {dimension_semantics = [#tpu.dimension_semantics<parallel>], iteration_bounds = array<i64: 1>, scalar_prefetch = 0 : i64, scratch_operands = 0 : i64, tpu.core_type = #tpu.core_type<tc>, window_params = [{transform_indices = @transform_0, window_bounds = array<i64: 512, 4>}, {pipeline_mode = #tpu.pipeline_mode<synchronous>, transform_indices = @transform_1, window_bounds = array<i64: 4, 48>}, {pipeline_mode = #tpu.pipeline_mode<synchronous>, transform_indices = @transform_2, window_bounds = array<i64: 1, 48>}, {transform_indices = @transform_3, window_bounds = array<i64: 512, 48>}]} {
    %c0 = arith.constant 0 : index
    %c0_0 = arith.constant 0 : index
    %0 = vector.load %arg1[%c0, %c0_0] : memref<512x4xf32, #tpu.memory_space<vmem>>, vector<512x4xf32>
    %c0_1 = arith.constant 0 : index
    %c0_2 = arith.constant 0 : index
    %1 = vector.load %arg2[%c0_1, %c0_2] : memref<4x48xf32, #tpu.memory_space<vmem>>, vector<4x48xf32>
    %cst = arith.constant dense<0.000000e+00> : vector<512x48xf32>
    %2 = tpu.matmul %0, %1, %cst {dimension_numbers = #tpu.dot_dimension_numbers<[1], [0], [0], [1], [0, 0, 1, 1], [], []>} : vector<512x4xf32>, vector<4x48xf32>, vector<512x48xf32> -> vector<512x48xf32>
    %c0_3 = arith.constant 0 : index
    %c0_4 = arith.constant 0 : index
    %3 = vector.load %arg3[%c0_3, %c0_4] : memref<1x48xf32, #tpu.memory_space<vmem>>, vector<1x48xf32>
    %4 = vector.broadcast %3 : vector<1x48xf32> to vector<512x48xf32>
    %5 = arith.addf %2, %4 : vector<512x48xf32>
    %c0_5 = arith.constant 0 : index
    %c0_6 = arith.constant 0 : index
    %6 = vector.load %arg4[%c0_5, %c0_6] : memref<512x48xf32, #tpu.memory_space<vmem>>, vector<512x48xf32>
    tpu.vector_store %arg4[%c0_5, %c0_6], %5 {strides = array<i32>} : memref<512x48xf32, #tpu.memory_space<vmem>>, vector<512x48xf32>,
    return
  }
  func.func @transform_0(%arg0: i32) -> (i32, i32) {
    %c0_i32 = arith.constant 0 : i32
    %c0_i32_0 = arith.constant 0 : i32
    return %arg0, %c0_i32 : i32, i32
  }
  func.func @transform_1(%arg0: i32) -> (i32, i32) {
    %c0_i32 = arith.constant 0 : i32
    %c0_i32_0 = arith.constant 0 : i32
    %c0_i32_1 = arith.constant 0 : i32
    return %c0_i32, %c0_i32_0 : i32, i32
  }
  func.func @transform_2(%arg0: i32) -> (i32, i32) {
    %c0_i32 = arith.constant 0 : i32
    %c0_i32_0 = arith.constant 0 : i32
    %c0_i32_1 = arith.constant 0 : i32
    return %c0_i32, %c0_i32_0 : i32, i32
  }
  func.func @transform_3(%arg0: i32) -> (i32, i32) {
    %c0_i32 = arith.constant 0 : i32
    %c0_i32_0 = arith.constant 0 : i32
    return %arg0, %c0_i32 : i32, i32
  }
}

module attributes {stable_mosaic.version = 11 : i64} {
  func.func @_attn_row_kernel(%arg0: i32, %arg1: i32, %arg2: memref<2x4x36xf32, #tpu.memory_space<vmem>>, %arg3: memref<1x1x8x2x4x8xf32, #tpu.memory_space<vmem>>, %arg4: memref<1x1x10x2x4x8xf32, #tpu.memory_space<vmem>>, %arg5: memref<1x1x10x2x4x8xf32, #tpu.memory_space<vmem>>, %arg6: memref<1x1x10x2x4x8xf32, #tpu.memory_space<vmem>>, %arg7: memref<1x1x10x2x4x8xf32, #tpu.memory_space<vmem>>, %arg8: memref<1x1x10x2x4x8xf32, #tpu.memory_space<vmem>>, %arg9: memref<1x1x10x2x4x8xf32, #tpu.memory_space<vmem>>, %arg10: memref<1x1x8x4x16xf32, #tpu.memory_space<vmem>>) attributes {dimension_semantics = [#tpu.dimension_semantics<parallel>, #tpu.dimension_semantics<parallel>], iteration_bounds = array<i64: 2, 8>, scalar_prefetch = 0 : i64, scratch_operands = 0 : i64, tpu.core_type = #tpu.core_type<tc>, window_params = [{pipeline_mode = #tpu.pipeline_mode<synchronous>, transform_indices = @transform_0, window_bounds = array<i64: 2, 4, 36>}, {transform_indices = @transform_1, window_bounds = array<i64: 1, 1, 8, 2, 4, 8>}, {transform_indices = @transform_2, window_bounds = array<i64: 1, 1, 10, 2, 4, 8>}, {transform_indices = @transform_3, window_bounds = array<i64: 1, 1, 10, 2, 4, 8>}, {transform_indices = @transform_4, window_bounds = array<i64: 1, 1, 10, 2, 4, 8>}, {transform_indices = @transform_5, window_bounds = array<i64: 1, 1, 10, 2, 4, 8>}, {transform_indices = @transform_6, window_bounds = array<i64: 1, 1, 10, 2, 4, 8>}, {transform_indices = @transform_7, window_bounds = array<i64: 1, 1, 10, 2, 4, 8>}, {transform_indices = @transform_8, window_bounds = array<i64: 1, 1, 8, 4, 16>}]} {
    %0 = tpu.iota {dimensions = array<i32: 0>} : vector<8x1x1x1xi32>
    %c0 = arith.constant 0 : index
    %c0_0 = arith.constant 0 : index
    %c0_1 = arith.constant 0 : index
    %c0_2 = arith.constant 0 : index
    %c0_3 = arith.constant 0 : index
    %c0_4 = arith.constant 0 : index
    %1 = vector.load %arg3[%c0, %c0_0, %c0_1, %c0_2, %c0_3, %c0_4] : memref<1x1x8x2x4x8xf32, #tpu.memory_space<vmem>>, vector<1x1x8x2x4x8xf32>
    %2 = vector.shape_cast %1 : vector<1x1x8x2x4x8xf32> to vector<8x2x4x8xf32>
    %3 = vector.shape_cast %2 : vector<8x2x4x8xf32> to vector<16x4x8xf32>
    %c0_5 = arith.constant 0 : index
    %c0_6 = arith.constant 0 : index
    %c0_7 = arith.constant 0 : index
    %c0_8 = arith.constant 0 : index
    %c0_9 = arith.constant 0 : index
    %c0_10 = arith.constant 0 : index
    %4 = vector.load %arg4[%c0_5, %c0_6, %c0_7, %c0_8, %c0_9, %c0_10] : memref<1x1x10x2x4x8xf32, #tpu.memory_space<vmem>>, vector<1x1x10x2x4x8xf32>
    %5 = vector.shape_cast %4 : vector<1x1x10x2x4x8xf32> to vector<10x2x4x8xf32>
    %c0_11 = arith.constant 0 : index
    %c0_12 = arith.constant 0 : index
    %c0_13 = arith.constant 0 : index
    %c0_14 = arith.constant 0 : index
    %c0_15 = arith.constant 0 : index
    %c0_16 = arith.constant 0 : index
    %6 = vector.load %arg5[%c0_11, %c0_12, %c0_13, %c0_14, %c0_15, %c0_16] : memref<1x1x10x2x4x8xf32, #tpu.memory_space<vmem>>, vector<1x1x10x2x4x8xf32>
    %7 = vector.shape_cast %6 : vector<1x1x10x2x4x8xf32> to vector<10x2x4x8xf32>
    %c0_17 = arith.constant 0 : index
    %c0_18 = arith.constant 0 : index
    %c0_19 = arith.constant 0 : index
    %c0_20 = arith.constant 0 : index
    %c0_21 = arith.constant 0 : index
    %c0_22 = arith.constant 0 : index
    %8 = vector.load %arg6[%c0_17, %c0_18, %c0_19, %c0_20, %c0_21, %c0_22] : memref<1x1x10x2x4x8xf32, #tpu.memory_space<vmem>>, vector<1x1x10x2x4x8xf32>
    %9 = vector.shape_cast %8 : vector<1x1x10x2x4x8xf32> to vector<10x2x4x8xf32>
    %c0_23 = arith.constant 0 : index
    %c0_24 = arith.constant 0 : index
    %c0_25 = arith.constant 0 : index
    %c0_26 = arith.constant 0 : index
    %c0_27 = arith.constant 0 : index
    %c0_28 = arith.constant 0 : index
    %10 = vector.load %arg7[%c0_23, %c0_24, %c0_25, %c0_26, %c0_27, %c0_28] : memref<1x1x10x2x4x8xf32, #tpu.memory_space<vmem>>, vector<1x1x10x2x4x8xf32>
    %11 = vector.shape_cast %10 : vector<1x1x10x2x4x8xf32> to vector<10x2x4x8xf32>
    %c0_29 = arith.constant 0 : index
    %c0_30 = arith.constant 0 : index
    %c0_31 = arith.constant 0 : index
    %c0_32 = arith.constant 0 : index
    %c0_33 = arith.constant 0 : index
    %c0_34 = arith.constant 0 : index
    %12 = vector.load %arg8[%c0_29, %c0_30, %c0_31, %c0_32, %c0_33, %c0_34] : memref<1x1x10x2x4x8xf32, #tpu.memory_space<vmem>>, vector<1x1x10x2x4x8xf32>
    %13 = vector.shape_cast %12 : vector<1x1x10x2x4x8xf32> to vector<10x2x4x8xf32>
    %c0_35 = arith.constant 0 : index
    %c0_36 = arith.constant 0 : index
    %c0_37 = arith.constant 0 : index
    %c0_38 = arith.constant 0 : index
    %c0_39 = arith.constant 0 : index
    %c0_40 = arith.constant 0 : index
    %14 = vector.load %arg9[%c0_35, %c0_36, %c0_37, %c0_38, %c0_39, %c0_40] : memref<1x1x10x2x4x8xf32, #tpu.memory_space<vmem>>, vector<1x1x10x2x4x8xf32>
    %15 = vector.shape_cast %14 : vector<1x1x10x2x4x8xf32> to vector<10x2x4x8xf32>
    %16 = vector.extract_strided_slice %5 {offsets = [0, 0, 0, 0], sizes = [8, 2, 4, 8], strides = [1, 1, 1, 1]} : vector<10x2x4x8xf32> to vector<8x2x4x8xf32>
    %17 = vector.shape_cast %16 : vector<8x2x4x8xf32> to vector<16x4x8xf32>
    "tpu.trace_start"() <{level = 10 : i32, message = "bqd,bkd->bqk"}> : () -> ()
    %cst = arith.constant dense<0.000000e+00> : vector<16x4x4xf32>
    %18 = tpu.matmul %3, %17, %cst {dimension_numbers = #tpu.dot_dimension_numbers<[2], [2], [1], [1], [0, 0, 0, 1, 1, 1], [0], [0]>} : vector<16x4x8xf32>, vector<16x4x8xf32>, vector<16x4x4xf32> -> vector<16x4x4xf32>
    "tpu.trace_stop"() : () -> ()
    %19 = vector.shape_cast %18 : vector<16x4x4xf32> to vector<8x2x4x4xf32>
    %cst_41 = arith.constant 0.353553385 : f32
    %20 = vector.broadcast %cst_41 : f32 to vector<8x2x4x4xf32>
    %21 = arith.mulf %19, %20 : vector<8x2x4x4xf32>
    %c0_42 = arith.constant 0 : index
    %c0_43 = arith.constant 0 : index
    %c0_44 = arith.constant 0 : index
    %22 = vector.load %arg2[%c0_42, %c0_43, %c0_44] : memref<2x4x36xf32, #tpu.memory_space<vmem>>, vector<2x4x4xf32>
    %23 = vector.shape_cast %22 : vector<2x4x4xf32> to vector<1x2x4x4xf32>
    %24 = vector.broadcast %23 : vector<1x2x4x4xf32> to vector<8x2x4x4xf32>
    %25 = arith.addf %21, %24 : vector<8x2x4x4xf32>
    %c0_i32 = arith.constant 0 : i32
    %26 = arith.cmpi eq, %arg1, %c0_i32 : i32
    %c0_i32_45 = arith.constant 0 : i32
    %27 = vector.broadcast %c0_i32_45 : i32 to vector<8x1x1x1xi32>
    %28 = arith.cmpi eq, %0, %27 : vector<8x1x1x1xi32>
    %29 = vector.broadcast %26 : i1 to vector<8x1x1x1xi1>
    %30 = arith.ori %29, %28 : vector<8x1x1x1xi1>
    %cst_46 = arith.constant 0xFF800000 : f32
    %31 = vector.shape_cast %30 : vector<8x1x1x1xi1> to vector<8x1x1x1xi1>
    %32 = vector.broadcast %31 : vector<8x1x1x1xi1> to vector<8x2x4x4xi1>
    %33 = vector.broadcast %cst_46 : f32 to vector<8x2x4x4xf32>
    %34 = arith.select %32, %33, %25 : vector<8x2x4x4xi1>, vector<8x2x4x4xf32>
    %35 = vector.extract_strided_slice %5 {offsets = [1, 0, 0, 0], sizes = [8, 2, 4, 8], strides = [1, 1, 1, 1]} : vector<10x2x4x8xf32> to vector<8x2x4x8xf32>
    %36 = vector.shape_cast %35 : vector<8x2x4x8xf32> to vector<16x4x8xf32>
    "tpu.trace_start"() <{level = 10 : i32, message = "bqd,bkd->bqk"}> : () -> ()
    %cst_47 = arith.constant dense<0.000000e+00> : vector<16x4x4xf32>
    %37 = tpu.matmul %3, %36, %cst_47 {dimension_numbers = #tpu.dot_dimension_numbers<[2], [2], [1], [1], [0, 0, 0, 1, 1, 1], [0], [0]>} : vector<16x4x8xf32>, vector<16x4x8xf32>, vector<16x4x4xf32> -> vector<16x4x4xf32>
    "tpu.trace_stop"() : () -> ()
    %38 = vector.shape_cast %37 : vector<16x4x4xf32> to vector<8x2x4x4xf32>
    %cst_48 = arith.constant 0.353553385 : f32
    %39 = vector.broadcast %cst_48 : f32 to vector<8x2x4x4xf32>
    %40 = arith.mulf %38, %39 : vector<8x2x4x4xf32>
    %c0_49 = arith.constant 0 : index
    %c0_50 = arith.constant 0 : index
    %c4 = arith.constant 4 : index
    %41 = vector.load %arg2[%c0_49, %c0_50, %c4] : memref<2x4x36xf32, #tpu.memory_space<vmem>>, vector<2x4x4xf32>
    %42 = vector.shape_cast %41 : vector<2x4x4xf32> to vector<1x2x4x4xf32>
    %43 = vector.broadcast %42 : vector<1x2x4x4xf32> to vector<8x2x4x4xf32>
    %44 = arith.addf %40, %43 : vector<8x2x4x4xf32>
    %c0_i32_51 = arith.constant 0 : i32
    %45 = arith.cmpi eq, %arg1, %c0_i32_51 : i32
    %cst_52 = arith.constant 0xFF800000 : f32
    %46 = vector.broadcast %cst_52 : f32 to vector<8x2x4x4xf32>
    %47 = arith.select %45, %46, %44 : vector<8x2x4x4xf32>
    %48 = vector.extract_strided_slice %5 {offsets = [2, 0, 0, 0], sizes = [8, 2, 4, 8], strides = [1, 1, 1, 1]} : vector<10x2x4x8xf32> to vector<8x2x4x8xf32>
    %49 = vector.shape_cast %48 : vector<8x2x4x8xf32> to vector<16x4x8xf32>
    "tpu.trace_start"() <{level = 10 : i32, message = "bqd,bkd->bqk"}> : () -> ()
    %cst_53 = arith.constant dense<0.000000e+00> : vector<16x4x4xf32>
    %50 = tpu.matmul %3, %49, %cst_53 {dimension_numbers = #tpu.dot_dimension_numbers<[2], [2], [1], [1], [0, 0, 0, 1, 1, 1], [0], [0]>} : vector<16x4x8xf32>, vector<16x4x8xf32>, vector<16x4x4xf32> -> vector<16x4x4xf32>
    "tpu.trace_stop"() : () -> ()
    %51 = vector.shape_cast %50 : vector<16x4x4xf32> to vector<8x2x4x4xf32>
    %cst_54 = arith.constant 0.353553385 : f32
    %52 = vector.broadcast %cst_54 : f32 to vector<8x2x4x4xf32>
    %53 = arith.mulf %51, %52 : vector<8x2x4x4xf32>
    %c0_55 = arith.constant 0 : index
    %c0_56 = arith.constant 0 : index
    %c8 = arith.constant 8 : index
    %54 = vector.load %arg2[%c0_55, %c0_56, %c8] : memref<2x4x36xf32, #tpu.memory_space<vmem>>, vector<2x4x4xf32>
    %55 = vector.shape_cast %54 : vector<2x4x4xf32> to vector<1x2x4x4xf32>
    %56 = vector.broadcast %55 : vector<1x2x4x4xf32> to vector<8x2x4x4xf32>
    %57 = arith.addf %53, %56 : vector<8x2x4x4xf32>
    %c0_i32_57 = arith.constant 0 : i32
    %58 = arith.cmpi eq, %arg1, %c0_i32_57 : i32
    %c7_i32 = arith.constant 7 : i32
    %59 = vector.broadcast %c7_i32 : i32 to vector<8x1x1x1xi32>
    %60 = arith.cmpi eq, %0, %59 : vector<8x1x1x1xi32>
    %61 = vector.broadcast %58 : i1 to vector<8x1x1x1xi1>
    %62 = arith.ori %61, %60 : vector<8x1x1x1xi1>
    %cst_58 = arith.constant 0xFF800000 : f32
    %63 = vector.shape_cast %62 : vector<8x1x1x1xi1> to vector<8x1x1x1xi1>
    %64 = vector.broadcast %63 : vector<8x1x1x1xi1> to vector<8x2x4x4xi1>
    %65 = vector.broadcast %cst_58 : f32 to vector<8x2x4x4xf32>
    %66 = arith.select %64, %65, %57 : vector<8x2x4x4xi1>, vector<8x2x4x4xf32>
    %67 = vector.extract_strided_slice %7 {offsets = [0, 0, 0, 0], sizes = [8, 2, 4, 8], strides = [1, 1, 1, 1]} : vector<10x2x4x8xf32> to vector<8x2x4x8xf32>
    %68 = vector.shape_cast %67 : vector<8x2x4x8xf32> to vector<16x4x8xf32>
    "tpu.trace_start"() <{level = 10 : i32, message = "bqd,bkd->bqk"}> : () -> ()
    %cst_59 = arith.constant dense<0.000000e+00> : vector<16x4x4xf32>
    %69 = tpu.matmul %3, %68, %cst_59 {dimension_numbers = #tpu.dot_dimension_numbers<[2], [2], [1], [1], [0, 0, 0, 1, 1, 1], [0], [0]>} : vector<16x4x8xf32>, vector<16x4x8xf32>, vector<16x4x4xf32> -> vector<16x4x4xf32>
    "tpu.trace_stop"() : () -> ()
    %70 = vector.shape_cast %69 : vector<16x4x4xf32> to vector<8x2x4x4xf32>
    %cst_60 = arith.constant 0.353553385 : f32
    %71 = vector.broadcast %cst_60 : f32 to vector<8x2x4x4xf32>
    %72 = arith.mulf %70, %71 : vector<8x2x4x4xf32>
    %c0_61 = arith.constant 0 : index
    %c0_62 = arith.constant 0 : index
    %c12 = arith.constant 12 : index
    %73 = vector.load %arg2[%c0_61, %c0_62, %c12] : memref<2x4x36xf32, #tpu.memory_space<vmem>>, vector<2x4x4xf32>
    %74 = vector.shape_cast %73 : vector<2x4x4xf32> to vector<1x2x4x4xf32>
    %75 = vector.broadcast %74 : vector<1x2x4x4xf32> to vector<8x2x4x4xf32>
    %76 = arith.addf %72, %75 : vector<8x2x4x4xf32>
    %c0_i32_63 = arith.constant 0 : i32
    %77 = vector.broadcast %c0_i32_63 : i32 to vector<8x1x1x1xi32>
    %78 = arith.cmpi eq, %0, %77 : vector<8x1x1x1xi32>
    %cst_64 = arith.constant 0xFF800000 : f32
    %79 = vector.shape_cast %78 : vector<8x1x1x1xi1> to vector<8x1x1x1xi1>
    %80 = vector.broadcast %79 : vector<8x1x1x1xi1> to vector<8x2x4x4xi1>
    %81 = vector.broadcast %cst_64 : f32 to vector<8x2x4x4xf32>
    %82 = arith.select %80, %81, %76 : vector<8x2x4x4xi1>, vector<8x2x4x4xf32>
    %83 = vector.extract_strided_slice %7 {offsets = [1, 0, 0, 0], sizes = [8, 2, 4, 8], strides = [1, 1, 1, 1]} : vector<10x2x4x8xf32> to vector<8x2x4x8xf32>
    %84 = vector.shape_cast %83 : vector<8x2x4x8xf32> to vector<16x4x8xf32>
    "tpu.trace_start"() <{level = 10 : i32, message = "bqd,bkd->bqk"}> : () -> ()
    %cst_65 = arith.constant dense<0.000000e+00> : vector<16x4x4xf32>
    %85 = tpu.matmul %3, %84, %cst_65 {dimension_numbers = #tpu.dot_dimension_numbers<[2], [2], [1], [1], [0, 0, 0, 1, 1, 1], [0], [0]>} : vector<16x4x8xf32>, vector<16x4x8xf32>, vector<16x4x4xf32> -> vector<16x4x4xf32>
    "tpu.trace_stop"() : () -> ()
    %86 = vector.shape_cast %85 : vector<16x4x4xf32> to vector<8x2x4x4xf32>
    %cst_66 = arith.constant 0.353553385 : f32
    %87 = vector.broadcast %cst_66 : f32 to vector<8x2x4x4xf32>
    %88 = arith.mulf %86, %87 : vector<8x2x4x4xf32>
    %c0_67 = arith.constant 0 : index
    %c0_68 = arith.constant 0 : index
    %c16 = arith.constant 16 : index
    %89 = vector.load %arg2[%c0_67, %c0_68, %c16] : memref<2x4x36xf32, #tpu.memory_space<vmem>>, vector<2x4x4xf32>
    %90 = vector.shape_cast %89 : vector<2x4x4xf32> to vector<1x2x4x4xf32>
    %91 = vector.broadcast %90 : vector<1x2x4x4xf32> to vector<8x2x4x4xf32>
    %92 = arith.addf %88, %91 : vector<8x2x4x4xf32>
    %93 = vector.extract_strided_slice %7 {offsets = [2, 0, 0, 0], sizes = [8, 2, 4, 8], strides = [1, 1, 1, 1]} : vector<10x2x4x8xf32> to vector<8x2x4x8xf32>
    %94 = vector.shape_cast %93 : vector<8x2x4x8xf32> to vector<16x4x8xf32>
    "tpu.trace_start"() <{level = 10 : i32, message = "bqd,bkd->bqk"}> : () -> ()
    %cst_69 = arith.constant dense<0.000000e+00> : vector<16x4x4xf32>
    %95 = tpu.matmul %3, %94, %cst_69 {dimension_numbers = #tpu.dot_dimension_numbers<[2], [2], [1], [1], [0, 0, 0, 1, 1, 1], [0], [0]>} : vector<16x4x8xf32>, vector<16x4x8xf32>, vector<16x4x4xf32> -> vector<16x4x4xf32>
    "tpu.trace_stop"() : () -> ()
    %96 = vector.shape_cast %95 : vector<16x4x4xf32> to vector<8x2x4x4xf32>
    %cst_70 = arith.constant 0.353553385 : f32
    %97 = vector.broadcast %cst_70 : f32 to vector<8x2x4x4xf32>
    %98 = arith.mulf %96, %97 : vector<8x2x4x4xf32>
    %c0_71 = arith.constant 0 : index
    %c0_72 = arith.constant 0 : index
    %c20 = arith.constant 20 : index
    %99 = vector.load %arg2[%c0_71, %c0_72, %c20] : memref<2x4x36xf32, #tpu.memory_space<vmem>>, vector<2x4x4xf32>
    %100 = vector.shape_cast %99 : vector<2x4x4xf32> to vector<1x2x4x4xf32>
    %101 = vector.broadcast %100 : vector<1x2x4x4xf32> to vector<8x2x4x4xf32>
    %102 = arith.addf %98, %101 : vector<8x2x4x4xf32>
    %c7_i32_73 = arith.constant 7 : i32
    %103 = vector.broadcast %c7_i32_73 : i32 to vector<8x1x1x1xi32>
    %104 = arith.cmpi eq, %0, %103 : vector<8x1x1x1xi32>
    %cst_74 = arith.constant 0xFF800000 : f32
    %105 = vector.shape_cast %104 : vector<8x1x1x1xi1> to vector<8x1x1x1xi1>
    %106 = vector.broadcast %105 : vector<8x1x1x1xi1> to vector<8x2x4x4xi1>
    %107 = vector.broadcast %cst_74 : f32 to vector<8x2x4x4xf32>
    %108 = arith.select %106, %107, %102 : vector<8x2x4x4xi1>, vector<8x2x4x4xf32>
    %109 = vector.extract_strided_slice %9 {offsets = [0, 0, 0, 0], sizes = [8, 2, 4, 8], strides = [1, 1, 1, 1]} : vector<10x2x4x8xf32> to vector<8x2x4x8xf32>
    %110 = vector.shape_cast %109 : vector<8x2x4x8xf32> to vector<16x4x8xf32>
    "tpu.trace_start"() <{level = 10 : i32, message = "bqd,bkd->bqk"}> : () -> ()
    %cst_75 = arith.constant dense<0.000000e+00> : vector<16x4x4xf32>
    %111 = tpu.matmul %3, %110, %cst_75 {dimension_numbers = #tpu.dot_dimension_numbers<[2], [2], [1], [1], [0, 0, 0, 1, 1, 1], [0], [0]>} : vector<16x4x8xf32>, vector<16x4x8xf32>, vector<16x4x4xf32> -> vector<16x4x4xf32>
    "tpu.trace_stop"() : () -> ()
    %112 = vector.shape_cast %111 : vector<16x4x4xf32> to vector<8x2x4x4xf32>
    %cst_76 = arith.constant 0.353553385 : f32
    %113 = vector.broadcast %cst_76 : f32 to vector<8x2x4x4xf32>
    %114 = arith.mulf %112, %113 : vector<8x2x4x4xf32>
    %c0_77 = arith.constant 0 : index
    %c0_78 = arith.constant 0 : index
    %c24 = arith.constant 24 : index
    %115 = vector.load %arg2[%c0_77, %c0_78, %c24] : memref<2x4x36xf32, #tpu.memory_space<vmem>>, vector<2x4x4xf32>
    %116 = vector.shape_cast %115 : vector<2x4x4xf32> to vector<1x2x4x4xf32>
    %117 = vector.broadcast %116 : vector<1x2x4x4xf32> to vector<8x2x4x4xf32>
    %118 = arith.addf %114, %117 : vector<8x2x4x4xf32>
    %c7_i32_79 = arith.constant 7 : i32
    %119 = arith.cmpi eq, %arg1, %c7_i32_79 : i32
    %c0_i32_80 = arith.constant 0 : i32
    %120 = vector.broadcast %c0_i32_80 : i32 to vector<8x1x1x1xi32>
    %121 = arith.cmpi eq, %0, %120 : vector<8x1x1x1xi32>
    %122 = vector.broadcast %119 : i1 to vector<8x1x1x1xi1>
    %123 = arith.ori %122, %121 : vector<8x1x1x1xi1>
    %cst_81 = arith.constant 0xFF800000 : f32
    %124 = vector.shape_cast %123 : vector<8x1x1x1xi1> to vector<8x1x1x1xi1>
    %125 = vector.broadcast %124 : vector<8x1x1x1xi1> to vector<8x2x4x4xi1>
    %126 = vector.broadcast %cst_81 : f32 to vector<8x2x4x4xf32>
    %127 = arith.select %125, %126, %118 : vector<8x2x4x4xi1>, vector<8x2x4x4xf32>
    %128 = vector.extract_strided_slice %9 {offsets = [1, 0, 0, 0], sizes = [8, 2, 4, 8], strides = [1, 1, 1, 1]} : vector<10x2x4x8xf32> to vector<8x2x4x8xf32>
    %129 = vector.shape_cast %128 : vector<8x2x4x8xf32> to vector<16x4x8xf32>
    "tpu.trace_start"() <{level = 10 : i32, message = "bqd,bkd->bqk"}> : () -> ()
    %cst_82 = arith.constant dense<0.000000e+00> : vector<16x4x4xf32>
    %130 = tpu.matmul %3, %129, %cst_82 {dimension_numbers = #tpu.dot_dimension_numbers<[2], [2], [1], [1], [0, 0, 0, 1, 1, 1], [0], [0]>} : vector<16x4x8xf32>, vector<16x4x8xf32>, vector<16x4x4xf32> -> vector<16x4x4xf32>
    "tpu.trace_stop"() : () -> ()
    %131 = vector.shape_cast %130 : vector<16x4x4xf32> to vector<8x2x4x4xf32>
    %cst_83 = arith.constant 0.353553385 : f32
    %132 = vector.broadcast %cst_83 : f32 to vector<8x2x4x4xf32>
    %133 = arith.mulf %131, %132 : vector<8x2x4x4xf32>
    %c0_84 = arith.constant 0 : index
    %c0_85 = arith.constant 0 : index
    %c28 = arith.constant 28 : index
    %134 = vector.load %arg2[%c0_84, %c0_85, %c28] : memref<2x4x36xf32, #tpu.memory_space<vmem>>, vector<2x4x4xf32>
    %135 = vector.shape_cast %134 : vector<2x4x4xf32> to vector<1x2x4x4xf32>
    %136 = vector.broadcast %135 : vector<1x2x4x4xf32> to vector<8x2x4x4xf32>
    %137 = arith.addf %133, %136 : vector<8x2x4x4xf32>
    %c7_i32_86 = arith.constant 7 : i32
    %138 = arith.cmpi eq, %arg1, %c7_i32_86 : i32
    %cst_87 = arith.constant 0xFF800000 : f32
    %139 = vector.broadcast %cst_87 : f32 to vector<8x2x4x4xf32>
    %140 = arith.select %138, %139, %137 : vector<8x2x4x4xf32>
    %141 = vector.extract_strided_slice %9 {offsets = [2, 0, 0, 0], sizes = [8, 2, 4, 8], strides = [1, 1, 1, 1]} : vector<10x2x4x8xf32> to vector<8x2x4x8xf32>
    %142 = vector.shape_cast %141 : vector<8x2x4x8xf32> to vector<16x4x8xf32>
    "tpu.trace_start"() <{level = 10 : i32, message = "bqd,bkd->bqk"}> : () -> ()
    %cst_88 = arith.constant dense<0.000000e+00> : vector<16x4x4xf32>
    %143 = tpu.matmul %3, %142, %cst_88 {dimension_numbers = #tpu.dot_dimension_numbers<[2], [2], [1], [1], [0, 0, 0, 1, 1, 1], [0], [0]>} : vector<16x4x8xf32>, vector<16x4x8xf32>, vector<16x4x4xf32> -> vector<16x4x4xf32>
    "tpu.trace_stop"() : () -> ()
    %144 = vector.shape_cast %143 : vector<16x4x4xf32> to vector<8x2x4x4xf32>
    %cst_89 = arith.constant 0.353553385 : f32
    %145 = vector.broadcast %cst_89 : f32 to vector<8x2x4x4xf32>
    %146 = arith.mulf %144, %145 : vector<8x2x4x4xf32>
    %c0_90 = arith.constant 0 : index
    %c0_91 = arith.constant 0 : index
    %c32 = arith.constant 32 : index
    %147 = vector.load %arg2[%c0_90, %c0_91, %c32] : memref<2x4x36xf32, #tpu.memory_space<vmem>>, vector<2x4x4xf32>
    %148 = vector.shape_cast %147 : vector<2x4x4xf32> to vector<1x2x4x4xf32>
    %149 = vector.broadcast %148 : vector<1x2x4x4xf32> to vector<8x2x4x4xf32>
    %150 = arith.addf %146, %149 : vector<8x2x4x4xf32>
    %c7_i32_92 = arith.constant 7 : i32
    %151 = arith.cmpi eq, %arg1, %c7_i32_92 : i32
    %c7_i32_93 = arith.constant 7 : i32
    %152 = vector.broadcast %c7_i32_93 : i32 to vector<8x1x1x1xi32>
    %153 = arith.cmpi eq, %0, %152 : vector<8x1x1x1xi32>
    %154 = vector.broadcast %151 : i1 to vector<8x1x1x1xi1>
    %155 = arith.ori %154, %153 : vector<8x1x1x1xi1>
    %cst_94 = arith.constant 0xFF800000 : f32
    %156 = vector.shape_cast %155 : vector<8x1x1x1xi1> to vector<8x1x1x1xi1>
    %157 = vector.broadcast %156 : vector<8x1x1x1xi1> to vector<8x2x4x4xi1>
    %158 = vector.broadcast %cst_94 : f32 to vector<8x2x4x4xf32>
    %159 = arith.select %157, %158, %150 : vector<8x2x4x4xi1>, vector<8x2x4x4xf32>
    %cst_95 = arith.constant dense<0xFF800000> : vector<8x2x4xf32>
    %160 = vector.multi_reduction <maximumf>, %34, %cst_95 [3] : vector<8x2x4x4xf32> to vector<8x2x4xf32>
    %161 = vector.shape_cast %160 : vector<8x2x4xf32> to vector<8x2x4x1xf32>
    %cst_96 = arith.constant dense<0xFF800000> : vector<8x2x4xf32>
    %162 = vector.multi_reduction <maximumf>, %47, %cst_96 [3] : vector<8x2x4x4xf32> to vector<8x2x4xf32>
    %163 = vector.shape_cast %162 : vector<8x2x4xf32> to vector<8x2x4x1xf32>
    %cst_97 = arith.constant dense<0xFF800000> : vector<8x2x4xf32>
    %164 = vector.multi_reduction <maximumf>, %66, %cst_97 [3] : vector<8x2x4x4xf32> to vector<8x2x4xf32>
    %165 = vector.shape_cast %164 : vector<8x2x4xf32> to vector<8x2x4x1xf32>
    %cst_98 = arith.constant dense<0xFF800000> : vector<8x2x4xf32>
    %166 = vector.multi_reduction <maximumf>, %82, %cst_98 [3] : vector<8x2x4x4xf32> to vector<8x2x4xf32>
    %167 = vector.shape_cast %166 : vector<8x2x4xf32> to vector<8x2x4x1xf32>
    %cst_99 = arith.constant dense<0xFF800000> : vector<8x2x4xf32>
    %168 = vector.multi_reduction <maximumf>, %92, %cst_99 [3] : vector<8x2x4x4xf32> to vector<8x2x4xf32>
    %169 = vector.shape_cast %168 : vector<8x2x4xf32> to vector<8x2x4x1xf32>
    %cst_100 = arith.constant dense<0xFF800000> : vector<8x2x4xf32>
    %170 = vector.multi_reduction <maximumf>, %108, %cst_100 [3] : vector<8x2x4x4xf32> to vector<8x2x4xf32>
    %171 = vector.shape_cast %170 : vector<8x2x4xf32> to vector<8x2x4x1xf32>
    %cst_101 = arith.constant dense<0xFF800000> : vector<8x2x4xf32>
    %172 = vector.multi_reduction <maximumf>, %127, %cst_101 [3] : vector<8x2x4x4xf32> to vector<8x2x4xf32>
    %173 = vector.shape_cast %172 : vector<8x2x4xf32> to vector<8x2x4x1xf32>
    %cst_102 = arith.constant dense<0xFF800000> : vector<8x2x4xf32>
    %174 = vector.multi_reduction <maximumf>, %140, %cst_102 [3] : vector<8x2x4x4xf32> to vector<8x2x4xf32>
    %175 = vector.shape_cast %174 : vector<8x2x4xf32> to vector<8x2x4x1xf32>
    %cst_103 = arith.constant dense<0xFF800000> : vector<8x2x4xf32>
    %176 = vector.multi_reduction <maximumf>, %159, %cst_103 [3] : vector<8x2x4x4xf32> to vector<8x2x4xf32>
    %177 = vector.shape_cast %176 : vector<8x2x4xf32> to vector<8x2x4x1xf32>
    %178 = arith.maximumf %161, %163 : vector<8x2x4x1xf32>
    %179 = arith.maximumf %178, %165 : vector<8x2x4x1xf32>
    %180 = arith.maximumf %179, %167 : vector<8x2x4x1xf32>
    %181 = arith.maximumf %180, %169 : vector<8x2x4x1xf32>
    %182 = arith.maximumf %181, %171 : vector<8x2x4x1xf32>
    %183 = arith.maximumf %182, %173 : vector<8x2x4x1xf32>
    %184 = arith.maximumf %183, %175 : vector<8x2x4x1xf32>
    %185 = arith.maximumf %184, %177 : vector<8x2x4x1xf32>
    %cst_104 = arith.constant 0.000000e+00 : f32
    %186 = vector.broadcast %cst_104 : f32 to vector<8x2x4x1xf32>
    %cst_105 = arith.constant 0.000000e+00 : f32
    %187 = vector.broadcast %cst_105 : f32 to vector<16x4x8xf32>
    %188 = vector.broadcast %185 : vector<8x2x4x1xf32> to vector<8x2x4x4xf32>
    %189 = arith.subf %34, %188 : vector<8x2x4x4xf32>
    %190 = math.exp %189 : vector<8x2x4x4xf32>
    %cst_106 = arith.constant dense<0.000000e+00> : vector<8x2x4xf32>
    %191 = vector.multi_reduction <add>, %190, %cst_106 [3] : vector<8x2x4x4xf32> to vector<8x2x4xf32>
    %192 = vector.shape_cast %191 : vector<8x2x4xf32> to vector<8x2x4x1xf32>
    %193 = arith.addf %186, %192 : vector<8x2x4x1xf32>
    %194 = vector.extract_strided_slice %11 {offsets = [0, 0, 0, 0], sizes = [8, 2, 4, 8], strides = [1, 1, 1, 1]} : vector<10x2x4x8xf32> to vector<8x2x4x8xf32>
    %195 = vector.shape_cast %194 : vector<8x2x4x8xf32> to vector<16x4x8xf32>
    %196 = vector.shape_cast %190 : vector<8x2x4x4xf32> to vector<16x4x4xf32>
    "tpu.trace_start"() <{level = 10 : i32, message = "bqk,bkd->bqd"}> : () -> ()
    %cst_107 = arith.constant dense<0.000000e+00> : vector<16x4x8xf32>
    %197 = tpu.matmul %196, %195, %cst_107 {dimension_numbers = #tpu.dot_dimension_numbers<[2], [1], [1], [2], [0, 0, 0, 1, 1, 2], [0], [0]>} : vector<16x4x4xf32>, vector<16x4x8xf32>, vector<16x4x8xf32> -> vector<16x4x8xf32>
    "tpu.trace_stop"() : () -> ()
    %198 = arith.addf %187, %197 : vector<16x4x8xf32>
    %199 = vector.broadcast %185 : vector<8x2x4x1xf32> to vector<8x2x4x4xf32>
    %200 = arith.subf %47, %199 : vector<8x2x4x4xf32>
    %201 = math.exp %200 : vector<8x2x4x4xf32>
    %cst_108 = arith.constant dense<0.000000e+00> : vector<8x2x4xf32>
    %202 = vector.multi_reduction <add>, %201, %cst_108 [3] : vector<8x2x4x4xf32> to vector<8x2x4xf32>
    %203 = vector.shape_cast %202 : vector<8x2x4xf32> to vector<8x2x4x1xf32>
    %204 = arith.addf %193, %203 : vector<8x2x4x1xf32>
    %205 = vector.extract_strided_slice %11 {offsets = [1, 0, 0, 0], sizes = [8, 2, 4, 8], strides = [1, 1, 1, 1]} : vector<10x2x4x8xf32> to vector<8x2x4x8xf32>
    %206 = vector.shape_cast %205 : vector<8x2x4x8xf32> to vector<16x4x8xf32>
    %207 = vector.shape_cast %201 : vector<8x2x4x4xf32> to vector<16x4x4xf32>
    "tpu.trace_start"() <{level = 10 : i32, message = "bqk,bkd->bqd"}> : () -> ()
    %cst_109 = arith.constant dense<0.000000e+00> : vector<16x4x8xf32>
    %208 = tpu.matmul %207, %206, %cst_109 {dimension_numbers = #tpu.dot_dimension_numbers<[2], [1], [1], [2], [0, 0, 0, 1, 1, 2], [0], [0]>} : vector<16x4x4xf32>, vector<16x4x8xf32>, vector<16x4x8xf32> -> vector<16x4x8xf32>
    "tpu.trace_stop"() : () -> ()
    %209 = arith.addf %198, %208 : vector<16x4x8xf32>
    %210 = vector.broadcast %185 : vector<8x2x4x1xf32> to vector<8x2x4x4xf32>
    %211 = arith.subf %66, %210 : vector<8x2x4x4xf32>
    %212 = math.exp %211 : vector<8x2x4x4xf32>
    %cst_110 = arith.constant dense<0.000000e+00> : vector<8x2x4xf32>
    %213 = vector.multi_reduction <add>, %212, %cst_110 [3] : vector<8x2x4x4xf32> to vector<8x2x4xf32>
    %214 = vector.shape_cast %213 : vector<8x2x4xf32> to vector<8x2x4x1xf32>
    %215 = arith.addf %204, %214 : vector<8x2x4x1xf32>
    %216 = vector.extract_strided_slice %11 {offsets = [2, 0, 0, 0], sizes = [8, 2, 4, 8], strides = [1, 1, 1, 1]} : vector<10x2x4x8xf32> to vector<8x2x4x8xf32>
    %217 = vector.shape_cast %216 : vector<8x2x4x8xf32> to vector<16x4x8xf32>
    %218 = vector.shape_cast %212 : vector<8x2x4x4xf32> to vector<16x4x4xf32>
    "tpu.trace_start"() <{level = 10 : i32, message = "bqk,bkd->bqd"}> : () -> ()
    %cst_111 = arith.constant dense<0.000000e+00> : vector<16x4x8xf32>
    %219 = tpu.matmul %218, %217, %cst_111 {dimension_numbers = #tpu.dot_dimension_numbers<[2], [1], [1], [2], [0, 0, 0, 1, 1, 2], [0], [0]>} : vector<16x4x4xf32>, vector<16x4x8xf32>, vector<16x4x8xf32> -> vector<16x4x8xf32>
    "tpu.trace_stop"() : () -> ()
    %220 = arith.addf %209, %219 : vector<16x4x8xf32>
    %221 = vector.broadcast %185 : vector<8x2x4x1xf32> to vector<8x2x4x4xf32>
    %222 = arith.subf %82, %221 : vector<8x2x4x4xf32>
    %223 = math.exp %222 : vector<8x2x4x4xf32>
    %cst_112 = arith.constant dense<0.000000e+00> : vector<8x2x4xf32>
    %224 = vector.multi_reduction <add>, %223, %cst_112 [3] : vector<8x2x4x4xf32> to vector<8x2x4xf32>
    %225 = vector.shape_cast %224 : vector<8x2x4xf32> to vector<8x2x4x1xf32>
    %226 = arith.addf %215, %225 : vector<8x2x4x1xf32>
    %227 = vector.extract_strided_slice %13 {offsets = [0, 0, 0, 0], sizes = [8, 2, 4, 8], strides = [1, 1, 1, 1]} : vector<10x2x4x8xf32> to vector<8x2x4x8xf32>
    %228 = vector.shape_cast %227 : vector<8x2x4x8xf32> to vector<16x4x8xf32>
    %229 = vector.shape_cast %223 : vector<8x2x4x4xf32> to vector<16x4x4xf32>
    "tpu.trace_start"() <{level = 10 : i32, message = "bqk,bkd->bqd"}> : () -> ()
    %cst_113 = arith.constant dense<0.000000e+00> : vector<16x4x8xf32>
    %230 = tpu.matmul %229, %228, %cst_113 {dimension_numbers = #tpu.dot_dimension_numbers<[2], [1], [1], [2], [0, 0, 0, 1, 1, 2], [0], [0]>} : vector<16x4x4xf32>, vector<16x4x8xf32>, vector<16x4x8xf32> -> vector<16x4x8xf32>
    "tpu.trace_stop"() : () -> ()
    %231 = arith.addf %220, %230 : vector<16x4x8xf32>
    %232 = vector.broadcast %185 : vector<8x2x4x1xf32> to vector<8x2x4x4xf32>
    %233 = arith.subf %92, %232 : vector<8x2x4x4xf32>
    %234 = math.exp %233 : vector<8x2x4x4xf32>
    %cst_114 = arith.constant dense<0.000000e+00> : vector<8x2x4xf32>
    %235 = vector.multi_reduction <add>, %234, %cst_114 [3] : vector<8x2x4x4xf32> to vector<8x2x4xf32>
    %236 = vector.shape_cast %235 : vector<8x2x4xf32> to vector<8x2x4x1xf32>
    %237 = arith.addf %226, %236 : vector<8x2x4x1xf32>
    %238 = vector.extract_strided_slice %13 {offsets = [1, 0, 0, 0], sizes = [8, 2, 4, 8], strides = [1, 1, 1, 1]} : vector<10x2x4x8xf32> to vector<8x2x4x8xf32>
    %239 = vector.shape_cast %238 : vector<8x2x4x8xf32> to vector<16x4x8xf32>
    %240 = vector.shape_cast %234 : vector<8x2x4x4xf32> to vector<16x4x4xf32>
    "tpu.trace_start"() <{level = 10 : i32, message = "bqk,bkd->bqd"}> : () -> ()
    %cst_115 = arith.constant dense<0.000000e+00> : vector<16x4x8xf32>
    %241 = tpu.matmul %240, %239, %cst_115 {dimension_numbers = #tpu.dot_dimension_numbers<[2], [1], [1], [2], [0, 0, 0, 1, 1, 2], [0], [0]>} : vector<16x4x4xf32>, vector<16x4x8xf32>, vector<16x4x8xf32> -> vector<16x4x8xf32>
    "tpu.trace_stop"() : () -> ()
    %242 = arith.addf %231, %241 : vector<16x4x8xf32>
    %243 = vector.broadcast %185 : vector<8x2x4x1xf32> to vector<8x2x4x4xf32>
    %244 = arith.subf %108, %243 : vector<8x2x4x4xf32>
    %245 = math.exp %244 : vector<8x2x4x4xf32>
    %cst_116 = arith.constant dense<0.000000e+00> : vector<8x2x4xf32>
    %246 = vector.multi_reduction <add>, %245, %cst_116 [3] : vector<8x2x4x4xf32> to vector<8x2x4xf32>
    %247 = vector.shape_cast %246 : vector<8x2x4xf32> to vector<8x2x4x1xf32>
    %248 = arith.addf %237, %247 : vector<8x2x4x1xf32>
    %249 = vector.extract_strided_slice %13 {offsets = [2, 0, 0, 0], sizes = [8, 2, 4, 8], strides = [1, 1, 1, 1]} : vector<10x2x4x8xf32> to vector<8x2x4x8xf32>
    %250 = vector.shape_cast %249 : vector<8x2x4x8xf32> to vector<16x4x8xf32>
    %251 = vector.shape_cast %245 : vector<8x2x4x4xf32> to vector<16x4x4xf32>
    "tpu.trace_start"() <{level = 10 : i32, message = "bqk,bkd->bqd"}> : () -> ()
    %cst_117 = arith.constant dense<0.000000e+00> : vector<16x4x8xf32>
    %252 = tpu.matmul %251, %250, %cst_117 {dimension_numbers = #tpu.dot_dimension_numbers<[2], [1], [1], [2], [0, 0, 0, 1, 1, 2], [0], [0]>} : vector<16x4x4xf32>, vector<16x4x8xf32>, vector<16x4x8xf32> -> vector<16x4x8xf32>
    "tpu.trace_stop"() : () -> ()
    %253 = arith.addf %242, %252 : vector<16x4x8xf32>
    %254 = vector.broadcast %185 : vector<8x2x4x1xf32> to vector<8x2x4x4xf32>
    %255 = arith.subf %127, %254 : vector<8x2x4x4xf32>
    %256 = math.exp %255 : vector<8x2x4x4xf32>
    %cst_118 = arith.constant dense<0.000000e+00> : vector<8x2x4xf32>
    %257 = vector.multi_reduction <add>, %256, %cst_118 [3] : vector<8x2x4x4xf32> to vector<8x2x4xf32>
    %258 = vector.shape_cast %257 : vector<8x2x4xf32> to vector<8x2x4x1xf32>
    %259 = arith.addf %248, %258 : vector<8x2x4x1xf32>
    %260 = vector.extract_strided_slice %15 {offsets = [0, 0, 0, 0], sizes = [8, 2, 4, 8], strides = [1, 1, 1, 1]} : vector<10x2x4x8xf32> to vector<8x2x4x8xf32>
    %261 = vector.shape_cast %260 : vector<8x2x4x8xf32> to vector<16x4x8xf32>
    %262 = vector.shape_cast %256 : vector<8x2x4x4xf32> to vector<16x4x4xf32>
    "tpu.trace_start"() <{level = 10 : i32, message = "bqk,bkd->bqd"}> : () -> ()
    %cst_119 = arith.constant dense<0.000000e+00> : vector<16x4x8xf32>
    %263 = tpu.matmul %262, %261, %cst_119 {dimension_numbers = #tpu.dot_dimension_numbers<[2], [1], [1], [2], [0, 0, 0, 1, 1, 2], [0], [0]>} : vector<16x4x4xf32>, vector<16x4x8xf32>, vector<16x4x8xf32> -> vector<16x4x8xf32>
    "tpu.trace_stop"() : () -> ()
    %264 = arith.addf %253, %263 : vector<16x4x8xf32>
    %265 = vector.broadcast %185 : vector<8x2x4x1xf32> to vector<8x2x4x4xf32>
    %266 = arith.subf %140, %265 : vector<8x2x4x4xf32>
    %267 = math.exp %266 : vector<8x2x4x4xf32>
    %cst_120 = arith.constant dense<0.000000e+00> : vector<8x2x4xf32>
    %268 = vector.multi_reduction <add>, %267, %cst_120 [3] : vector<8x2x4x4xf32> to vector<8x2x4xf32>
    %269 = vector.shape_cast %268 : vector<8x2x4xf32> to vector<8x2x4x1xf32>
    %270 = arith.addf %259, %269 : vector<8x2x4x1xf32>
    %271 = vector.extract_strided_slice %15 {offsets = [1, 0, 0, 0], sizes = [8, 2, 4, 8], strides = [1, 1, 1, 1]} : vector<10x2x4x8xf32> to vector<8x2x4x8xf32>
    %272 = vector.shape_cast %271 : vector<8x2x4x8xf32> to vector<16x4x8xf32>
    %273 = vector.shape_cast %267 : vector<8x2x4x4xf32> to vector<16x4x4xf32>
    "tpu.trace_start"() <{level = 10 : i32, message = "bqk,bkd->bqd"}> : () -> ()
    %cst_121 = arith.constant dense<0.000000e+00> : vector<16x4x8xf32>
    %274 = tpu.matmul %273, %272, %cst_121 {dimension_numbers = #tpu.dot_dimension_numbers<[2], [1], [1], [2], [0, 0, 0, 1, 1, 2], [0], [0]>} : vector<16x4x4xf32>, vector<16x4x8xf32>, vector<16x4x8xf32> -> vector<16x4x8xf32>
    "tpu.trace_stop"() : () -> ()
    %275 = arith.addf %264, %274 : vector<16x4x8xf32>
    %276 = vector.broadcast %185 : vector<8x2x4x1xf32> to vector<8x2x4x4xf32>
    %277 = arith.subf %159, %276 : vector<8x2x4x4xf32>
    %278 = math.exp %277 : vector<8x2x4x4xf32>
    %cst_122 = arith.constant dense<0.000000e+00> : vector<8x2x4xf32>
    %279 = vector.multi_reduction <add>, %278, %cst_122 [3] : vector<8x2x4x4xf32> to vector<8x2x4xf32>
    %280 = vector.shape_cast %279 : vector<8x2x4xf32> to vector<8x2x4x1xf32>
    %281 = arith.addf %270, %280 : vector<8x2x4x1xf32>
    %282 = vector.extract_strided_slice %15 {offsets = [2, 0, 0, 0], sizes = [8, 2, 4, 8], strides = [1, 1, 1, 1]} : vector<10x2x4x8xf32> to vector<8x2x4x8xf32>
    %283 = vector.shape_cast %282 : vector<8x2x4x8xf32> to vector<16x4x8xf32>
    %284 = vector.shape_cast %278 : vector<8x2x4x4xf32> to vector<16x4x4xf32>
    "tpu.trace_start"() <{level = 10 : i32, message = "bqk,bkd->bqd"}> : () -> ()
    %cst_123 = arith.constant dense<0.000000e+00> : vector<16x4x8xf32>
    %285 = tpu.matmul %284, %283, %cst_123 {dimension_numbers = #tpu.dot_dimension_numbers<[2], [1], [1], [2], [0, 0, 0, 1, 1, 2], [0], [0]>} : vector<16x4x4xf32>, vector<16x4x8xf32>, vector<16x4x8xf32> -> vector<16x4x8xf32>
    "tpu.trace_stop"() : () -> ()
    %286 = arith.addf %275, %285 : vector<16x4x8xf32>
    %287 = tpu.reciprocal %281 : vector<8x2x4x1xf32> -> vector<8x2x4x1xf32>
    %288 = vector.shape_cast %286 : vector<16x4x8xf32> to vector<8x2x4x8xf32>
    %289 = vector.broadcast %287 : vector<8x2x4x1xf32> to vector<8x2x4x8xf32>
    %290 = arith.mulf %288, %289 : vector<8x2x4x8xf32>
    %291 = vector.extract_strided_slice %290 {offsets = [0, 0, 0, 0], sizes = [8, 1, 4, 8], strides = [1, 1, 1, 1]} : vector<8x2x4x8xf32> to vector<8x1x4x8xf32>
    %292 = vector.shape_cast %291 : vector<8x1x4x8xf32> to vector<8x4x8xf32>
    %c0_124 = arith.constant 0 : index
    %c0_125 = arith.constant 0 : index
    %c0_126 = arith.constant 0 : index
    %c0_127 = arith.constant 0 : index
    %c0_128 = arith.constant 0 : index
    %293 = vector.load %arg10[%c0_124, %c0_125, %c0_126, %c0_127, %c0_128] : memref<1x1x8x4x16xf32, #tpu.memory_space<vmem>>, vector<1x1x8x4x8xf32>
    %294 = vector.shape_cast %293 : vector<1x1x8x4x8xf32> to vector<8x4x8xf32>
    %295 = vector.shape_cast %292 : vector<8x4x8xf32> to vector<1x1x8x4x8xf32>
    tpu.vector_store %arg10[%c0_124, %c0_125, %c0_126, %c0_127, %c0_128], %295 {strides = array<i32>} : memref<1x1x8x4x16xf32, #tpu.memory_space<vmem>>, vector<1x1x8x4x8xf32>,
    %296 = vector.extract_strided_slice %290 {offsets = [0, 1, 0, 0], sizes = [8, 1, 4, 8], strides = [1, 1, 1, 1]} : vector<8x2x4x8xf32> to vector<8x1x4x8xf32>
    %297 = vector.shape_cast %296 : vector<8x1x4x8xf32> to vector<8x4x8xf32>
    %c0_129 = arith.constant 0 : index
    %c0_130 = arith.constant 0 : index
    %c0_131 = arith.constant 0 : index
    %c0_132 = arith.constant 0 : index
    %c8_133 = arith.constant 8 : index
    %298 = vector.load %arg10[%c0_129, %c0_130, %c0_131, %c0_132, %c8_133] : memref<1x1x8x4x16xf32, #tpu.memory_space<vmem>>, vector<1x1x8x4x8xf32>
    %299 = vector.shape_cast %298 : vector<1x1x8x4x8xf32> to vector<8x4x8xf32>
    %300 = vector.shape_cast %297 : vector<8x4x8xf32> to vector<1x1x8x4x8xf32>
    tpu.vector_store %arg10[%c0_129, %c0_130, %c0_131, %c0_132, %c8_133], %300 {strides = array<i32>} : memref<1x1x8x4x16xf32, #tpu.memory_space<vmem>>, vector<1x1x8x4x8xf32>,
    return
  }
  func.func @transform_0(%arg0: i32, %arg1: i32) -> (i32, i32, i32) {
    %c0_i32 = arith.constant 0 : i32
    %c0_i32_0 = arith.constant 0 : i32
    %c0_i32_1 = arith.constant 0 : i32
    %c0_i32_2 = arith.constant 0 : i32
    return %c0_i32, %c0_i32_0, %c0_i32_1 : i32, i32, i32
  }
  func.func @transform_1(%arg0: i32, %arg1: i32) -> (i32, i32, i32, i32, i32, i32) {
    %c0_i32 = arith.constant 0 : i32
    %c0_i32_0 = arith.constant 0 : i32
    %c0_i32_1 = arith.constant 0 : i32
    %c0_i32_2 = arith.constant 0 : i32
    %c0_i32_3 = arith.constant 0 : i32
    return %arg0, %arg1, %c0_i32, %c0_i32_0, %c0_i32_1, %c0_i32_2 : i32, i32, i32, i32, i32, i32
  }
  func.func @transform_2(%arg0: i32, %arg1: i32) -> (i32, i32, i32, i32, i32, i32) {
    %c0_i32 = arith.constant 0 : i32
    %0 = arith.addi %arg1, %c0_i32 : i32
    %c0_i32_0 = arith.constant 0 : i32
    %c0_i32_1 = arith.constant 0 : i32
    %c0_i32_2 = arith.constant 0 : i32
    %c0_i32_3 = arith.constant 0 : i32
    %c0_i32_4 = arith.constant 0 : i32
    return %arg0, %0, %c0_i32_0, %c0_i32_1, %c0_i32_2, %c0_i32_3 : i32, i32, i32, i32, i32, i32
  }
  func.func @transform_3(%arg0: i32, %arg1: i32) -> (i32, i32, i32, i32, i32, i32) {
    %c1_i32 = arith.constant 1 : i32
    %0 = arith.addi %arg1, %c1_i32 : i32
    %c0_i32 = arith.constant 0 : i32
    %c0_i32_0 = arith.constant 0 : i32
    %c0_i32_1 = arith.constant 0 : i32
    %c0_i32_2 = arith.constant 0 : i32
    %c0_i32_3 = arith.constant 0 : i32
    return %arg0, %0, %c0_i32, %c0_i32_0, %c0_i32_1, %c0_i32_2 : i32, i32, i32, i32, i32, i32
  }
  func.func @transform_4(%arg0: i32, %arg1: i32) -> (i32, i32, i32, i32, i32, i32) {
    %c2_i32 = arith.constant 2 : i32
    %0 = arith.addi %arg1, %c2_i32 : i32
    %c0_i32 = arith.constant 0 : i32
    %c0_i32_0 = arith.constant 0 : i32
    %c0_i32_1 = arith.constant 0 : i32
    %c0_i32_2 = arith.constant 0 : i32
    %c0_i32_3 = arith.constant 0 : i32
    return %arg0, %0, %c0_i32, %c0_i32_0, %c0_i32_1, %c0_i32_2 : i32, i32, i32, i32, i32, i32
  }
  func.func @transform_5(%arg0: i32, %arg1: i32) -> (i32, i32, i32, i32, i32, i32) {
    %c0_i32 = arith.constant 0 : i32
    %0 = arith.addi %arg1, %c0_i32 : i32
    %c0_i32_0 = arith.constant 0 : i32
    %c0_i32_1 = arith.constant 0 : i32
    %c0_i32_2 = arith.constant 0 : i32
    %c0_i32_3 = arith.constant 0 : i32
    %c0_i32_4 = arith.constant 0 : i32
    return %arg0, %0, %c0_i32_0, %c0_i32_1, %c0_i32_2, %c0_i32_3 : i32, i32, i32, i32, i32, i32
  }
  func.func @transform_6(%arg0: i32, %arg1: i32) -> (i32, i32, i32, i32, i32, i32) {
    %c1_i32 = arith.constant 1 : i32
    %0 = arith.addi %arg1, %c1_i32 : i32
    %c0_i32 = arith.constant 0 : i32
    %c0_i32_0 = arith.constant 0 : i32
    %c0_i32_1 = arith.constant 0 : i32
    %c0_i32_2 = arith.constant 0 : i32
    %c0_i32_3 = arith.constant 0 : i32
    return %arg0, %0, %c0_i32, %c0_i32_0, %c0_i32_1, %c0_i32_2 : i32, i32, i32, i32, i32, i32
  }
  func.func @transform_7(%arg0: i32, %arg1: i32) -> (i32, i32, i32, i32, i32, i32) {
    %c2_i32 = arith.constant 2 : i32
    %0 = arith.addi %arg1, %c2_i32 : i32
    %c0_i32 = arith.constant 0 : i32
    %c0_i32_0 = arith.constant 0 : i32
    %c0_i32_1 = arith.constant 0 : i32
    %c0_i32_2 = arith.constant 0 : i32
    %c0_i32_3 = arith.constant 0 : i32
    return %arg0, %0, %c0_i32, %c0_i32_0, %c0_i32_1, %c0_i32_2 : i32, i32, i32, i32, i32, i32
  }
  func.func @transform_8(%arg0: i32, %arg1: i32) -> (i32, i32, i32, i32, i32) {
    %c0_i32 = arith.constant 0 : i32
    %c0_i32_0 = arith.constant 0 : i32
    %c0_i32_1 = arith.constant 0 : i32
    %c0_i32_2 = arith.constant 0 : i32
    return %arg0, %arg1, %c0_i32, %c0_i32_0, %c0_i32_1 : i32, i32, i32, i32, i32
  }
}

module attributes {stable_mosaic.version = 11 : i64} {
  func.func @_linear_kernel(%arg0: i32, %arg1: memref<512x16xf32, #tpu.memory_space<vmem>>, %arg2: memref<16x4xf32, #tpu.memory_space<vmem>>, %arg3: memref<1x4xf32, #tpu.memory_space<vmem>>, %arg4: memref<512x4xf32, #tpu.memory_space<vmem>>) attributes {dimension_semantics = [#tpu.dimension_semantics<parallel>], iteration_bounds = array<i64: 1>, scalar_prefetch = 0 : i64, scratch_operands = 0 : i64, tpu.core_type = #tpu.core_type<tc>, window_params = [{transform_indices = @transform_0, window_bounds = array<i64: 512, 16>}, {pipeline_mode = #tpu.pipeline_mode<synchronous>, transform_indices = @transform_1, window_bounds = array<i64: 16, 4>}, {pipeline_mode = #tpu.pipeline_mode<synchronous>, transform_indices = @transform_2, window_bounds = array<i64: 1, 4>}, {transform_indices = @transform_3, window_bounds = array<i64: 512, 4>}]} {
    %c0 = arith.constant 0 : index
    %c0_0 = arith.constant 0 : index
    %0 = vector.load %arg1[%c0, %c0_0] : memref<512x16xf32, #tpu.memory_space<vmem>>, vector<512x16xf32>
    %c0_1 = arith.constant 0 : index
    %c0_2 = arith.constant 0 : index
    %1 = vector.load %arg2[%c0_1, %c0_2] : memref<16x4xf32, #tpu.memory_space<vmem>>, vector<16x4xf32>
    %cst = arith.constant dense<0.000000e+00> : vector<512x4xf32>
    %2 = tpu.matmul %0, %1, %cst {dimension_numbers = #tpu.dot_dimension_numbers<[1], [0], [0], [1], [0, 0, 1, 1], [], []>} : vector<512x16xf32>, vector<16x4xf32>, vector<512x4xf32> -> vector<512x4xf32>
    %c0_3 = arith.constant 0 : index
    %c0_4 = arith.constant 0 : index
    %3 = vector.load %arg3[%c0_3, %c0_4] : memref<1x4xf32, #tpu.memory_space<vmem>>, vector<1x4xf32>
    %4 = vector.broadcast %3 : vector<1x4xf32> to vector<512x4xf32>
    %5 = arith.addf %2, %4 : vector<512x4xf32>
    %c0_5 = arith.constant 0 : index
    %c0_6 = arith.constant 0 : index
    %6 = vector.load %arg4[%c0_5, %c0_6] : memref<512x4xf32, #tpu.memory_space<vmem>>, vector<512x4xf32>
    tpu.vector_store %arg4[%c0_5, %c0_6], %5 {strides = array<i32>} : memref<512x4xf32, #tpu.memory_space<vmem>>, vector<512x4xf32>,
    return
  }
  func.func @transform_0(%arg0: i32) -> (i32, i32) {
    %c0_i32 = arith.constant 0 : i32
    %c0_i32_0 = arith.constant 0 : i32
    return %arg0, %c0_i32 : i32, i32
  }
  func.func @transform_1(%arg0: i32) -> (i32, i32) {
    %c0_i32 = arith.constant 0 : i32
    %c0_i32_0 = arith.constant 0 : i32
    %c0_i32_1 = arith.constant 0 : i32
    return %c0_i32, %c0_i32_0 : i32, i32
  }
  func.func @transform_2(%arg0: i32) -> (i32, i32) {
    %c0_i32 = arith.constant 0 : i32
    %c0_i32_0 = arith.constant 0 : i32
    %c0_i32_1 = arith.constant 0 : i32
    return %c0_i32, %c0_i32_0 : i32, i32
  }
  func.func @transform_3(%arg0: i32) -> (i32, i32) {
    %c0_i32 = arith.constant 0 : i32
    %c0_i32_0 = arith.constant 0 : i32
    return %arg0, %c0_i32 : i32, i32
  }
}

</mosaic_0001>

<bundles_post_ra>
// kernel: attention_convolution_2d.3
= control target key start
LH: loop header
LB: loop body
LE: loop exit
PB: predicated region body
PF: predicated region fallthrough
CT: control target
= control target key end

     0   :  { %8 = vsyncpa [#allocation3], 0  ;;  %s1668_s0 = inlined_call_operand.vmem [shape: f32[512,4], index: 0, kind: input, shape index: {}]   ;;  %s1669_s1 = inlined_call_operand.hbm [shape: f32[4,48], index: 1, kind: input, shape index: {}]   ;;  %s1670_s2 = inlined_call_operand.hbm [shape: f32[1,48], index: 2, kind: input, shape index: {}]   ;;  %s1671_s3 = inlined_call_operand.vmem [shape: f32[512,48], index: 3, kind: output, shape index: {}]  }
   0x1   :  { %9 = vsyncpa [#allocation5], 0  ;;  %s1044_s12 = smov [#allocation2]   ;;  %s1045_s14 = smov [#allocation4]  }
   0x2   :  { %s18_s13 = sshll.u32 %s1044_s12, 4  ;;  %s28_s15 = sshll.u32 %s1045_s14, 4  ;;  %s19_s13 = int_to_ptr.vmem [resolvable:$true] %s18_s13  ;;  %s29_s15 = int_to_ptr.vmem [resolvable:$true] %s28_s15 }
   0x3   :  { %s996_s18 = scalar_lea.hbm %s1669_s1, 64 }
   0x4   :  { %p997_p0 = scmp.ne.s32.totalorder %s1669_s1, %s996_s18  ;;  %p1000_p1 = scmp.lt.u32.totalorder %s996_s18, %s1669_s1 }
   0x6   :  { %p1002_p2 = pnand %p1000_p1, %p997_p0 }
   0x8   :  { %1005 = shalt.err (!%p1002_p2)
}
   0x9   :  { %s1006_s23 = scalar_lea.vmem %s19_s13, 64  ;;  %p1011_p4 = scmp.lt.s32.totalorder %s19_s13, %s19_s13 }
   0xa   :  { %p1007_p3 = scmp.ne.s32.totalorder %s19_s13, %s1006_s23  ;;  %p1012_p5 = scmp.lt.s32.totalorder %s1006_s23, %s1006_s23 }
   0xc   :  { %p1013_p6 = por %p1012_p5, %p1011_p4 }
   0xe   :  { %p1014_p7 = pnand %p1013_p6, %p1007_p3 }
  0x10   :  { %1017 = shalt.err (!%p1014_p7)
}
  0x11   :  { %21 = dma.hbm_to_vmem [thread:$0]  %s1669_s1, 64, %s19_s13, [#allocation3]  }
  0x12   :  { %s1018_s28 = scalar_lea.hbm %s1670_s2, 16 }
  0x13   :  { %p1019_p8 = scmp.ne.s32.totalorder %s1670_s2, %s1018_s28  ;;  %p1022_p9 = scmp.lt.u32.totalorder %s1018_s28, %s1670_s2 }
  0x15   :  { %p1024_p10 = pnand %p1022_p9, %p1019_p8 }
  0x17   :  { %1027 = shalt.err (!%p1024_p10)
}
  0x18   :  { %s1028_s6 = scalar_lea.vmem %s29_s15, 16  ;;  %s1032_s7 = scalar_lea.vmem %s29_s15, 32 }
  0x19   :  { %p1029_p11 = scmp.ne.s32.totalorder %s29_s15, %s1028_s6  ;;  %p1033_p12 = scmp.lt.s32.totalorder %s29_s15, %s29_s15 }
  0x1a   :  { %p1034_p13 = scmp.lt.s32.totalorder %s1032_s7, %s1028_s6 }
  0x1c   :  { %p1035_p0 = por %p1034_p13, %p1033_p12 }
  0x1e   :  { %p1036_p1 = pnand %p1035_p0, %p1029_p11 }
  0x20   :  { %1039 = shalt.err (!%p1036_p1)
}
  0x21   :  { %31 = dma.hbm_to_vmem [thread:$0]  %s1670_s2, 16, %s29_s15, [#allocation5]  }
  0x22   :  { %1040 = dma.done.wait [#allocation3], 64  }
  0x23   :  { %1041 = vsyncadd [#allocation3], 4294967232 }
  0x24   :  { %1042 = dma.done.wait [#allocation5], 16  }
  0x25   :  { %1043 = vsyncadd [#allocation5], 4294967280  ;;  %vm303_vm0 = vcmask 1043456   ;;  %v102_v0 = vld [vmem:[#allocation2] sm:$0xf]  ;;  %vm110_vm1 = vcmask 31744  }
  0x26   :  { %v38_v1 = vld [vmem:[%s1668_s0] sm:$0xff]  ;;  %894 = vmatprep.subr.msk.mxu0 %vm303_vm0, %v102_v0  ;;  %992 = vmatprep.subr.msk.mxu1 %vm303_vm0, %v102_v0  ;;  %v39_v3 = vld [vmem:[%s1668_s0 + $0x8] sm:$0xff]  ;;  %v40_v5 = vld [vmem:[%s1668_s0 + $0x10] sm:$0xff]  ;;  %vm692_vm2 = vcmask 392192  }
  0x27   :  { %v70_v2 = vld [vmem:[%s1668_s0 + $0x100] sm:$0xff]  ;;  %v71_v4 = vld [vmem:[%s1668_s0 + $0x108] sm:$0xff]  ;;  %895 = vmatpush3.msk.msra.mxu0 %vm303_vm0, %v102_v0  ;;  %993 = vmatpush3.msk.msra.mxu1 %vm303_vm0, %v102_v0  ;;  %v72_v6 = vld [vmem:[%s1668_s0 + $0x110] sm:$0xff] }
  0x28   :  { %896 = vmatprep.mubr.msk.f32.mxu0 %vm110_vm1, %v38_v1  ;;  %944 = vmatprep.mubr.msk.f32.mxu1 %vm110_vm1, %v70_v2  ;;  %v41_v7 = vld [vmem:[%s1668_s0 + $0x18] sm:$0xff]  ;;  %v42_v9 = vld [vmem:[%s1668_s0 + $0x20] sm:$0xff]  ;;  %v43_v11 = vld [vmem:[%s1668_s0 + $0x28] sm:$0xff] }
  0x29   :  { %897 = vmatmul.mubr.msk.f32.vlgmr.msra.gmra.mrb[0].mxu0 %vm110_vm1, %v39_v3  ;;  %945 = vmatmul.mubr.msk.f32.vlgmr.msra.gmra.mrb[0].mxu1 %vm110_vm1, %v71_v4  ;;  %v73_v8 = vld [vmem:[%s1668_s0 + $0x118] sm:$0xff]  ;;  %v74_v10 = vld [vmem:[%s1668_s0 + $0x120] sm:$0xff]  ;;  %v75_v12 = vld [vmem:[%s1668_s0 + $0x128] sm:$0xff] }
  0x2a   :  { %899 = vmatprep.mubr.msk.f32.mxu0 %vm110_vm1, %v40_v5  ;;  %947 = vmatprep.mubr.msk.f32.mxu1 %vm110_vm1, %v72_v6  ;;  %v44_v13 = vld [vmem:[%s1668_s0 + $0x30] sm:$0xff]  ;;  %v45_v15 = vld [vmem:[%s1668_s0 + $0x38] sm:$0xff]  ;;  %v46_v17 = vld [vmem:[%s1668_s0 + $0x40] sm:$0xff] }
  0x2b   :  { %v76_v14 = vld [vmem:[%s1668_s0 + $0x130] sm:$0xff]  ;;  %v77_v16 = vld [vmem:[%s1668_s0 + $0x138] sm:$0xff]  ;;  %v78_v18 = vld [vmem:[%s1668_s0 + $0x140] sm:$0xff] }
  0x2c   :  { %v47_v19 = vld [vmem:[%s1668_s0 + $0x48] sm:$0xff]  ;;  %v48_v21 = vld [vmem:[%s1668_s0 + $0x50] sm:$0xff]  ;;  %v49_v23 = vld [vmem:[%s1668_s0 + $0x58] sm:$0xff] }
  0x2d   :  { %900 = vmatmul.mubr.msk.f32.gmra.mrb[2].mxu0 %vm110_vm1, %v41_v7  ;;  %948 = vmatmul.mubr.msk.f32.gmra.mrb[2].mxu1 %vm110_vm1, %v73_v8  ;;  %v79_v20 = vld [vmem:[%s1668_s0 + $0x148] sm:$0xff]  ;;  %v80_v22 = vld [vmem:[%s1668_s0 + $0x150] sm:$0xff]  ;;  %v81_v24 = vld [vmem:[%s1668_s0 + $0x158] sm:$0xff] }
  0x2e   :  { %902 = vmatprep.mubr.msk.f32.mxu0 %vm110_vm1, %v42_v9  ;;  %950 = vmatprep.mubr.msk.f32.mxu1 %vm110_vm1, %v74_v10  ;;  %v50_v25 = vld [vmem:[%s1668_s0 + $0x60] sm:$0xff]  ;;  %v51_v27 = vld [vmem:[%s1668_s0 + $0x68] sm:$0xff]  ;;  %v52_v29 = vld [vmem:[%s1668_s0 + $0x70] sm:$0xff] }
  0x2f   :  { %v82_v26 = vld [vmem:[%s1668_s0 + $0x160] sm:$0xff]  ;;  %v83_v28 = vld [vmem:[%s1668_s0 + $0x168] sm:$0xff]  ;;  %v84_v30 = vld [vmem:[%s1668_s0 + $0x170] sm:$0xff] }
  0x30   :  { %v53_v31 = vld [vmem:[%s1668_s0 + $0x78] sm:$0xff]  ;;  %v54_v33 = vld [vmem:[%s1668_s0 + $0x80] sm:$0xff]  ;;  %v55_v35 = vld [vmem:[%s1668_s0 + $0x88] sm:$0xff] }
  0x31   :  { %903 = vmatmul.mubr.msk.f32.gmra.mrb[4].mxu0 %vm110_vm1, %v43_v11  ;;  %951 = vmatmul.mubr.msk.f32.gmra.mrb[4].mxu1 %vm110_vm1, %v75_v12  ;;  %v85_v32 = vld [vmem:[%s1668_s0 + $0x178] sm:$0xff]  ;;  %v86_v34 = vld [vmem:[%s1668_s0 + $0x180] sm:$0xff]  ;;  %v87_v36 = vld [vmem:[%s1668_s0 + $0x188] sm:$0xff] }
  0x32   :  { %905 = vmatprep.mubr.msk.f32.mxu0 %vm110_vm1, %v44_v13  ;;  %953 = vmatprep.mubr.msk.f32.mxu1 %vm110_vm1, %v76_v14  ;;  %v56_v37 = vld [vmem:[%s1668_s0 + $0x90] sm:$0xff]  ;;  %v57_v39 = vld [vmem:[%s1668_s0 + $0x98] sm:$0xff]  ;;  %v58_v41 = vld [vmem:[%s1668_s0 + $0xa0] sm:$0xff] }
  0x33   :  { %v88_v38 = vld [vmem:[%s1668_s0 + $0x190] sm:$0xff]  ;;  %v89_v40 = vld [vmem:[%s1668_s0 + $0x198] sm:$0xff]  ;;  %v90_v42 = vld [vmem:[%s1668_s0 + $0x1a0] sm:$0xff] }
  0x34   :  { %v59_v43 = vld [vmem:[%s1668_s0 + $0xa8] sm:$0xff]  ;;  %v60_v45 = vld [vmem:[%s1668_s0 + $0xb0] sm:$0xff]  ;;  %v61_v47 = vld [vmem:[%s1668_s0 + $0xb8] sm:$0xff] }
  0x35   :  { %906 = vmatmul.mubr.msk.f32.gmra.mrb[6].mxu0 %vm110_vm1, %v45_v15  ;;  %954 = vmatmul.mubr.msk.f32.gmra.mrb[6].mxu1 %vm110_vm1, %v77_v16  ;;  %v91_v44 = vld [vmem:[%s1668_s0 + $0x1a8] sm:$0xff]  ;;  %v92_v46 = vld [vmem:[%s1668_s0 + $0x1b0] sm:$0xff]  ;;  %v93_v48 = vld [vmem:[%s1668_s0 + $0x1b8] sm:$0xff] }
  0x36   :  { %908 = vmatprep.mubr.msk.f32.mxu0 %vm110_vm1, %v46_v17  ;;  %956 = vmatprep.mubr.msk.f32.mxu1 %vm110_vm1, %v78_v18  ;;  %v62_v49 = vld [vmem:[%s1668_s0 + $0xc0] sm:$0xff]  ;;  %v63_v51 = vld [vmem:[%s1668_s0 + $0xc8] sm:$0xff]  ;;  %v64_v53 = vld [vmem:[%s1668_s0 + $0xd0] sm:$0xff] }
  0x37   :  { %v94_v50 = vld [vmem:[%s1668_s0 + $0x1c0] sm:$0xff]  ;;  %v95_v52 = vld [vmem:[%s1668_s0 + $0x1c8] sm:$0xff]  ;;  %v96_v54 = vld [vmem:[%s1668_s0 + $0x1d0] sm:$0xff] }
  0x38   :  { %v65_v55 = vld [vmem:[%s1668_s0 + $0xd8] sm:$0xff]  ;;  %v66_v57 = vld [vmem:[%s1668_s0 + $0xe0] sm:$0xff]  ;;  %v67_v59 = vld [vmem:[%s1668_s0 + $0xe8] sm:$0xff] }
  0x39   :  { %909 = vmatmul.mubr.msk.f32.gmra.mrb[8].mxu0 %vm110_vm1, %v47_v19  ;;  %957 = vmatmul.mubr.msk.f32.gmra.mrb[8].mxu1 %vm110_vm1, %v79_v20  ;;  %v97_v56 = vld [vmem:[%s1668_s0 + $0x1d8] sm:$0xff]  ;;  %v98_v58 = vld [vmem:[%s1668_s0 + $0x1e0] sm:$0xff]  ;;  %v99_v60 = vld [vmem:[%s1668_s0 + $0x1e8] sm:$0xff] }
  0x3a   :  { %911 = vmatprep.mubr.msk.f32.mxu0 %vm110_vm1, %v48_v21  ;;  %959 = vmatprep.mubr.msk.f32.mxu1 %vm110_vm1, %v80_v22  ;;  %v68_v61 = vld [vmem:[%s1668_s0 + $0xf0] sm:$0xff]  ;;  %v69_v63 = vld [vmem:[%s1668_s0 + $0xf8] sm:$0xff]  ;;  %v1346_v1 = vld [vmem:[#allocation4] ss:$0 sm:$0xff] }
  0x3b   :  { %v100_v62 = vld [vmem:[%s1668_s0 + $0x1f0] sm:$0xff]  ;;  %v101_v0 = vld [vmem:[%s1668_s0 + $0x1f8] sm:$0xff] }
  0x3d   :  { %912 = vmatmul.mubr.msk.f32.gmra.mrb[10].mxu0 %vm110_vm1, %v49_v23  ;;  %960 = vmatmul.mubr.msk.f32.gmra.mrb[10].mxu1 %vm110_vm1, %v81_v24 }
  0x3e   :  { %914 = vmatprep.mubr.msk.f32.mxu0 %vm110_vm1, %v50_v25  ;;  %962 = vmatprep.mubr.msk.f32.mxu1 %vm110_vm1, %v82_v26 }
  0x41   :  { %915 = vmatmul.mubr.msk.f32.gmra.mrb[12].mxu0 %vm110_vm1, %v51_v27  ;;  %963 = vmatmul.mubr.msk.f32.gmra.mrb[12].mxu1 %vm110_vm1, %v83_v28 }
  0x42   :  { %917 = vmatprep.mubr.msk.f32.mxu0 %vm110_vm1, %v52_v29  ;;  %965 = vmatprep.mubr.msk.f32.mxu1 %vm110_vm1, %v84_v30 }
  0x45   :  { %918 = vmatmul.mubr.msk.f32.gmra.mrb[14].mxu0 %vm110_vm1, %v53_v31  ;;  %966 = vmatmul.mubr.msk.f32.gmra.mrb[14].mxu1 %vm110_vm1, %v85_v32 }
  0x46   :  { %920 = vmatprep.mubr.msk.f32.mxu0 %vm110_vm1, %v54_v33  ;;  %968 = vmatprep.mubr.msk.f32.mxu1 %vm110_vm1, %v86_v34 }
  0x49   :  { %921 = vmatmul.mubr.msk.f32.gmra.mrb[16].mxu0 %vm110_vm1, %v55_v35  ;;  %969 = vmatmul.mubr.msk.f32.gmra.mrb[16].mxu1 %vm110_vm1, %v87_v36 }
  0x4a   :  { %923 = vmatprep.mubr.msk.f32.mxu0 %vm110_vm1, %v56_v37  ;;  %971 = vmatprep.mubr.msk.f32.mxu1 %vm110_vm1, %v88_v38 }
  0x4d   :  { %924 = vmatmul.mubr.msk.f32.gmra.mrb[18].mxu0 %vm110_vm1, %v57_v39  ;;  %972 = vmatmul.mubr.msk.f32.gmra.mrb[18].mxu1 %vm110_vm1, %v89_v40 }
  0x4e   :  { %926 = vmatprep.mubr.msk.f32.mxu0 %vm110_vm1, %v58_v41  ;;  %974 = vmatprep.mubr.msk.f32.mxu1 %vm110_vm1, %v90_v42 }
  0x51   :  { %927 = vmatmul.mubr.msk.f32.gmra.mrb[20].mxu0 %vm110_vm1, %v59_v43  ;;  %975 = vmatmul.mubr.msk.f32.gmra.mrb[20].mxu1 %vm110_vm1, %v91_v44 }
  0x52   :  { %929 = vmatprep.mubr.msk.f32.mxu0 %vm110_vm1, %v60_v45  ;;  %977 = vmatprep.mubr.msk.f32.mxu1 %vm110_vm1, %v92_v46 }
  0x55   :  { %930 = vmatmul.mubr.msk.f32.gmra.mrb[22].mxu0 %vm110_vm1, %v61_v47  ;;  %978 = vmatmul.mubr.msk.f32.gmra.mrb[22].mxu1 %vm110_vm1, %v93_v48 }
  0x56   :  { %932 = vmatprep.mubr.msk.f32.mxu0 %vm110_vm1, %v62_v49  ;;  %980 = vmatprep.mubr.msk.f32.mxu1 %vm110_vm1, %v94_v50 }
  0x59   :  { %933 = vmatmul.mubr.msk.f32.gmra.mrb[24].mxu0 %vm110_vm1, %v63_v51  ;;  %981 = vmatmul.mubr.msk.f32.gmra.mrb[24].mxu1 %vm110_vm1, %v95_v52 }
  0x5a   :  { %935 = vmatprep.mubr.msk.f32.mxu0 %vm110_vm1, %v64_v53  ;;  %983 = vmatprep.mubr.msk.f32.mxu1 %vm110_vm1, %v96_v54 }
  0x5d   :  { %936 = vmatmul.mubr.msk.f32.gmra.mrb[26].mxu0 %vm110_vm1, %v65_v55  ;;  %984 = vmatmul.mubr.msk.f32.gmra.mrb[26].mxu1 %vm110_vm1, %v97_v56 }
  0x5e   :  { %938 = vmatprep.mubr.msk.f32.mxu0 %vm110_vm1, %v66_v57  ;;  %986 = vmatprep.mubr.msk.f32.mxu1 %vm110_vm1, %v98_v58 }
  0x61   :  { %939 = vmatmul.mubr.msk.f32.gmra.mrb[28].mxu0 %vm110_vm1, %v67_v59  ;;  %987 = vmatmul.mubr.msk.f32.gmra.mrb[28].mxu1 %vm110_vm1, %v99_v60 }
  0x62   :  { %941 = vmatprep.mubr.msk.f32.mxu0 %vm110_vm1, %v68_v61  ;;  %989 = vmatprep.mubr.msk.f32.mxu1 %vm110_vm1, %v100_v62 }
  0x65   :  { %942 = vmatmul.mubr.msk.f32.gmra.mrb[30].mxu0 %vm110_vm1, %v69_v63  ;;  %990 = vmatmul.mubr.msk.f32.gmra.mrb[30].mxu1 %vm110_vm1, %v101_v0 }
  0xfc   :  { %v898_v2 = vpop.f32.mrb[0].mxu0  ;;  %v946_v3 = vpop.f32.mrb[0].mxu1 }
  0xfd   :  { %v379_v4 = vadd.f32 %v898_v2, %v1346_v1  ;;  %v539_v5 = vadd.f32 %v946_v3, %v1346_v1  ;;  %v373_v6 = vpop.f32.mrb[1].mxu0  ;;  %v533_v7 = vpop.f32.mrb[1].mxu1 }
  0xfe   :  { %v374_v8 = vadd.f32 %v1346_v1, %v373_v6  ;;  %v534_v9 = vadd.f32 %v1346_v1, %v533_v7 }
  0xff   :  { %694 = vst.msk [vmem:[%s1671_s3 + $0x8] sm:$0xff] %vm692_vm2, %v379_v4  ;;  %726 = vst.msk [vmem:[%s1671_s3 + $0x108] sm:$0xff] %vm692_vm2, %v539_v5 }
 0x100   :  { %693 = vst.msk [vmem:[%s1671_s3] sm:$0xff] %vm692_vm2, %v374_v8  ;;  %725 = vst.msk [vmem:[%s1671_s3 + $0x100] sm:$0xff] %vm692_vm2, %v534_v9  ;;  %v901_v10 = vpop.f32.mrb[2].mxu0  ;;  %v949_v11 = vpop.f32.mrb[2].mxu1 }
 0x101   :  { %v389_v12 = vadd.f32 %v901_v10, %v1346_v1  ;;  %v549_v13 = vadd.f32 %v949_v11, %v1346_v1  ;;  %v383_v14 = vpop.f32.mrb[3].mxu0  ;;  %v543_v15 = vpop.f32.mrb[3].mxu1 }
 0x102   :  { %v384_v16 = vadd.f32 %v1346_v1, %v383_v14  ;;  %v544_v17 = vadd.f32 %v1346_v1, %v543_v15 }
 0x103   :  { %696 = vst.msk [vmem:[%s1671_s3 + $0x18] sm:$0xff] %vm692_vm2, %v389_v12  ;;  %728 = vst.msk [vmem:[%s1671_s3 + $0x118] sm:$0xff] %vm692_vm2, %v549_v13 }
 0x104   :  { %695 = vst.msk [vmem:[%s1671_s3 + $0x10] sm:$0xff] %vm692_vm2, %v384_v16  ;;  %727 = vst.msk [vmem:[%s1671_s3 + $0x110] sm:$0xff] %vm692_vm2, %v544_v17  ;;  %v904_v18 = vpop.f32.mrb[4].mxu0  ;;  %v952_v19 = vpop.f32.mrb[4].mxu1 }
 0x105   :  { %v399_v20 = vadd.f32 %v904_v18, %v1346_v1  ;;  %v559_v21 = vadd.f32 %v952_v19, %v1346_v1  ;;  %v393_v22 = vpop.f32.mrb[5].mxu0  ;;  %v553_v23 = vpop.f32.mrb[5].mxu1 }
 0x106   :  { %v394_v24 = vadd.f32 %v1346_v1, %v393_v22  ;;  %v554_v25 = vadd.f32 %v1346_v1, %v553_v23 }
 0x107   :  { %698 = vst.msk [vmem:[%s1671_s3 + $0x28] sm:$0xff] %vm692_vm2, %v399_v20  ;;  %730 = vst.msk [vmem:[%s1671_s3 + $0x128] sm:$0xff] %vm692_vm2, %v559_v21 }
 0x108   :  { %697 = vst.msk [vmem:[%s1671_s3 + $0x20] sm:$0xff] %vm692_vm2, %v394_v24  ;;  %729 = vst.msk [vmem:[%s1671_s3 + $0x120] sm:$0xff] %vm692_vm2, %v554_v25  ;;  %v907_v26 = vpop.f32.mrb[6].mxu0  ;;  %v955_v27 = vpop.f32.mrb[6].mxu1 }
 0x109   :  { %v409_v28 = vadd.f32 %v907_v26, %v1346_v1  ;;  %v569_v29 = vadd.f32 %v955_v27, %v1346_v1  ;;  %v403_v30 = vpop.f32.mrb[7].mxu0  ;;  %v563_v31 = vpop.f32.mrb[7].mxu1 }
 0x10a   :  { %v404_v32 = vadd.f32 %v1346_v1, %v403_v30  ;;  %v564_v33 = vadd.f32 %v1346_v1, %v563_v31 }
 0x10b   :  { %700 = vst.msk [vmem:[%s1671_s3 + $0x38] sm:$0xff] %vm692_vm2, %v409_v28  ;;  %732 = vst.msk [vmem:[%s1671_s3 + $0x138] sm:$0xff] %vm692_vm2, %v569_v29 }
 0x10c   :  { %699 = vst.msk [vmem:[%s1671_s3 + $0x30] sm:$0xff] %vm692_vm2, %v404_v32  ;;  %731 = vst.msk [vmem:[%s1671_s3 + $0x130] sm:$0xff] %vm692_vm2, %v564_v33  ;;  %v910_v34 = vpop.f32.mrb[8].mxu0  ;;  %v958_v35 = vpop.f32.mrb[8].mxu1 }
 0x10d   :  { %v419_v36 = vadd.f32 %v910_v34, %v1346_v1  ;;  %v579_v37 = vadd.f32 %v958_v35, %v1346_v1  ;;  %v413_v38 = vpop.f32.mrb[9].mxu0  ;;  %v573_v39 = vpop.f32.mrb[9].mxu1 }
 0x10e   :  { %v414_v40 = vadd.f32 %v1346_v1, %v413_v38  ;;  %v574_v41 = vadd.f32 %v1346_v1, %v573_v39 }
 0x10f   :  { %702 = vst.msk [vmem:[%s1671_s3 + $0x48] sm:$0xff] %vm692_vm2, %v419_v36  ;;  %734 = vst.msk [vmem:[%s1671_s3 + $0x148] sm:$0xff] %vm692_vm2, %v579_v37 }
 0x110   :  { %701 = vst.msk [vmem:[%s1671_s3 + $0x40] sm:$0xff] %vm692_vm2, %v414_v40  ;;  %733 = vst.msk [vmem:[%s1671_s3 + $0x140] sm:$0xff] %vm692_vm2, %v574_v41  ;;  %v913_v42 = vpop.f32.mrb[10].mxu0  ;;  %v961_v43 = vpop.f32.mrb[10].mxu1 }
 0x111   :  { %v429_v44 = vadd.f32 %v913_v42, %v1346_v1  ;;  %v589_v45 = vadd.f32 %v961_v43, %v1346_v1  ;;  %v423_v46 = vpop.f32.mrb[11].mxu0  ;;  %v583_v47 = vpop.f32.mrb[11].mxu1 }
 0x112   :  { %v424_v48 = vadd.f32 %v1346_v1, %v423_v46  ;;  %v584_v49 = vadd.f32 %v1346_v1, %v583_v47 }
 0x113   :  { %704 = vst.msk [vmem:[%s1671_s3 + $0x58] sm:$0xff] %vm692_vm2, %v429_v44  ;;  %736 = vst.msk [vmem:[%s1671_s3 + $0x158] sm:$0xff] %vm692_vm2, %v589_v45 }
 0x114   :  { %703 = vst.msk [vmem:[%s1671_s3 + $0x50] sm:$0xff] %vm692_vm2, %v424_v48  ;;  %735 = vst.msk [vmem:[%s1671_s3 + $0x150] sm:$0xff] %vm692_vm2, %v584_v49  ;;  %v916_v50 = vpop.f32.mrb[12].mxu0  ;;  %v964_v51 = vpop.f32.mrb[12].mxu1 }
 0x115   :  { %v439_v52 = vadd.f32 %v916_v50, %v1346_v1  ;;  %v599_v53 = vadd.f32 %v964_v51, %v1346_v1  ;;  %v433_v54 = vpop.f32.mrb[13].mxu0  ;;  %v593_v55 = vpop.f32.mrb[13].mxu1 }
 0x116   :  { %v434_v56 = vadd.f32 %v1346_v1, %v433_v54  ;;  %v594_v57 = vadd.f32 %v1346_v1, %v593_v55 }
 0x117   :  { %706 = vst.msk [vmem:[%s1671_s3 + $0x68] sm:$0xff] %vm692_vm2, %v439_v52  ;;  %738 = vst.msk [vmem:[%s1671_s3 + $0x168] sm:$0xff] %vm692_vm2, %v599_v53 }
 0x118   :  { %705 = vst.msk [vmem:[%s1671_s3 + $0x60] sm:$0xff] %vm692_vm2, %v434_v56  ;;  %737 = vst.msk [vmem:[%s1671_s3 + $0x160] sm:$0xff] %vm692_vm2, %v594_v57  ;;  %v919_v58 = vpop.f32.mrb[14].mxu0  ;;  %v967_v59 = vpop.f32.mrb[14].mxu1 }
 0x119   :  { %v449_v60 = vadd.f32 %v919_v58, %v1346_v1  ;;  %v609_v61 = vadd.f32 %v967_v59, %v1346_v1  ;;  %v443_v62 = vpop.f32.mrb[15].mxu0  ;;  %v603_v63 = vpop.f32.mrb[15].mxu1 }
 0x11a   :  { %v444_v0 = vadd.f32 %v1346_v1, %v443_v62  ;;  %v604_v2 = vadd.f32 %v1346_v1, %v603_v63 }
 0x11b   :  { %708 = vst.msk [vmem:[%s1671_s3 + $0x78] sm:$0xff] %vm692_vm2, %v449_v60  ;;  %740 = vst.msk [vmem:[%s1671_s3 + $0x178] sm:$0xff] %vm692_vm2, %v609_v61 }
 0x11c   :  { %707 = vst.msk [vmem:[%s1671_s3 + $0x70] sm:$0xff] %vm692_vm2, %v444_v0  ;;  %739 = vst.msk [vmem:[%s1671_s3 + $0x170] sm:$0xff] %vm692_vm2, %v604_v2  ;;  %v922_v3 = vpop.f32.mrb[16].mxu0  ;;  %v970_v4 = vpop.f32.mrb[16].mxu1 }
 0x11d   :  { %v459_v5 = vadd.f32 %v922_v3, %v1346_v1  ;;  %v619_v6 = vadd.f32 %v970_v4, %v1346_v1  ;;  %v453_v7 = vpop.f32.mrb[17].mxu0  ;;  %v613_v8 = vpop.f32.mrb[17].mxu1 }
 0x11e   :  { %v454_v9 = vadd.f32 %v1346_v1, %v453_v7  ;;  %v614_v10 = vadd.f32 %v1346_v1, %v613_v8 }
 0x11f   :  { %710 = vst.msk [vmem:[%s1671_s3 + $0x88] sm:$0xff] %vm692_vm2, %v459_v5  ;;  %742 = vst.msk [vmem:[%s1671_s3 + $0x188] sm:$0xff] %vm692_vm2, %v619_v6 }
 0x120   :  { %709 = vst.msk [vmem:[%s1671_s3 + $0x80] sm:$0xff] %vm692_vm2, %v454_v9  ;;  %741 = vst.msk [vmem:[%s1671_s3 + $0x180] sm:$0xff] %vm692_vm2, %v614_v10  ;;  %v925_v11 = vpop.f32.mrb[18].mxu0  ;;  %v973_v12 = vpop.f32.mrb[18].mxu1 }
 0x121   :  { %v469_v13 = vadd.f32 %v925_v11, %v1346_v1  ;;  %v629_v14 = vadd.f32 %v973_v12, %v1346_v1  ;;  %v463_v15 = vpop.f32.mrb[19].mxu0  ;;  %v623_v16 = vpop.f32.mrb[19].mxu1 }
 0x122   :  { %v464_v17 = vadd.f32 %v1346_v1, %v463_v15  ;;  %v624_v18 = vadd.f32 %v1346_v1, %v623_v16 }
 0x123   :  { %712 = vst.msk [vmem:[%s1671_s3 + $0x98] sm:$0xff] %vm692_vm2, %v469_v13  ;;  %744 = vst.msk [vmem:[%s1671_s3 + $0x198] sm:$0xff] %vm692_vm2, %v629_v14 }
 0x124   :  { %711 = vst.msk [vmem:[%s1671_s3 + $0x90] sm:$0xff] %vm692_vm2, %v464_v17  ;;  %743 = vst.msk [vmem:[%s1671_s3 + $0x190] sm:$0xff] %vm692_vm2, %v624_v18  ;;  %v928_v19 = vpop.f32.mrb[20].mxu0  ;;  %v976_v20 = vpop.f32.mrb[20].mxu1 }
 0x125   :  { %v479_v21 = vadd.f32 %v928_v19, %v1346_v1  ;;  %v639_v22 = vadd.f32 %v976_v20, %v1346_v1  ;;  %v473_v23 = vpop.f32.mrb[21].mxu0  ;;  %v633_v24 = vpop.f32.mrb[21].mxu1 }
 0x126   :  { %v474_v25 = vadd.f32 %v1346_v1, %v473_v23  ;;  %v634_v26 = vadd.f32 %v1346_v1, %v633_v24 }
 0x127   :  { %714 = vst.msk [vmem:[%s1671_s3 + $0xa8] sm:$0xff] %vm692_vm2, %v479_v21  ;;  %746 = vst.msk [vmem:[%s1671_s3 + $0x1a8] sm:$0xff] %vm692_vm2, %v639_v22 }
 0x128   :  { %713 = vst.msk [vmem:[%s1671_s3 + $0xa0] sm:$0xff] %vm692_vm2, %v474_v25  ;;  %745 = vst.msk [vmem:[%s1671_s3 + $0x1a0] sm:$0xff] %vm692_vm2, %v634_v26  ;;  %v931_v27 = vpop.f32.mrb[22].mxu0  ;;  %v979_v28 = vpop.f32.mrb[22].mxu1 }
 0x129   :  { %v489_v29 = vadd.f32 %v931_v27, %v1346_v1  ;;  %v649_v30 = vadd.f32 %v979_v28, %v1346_v1  ;;  %v483_v31 = vpop.f32.mrb[23].mxu0  ;;  %v643_v32 = vpop.f32.mrb[23].mxu1 }
 0x12a   :  { %v484_v33 = vadd.f32 %v1346_v1, %v483_v31  ;;  %v644_v34 = vadd.f32 %v1346_v1, %v643_v32 }
 0x12b   :  { %716 = vst.msk [vmem:[%s1671_s3 + $0xb8] sm:$0xff] %vm692_vm2, %v489_v29  ;;  %748 = vst.msk [vmem:[%s1671_s3 + $0x1b8] sm:$0xff] %vm692_vm2, %v649_v30 }
 0x12c   :  { %715 = vst.msk [vmem:[%s1671_s3 + $0xb0] sm:$0xff] %vm692_vm2, %v484_v33  ;;  %747 = vst.msk [vmem:[%s1671_s3 + $0x1b0] sm:$0xff] %vm692_vm2, %v644_v34  ;;  %v934_v35 = vpop.f32.mrb[24].mxu0  ;;  %v982_v36 = vpop.f32.mrb[24].mxu1 }
 0x12d   :  { %v499_v37 = vadd.f32 %v934_v35, %v1346_v1  ;;  %v659_v38 = vadd.f32 %v982_v36, %v1346_v1  ;;  %v493_v39 = vpop.f32.mrb[25].mxu0  ;;  %v653_v40 = vpop.f32.mrb[25].mxu1 }
 0x12e   :  { %v494_v41 = vadd.f32 %v1346_v1, %v493_v39  ;;  %v654_v42 = vadd.f32 %v1346_v1, %v653_v40 }
 0x12f   :  { %718 = vst.msk [vmem:[%s1671_s3 + $0xc8] sm:$0xff] %vm692_vm2, %v499_v37  ;;  %750 = vst.msk [vmem:[%s1671_s3 + $0x1c8] sm:$0xff] %vm692_vm2, %v659_v38 }
 0x130   :  { %717 = vst.msk [vmem:[%s1671_s3 + $0xc0] sm:$0xff] %vm692_vm2, %v494_v41  ;;  %749 = vst.msk [vmem:[%s1671_s3 + $0x1c0] sm:$0xff] %vm692_vm2, %v654_v42  ;;  %v937_v43 = vpop.f32.mrb[26].mxu0  ;;  %v985_v44 = vpop.f32.mrb[26].mxu1 }
 0x131   :  { %v509_v45 = vadd.f32 %v937_v43, %v1346_v1  ;;  %v669_v46 = vadd.f32 %v985_v44, %v1346_v1  ;;  %v503_v47 = vpop.f32.mrb[27].mxu0  ;;  %v663_v48 = vpop.f32.mrb[27].mxu1 }
 0x132   :  { %v504_v49 = vadd.f32 %v1346_v1, %v503_v47  ;;  %v664_v50 = vadd.f32 %v1346_v1, %v663_v48 }
 0x133   :  { %720 = vst.msk [vmem:[%s1671_s3 + $0xd8] sm:$0xff] %vm692_vm2, %v509_v45  ;;  %752 = vst.msk [vmem:[%s1671_s3 + $0x1d8] sm:$0xff] %vm692_vm2, %v669_v46 }
 0x134   :  { %719 = vst.msk [vmem:[%s1671_s3 + $0xd0] sm:$0xff] %vm692_vm2, %v504_v49  ;;  %751 = vst.msk [vmem:[%s1671_s3 + $0x1d0] sm:$0xff] %vm692_vm2, %v664_v50  ;;  %v940_v51 = vpop.f32.mrb[28].mxu0  ;;  %v988_v52 = vpop.f32.mrb[28].mxu1 }
 0x135   :  { %v519_v53 = vadd.f32 %v940_v51, %v1346_v1  ;;  %v679_v54 = vadd.f32 %v988_v52, %v1346_v1  ;;  %v513_v55 = vpop.f32.mrb[29].mxu0  ;;  %v673_v56 = vpop.f32.mrb[29].mxu1 }
 0x136   :  { %v514_v57 = vadd.f32 %v1346_v1, %v513_v55  ;;  %v674_v58 = vadd.f32 %v1346_v1, %v673_v56 }
 0x137   :  { %722 = vst.msk [vmem:[%s1671_s3 + $0xe8] sm:$0xff] %vm692_vm2, %v519_v53  ;;  %754 = vst.msk [vmem:[%s1671_s3 + $0x1e8] sm:$0xff] %vm692_vm2, %v679_v54 }
 0x138   :  { %721 = vst.msk [vmem:[%s1671_s3 + $0xe0] sm:$0xff] %vm692_vm2, %v514_v57  ;;  %753 = vst.msk [vmem:[%s1671_s3 + $0x1e0] sm:$0xff] %vm692_vm2, %v674_v58  ;;  %v943_v59 = vpop.f32.mrb[30].mxu0  ;;  %v991_v60 = vpop.f32.mrb[30].mxu1 }
 0x139   :  { %v529_v61 = vadd.f32 %v943_v59, %v1346_v1  ;;  %v689_v62 = vadd.f32 %v991_v60, %v1346_v1  ;;  %v523_v63 = vpop.f32.mrb[31].mxu0  ;;  %v683_v0 = vpop.f32.mrb[31].mxu1 }
 0x13a   :  { %v524_v2 = vadd.f32 %v1346_v1, %v523_v63  ;;  %v684_v3 = vadd.f32 %v1346_v1, %v683_v0 }
 0x13b   :  { %724 = vst.msk [vmem:[%s1671_s3 + $0xf8] sm:$0xff] %vm692_vm2, %v529_v61  ;;  %756 = vst.msk [vmem:[%s1671_s3 + $0x1f8] sm:$0xff] %vm692_vm2, %v689_v62 }
 0x13c   :  { %723 = vst.msk [vmem:[%s1671_s3 + $0xf0] sm:$0xff] %vm692_vm2, %v524_v2  ;;  %755 = vst.msk [vmem:[%s1671_s3 + $0x1f0] sm:$0xff] %vm692_vm2, %v684_v3 }
 0x13d   :  { %761 = vsyncpa [#allocation3], 1 }
 0x13e   :  { %762 = vsyncpa [#allocation5], 1 }

// kernel: attention_convolution_2d.5
= control target key start
LH: loop header
LB: loop body
LE: loop exit
PB: predicated region body
PF: predicated region fallthrough
CT: control target
= control target key end

     0   :  { %vm87_vm0 = vcmask 130048   ;;  %vm665_vm1 = vcmask 31744   ;;  %s1578_s1 = inlined_call_operand.vmem [shape: f32[16,4], index: 1, kind: input, shape index: {}]   ;;  %s1579_s0 = inlined_call_operand.vmem [shape: f32[512,16], index: 0, kind: input, shape index: {}]   ;;  %s1580_s2 = inlined_call_operand.vmem [shape: f32[1,4], index: 2, kind: input, shape index: {}]   ;;  %s1581_s3 = inlined_call_operand.vmem [shape: f32[512,4], index: 3, kind: output, shape index: {}]  }
   0x1   :  { %v78_v0 = vld [vmem:[%s1578_s1] sm:$0xff]  ;;  %v79_v1 = vld [vmem:[%s1578_s1 + $0x8] sm:$0xff]  ;;  %v16_v7 = vld [vmem:[%s1579_s0 + $0x10] sm:$0xff] }
   0x2   :  { %v14_v2 = vld [vmem:[%s1579_s0] sm:$0xff]  ;;  %v965_v3 = vpack.c.bf16 %v79_v1, %v78_v0  ;;  %v15_v5 = vld [vmem:[%s1579_s0 + $0x8] sm:$0xff]  ;;  %v48_v8 = vld [vmem:[%s1579_s0 + $0x110] sm:$0xff] }
   0x3   :  { %869 = vmatprep.mubr.msk.f32.mxu0 %vm87_vm0, %v14_v2  ;;  %v46_v4 = vld [vmem:[%s1579_s0 + $0x100] sm:$0xff]  ;;  %v47_v6 = vld [vmem:[%s1579_s0 + $0x108] sm:$0xff]  ;;  %v17_v9 = vld [vmem:[%s1579_s0 + $0x18] sm:$0xff] }
   0x4   :  { %917 = vmatprep.mubr.msk.f32.mxu1 %vm87_vm0, %v46_v4  ;;  %966 = vmatprep.subr.bf16.mxu0 %v965_v3  ;;  %v49_v10 = vld [vmem:[%s1579_s0 + $0x118] sm:$0xff]  ;;  %v18_v11 = vld [vmem:[%s1579_s0 + $0x20] sm:$0xff]  ;;  %v19_v13 = vld [vmem:[%s1579_s0 + $0x28] sm:$0xff] }
   0x5   :  { %969 = vmatprep.subr.bf16.mxu1 %v965_v3  ;;  %968 = vmatpush3.bf16.msra.mxu0 %v965_v3  ;;  %v50_v12 = vld [vmem:[%s1579_s0 + $0x120] sm:$0xff]  ;;  %v51_v14 = vld [vmem:[%s1579_s0 + $0x128] sm:$0xff]  ;;  %v20_v15 = vld [vmem:[%s1579_s0 + $0x30] sm:$0xff] }
   0x6   :  { %970 = vmatpush3.bf16.msra.mxu1 %v965_v3  ;;  %v52_v16 = vld [vmem:[%s1579_s0 + $0x130] sm:$0xff]  ;;  %v21_v17 = vld [vmem:[%s1579_s0 + $0x38] sm:$0xff]  ;;  %v22_v19 = vld [vmem:[%s1579_s0 + $0x40] sm:$0xff] }
   0x7   :  { %v53_v18 = vld [vmem:[%s1579_s0 + $0x138] sm:$0xff]  ;;  %v54_v20 = vld [vmem:[%s1579_s0 + $0x140] sm:$0xff]  ;;  %v23_v21 = vld [vmem:[%s1579_s0 + $0x48] sm:$0xff] }
   0x8   :  { %870 = vmatmul.mubr.msk.f32.vlgmr.msra.gmra.mrb[0].mxu0 %vm87_vm0, %v15_v5  ;;  %v55_v22 = vld [vmem:[%s1579_s0 + $0x148] sm:$0xff]  ;;  %v24_v23 = vld [vmem:[%s1579_s0 + $0x50] sm:$0xff]  ;;  %v25_v25 = vld [vmem:[%s1579_s0 + $0x58] sm:$0xff] }
   0x9   :  { %918 = vmatmul.mubr.msk.f32.vlgmr.msra.gmra.mrb[0].mxu1 %vm87_vm0, %v47_v6  ;;  %872 = vmatprep.mubr.msk.f32.mxu0 %vm87_vm0, %v16_v7  ;;  %v56_v24 = vld [vmem:[%s1579_s0 + $0x150] sm:$0xff]  ;;  %v57_v26 = vld [vmem:[%s1579_s0 + $0x158] sm:$0xff]  ;;  %v26_v27 = vld [vmem:[%s1579_s0 + $0x60] sm:$0xff] }
   0xa   :  { %920 = vmatprep.mubr.msk.f32.mxu1 %vm87_vm0, %v48_v8  ;;  %v58_v28 = vld [vmem:[%s1579_s0 + $0x160] sm:$0xff]  ;;  %v27_v29 = vld [vmem:[%s1579_s0 + $0x68] sm:$0xff]  ;;  %v28_v31 = vld [vmem:[%s1579_s0 + $0x70] sm:$0xff] }
   0xb   :  { %v59_v30 = vld [vmem:[%s1579_s0 + $0x168] sm:$0xff]  ;;  %v60_v32 = vld [vmem:[%s1579_s0 + $0x170] sm:$0xff]  ;;  %v29_v33 = vld [vmem:[%s1579_s0 + $0x78] sm:$0xff] }
   0xc   :  { %873 = vmatmul.mubr.msk.f32.gmra.mrb[2].mxu0 %vm87_vm0, %v17_v9  ;;  %v61_v34 = vld [vmem:[%s1579_s0 + $0x178] sm:$0xff]  ;;  %v30_v35 = vld [vmem:[%s1579_s0 + $0x80] sm:$0xff]  ;;  %v31_v37 = vld [vmem:[%s1579_s0 + $0x88] sm:$0xff] }
   0xd   :  { %921 = vmatmul.mubr.msk.f32.gmra.mrb[2].mxu1 %vm87_vm0, %v49_v10  ;;  %875 = vmatprep.mubr.msk.f32.mxu0 %vm87_vm0, %v18_v11  ;;  %v62_v36 = vld [vmem:[%s1579_s0 + $0x180] sm:$0xff]  ;;  %v63_v38 = vld [vmem:[%s1579_s0 + $0x188] sm:$0xff]  ;;  %v32_v39 = vld [vmem:[%s1579_s0 + $0x90] sm:$0xff] }
   0xe   :  { %923 = vmatprep.mubr.msk.f32.mxu1 %vm87_vm0, %v50_v12  ;;  %v64_v40 = vld [vmem:[%s1579_s0 + $0x190] sm:$0xff]  ;;  %v33_v41 = vld [vmem:[%s1579_s0 + $0x98] sm:$0xff]  ;;  %v34_v43 = vld [vmem:[%s1579_s0 + $0xa0] sm:$0xff] }
   0xf   :  { %v65_v42 = vld [vmem:[%s1579_s0 + $0x198] sm:$0xff]  ;;  %v66_v44 = vld [vmem:[%s1579_s0 + $0x1a0] sm:$0xff]  ;;  %v35_v45 = vld [vmem:[%s1579_s0 + $0xa8] sm:$0xff] }
  0x10   :  { %876 = vmatmul.mubr.msk.f32.gmra.mrb[4].mxu0 %vm87_vm0, %v19_v13  ;;  %v67_v46 = vld [vmem:[%s1579_s0 + $0x1a8] sm:$0xff]  ;;  %v36_v47 = vld [vmem:[%s1579_s0 + $0xb0] sm:$0xff]  ;;  %v37_v49 = vld [vmem:[%s1579_s0 + $0xb8] sm:$0xff] }
  0x11   :  { %924 = vmatmul.mubr.msk.f32.gmra.mrb[4].mxu1 %vm87_vm0, %v51_v14  ;;  %878 = vmatprep.mubr.msk.f32.mxu0 %vm87_vm0, %v20_v15  ;;  %v68_v48 = vld [vmem:[%s1579_s0 + $0x1b0] sm:$0xff]  ;;  %v69_v50 = vld [vmem:[%s1579_s0 + $0x1b8] sm:$0xff]  ;;  %v38_v51 = vld [vmem:[%s1579_s0 + $0xc0] sm:$0xff] }
  0x12   :  { %926 = vmatprep.mubr.msk.f32.mxu1 %vm87_vm0, %v52_v16  ;;  %v70_v52 = vld [vmem:[%s1579_s0 + $0x1c0] sm:$0xff]  ;;  %v39_v53 = vld [vmem:[%s1579_s0 + $0xc8] sm:$0xff]  ;;  %v40_v55 = vld [vmem:[%s1579_s0 + $0xd0] sm:$0xff] }
  0x13   :  { %v71_v54 = vld [vmem:[%s1579_s0 + $0x1c8] sm:$0xff]  ;;  %v72_v56 = vld [vmem:[%s1579_s0 + $0x1d0] sm:$0xff]  ;;  %v41_v57 = vld [vmem:[%s1579_s0 + $0xd8] sm:$0xff] }
  0x14   :  { %879 = vmatmul.mubr.msk.f32.gmra.mrb[6].mxu0 %vm87_vm0, %v21_v17  ;;  %v73_v58 = vld [vmem:[%s1579_s0 + $0x1d8] sm:$0xff]  ;;  %v42_v59 = vld [vmem:[%s1579_s0 + $0xe0] sm:$0xff]  ;;  %v43_v61 = vld [vmem:[%s1579_s0 + $0xe8] sm:$0xff] }
  0x15   :  { %927 = vmatmul.mubr.msk.f32.gmra.mrb[6].mxu1 %vm87_vm0, %v53_v18  ;;  %881 = vmatprep.mubr.msk.f32.mxu0 %vm87_vm0, %v22_v19  ;;  %v74_v60 = vld [vmem:[%s1579_s0 + $0x1e0] sm:$0xff]  ;;  %v75_v62 = vld [vmem:[%s1579_s0 + $0x1e8] sm:$0xff]  ;;  %v44_v63 = vld [vmem:[%s1579_s0 + $0xf0] sm:$0xff] }
  0x16   :  { %929 = vmatprep.mubr.msk.f32.mxu1 %vm87_vm0, %v54_v20  ;;  %v76_v0 = vld [vmem:[%s1579_s0 + $0x1f0] sm:$0xff]  ;;  %v45_v1 = vld [vmem:[%s1579_s0 + $0xf8] sm:$0xff]  ;;  %v1256_v3 = vld [vmem:[%s1580_s2] ss:$0 sm:$0xff] }
  0x17   :  { %v77_v2 = vld [vmem:[%s1579_s0 + $0x1f8] sm:$0xff] }
  0x18   :  { %882 = vmatmul.mubr.msk.f32.gmra.mrb[8].mxu0 %vm87_vm0, %v23_v21 }
  0x19   :  { %930 = vmatmul.mubr.msk.f32.gmra.mrb[8].mxu1 %vm87_vm0, %v55_v22  ;;  %884 = vmatprep.mubr.msk.f32.mxu0 %vm87_vm0, %v24_v23 }
  0x1a   :  { %932 = vmatprep.mubr.msk.f32.mxu1 %vm87_vm0, %v56_v24 }
  0x1c   :  { %885 = vmatmul.mubr.msk.f32.gmra.mrb[10].mxu0 %vm87_vm0, %v25_v25 }
  0x1d   :  { %933 = vmatmul.mubr.msk.f32.gmra.mrb[10].mxu1 %vm87_vm0, %v57_v26  ;;  %887 = vmatprep.mubr.msk.f32.mxu0 %vm87_vm0, %v26_v27 }
  0x1e   :  { %935 = vmatprep.mubr.msk.f32.mxu1 %vm87_vm0, %v58_v28 }
  0x20   :  { %888 = vmatmul.mubr.msk.f32.gmra.mrb[12].mxu0 %vm87_vm0, %v27_v29 }
  0x21   :  { %936 = vmatmul.mubr.msk.f32.gmra.mrb[12].mxu1 %vm87_vm0, %v59_v30  ;;  %890 = vmatprep.mubr.msk.f32.mxu0 %vm87_vm0, %v28_v31 }
  0x22   :  { %938 = vmatprep.mubr.msk.f32.mxu1 %vm87_vm0, %v60_v32 }
  0x24   :  { %891 = vmatmul.mubr.msk.f32.gmra.mrb[14].mxu0 %vm87_vm0, %v29_v33 }
  0x25   :  { %939 = vmatmul.mubr.msk.f32.gmra.mrb[14].mxu1 %vm87_vm0, %v61_v34  ;;  %893 = vmatprep.mubr.msk.f32.mxu0 %vm87_vm0, %v30_v35 }
  0x26   :  { %941 = vmatprep.mubr.msk.f32.mxu1 %vm87_vm0, %v62_v36 }
  0x28   :  { %894 = vmatmul.mubr.msk.f32.gmra.mrb[16].mxu0 %vm87_vm0, %v31_v37 }
  0x29   :  { %942 = vmatmul.mubr.msk.f32.gmra.mrb[16].mxu1 %vm87_vm0, %v63_v38  ;;  %896 = vmatprep.mubr.msk.f32.mxu0 %vm87_vm0, %v32_v39 }
  0x2a   :  { %944 = vmatprep.mubr.msk.f32.mxu1 %vm87_vm0, %v64_v40 }
  0x2c   :  { %897 = vmatmul.mubr.msk.f32.gmra.mrb[18].mxu0 %vm87_vm0, %v33_v41 }
  0x2d   :  { %945 = vmatmul.mubr.msk.f32.gmra.mrb[18].mxu1 %vm87_vm0, %v65_v42  ;;  %899 = vmatprep.mubr.msk.f32.mxu0 %vm87_vm0, %v34_v43 }
  0x2e   :  { %947 = vmatprep.mubr.msk.f32.mxu1 %vm87_vm0, %v66_v44 }
  0x30   :  { %900 = vmatmul.mubr.msk.f32.gmra.mrb[20].mxu0 %vm87_vm0, %v35_v45 }
  0x31   :  { %948 = vmatmul.mubr.msk.f32.gmra.mrb[20].mxu1 %vm87_vm0, %v67_v46  ;;  %902 = vmatprep.mubr.msk.f32.mxu0 %vm87_vm0, %v36_v47 }
  0x32   :  { %950 = vmatprep.mubr.msk.f32.mxu1 %vm87_vm0, %v68_v48 }
  0x34   :  { %903 = vmatmul.mubr.msk.f32.gmra.mrb[22].mxu0 %vm87_vm0, %v37_v49 }
  0x35   :  { %951 = vmatmul.mubr.msk.f32.gmra.mrb[22].mxu1 %vm87_vm0, %v69_v50  ;;  %905 = vmatprep.mubr.msk.f32.mxu0 %vm87_vm0, %v38_v51 }
  0x36   :  { %953 = vmatprep.mubr.msk.f32.mxu1 %vm87_vm0, %v70_v52 }
  0x38   :  { %906 = vmatmul.mubr.msk.f32.gmra.mrb[24].mxu0 %vm87_vm0, %v39_v53 }
  0x39   :  { %954 = vmatmul.mubr.msk.f32.gmra.mrb[24].mxu1 %vm87_vm0, %v71_v54  ;;  %908 = vmatprep.mubr.msk.f32.mxu0 %vm87_vm0, %v40_v55 }
  0x3a   :  { %956 = vmatprep.mubr.msk.f32.mxu1 %vm87_vm0, %v72_v56 }
  0x3c   :  { %909 = vmatmul.mubr.msk.f32.gmra.mrb[26].mxu0 %vm87_vm0, %v41_v57 }
  0x3d   :  { %957 = vmatmul.mubr.msk.f32.gmra.mrb[26].mxu1 %vm87_vm0, %v73_v58  ;;  %911 = vmatprep.mubr.msk.f32.mxu0 %vm87_vm0, %v42_v59 }
  0x3e   :  { %959 = vmatprep.mubr.msk.f32.mxu1 %vm87_vm0, %v74_v60 }
  0x40   :  { %912 = vmatmul.mubr.msk.f32.gmra.mrb[28].mxu0 %vm87_vm0, %v43_v61 }
  0x41   :  { %960 = vmatmul.mubr.msk.f32.gmra.mrb[28].mxu1 %vm87_vm0, %v75_v62  ;;  %914 = vmatprep.mubr.msk.f32.mxu0 %vm87_vm0, %v44_v63 }
  0x42   :  { %962 = vmatprep.mubr.msk.f32.mxu1 %vm87_vm0, %v76_v0 }
  0x44   :  { %915 = vmatmul.mubr.msk.f32.gmra.mrb[30].mxu0 %vm87_vm0, %v45_v1 }
  0x45   :  { %963 = vmatmul.mubr.msk.f32.gmra.mrb[30].mxu1 %vm87_vm0, %v77_v2 }
  0xdb   :  { %v871_v4 = vpop.f32.mrb[0].mxu0 }
  0xdc   :  { %v919_v5 = vpop.f32.mrb[0].mxu1  ;;  %v352_v6 = vadd.f32 %v871_v4, %v1256_v3  ;;  %v346_v8 = vpop.f32.mrb[1].mxu0 }
  0xdd   :  { %v512_v7 = vadd.f32 %v919_v5, %v1256_v3  ;;  %v506_v9 = vpop.f32.mrb[1].mxu1  ;;  %v347_v10 = vadd.f32 %v1256_v3, %v346_v8 }
  0xde   :  { %v507_v11 = vadd.f32 %v1256_v3, %v506_v9  ;;  %667 = vst.msk [vmem:[%s1581_s3 + $0x8] sm:$0xff] %vm665_vm1, %v352_v6 }
  0xdf   :  { %699 = vst.msk [vmem:[%s1581_s3 + $0x108] sm:$0xff] %vm665_vm1, %v512_v7  ;;  %666 = vst.msk [vmem:[%s1581_s3] sm:$0xff] %vm665_vm1, %v347_v10  ;;  %v874_v12 = vpop.f32.mrb[2].mxu0 }
  0xe0   :  { %698 = vst.msk [vmem:[%s1581_s3 + $0x100] sm:$0xff] %vm665_vm1, %v507_v11  ;;  %v922_v13 = vpop.f32.mrb[2].mxu1  ;;  %v362_v14 = vadd.f32 %v874_v12, %v1256_v3  ;;  %v356_v16 = vpop.f32.mrb[3].mxu0 }
  0xe1   :  { %v522_v15 = vadd.f32 %v922_v13, %v1256_v3  ;;  %v516_v17 = vpop.f32.mrb[3].mxu1  ;;  %v357_v18 = vadd.f32 %v1256_v3, %v356_v16 }
  0xe2   :  { %v517_v19 = vadd.f32 %v1256_v3, %v516_v17  ;;  %669 = vst.msk [vmem:[%s1581_s3 + $0x18] sm:$0xff] %vm665_vm1, %v362_v14 }
  0xe3   :  { %701 = vst.msk [vmem:[%s1581_s3 + $0x118] sm:$0xff] %vm665_vm1, %v522_v15  ;;  %668 = vst.msk [vmem:[%s1581_s3 + $0x10] sm:$0xff] %vm665_vm1, %v357_v18  ;;  %v877_v20 = vpop.f32.mrb[4].mxu0 }
  0xe4   :  { %700 = vst.msk [vmem:[%s1581_s3 + $0x110] sm:$0xff] %vm665_vm1, %v517_v19  ;;  %v925_v21 = vpop.f32.mrb[4].mxu1  ;;  %v372_v22 = vadd.f32 %v877_v20, %v1256_v3  ;;  %v366_v24 = vpop.f32.mrb[5].mxu0 }
  0xe5   :  { %v532_v23 = vadd.f32 %v925_v21, %v1256_v3  ;;  %v526_v25 = vpop.f32.mrb[5].mxu1  ;;  %v367_v26 = vadd.f32 %v1256_v3, %v366_v24 }
  0xe6   :  { %v527_v27 = vadd.f32 %v1256_v3, %v526_v25  ;;  %671 = vst.msk [vmem:[%s1581_s3 + $0x28] sm:$0xff] %vm665_vm1, %v372_v22 }
  0xe7   :  { %703 = vst.msk [vmem:[%s1581_s3 + $0x128] sm:$0xff] %vm665_vm1, %v532_v23  ;;  %670 = vst.msk [vmem:[%s1581_s3 + $0x20] sm:$0xff] %vm665_vm1, %v367_v26  ;;  %v880_v28 = vpop.f32.mrb[6].mxu0 }
  0xe8   :  { %702 = vst.msk [vmem:[%s1581_s3 + $0x120] sm:$0xff] %vm665_vm1, %v527_v27  ;;  %v928_v29 = vpop.f32.mrb[6].mxu1  ;;  %v382_v30 = vadd.f32 %v880_v28, %v1256_v3  ;;  %v376_v32 = vpop.f32.mrb[7].mxu0 }
  0xe9   :  { %v542_v31 = vadd.f32 %v928_v29, %v1256_v3  ;;  %v536_v33 = vpop.f32.mrb[7].mxu1  ;;  %v377_v34 = vadd.f32 %v1256_v3, %v376_v32 }
  0xea   :  { %v537_v35 = vadd.f32 %v1256_v3, %v536_v33  ;;  %673 = vst.msk [vmem:[%s1581_s3 + $0x38] sm:$0xff] %vm665_vm1, %v382_v30 }
  0xeb   :  { %705 = vst.msk [vmem:[%s1581_s3 + $0x138] sm:$0xff] %vm665_vm1, %v542_v31  ;;  %672 = vst.msk [vmem:[%s1581_s3 + $0x30] sm:$0xff] %vm665_vm1, %v377_v34  ;;  %v883_v36 = vpop.f32.mrb[8].mxu0 }
  0xec   :  { %704 = vst.msk [vmem:[%s1581_s3 + $0x130] sm:$0xff] %vm665_vm1, %v537_v35  ;;  %v931_v37 = vpop.f32.mrb[8].mxu1  ;;  %v392_v38 = vadd.f32 %v883_v36, %v1256_v3  ;;  %v386_v40 = vpop.f32.mrb[9].mxu0 }
  0xed   :  { %v552_v39 = vadd.f32 %v931_v37, %v1256_v3  ;;  %v546_v41 = vpop.f32.mrb[9].mxu1  ;;  %v387_v42 = vadd.f32 %v1256_v3, %v386_v40 }
  0xee   :  { %v547_v43 = vadd.f32 %v1256_v3, %v546_v41  ;;  %675 = vst.msk [vmem:[%s1581_s3 + $0x48] sm:$0xff] %vm665_vm1, %v392_v38 }
  0xef   :  { %707 = vst.msk [vmem:[%s1581_s3 + $0x148] sm:$0xff] %vm665_vm1, %v552_v39  ;;  %674 = vst.msk [vmem:[%s1581_s3 + $0x40] sm:$0xff] %vm665_vm1, %v387_v42  ;;  %v886_v44 = vpop.f32.mrb[10].mxu0 }
  0xf0   :  { %706 = vst.msk [vmem:[%s1581_s3 + $0x140] sm:$0xff] %vm665_vm1, %v547_v43  ;;  %v934_v45 = vpop.f32.mrb[10].mxu1  ;;  %v402_v46 = vadd.f32 %v886_v44, %v1256_v3  ;;  %v396_v48 = vpop.f32.mrb[11].mxu0 }
  0xf1   :  { %v562_v47 = vadd.f32 %v934_v45, %v1256_v3  ;;  %v556_v49 = vpop.f32.mrb[11].mxu1  ;;  %v397_v50 = vadd.f32 %v1256_v3, %v396_v48 }
  0xf2   :  { %v557_v51 = vadd.f32 %v1256_v3, %v556_v49  ;;  %677 = vst.msk [vmem:[%s1581_s3 + $0x58] sm:$0xff] %vm665_vm1, %v402_v46 }
  0xf3   :  { %709 = vst.msk [vmem:[%s1581_s3 + $0x158] sm:$0xff] %vm665_vm1, %v562_v47  ;;  %676 = vst.msk [vmem:[%s1581_s3 + $0x50] sm:$0xff] %vm665_vm1, %v397_v50  ;;  %v889_v52 = vpop.f32.mrb[12].mxu0 }
  0xf4   :  { %708 = vst.msk [vmem:[%s1581_s3 + $0x150] sm:$0xff] %vm665_vm1, %v557_v51  ;;  %v937_v53 = vpop.f32.mrb[12].mxu1  ;;  %v412_v54 = vadd.f32 %v889_v52, %v1256_v3  ;;  %v406_v56 = vpop.f32.mrb[13].mxu0 }
  0xf5   :  { %v572_v55 = vadd.f32 %v937_v53, %v1256_v3  ;;  %v566_v57 = vpop.f32.mrb[13].mxu1  ;;  %v407_v58 = vadd.f32 %v1256_v3, %v406_v56 }
  0xf6   :  { %v567_v59 = vadd.f32 %v1256_v3, %v566_v57  ;;  %679 = vst.msk [vmem:[%s1581_s3 + $0x68] sm:$0xff] %vm665_vm1, %v412_v54 }
  0xf7   :  { %711 = vst.msk [vmem:[%s1581_s3 + $0x168] sm:$0xff] %vm665_vm1, %v572_v55  ;;  %678 = vst.msk [vmem:[%s1581_s3 + $0x60] sm:$0xff] %vm665_vm1, %v407_v58  ;;  %v892_v60 = vpop.f32.mrb[14].mxu0 }
  0xf8   :  { %710 = vst.msk [vmem:[%s1581_s3 + $0x160] sm:$0xff] %vm665_vm1, %v567_v59  ;;  %v940_v61 = vpop.f32.mrb[14].mxu1  ;;  %v422_v62 = vadd.f32 %v892_v60, %v1256_v3  ;;  %v416_v0 = vpop.f32.mrb[15].mxu0 }
  0xf9   :  { %v582_v63 = vadd.f32 %v940_v61, %v1256_v3  ;;  %v576_v1 = vpop.f32.mrb[15].mxu1  ;;  %v417_v2 = vadd.f32 %v1256_v3, %v416_v0 }
  0xfa   :  { %v577_v4 = vadd.f32 %v1256_v3, %v576_v1  ;;  %681 = vst.msk [vmem:[%s1581_s3 + $0x78] sm:$0xff] %vm665_vm1, %v422_v62 }
  0xfb   :  { %713 = vst.msk [vmem:[%s1581_s3 + $0x178] sm:$0xff] %vm665_vm1, %v582_v63  ;;  %680 = vst.msk [vmem:[%s1581_s3 + $0x70] sm:$0xff] %vm665_vm1, %v417_v2  ;;  %v895_v5 = vpop.f32.mrb[16].mxu0 }
  0xfc   :  { %712 = vst.msk [vmem:[%s1581_s3 + $0x170] sm:$0xff] %vm665_vm1, %v577_v4  ;;  %v943_v6 = vpop.f32.mrb[16].mxu1  ;;  %v432_v7 = vadd.f32 %v895_v5, %v1256_v3  ;;  %v426_v9 = vpop.f32.mrb[17].mxu0 }
  0xfd   :  { %v592_v8 = vadd.f32 %v943_v6, %v1256_v3  ;;  %v586_v10 = vpop.f32.mrb[17].mxu1  ;;  %v427_v11 = vadd.f32 %v1256_v3, %v426_v9 }
  0xfe   :  { %v587_v12 = vadd.f32 %v1256_v3, %v586_v10  ;;  %683 = vst.msk [vmem:[%s1581_s3 + $0x88] sm:$0xff] %vm665_vm1, %v432_v7 }
  0xff   :  { %715 = vst.msk [vmem:[%s1581_s3 + $0x188] sm:$0xff] %vm665_vm1, %v592_v8  ;;  %682 = vst.msk [vmem:[%s1581_s3 + $0x80] sm:$0xff] %vm665_vm1, %v427_v11  ;;  %v898_v13 = vpop.f32.mrb[18].mxu0 }
 0x100   :  { %714 = vst.msk [vmem:[%s1581_s3 + $0x180] sm:$0xff] %vm665_vm1, %v587_v12  ;;  %v946_v14 = vpop.f32.mrb[18].mxu1  ;;  %v442_v15 = vadd.f32 %v898_v13, %v1256_v3  ;;  %v436_v17 = vpop.f32.mrb[19].mxu0 }
 0x101   :  { %v602_v16 = vadd.f32 %v946_v14, %v1256_v3  ;;  %v596_v18 = vpop.f32.mrb[19].mxu1  ;;  %v437_v19 = vadd.f32 %v1256_v3, %v436_v17 }
 0x102   :  { %v597_v20 = vadd.f32 %v1256_v3, %v596_v18  ;;  %685 = vst.msk [vmem:[%s1581_s3 + $0x98] sm:$0xff] %vm665_vm1, %v442_v15 }
 0x103   :  { %717 = vst.msk [vmem:[%s1581_s3 + $0x198] sm:$0xff] %vm665_vm1, %v602_v16  ;;  %684 = vst.msk [vmem:[%s1581_s3 + $0x90] sm:$0xff] %vm665_vm1, %v437_v19  ;;  %v901_v21 = vpop.f32.mrb[20].mxu0 }
 0x104   :  { %716 = vst.msk [vmem:[%s1581_s3 + $0x190] sm:$0xff] %vm665_vm1, %v597_v20  ;;  %v949_v22 = vpop.f32.mrb[20].mxu1  ;;  %v452_v23 = vadd.f32 %v901_v21, %v1256_v3  ;;  %v446_v25 = vpop.f32.mrb[21].mxu0 }
 0x105   :  { %v612_v24 = vadd.f32 %v949_v22, %v1256_v3  ;;  %v606_v26 = vpop.f32.mrb[21].mxu1  ;;  %v447_v27 = vadd.f32 %v1256_v3, %v446_v25 }
 0x106   :  { %v607_v28 = vadd.f32 %v1256_v3, %v606_v26  ;;  %687 = vst.msk [vmem:[%s1581_s3 + $0xa8] sm:$0xff] %vm665_vm1, %v452_v23 }
 0x107   :  { %719 = vst.msk [vmem:[%s1581_s3 + $0x1a8] sm:$0xff] %vm665_vm1, %v612_v24  ;;  %686 = vst.msk [vmem:[%s1581_s3 + $0xa0] sm:$0xff] %vm665_vm1, %v447_v27  ;;  %v904_v29 = vpop.f32.mrb[22].mxu0 }
 0x108   :  { %718 = vst.msk [vmem:[%s1581_s3 + $0x1a0] sm:$0xff] %vm665_vm1, %v607_v28  ;;  %v952_v30 = vpop.f32.mrb[22].mxu1  ;;  %v462_v31 = vadd.f32 %v904_v29, %v1256_v3  ;;  %v456_v33 = vpop.f32.mrb[23].mxu0 }
 0x109   :  { %v622_v32 = vadd.f32 %v952_v30, %v1256_v3  ;;  %v616_v34 = vpop.f32.mrb[23].mxu1  ;;  %v457_v35 = vadd.f32 %v1256_v3, %v456_v33 }
 0x10a   :  { %v617_v36 = vadd.f32 %v1256_v3, %v616_v34  ;;  %689 = vst.msk [vmem:[%s1581_s3 + $0xb8] sm:$0xff] %vm665_vm1, %v462_v31 }
 0x10b   :  { %721 = vst.msk [vmem:[%s1581_s3 + $0x1b8] sm:$0xff] %vm665_vm1, %v622_v32  ;;  %688 = vst.msk [vmem:[%s1581_s3 + $0xb0] sm:$0xff] %vm665_vm1, %v457_v35  ;;  %v907_v37 = vpop.f32.mrb[24].mxu0 }
 0x10c   :  { %720 = vst.msk [vmem:[%s1581_s3 + $0x1b0] sm:$0xff] %vm665_vm1, %v617_v36  ;;  %v955_v38 = vpop.f32.mrb[24].mxu1  ;;  %v472_v39 = vadd.f32 %v907_v37, %v1256_v3  ;;  %v466_v41 = vpop.f32.mrb[25].mxu0 }
 0x10d   :  { %v632_v40 = vadd.f32 %v955_v38, %v1256_v3  ;;  %v626_v42 = vpop.f32.mrb[25].mxu1  ;;  %v467_v43 = vadd.f32 %v1256_v3, %v466_v41 }
 0x10e   :  { %v627_v44 = vadd.f32 %v1256_v3, %v626_v42  ;;  %691 = vst.msk [vmem:[%s1581_s3 + $0xc8] sm:$0xff] %vm665_vm1, %v472_v39 }
 0x10f   :  { %723 = vst.msk [vmem:[%s1581_s3 + $0x1c8] sm:$0xff] %vm665_vm1, %v632_v40  ;;  %690 = vst.msk [vmem:[%s1581_s3 + $0xc0] sm:$0xff] %vm665_vm1, %v467_v43  ;;  %v910_v45 = vpop.f32.mrb[26].mxu0 }
 0x110   :  { %722 = vst.msk [vmem:[%s1581_s3 + $0x1c0] sm:$0xff] %vm665_vm1, %v627_v44  ;;  %v958_v46 = vpop.f32.mrb[26].mxu1  ;;  %v482_v47 = vadd.f32 %v910_v45, %v1256_v3  ;;  %v476_v49 = vpop.f32.mrb[27].mxu0 }
 0x111   :  { %v642_v48 = vadd.f32 %v958_v46, %v1256_v3  ;;  %v636_v50 = vpop.f32.mrb[27].mxu1  ;;  %v477_v51 = vadd.f32 %v1256_v3, %v476_v49 }
 0x112   :  { %v637_v52 = vadd.f32 %v1256_v3, %v636_v50  ;;  %693 = vst.msk [vmem:[%s1581_s3 + $0xd8] sm:$0xff] %vm665_vm1, %v482_v47 }
 0x113   :  { %725 = vst.msk [vmem:[%s1581_s3 + $0x1d8] sm:$0xff] %vm665_vm1, %v642_v48  ;;  %692 = vst.msk [vmem:[%s1581_s3 + $0xd0] sm:$0xff] %vm665_vm1, %v477_v51  ;;  %v913_v53 = vpop.f32.mrb[28].mxu0 }
 0x114   :  { %724 = vst.msk [vmem:[%s1581_s3 + $0x1d0] sm:$0xff] %vm665_vm1, %v637_v52  ;;  %v961_v54 = vpop.f32.mrb[28].mxu1  ;;  %v492_v55 = vadd.f32 %v913_v53, %v1256_v3  ;;  %v486_v57 = vpop.f32.mrb[29].mxu0 }
 0x115   :  { %v652_v56 = vadd.f32 %v961_v54, %v1256_v3  ;;  %v646_v58 = vpop.f32.mrb[29].mxu1  ;;  %v487_v59 = vadd.f32 %v1256_v3, %v486_v57 }
 0x116   :  { %v647_v60 = vadd.f32 %v1256_v3, %v646_v58  ;;  %695 = vst.msk [vmem:[%s1581_s3 + $0xe8] sm:$0xff] %vm665_vm1, %v492_v55 }
 0x117   :  { %727 = vst.msk [vmem:[%s1581_s3 + $0x1e8] sm:$0xff] %vm665_vm1, %v652_v56  ;;  %694 = vst.msk [vmem:[%s1581_s3 + $0xe0] sm:$0xff] %vm665_vm1, %v487_v59  ;;  %v916_v61 = vpop.f32.mrb[30].mxu0 }
 0x118   :  { %726 = vst.msk [vmem:[%s1581_s3 + $0x1e0] sm:$0xff] %vm665_vm1, %v647_v60  ;;  %v964_v62 = vpop.f32.mrb[30].mxu1  ;;  %v502_v63 = vadd.f32 %v916_v61, %v1256_v3  ;;  %v496_v1 = vpop.f32.mrb[31].mxu0 }
 0x119   :  { %v662_v0 = vadd.f32 %v964_v62, %v1256_v3  ;;  %v656_v2 = vpop.f32.mrb[31].mxu1  ;;  %v497_v4 = vadd.f32 %v1256_v3, %v496_v1 }
 0x11a   :  { %v657_v5 = vadd.f32 %v1256_v3, %v656_v2  ;;  %697 = vst.msk [vmem:[%s1581_s3 + $0xf8] sm:$0xff] %vm665_vm1, %v502_v63 }
 0x11b   :  { %729 = vst.msk [vmem:[%s1581_s3 + $0x1f8] sm:$0xff] %vm665_vm1, %v662_v0  ;;  %696 = vst.msk [vmem:[%s1581_s3 + $0xf0] sm:$0xff] %vm665_vm1, %v497_v4 }
 0x11c   :  { %728 = vst.msk [vmem:[%s1581_s3 + $0x1f0] sm:$0xff] %vm665_vm1, %v657_v5 }

// kernel: attention_convolution_2d.4
= control target key start
LH: loop header
LB: loop body
LE: loop exit
PB: predicated region body
PF: predicated region fallthrough
CT: control target
= control target key end

     0   :  { %s27552_s27 = smov 0   ;;  %s27554_s28 = smov 0   ;;  %s32663_s0 = inlined_call_operand.vmem [shape: f32[2,4,36], index: 0, kind: input, shape index: {}]   ;;  %s32664_s1 = inlined_call_operand.vmem [shape: f32[2,8,8,2,4,8], index: 1, kind: input, shape index: {}]   ;;  %s32665_s2 = inlined_call_operand.vmem [shape: f32[2,10,10,2,4,8], index: 2, kind: input, shape index: {}, may-alias: {2,3,4}]   ;;  %s32666_s3 = inlined_call_operand.vmem [shape: f32[2,10,10,2,4,8], index: 3, kind: input, shape index: {}, may-alias: {2,3,4}]   ;;  %s32667_s4 = inlined_call_operand.vmem [shape: f32[2,10,10,2,4,8], index: 4, kind: input, shape index: {}, may-alias: {2,3,4}]   ;;  %s32668_s5 = inlined_call_operand.vmem [shape: f32[2,10,10,2,4,8], index: 5, kind: input, shape index: {}, may-alias: {5,6,7}]   ;;  %s32669_s6 = inlined_call_operand.vmem [shape: f32[2,10,10,2,4,8], index: 6, kind: input, shape index: {}, may-alias: {5,6,7}]   ;;  %s32670_s7 = inlined_call_operand.vmem [shape: f32[2,10,10,2,4,8], index: 7, kind: input, shape index: {}, may-alias: {5,6,7}]   ;;  %s32671_s8 = inlined_call_operand.vmem [shape: f32[2,8,8,4,16], index: 8, kind: output, shape index: {}]  }
   0x1   :  { %s27556_s29 = smov 0   ;;  %s27558_s30 = smov 0  }
   0x2   :  { %s27560_s9 = smov 0  }
   0x3 LB: > { %s27_s10 = sadd.s32 1, %s27485_s29  ;;  %s30_s11 = sadd.s32 1, %s27489_s30  ;;  %s27493_s9 = sphi %s27560_s9, %s18_s9   ;;  %s27489_s30 = sphi %s27558_s30, %s33328_s30   ;;  %s27485_s29 = sphi %s27556_s29, %s33327_s29   ;;  %s27481_s28 = sphi %s27554_s28, %s33326_s28   ;;  %s27477_s27 = sphi %s27552_s27, %s33325_s27  }
   0x4   : > { %p28_p0 = scmp.ge.s32.totalorder %s27_s10, 8  ;;  %p24211_p1 = scmp.ge.s32.totalorder %s27493_s9, 1 }
   0x5   : > { %p394_p2 = scmp.lt.s32.totalorder %s27493_s9, 17 }
   0x6   : > { %s33330_s10 = smov (%p28_p0, %s27_s10), 0  ;;  %s33332_s11 = smov (!%p28_p0, %s30_s11), %s27489_s30 }
   0x7   : > { %p395_p3 = pnand %p24211_p1, %p394_p2  ;;  %p32_p4 = scmp.ge.s32.totalorder %s33332_s11, 2 }
   0x9   : > { %s33334_s11 = smov (%p32_p4, %s33332_s11), 0  ;;  %398 = sbr.rel (%p395_p3) target bundleno = 1354 (0x54a), region = 52 }
  0x10   : > { %p494_p5 = scmp.lt.s32.totalorder %s27481_s28, 1  ;;  %p505_p6 = scmp.lt.s32.totalorder %s27477_s27, 9  ;;  %v32680_v0 = vmov 0.0   ;;  %v3126_v1 = vld [vmem:[%s32663_s0 + $0x4] sm:$0xf]  ;;  %vm27496_vm0 = vmmov 0  }
  0x11   : > { %25378 = vmatprep.subr.mxu0 %v32680_v0  ;;  %25383 = vmatprep.subr.mxu1 %v32680_v0  ;;  %p496_p7 = scmp.lt.s32.totalorder %s27477_s27, 7  ;;  %s27497_s15 = smov 124   ;;  %v4310_v2 = vld [vmem:[%s32663_s0 + $0x4] sm:$0xf]  ;;  %vm710_vm1 = vcmask 64512   ;;  %v32674_v46 = vmov -inf  }
  0x12   : > { %s33336_s28 = smov (!%p494_p5, %s27481_s28), 1  ;;  %25380 = vmatprep.mubr.msk.f32.mxu0 %vm27496_vm0, %v32680_v0  ;;  %25385 = vmatprep.mubr.msk.f32.mxu1 %vm27496_vm0, %v32680_v0  ;;  %s32672_s23 = smov 120   ;;  %v7888_v3 = vld [vmem:[%s32663_s0 + $0x4] sm:$0xf]  ;;  %v3125_v39 = vld [vmem:[%s32663_s0] sm:$0xf] }
  0x13   : > { %s506_s14 = scalar_select %p505_p6, %s27477_s27, 9  ;;  %3131 = vrot.lane.b32.xlu0 %v3126_v1, %s27497_s15  ;;  %v9114_v38 = vld [vmem:[%s32663_s0 + $0x4] sm:$0xf]  ;;  %v6719_v57 = vld [vmem:[%s32663_s0] sm:$0xf]  ;;  %vm11529_vm3 = vcmask 27648  }
  0x14   : > { %s27600_s16 = smul.u32 200, %s33336_s28  ;;  %s24213_s22 = sshll.u32 %s33336_s28, 7  ;;  %v7887_v60 = vld [vmem:[%s32663_s0] sm:$0xf]  ;;  %v6720_v61 = vld [vmem:[%s32663_s0 + $0x4] sm:$0xf] }
  0x15   : > { %s27074_s19 = smul.u32 20, %s506_s14  ;;  %s27500_s14 = smov 104   ;;  %v5536_v1 = vld [vmem:[%s32663_s0 + $0x4] sm:$0xf]  ;;  %vm12318_vm5 = vcmask 1043456   ;;  %vm12314_vm6 = vcmask 31744  }
  0x16   : > { %s27606_s20 = scalar_select %p496_p7, %s27477_s27, 7  ;;  %vm23936_vm7 = vcmask 60416   ;;  %vm23977_vm8 = vcmask 126016  }
  0x17   : > { %s27609_s21 = sadd.s32 %s27600_s16, %s27074_s19  ;;  %4315 = vrot.lane.b32.xlu0 %v4310_v2, %s32672_s23  ;;  %v10304_v2 = vld [vmem:[%s32663_s0 + $0x4] sm:$0xf]  ;;  %s27505_s17 = smov 96  }
  0x18   : > { %s24215_s24 = sshll.u32 %s27609_s21, 2  ;;  %s24212_s25 = sshll.u32 %s27606_s20, 4 }
  0x19   : > { %s27620_s13 = scalar_lea.vmem %s32665_s2, %s24215_s24  ;;  %s500_s18 = sadd.s32 %s24213_s22, %s24212_s25 }
  0x1a   : > { %v590_v4 = vld [vmem:[%s27620_s13] sm:$0xf]  ;;  %v591_v5 = vld [vmem:[%s27620_s13 + $0x4] sm:$0xf]  ;;  %s24214_s19 = sshll.u32 %s500_s18, 2  ;;  %s27499_s22 = smov 108  }
  0x1b   : > { %25379 = vmatpush3.xpose.msk.msra.mxu0 %vm710_vm1, %v590_v4  ;;  %25384 = vmatpush3.xpose.msk.msra.mxu1 %vm710_vm1, %v591_v5  ;;  %s27632_s12 = scalar_lea.vmem %s32664_s1, %s24214_s19  ;;  %v27637_v6 = vld [vmem:[%s27620_s13 + $0x8] sm:$0xf]  ;;  %v27640_v7 = vld [vmem:[%s27620_s13 + $0xc] sm:$0xf]  ;;  %v27668_v12 = vld [vmem:[%s27620_s13 + $0x10] sm:$0xf] }
  0x1c   : > { %25388 = vmatprep.subr.mxu0 %v32680_v0  ;;  %25393 = vmatprep.subr.mxu1 %v32680_v0  ;;  %v27643_v8 = vld [vmem:[%s27632_s12] sm:$0xf]  ;;  %v27646_v9 = vld [vmem:[%s27632_s12 + $0x4] sm:$0xf]  ;;  %v27658_v10 = vld [vmem:[%s27632_s12 + $0x8] sm:$0xf] }
  0x1d   : > { %7893 = vrot.lane.b32.xlu0 %v7888_v3, %s27499_s22  ;;  %v27661_v11 = vld [vmem:[%s27632_s12 + $0xc] sm:$0xf]  ;;  %v27671_v13 = vld [vmem:[%s27620_s13 + $0x14] sm:$0xf]  ;;  %v27684_v14 = vld [vmem:[%s27632_s12 + $0x10] sm:$0xf] }
  0x1e   : > { %25381 = vmatmul.mubr.msk.f32.vlgmr.msra.gmra.mrb[0].mxu0 %vm710_vm1, %v27643_v8  ;;  %25386 = vmatmul.mubr.msk.f32.vlgmr.msra.gmra.mrb[0].mxu1 %vm710_vm1, %v27646_v9  ;;  %v27687_v15 = vld [vmem:[%s27632_s12 + $0x14] sm:$0xf]  ;;  %v27694_v16 = vld [vmem:[%s27620_s13 + $0x18] sm:$0xf]  ;;  %v27697_v17 = vld [vmem:[%s27620_s13 + $0x1c] sm:$0xf] }
  0x1f   : > { %25389 = vmatpush3.xpose.msk.msra.mxu0 %vm710_vm1, %v27637_v6  ;;  %25394 = vmatpush3.xpose.msk.msra.mxu1 %vm710_vm1, %v27640_v7  ;;  %v27710_v18 = vld [vmem:[%s27632_s12 + $0x18] sm:$0xf]  ;;  %v27713_v19 = vld [vmem:[%s27632_s12 + $0x1c] sm:$0xf]  ;;  %v27720_v20 = vld [vmem:[%s27620_s13 + $0x20] sm:$0xf] }
  0x20   : > { %25390 = vmatprep.mubr.msk.f32.mxu0 %vm27496_vm0, %v32680_v0  ;;  %25395 = vmatprep.mubr.msk.f32.mxu1 %vm27496_vm0, %v32680_v0  ;;  %v27723_v21 = vld [vmem:[%s27620_s13 + $0x24] sm:$0xf]  ;;  %v27736_v22 = vld [vmem:[%s27632_s12 + $0x20] sm:$0xf]  ;;  %v27746_v24 = vld [vmem:[%s27620_s13 + $0x28] sm:$0xf] }
  0x21   : > { %25398 = vmatprep.subr.mxu0 %v32680_v0  ;;  %25403 = vmatprep.subr.mxu1 %v32680_v0  ;;  %v27739_v23 = vld [vmem:[%s27632_s12 + $0x24] sm:$0xf]  ;;  %v27749_v25 = vld [vmem:[%s27620_s13 + $0x2c] sm:$0xf]  ;;  %v27762_v26 = vld [vmem:[%s27632_s12 + $0x28] sm:$0xf] }
  0x22   : > { %25391 = vmatmul.mubr.msk.f32.vlgmr.msra.gmra.mrb[2].mxu0 %vm710_vm1, %v27658_v10  ;;  %25396 = vmatmul.mubr.msk.f32.vlgmr.msra.gmra.mrb[2].mxu1 %vm710_vm1, %v27661_v11  ;;  %v27765_v27 = vld [vmem:[%s27632_s12 + $0x2c] sm:$0xf]  ;;  %v27772_v28 = vld [vmem:[%s27620_s13 + $0x30] sm:$0xf]  ;;  %v27775_v29 = vld [vmem:[%s27620_s13 + $0x34] sm:$0xf] }
  0x23   : > { %25399 = vmatpush3.xpose.msk.msra.mxu0 %vm710_vm1, %v27668_v12  ;;  %25404 = vmatpush3.xpose.msk.msra.mxu1 %vm710_vm1, %v27671_v13  ;;  %v27788_v30 = vld [vmem:[%s27632_s12 + $0x30] sm:$0xf]  ;;  %v27791_v31 = vld [vmem:[%s27632_s12 + $0x34] sm:$0xf]  ;;  %v27798_v32 = vld [vmem:[%s27620_s13 + $0x38] sm:$0xf] }
  0x24   : > { %25400 = vmatprep.mubr.msk.f32.mxu0 %vm27496_vm0, %v32680_v0  ;;  %25405 = vmatprep.mubr.msk.f32.mxu1 %vm27496_vm0, %v32680_v0  ;;  %v27801_v33 = vld [vmem:[%s27620_s13 + $0x3c] sm:$0xf]  ;;  %v27814_v34 = vld [vmem:[%s27632_s12 + $0x38] sm:$0xf]  ;;  %v27922_v36 = vld [vmem:[%s27620_s13 + $0x40] sm:$0xf] }
  0x25   : > { %25408 = vmatprep.subr.mxu0 %v32680_v0  ;;  %25413 = vmatprep.subr.mxu1 %v32680_v0  ;;  %v27817_v35 = vld [vmem:[%s27632_s12 + $0x3c] sm:$0xf]  ;;  %v27925_v37 = vld [vmem:[%s27620_s13 + $0x44] sm:$0xf]  ;;  %s512_s19 = sadd.s32 1, %s27477_s27  ;;  %s523_s25 = sadd.s32 2, %s27477_s27 }
  0x26   : > { %25401 = vmatmul.mubr.msk.f32.vlgmr.msra.gmra.mrb[4].mxu0 %vm710_vm1, %v27684_v14  ;;  %25406 = vmatmul.mubr.msk.f32.vlgmr.msra.gmra.mrb[4].mxu1 %vm710_vm1, %v27687_v15  ;;  %p515_p8 = scmp.lt.s32.totalorder %s512_s19, 9  ;;  %v608_v40 = vld [vmem:[%s27620_s13 + $0x48] sm:$0xf]  ;;  %v609_v41 = vld [vmem:[%s27620_s13 + $0x4c] sm:$0xf]  ;;  %s27504_s13 = smov 100  }
  0x27   : > { %25409 = vmatpush3.xpose.msk.msra.mxu0 %vm710_vm1, %v27694_v16  ;;  %25414 = vmatpush3.xpose.msk.msra.mxu1 %vm710_vm1, %v27697_v17  ;;  %v11488_v3 = vld [vmem:[%s32663_s0 + $0x4] sm:$0xf]  ;;  %v4309_v4 = vld [vmem:[%s32663_s0] sm:$0xf]  ;;  %p526_p9 = scmp.lt.s32.totalorder %s523_s25, 9  ;;  %p1961_p10 = scmp.eq.s32.totalorder %s27477_s27, 0 }
  0x28   : > { %25410 = vmatprep.mubr.msk.f32.mxu0 %vm27496_vm0, %v32680_v0  ;;  %25415 = vmatprep.mubr.msk.f32.mxu1 %vm27496_vm0, %v32680_v0  ;;  %s33338_s19 = smov (!%p515_p8, %s512_s19), 9  ;;  %v5535_v5 = vld [vmem:[%s32663_s0] sm:$0xf]  ;;  %p9139_p11 = scmp.eq.s32.totalorder %s27477_s27, 7 }
  0x29   : > { %25418 = vmatprep.subr.mxu0 %v32680_v0  ;;  %25423 = vmatprep.subr.mxu1 %v32680_v0  ;;  %s33340_s25 = smov (!%p526_p9, %s523_s25), 9 }
  0x2a   : > { %25411 = vmatmul.mubr.msk.f32.vlgmr.msra.gmra.mrb[6].mxu0 %vm710_vm1, %v27710_v18  ;;  %25416 = vmatmul.mubr.msk.f32.vlgmr.msra.gmra.mrb[6].mxu1 %vm710_vm1, %v27713_v19 }
  0x2b   : > { %25419 = vmatpush3.xpose.msk.msra.mxu0 %vm710_vm1, %v27720_v20  ;;  %25424 = vmatpush3.xpose.msk.msra.mxu1 %vm710_vm1, %v27723_v21 }
  0x2c   : > { %25420 = vmatprep.mubr.msk.f32.mxu0 %vm27496_vm0, %v32680_v0  ;;  %25425 = vmatprep.mubr.msk.f32.mxu1 %vm27496_vm0, %v32680_v0 }
  0x2d   : > { %25428 = vmatprep.subr.mxu0 %v32680_v0  ;;  %25433 = vmatprep.subr.mxu1 %v32680_v0 }
  0x2e   : > { %25421 = vmatmul.mubr.msk.f32.vlgmr.msra.gmra.mrb[8].mxu0 %vm710_vm1, %v27736_v22  ;;  %25426 = vmatmul.mubr.msk.f32.vlgmr.msra.gmra.mrb[8].mxu1 %vm710_vm1, %v27739_v23 }
  0x2f   : > { %25429 = vmatpush3.xpose.msk.msra.mxu0 %vm710_vm1, %v27746_v24  ;;  %25434 = vmatpush3.xpose.msk.msra.mxu1 %vm710_vm1, %v27749_v25 }
  0x30   : > { %25430 = vmatprep.mubr.msk.f32.mxu0 %vm27496_vm0, %v32680_v0  ;;  %25435 = vmatprep.mubr.msk.f32.mxu1 %vm27496_vm0, %v32680_v0 }
  0x31   : > { %25438 = vmatprep.subr.mxu0 %v32680_v0  ;;  %25443 = vmatprep.subr.mxu1 %v32680_v0 }
  0x32   : > { %25431 = vmatmul.mubr.msk.f32.vlgmr.msra.gmra.mrb[10].mxu0 %vm710_vm1, %v27762_v26  ;;  %25436 = vmatmul.mubr.msk.f32.vlgmr.msra.gmra.mrb[10].mxu1 %vm710_vm1, %v27765_v27 }
  0x33   : > { %25439 = vmatpush3.xpose.msk.msra.mxu0 %vm710_vm1, %v27772_v28  ;;  %25444 = vmatpush3.xpose.msk.msra.mxu1 %vm710_vm1, %v27775_v29 }
  0x34   : > { %25440 = vmatprep.mubr.msk.f32.mxu0 %vm27496_vm0, %v32680_v0  ;;  %25445 = vmatprep.mubr.msk.f32.mxu1 %vm27496_vm0, %v32680_v0 }
  0x35   : > { %25448 = vmatprep.subr.mxu0 %v32680_v0  ;;  %25453 = vmatprep.subr.mxu1 %v32680_v0 }
  0x36   : > { %25441 = vmatmul.mubr.msk.f32.vlgmr.msra.gmra.mrb[12].mxu0 %vm710_vm1, %v27788_v30  ;;  %25446 = vmatmul.mubr.msk.f32.vlgmr.msra.gmra.mrb[12].mxu1 %vm710_vm1, %v27791_v31 }
  0x37   : > { %25449 = vmatpush3.xpose.msk.msra.mxu0 %vm710_vm1, %v27798_v32  ;;  %25454 = vmatpush3.xpose.msk.msra.mxu1 %vm710_vm1, %v27801_v33 }
  0x38   : > { %25450 = vmatprep.mubr.msk.f32.mxu0 %vm27496_vm0, %v32680_v0  ;;  %25455 = vmatprep.mubr.msk.f32.mxu1 %vm27496_vm0, %v32680_v0 }
  0x39   : > { %25458 = vmatprep.subr.mxu0 %v32680_v0  ;;  %25463 = vmatprep.subr.mxu1 %v32680_v0 }
  0x3a   : > { %25451 = vmatmul.mubr.msk.f32.vlgmr.msra.gmra.mrb[14].mxu0 %vm710_vm1, %v27814_v34  ;;  %25456 = vmatmul.mubr.msk.f32.vlgmr.msra.gmra.mrb[14].mxu1 %vm710_vm1, %v27817_v35 }
  0x3b   : > { %25459 = vmatpush3.xpose.msk.msra.mxu0 %vm710_vm1, %v27637_v6  ;;  %25464 = vmatpush3.xpose.msk.msra.mxu1 %vm710_vm1, %v27640_v7  ;;  %v9113_v6 = vld [vmem:[%s32663_s0] sm:$0xf] }
  0x3c   : > { %25460 = vmatprep.mubr.msk.f32.mxu0 %vm27496_vm0, %v32680_v0  ;;  %25465 = vmatprep.mubr.msk.f32.mxu1 %vm27496_vm0, %v32680_v0  ;;  %v10303_v7 = vld [vmem:[%s32663_s0] sm:$0xf] }
  0x3d   : > { %25468 = vmatprep.subr.mxu0 %v32680_v0  ;;  %25473 = vmatprep.subr.mxu1 %v32680_v0 }
  0x3e   : > { %25461 = vmatmul.mubr.msk.f32.vlgmr.msra.gmra.mrb[16].mxu0 %vm710_vm1, %v27643_v8  ;;  %25466 = vmatmul.mubr.msk.f32.vlgmr.msra.gmra.mrb[16].mxu1 %vm710_vm1, %v27646_v9 }
  0x3f   : > { %25469 = vmatpush3.xpose.msk.msra.mxu0 %vm710_vm1, %v27668_v12  ;;  %25474 = vmatpush3.xpose.msk.msra.mxu1 %vm710_vm1, %v27671_v13 }
  0x40   : > { %25470 = vmatprep.mubr.msk.f32.mxu0 %vm27496_vm0, %v32680_v0  ;;  %25475 = vmatprep.mubr.msk.f32.mxu1 %vm27496_vm0, %v32680_v0 }
  0x41   : > { %25478 = vmatprep.subr.mxu0 %v32680_v0  ;;  %25483 = vmatprep.subr.mxu1 %v32680_v0 }
  0x42   : > { %25471 = vmatmul.mubr.msk.f32.vlgmr.msra.gmra.mrb[18].mxu0 %vm710_vm1, %v27658_v10  ;;  %25476 = vmatmul.mubr.msk.f32.vlgmr.msra.gmra.mrb[18].mxu1 %vm710_vm1, %v27661_v11 }
  0x43   : > { %25479 = vmatpush3.xpose.msk.msra.mxu0 %vm710_vm1, %v27694_v16  ;;  %25484 = vmatpush3.xpose.msk.msra.mxu1 %vm710_vm1, %v27697_v17 }
  0x44   : > { %25480 = vmatprep.mubr.msk.f32.mxu0 %vm27496_vm0, %v32680_v0  ;;  %25485 = vmatprep.mubr.msk.f32.mxu1 %vm27496_vm0, %v32680_v0 }
  0x45   : > { %25488 = vmatprep.subr.mxu0 %v32680_v0  ;;  %25493 = vmatprep.subr.mxu1 %v32680_v0 }
  0x46   : > { %25481 = vmatmul.mubr.msk.f32.vlgmr.msra.gmra.mrb[20].mxu0 %vm710_vm1, %v27684_v14  ;;  %25486 = vmatmul.mubr.msk.f32.vlgmr.msra.gmra.mrb[20].mxu1 %vm710_vm1, %v27687_v15 }
  0x47   : > { %25489 = vmatpush3.xpose.msk.msra.mxu0 %vm710_vm1, %v27720_v20  ;;  %25494 = vmatpush3.xpose.msk.msra.mxu1 %vm710_vm1, %v27723_v21 }
  0x48   : > { %25490 = vmatprep.mubr.msk.f32.mxu0 %vm27496_vm0, %v32680_v0  ;;  %25495 = vmatprep.mubr.msk.f32.mxu1 %vm27496_vm0, %v32680_v0 }
  0x49   : > { %25498 = vmatprep.subr.mxu0 %v32680_v0  ;;  %25503 = vmatprep.subr.mxu1 %v32680_v0 }
  0x4a   : > { %25491 = vmatmul.mubr.msk.f32.vlgmr.msra.gmra.mrb[22].mxu0 %vm710_vm1, %v27710_v18  ;;  %25496 = vmatmul.mubr.msk.f32.vlgmr.msra.gmra.mrb[22].mxu1 %vm710_vm1, %v27713_v19 }
  0x4b   : > { %25499 = vmatpush3.xpose.msk.msra.mxu0 %vm710_vm1, %v27746_v24  ;;  %25504 = vmatpush3.xpose.msk.msra.mxu1 %vm710_vm1, %v27749_v25 }
  0x4c   : > { %25500 = vmatprep.mubr.msk.f32.mxu0 %vm27496_vm0, %v32680_v0  ;;  %25505 = vmatprep.mubr.msk.f32.mxu1 %vm27496_vm0, %v32680_v0 }
  0x4d   : > { %25508 = vmatprep.subr.mxu0 %v32680_v0  ;;  %25513 = vmatprep.subr.mxu1 %v32680_v0 }
  0x4e   : > { %25501 = vmatmul.mubr.msk.f32.vlgmr.msra.gmra.mrb[24].mxu0 %vm710_vm1, %v27736_v22  ;;  %25506 = vmatmul.mubr.msk.f32.vlgmr.msra.gmra.mrb[24].mxu1 %vm710_vm1, %v27739_v23 }
  0x4f   : > { %25509 = vmatpush3.xpose.msk.msra.mxu0 %vm710_vm1, %v27772_v28  ;;  %25514 = vmatpush3.xpose.msk.msra.mxu1 %vm710_vm1, %v27775_v29 }
  0x50   : > { %25510 = vmatprep.mubr.msk.f32.mxu0 %vm27496_vm0, %v32680_v0  ;;  %25515 = vmatprep.mubr.msk.f32.mxu1 %vm27496_vm0, %v32680_v0 }
  0x51   : > { %25518 = vmatprep.subr.mxu0 %v32680_v0  ;;  %25523 = vmatprep.subr.mxu1 %v32680_v0 }
  0x52   : > { %25511 = vmatmul.mubr.msk.f32.vlgmr.msra.gmra.mrb[26].mxu0 %vm710_vm1, %v27762_v26  ;;  %25516 = vmatmul.mubr.msk.f32.vlgmr.msra.gmra.mrb[26].mxu1 %vm710_vm1, %v27765_v27 }
  0x53   : > { %25519 = vmatpush3.xpose.msk.msra.mxu0 %vm710_vm1, %v27798_v32  ;;  %25524 = vmatpush3.xpose.msk.msra.mxu1 %vm710_vm1, %v27801_v33 }
  0x54   : > { %25520 = vmatprep.mubr.msk.f32.mxu0 %vm27496_vm0, %v32680_v0  ;;  %25525 = vmatprep.mubr.msk.f32.mxu1 %vm27496_vm0, %v32680_v0 }
  0x55   : > { %25528 = vmatprep.subr.mxu0 %v32680_v0  ;;  %25533 = vmatprep.subr.mxu1 %v32680_v0 }
  0x56   : > { %25521 = vmatmul.mubr.msk.f32.vlgmr.msra.gmra.mrb[28].mxu0 %vm710_vm1, %v27788_v30  ;;  %25526 = vmatmul.mubr.msk.f32.vlgmr.msra.gmra.mrb[28].mxu1 %vm710_vm1, %v27791_v31 }
  0x57   : > { %25529 = vmatpush3.xpose.msk.msra.mxu0 %vm710_vm1, %v27922_v36  ;;  %25534 = vmatpush3.xpose.msk.msra.mxu1 %vm710_vm1, %v27925_v37 }
  0x58   : > { %25530 = vmatprep.mubr.msk.f32.mxu0 %vm27496_vm0, %v32680_v0  ;;  %25535 = vmatprep.mubr.msk.f32.mxu1 %vm27496_vm0, %v32680_v0 }
  0x59   : > { %25538 = vmatprep.subr.mxu0 %v32680_v0  ;;  %25543 = vmatprep.subr.mxu1 %v32680_v0 }
  0x5a   : > { %25531 = vmatmul.mubr.msk.f32.vlgmr.msra.gmra.mrb[30].mxu0 %vm710_vm1, %v27814_v34  ;;  %25536 = vmatmul.mubr.msk.f32.vlgmr.msra.gmra.mrb[30].mxu1 %vm710_vm1, %v27817_v35 }
  0x5b   : > { %25539 = vmatpush3.xpose.msk.msra.mxu0 %vm710_vm1, %v27668_v12  ;;  %25544 = vmatpush3.xpose.msk.msra.mxu1 %vm710_vm1, %v27671_v13  ;;  %v11487_v12 = vld [vmem:[%s32663_s0] sm:$0xf] }
  0x5c   : > { %9119 = vrot.lane.b32.xlu0 %v9114_v38, %s27500_s14  ;;  %25540 = vmatprep.mubr.msk.f32.mxu0 %vm27496_vm0, %v32680_v0 }
  0x5d   : > { %25545 = vmatprep.mubr.msk.f32.mxu1 %vm27496_vm0, %v32680_v0  ;;  %25548 = vmatprep.subr.mxu0 %v32680_v0 }
  0x5e   : > { %25541 = vmatmul.mubr.msk.f32.vlgmr.msra.gmra.mrb[32].mxu0 %vm710_vm1, %v27643_v8  ;;  %25546 = vmatmul.mubr.msk.f32.vlgmr.msra.gmra.mrb[32].mxu1 %vm710_vm1, %v27646_v9 }
  0x5f   : > { %25553 = vmatprep.subr.mxu1 %v32680_v0  ;;  %25549 = vmatpush3.xpose.msk.msra.mxu0 %vm710_vm1, %v27694_v16 }
  0x60   : > { %25554 = vmatpush3.xpose.msk.msra.mxu1 %vm710_vm1, %v27697_v17  ;;  %3129 = vrot.lane.b32.xlu0 %v3125_v39, %s27497_s15  ;;  %s27076_s15 = smul.u32 20, %s33338_s19 }
  0x61   : > { %25550 = vmatprep.mubr.msk.f32.mxu0 %vm27496_vm0, %v32680_v0  ;;  %25555 = vmatprep.mubr.msk.f32.mxu1 %vm27496_vm0, %v32680_v0 }
  0x62   : > { %25551 = vmatmul.mubr.msk.f32.vlgmr.msra.gmra.mrb[34].mxu0 %vm710_vm1, %v27658_v10  ;;  %25558 = vmatprep.subr.mxu0 %v32680_v0  ;;  %s28031_s26 = sadd.s32 %s27076_s15, %s27600_s16  ;;  %s27502_s15 = smov 112  }
  0x63   : > { %25556 = vmatmul.mubr.msk.f32.vlgmr.msra.gmra.mrb[34].mxu1 %vm710_vm1, %v27661_v11  ;;  %25563 = vmatprep.subr.mxu1 %v32680_v0  ;;  %s32673_s23 = sshll.u32 %s28031_s26, 2  ;;  %s33134_s21 = sshll.u32 %s28031_s26, 2 }
  0x64   : > { %25559 = vmatpush3.xpose.msk.msra.mxu0 %vm710_vm1, %v27720_v20  ;;  %25564 = vmatpush3.xpose.msk.msra.mxu1 %vm710_vm1, %v27723_v21  ;;  %s28061_s18 = scalar_lea.vmem %s32666_s3, %s32673_s23  ;;  %s32843_s23 = smov 120  }
  0x65   : > { %25560 = vmatprep.mubr.msk.f32.mxu0 %vm27496_vm0, %v32680_v0  ;;  %25565 = vmatprep.mubr.msk.f32.mxu1 %vm27496_vm0, %v32680_v0  ;;  %v610_v42 = vld [vmem:[%s28061_s18] sm:$0xf]  ;;  %v611_v43 = vld [vmem:[%s28061_s18 + $0x4] sm:$0xf]  ;;  %v28088_v44 = vld [vmem:[%s28061_s18 + $0x8] sm:$0xf] }
  0x66   : > { %25568 = vmatprep.subr.mxu0 %v32680_v0  ;;  %25573 = vmatprep.subr.mxu1 %v32680_v0  ;;  %v28093_v45 = vld [vmem:[%s28061_s18 + $0xc] sm:$0xf]  ;;  %v28107_v47 = vld [vmem:[%s28061_s18 + $0x10] sm:$0xf]  ;;  %v28113_v48 = vld [vmem:[%s28061_s18 + $0x14] sm:$0xf] }
  0x67   : > { %25561 = vmatmul.mubr.msk.f32.vlgmr.msra.gmra.mrb[36].mxu0 %vm710_vm1, %v27684_v14  ;;  %25566 = vmatmul.mubr.msk.f32.vlgmr.msra.gmra.mrb[36].mxu1 %vm710_vm1, %v27687_v15  ;;  %v28127_v49 = vld [vmem:[%s28061_s18 + $0x18] sm:$0xf]  ;;  %v28133_v50 = vld [vmem:[%s28061_s18 + $0x1c] sm:$0xf]  ;;  %v28147_v51 = vld [vmem:[%s28061_s18 + $0x20] sm:$0xf] }
  0x68   : > { %25569 = vmatpush3.xpose.msk.msra.mxu0 %vm710_vm1, %v27746_v24  ;;  %25574 = vmatpush3.xpose.msk.msra.mxu1 %vm710_vm1, %v27749_v25  ;;  %v28153_v52 = vld [vmem:[%s28061_s18 + $0x24] sm:$0xf]  ;;  %v28167_v53 = vld [vmem:[%s28061_s18 + $0x28] sm:$0xf]  ;;  %v28173_v54 = vld [vmem:[%s28061_s18 + $0x2c] sm:$0xf] }
  0x69   : > { %25570 = vmatprep.mubr.msk.f32.mxu0 %vm27496_vm0, %v32680_v0  ;;  %25575 = vmatprep.mubr.msk.f32.mxu1 %vm27496_vm0, %v32680_v0  ;;  %v28187_v55 = vld [vmem:[%s28061_s18 + $0x30] sm:$0xf]  ;;  %v28193_v56 = vld [vmem:[%s28061_s18 + $0x34] sm:$0xf]  ;;  %v28213_v58 = vld [vmem:[%s28061_s18 + $0x38] sm:$0xf] }
  0x6a   : > { %25578 = vmatprep.subr.mxu0 %v32680_v0  ;;  %25583 = vmatprep.subr.mxu1 %v32680_v0  ;;  %v28216_v59 = vld [vmem:[%s28061_s18 + $0x3c] sm:$0xf]  ;;  %v28339_v62 = vld [vmem:[%s28061_s18 + $0x40] sm:$0xf]  ;;  %v28342_v63 = vld [vmem:[%s28061_s18 + $0x44] sm:$0xf] }
  0x6b   : > { %25571 = vmatmul.mubr.msk.f32.vlgmr.msra.gmra.mrb[38].mxu0 %vm710_vm1, %v27710_v18  ;;  %25576 = vmatmul.mubr.msk.f32.vlgmr.msra.gmra.mrb[38].mxu1 %vm710_vm1, %v27713_v19  ;;  %v628_v13 = vld [vmem:[%s28061_s18 + $0x48] sm:$0xf]  ;;  %v629_v16 = vld [vmem:[%s28061_s18 + $0x4c] sm:$0xf]  ;;  %s1962_s18 = scalar_select %p1961_p10, 1, 0 }
  0x6c   : > { %25579 = vmatpush3.xpose.msk.msra.mxu0 %vm710_vm1, %v27772_v28  ;;  %25584 = vmatpush3.xpose.msk.msra.mxu1 %vm710_vm1, %v27775_v29 }
  0x6d   : > { %25580 = vmatprep.mubr.msk.f32.mxu0 %vm27496_vm0, %v32680_v0  ;;  %25585 = vmatprep.mubr.msk.f32.mxu1 %vm27496_vm0, %v32680_v0 }
  0x6e   : > { %25588 = vmatprep.subr.mxu0 %v32680_v0  ;;  %25593 = vmatprep.subr.mxu1 %v32680_v0 }
  0x6f   : > { %25581 = vmatmul.mubr.msk.f32.vlgmr.msra.gmra.mrb[40].mxu0 %vm710_vm1, %v27736_v22  ;;  %25586 = vmatmul.mubr.msk.f32.vlgmr.msra.gmra.mrb[40].mxu1 %vm710_vm1, %v27739_v23 }
  0x70   : > { %25589 = vmatpush3.xpose.msk.msra.mxu0 %vm710_vm1, %v27798_v32  ;;  %25594 = vmatpush3.xpose.msk.msra.mxu1 %vm710_vm1, %v27801_v33 }
  0x71   : > { %25590 = vmatprep.mubr.msk.f32.mxu0 %vm27496_vm0, %v32680_v0  ;;  %25595 = vmatprep.mubr.msk.f32.mxu1 %vm27496_vm0, %v32680_v0 }
  0x72   : > { %25598 = vmatprep.subr.mxu0 %v32680_v0  ;;  %25603 = vmatprep.subr.mxu1 %v32680_v0 }
  0x73   : > { %25591 = vmatmul.mubr.msk.f32.vlgmr.msra.gmra.mrb[42].mxu0 %vm710_vm1, %v27762_v26  ;;  %25596 = vmatmul.mubr.msk.f32.vlgmr.msra.gmra.mrb[42].mxu1 %vm710_vm1, %v27765_v27 }
  0x74   : > { %25599 = vmatpush3.xpose.msk.msra.mxu0 %vm710_vm1, %v27922_v36  ;;  %25604 = vmatpush3.xpose.msk.msra.mxu1 %vm710_vm1, %v27925_v37 }
  0x75   : > { %25600 = vmatprep.mubr.msk.f32.mxu0 %vm27496_vm0, %v32680_v0  ;;  %25605 = vmatprep.mubr.msk.f32.mxu1 %vm27496_vm0, %v32680_v0 }
  0x76   : > { %25608 = vmatprep.subr.mxu0 %v32680_v0  ;;  %25613 = vmatprep.subr.mxu1 %v32680_v0 }
  0x77   : > { %25601 = vmatmul.mubr.msk.f32.vlgmr.msra.gmra.mrb[44].mxu0 %vm710_vm1, %v27788_v30  ;;  %25606 = vmatmul.mubr.msk.f32.vlgmr.msra.gmra.mrb[44].mxu1 %vm710_vm1, %v27791_v31 }
  0x78   : > { %25609 = vmatpush3.xpose.msk.msra.mxu0 %vm710_vm1, %v608_v40  ;;  %25614 = vmatpush3.xpose.msk.msra.mxu1 %vm710_vm1, %v609_v41  ;;  %v28648_v40 = vld [vmem:[%s32663_s0 + $0x4] sm:$0xf] }
  0x79   : > { %25610 = vmatprep.mubr.msk.f32.mxu0 %vm27496_vm0, %v32680_v0  ;;  %25615 = vmatprep.mubr.msk.f32.mxu1 %vm27496_vm0, %v32680_v0 }
  0x7a   : > { %25618 = vmatprep.subr.mxu0 %v32680_v0  ;;  %25623 = vmatprep.subr.mxu1 %v32680_v0 }
  0x7b   : > { %25611 = vmatmul.mubr.msk.f32.vlgmr.msra.gmra.mrb[46].mxu0 %vm710_vm1, %v27814_v34  ;;  %25616 = vmatmul.mubr.msk.f32.vlgmr.msra.gmra.mrb[46].mxu1 %vm710_vm1, %v27817_v35 }
  0x7c   : > { %25619 = vmatpush3.xpose.msk.msra.mxu0 %vm710_vm1, %v610_v42  ;;  %25624 = vmatpush3.xpose.msk.msra.mxu1 %vm710_vm1, %v611_v43 }
  0x7d   : > { %25620 = vmatprep.mubr.msk.f32.mxu0 %vm27496_vm0, %v32680_v0  ;;  %25625 = vmatprep.mubr.msk.f32.mxu1 %vm27496_vm0, %v32680_v0 }
  0x7e   : > { %25628 = vmatprep.subr.mxu0 %v32680_v0  ;;  %25633 = vmatprep.subr.mxu1 %v32680_v0 }
  0x7f   : > { %25621 = vmatmul.mubr.msk.f32.vlgmr.msra.gmra.mrb[48].mxu0 %vm710_vm1, %v27643_v8  ;;  %25626 = vmatmul.mubr.msk.f32.vlgmr.msra.gmra.mrb[48].mxu1 %vm710_vm1, %v27646_v9 }
  0x80   : > { %11534 = vmax.xlane.f32.xlu0 %v32674_v46  ;;  %25629 = vmatpush3.xpose.msk.msra.mxu0 %vm710_vm1, %v28088_v44 }
  0x81   : > { %25634 = vmatpush3.xpose.msk.msra.mxu1 %vm710_vm1, %v28093_v45  ;;  %25630 = vmatprep.mubr.msk.f32.mxu0 %vm27496_vm0, %v32680_v0 }
  0x82   : > { %25635 = vmatprep.mubr.msk.f32.mxu1 %vm27496_vm0, %v32680_v0  ;;  %25638 = vmatprep.subr.mxu0 %v32680_v0 }
  0x83   : > { %25631 = vmatmul.mubr.msk.f32.vlgmr.msra.gmra.mrb[50].mxu0 %vm710_vm1, %v27658_v10  ;;  %25643 = vmatprep.subr.mxu1 %v32680_v0 }
  0x84   : > { %25636 = vmatmul.mubr.msk.f32.vlgmr.msra.gmra.mrb[50].mxu1 %vm710_vm1, %v27661_v11  ;;  %25639 = vmatpush3.xpose.msk.msra.mxu0 %vm710_vm1, %v28107_v47 }
  0x85   : > { %25644 = vmatpush3.xpose.msk.msra.mxu1 %vm710_vm1, %v28113_v48  ;;  %25640 = vmatprep.mubr.msk.f32.mxu0 %vm27496_vm0, %v32680_v0 }
  0x86   : > { %25645 = vmatprep.mubr.msk.f32.mxu1 %vm27496_vm0, %v32680_v0  ;;  %25648 = vmatprep.subr.mxu0 %v32680_v0 }
  0x87   : > { %25641 = vmatmul.mubr.msk.f32.vlgmr.msra.gmra.mrb[52].mxu0 %vm710_vm1, %v27684_v14  ;;  %25653 = vmatprep.subr.mxu1 %v32680_v0 }
  0x88   : > { %25646 = vmatmul.mubr.msk.f32.vlgmr.msra.gmra.mrb[52].mxu1 %vm710_vm1, %v27687_v15  ;;  %25649 = vmatpush3.xpose.msk.msra.mxu0 %vm710_vm1, %v28127_v49 }
  0x89   : > { %25654 = vmatpush3.xpose.msk.msra.mxu1 %vm710_vm1, %v28133_v50  ;;  %25650 = vmatprep.mubr.msk.f32.mxu0 %vm27496_vm0, %v32680_v0 }
  0x8a   : > { %25655 = vmatprep.mubr.msk.f32.mxu1 %vm27496_vm0, %v32680_v0  ;;  %25658 = vmatprep.subr.mxu0 %v32680_v0 }
  0x8b   : > { %25651 = vmatmul.mubr.msk.f32.vlgmr.msra.gmra.mrb[54].mxu0 %vm710_vm1, %v27710_v18  ;;  %25663 = vmatprep.subr.mxu1 %v32680_v0 }
  0x8c   : > { %25656 = vmatmul.mubr.msk.f32.vlgmr.msra.gmra.mrb[54].mxu1 %vm710_vm1, %v27713_v19  ;;  %25659 = vmatpush3.xpose.msk.msra.mxu0 %vm710_vm1, %v28147_v51 }
  0x8d   : > { %25664 = vmatpush3.xpose.msk.msra.mxu1 %vm710_vm1, %v28153_v52  ;;  %25660 = vmatprep.mubr.msk.f32.mxu0 %vm27496_vm0, %v32680_v0 }
  0x8e   : > { %25665 = vmatprep.mubr.msk.f32.mxu1 %vm27496_vm0, %v32680_v0  ;;  %25668 = vmatprep.subr.mxu0 %v32680_v0 }
  0x8f   : > { %25661 = vmatmul.mubr.msk.f32.vlgmr.msra.gmra.mrb[56].mxu0 %vm710_vm1, %v27736_v22  ;;  %25673 = vmatprep.subr.mxu1 %v32680_v0 }
  0x90   : > { %25666 = vmatmul.mubr.msk.f32.vlgmr.msra.gmra.mrb[56].mxu1 %vm710_vm1, %v27739_v23  ;;  %25669 = vmatpush3.xpose.msk.msra.mxu0 %vm710_vm1, %v28167_v53 }
  0x91   : > { %25674 = vmatpush3.xpose.msk.msra.mxu1 %vm710_vm1, %v28173_v54  ;;  %25670 = vmatprep.mubr.msk.f32.mxu0 %vm27496_vm0, %v32680_v0 }
  0x92   : > { %25675 = vmatprep.mubr.msk.f32.mxu1 %vm27496_vm0, %v32680_v0  ;;  %25678 = vmatprep.subr.mxu0 %v32680_v0 }
  0x93   : > { %25671 = vmatmul.mubr.msk.f32.vlgmr.msra.gmra.mrb[58].mxu0 %vm710_vm1, %v27762_v26  ;;  %25683 = vmatprep.subr.mxu1 %v32680_v0 }
  0x94   : > { %25676 = vmatmul.mubr.msk.f32.vlgmr.msra.gmra.mrb[58].mxu1 %vm710_vm1, %v27765_v27  ;;  %25679 = vmatpush3.xpose.msk.msra.mxu0 %vm710_vm1, %v28187_v55 }
  0x95   : > { %25684 = vmatpush3.xpose.msk.msra.mxu1 %vm710_vm1, %v28193_v56  ;;  %25680 = vmatprep.mubr.msk.f32.mxu0 %vm27496_vm0, %v32680_v0 }
  0x96   : > { %6723 = vrot.lane.b32.xlu0 %v6719_v57, %s27502_s15  ;;  %25685 = vmatprep.mubr.msk.f32.mxu1 %vm27496_vm0, %v32680_v0 }
  0x97   : > { %25681 = vmatmul.mubr.msk.f32.vlgmr.msra.gmra.mrb[60].mxu0 %vm710_vm1, %v27788_v30  ;;  %25688 = vmatprep.subr.mxu0 %v32680_v0 }
  0x98   : > { %25686 = vmatmul.mubr.msk.f32.vlgmr.msra.gmra.mrb[60].mxu1 %vm710_vm1, %v27791_v31  ;;  %25693 = vmatprep.subr.mxu1 %v32680_v0 }
  0x99   : > { %25689 = vmatpush3.xpose.msk.msra.mxu0 %vm710_vm1, %v28213_v58  ;;  %25694 = vmatpush3.xpose.msk.msra.mxu1 %vm710_vm1, %v28216_v59 }
  0x9a   : > { %7891 = vrot.lane.b32.xlu0 %v7887_v60, %s27499_s22  ;;  %25690 = vmatprep.mubr.msk.f32.mxu0 %vm27496_vm0, %v32680_v0 }
  0x9b   : > { %25695 = vmatprep.mubr.msk.f32.mxu1 %vm27496_vm0, %v32680_v0  ;;  %25698 = vmatprep.subr.mxu0 %v32680_v0 }
  0x9c   : > { %25691 = vmatmul.mubr.msk.f32.vlgmr.msra.gmra.mrb[62].mxu0 %vm710_vm1, %v27814_v34  ;;  %25696 = vmatmul.mubr.msk.f32.vlgmr.msra.gmra.mrb[62].mxu1 %vm710_vm1, %v27817_v35 }
  0x9d   : > { %25703 = vmatprep.subr.mxu1 %v32680_v0  ;;  %25699 = vmatpush3.xpose.msk.msra.mxu0 %vm710_vm1, %v28088_v44 }
  0x9e   : > { %25704 = vmatpush3.xpose.msk.msra.mxu1 %vm710_vm1, %v28093_v45  ;;  %25700 = vmatprep.mubr.msk.f32.mxu0 %vm27496_vm0, %v32680_v0 }
  0x9f   : > { %25705 = vmatprep.mubr.msk.f32.mxu1 %vm27496_vm0, %v32680_v0  ;;  %25708 = vmatprep.subr.mxu0 %v32680_v0 }
  0xa0   : > { %25701 = vmatmul.mubr.msk.f32.vlgmr.msra.gmra.mrb[64].mxu0 %vm710_vm1, %v27643_v8  ;;  %25713 = vmatprep.subr.mxu1 %v32680_v0 }
  0xa1   : > { %25706 = vmatmul.mubr.msk.f32.vlgmr.msra.gmra.mrb[64].mxu1 %vm710_vm1, %v27646_v9  ;;  %25709 = vmatpush3.xpose.msk.msra.mxu0 %vm710_vm1, %v28107_v47 }
  0xa2   : > { %25714 = vmatpush3.xpose.msk.msra.mxu1 %vm710_vm1, %v28113_v48  ;;  %25710 = vmatprep.mubr.msk.f32.mxu0 %vm27496_vm0, %v32680_v0 }
  0xa3   : > { %25715 = vmatprep.mubr.msk.f32.mxu1 %vm27496_vm0, %v32680_v0  ;;  %25718 = vmatprep.subr.mxu0 %v32680_v0 }
  0xa4   : > { %25711 = vmatmul.mubr.msk.f32.vlgmr.msra.gmra.mrb[66].mxu0 %vm710_vm1, %v27658_v10  ;;  %25723 = vmatprep.subr.mxu1 %v32680_v0 }
  0xa5   : > { %25716 = vmatmul.mubr.msk.f32.vlgmr.msra.gmra.mrb[66].mxu1 %vm710_vm1, %v27661_v11  ;;  %25719 = vmatpush3.xpose.msk.msra.mxu0 %vm710_vm1, %v28127_v49 }
  0xa6   : > { %25724 = vmatpush3.xpose.msk.msra.mxu1 %vm710_vm1, %v28133_v50  ;;  %25720 = vmatprep.mubr.msk.f32.mxu0 %vm27496_vm0, %v32680_v0 }
  0xa7   : > { %25725 = vmatprep.mubr.msk.f32.mxu1 %vm27496_vm0, %v32680_v0  ;;  %25728 = vmatprep.subr.mxu0 %v32680_v0 }
  0xa8   : > { %25721 = vmatmul.mubr.msk.f32.vlgmr.msra.gmra.mrb[68].mxu0 %vm710_vm1, %v27684_v14  ;;  %25733 = vmatprep.subr.mxu1 %v32680_v0 }
  0xa9   : > { %25726 = vmatmul.mubr.msk.f32.vlgmr.msra.gmra.mrb[68].mxu1 %vm710_vm1, %v27687_v15  ;;  %25729 = vmatpush3.xpose.msk.msra.mxu0 %vm710_vm1, %v28147_v51 }
  0xaa   : > { %25734 = vmatpush3.xpose.msk.msra.mxu1 %vm710_vm1, %v28153_v52  ;;  %25730 = vmatprep.mubr.msk.f32.mxu0 %vm27496_vm0, %v32680_v0 }
  0xab   : > { %25735 = vmatprep.mubr.msk.f32.mxu1 %vm27496_vm0, %v32680_v0  ;;  %25738 = vmatprep.subr.mxu0 %v32680_v0 }
  0xac   : > { %25731 = vmatmul.mubr.msk.f32.vlgmr.msra.gmra.mrb[70].mxu0 %vm710_vm1, %v27710_v18  ;;  %25743 = vmatprep.subr.mxu1 %v32680_v0 }
  0xad   : > { %25736 = vmatmul.mubr.msk.f32.vlgmr.msra.gmra.mrb[70].mxu1 %vm710_vm1, %v27713_v19  ;;  %25739 = vmatpush3.xpose.msk.msra.mxu0 %vm710_vm1, %v28167_v53 }
  0xae   : > { %25744 = vmatpush3.xpose.msk.msra.mxu1 %vm710_vm1, %v28173_v54  ;;  %25740 = vmatprep.mubr.msk.f32.mxu0 %vm27496_vm0, %v32680_v0 }
  0xaf   : > { %25745 = vmatprep.mubr.msk.f32.mxu1 %vm27496_vm0, %v32680_v0  ;;  %25748 = vmatprep.subr.mxu0 %v32680_v0 }
  0xb0   : > { %25741 = vmatmul.mubr.msk.f32.vlgmr.msra.gmra.mrb[72].mxu0 %vm710_vm1, %v27736_v22  ;;  %25753 = vmatprep.subr.mxu1 %v32680_v0 }
  0xb1   : > { %25746 = vmatmul.mubr.msk.f32.vlgmr.msra.gmra.mrb[72].mxu1 %vm710_vm1, %v27739_v23  ;;  %25749 = vmatpush3.xpose.msk.msra.mxu0 %vm710_vm1, %v28187_v55 }
  0xb2   : > { %25754 = vmatpush3.xpose.msk.msra.mxu1 %vm710_vm1, %v28193_v56  ;;  %25750 = vmatprep.mubr.msk.f32.mxu0 %vm27496_vm0, %v32680_v0 }
  0xb3   : > { %25755 = vmatprep.mubr.msk.f32.mxu1 %vm27496_vm0, %v32680_v0  ;;  %25758 = vmatprep.subr.mxu0 %v32680_v0 }
  0xb4   : > { %25751 = vmatmul.mubr.msk.f32.vlgmr.msra.gmra.mrb[74].mxu0 %vm710_vm1, %v27762_v26  ;;  %25763 = vmatprep.subr.mxu1 %v32680_v0 }
  0xb5   : > { %25756 = vmatmul.mubr.msk.f32.vlgmr.msra.gmra.mrb[74].mxu1 %vm710_vm1, %v27765_v27  ;;  %25759 = vmatpush3.xpose.msk.msra.mxu0 %vm710_vm1, %v28213_v58 }
  0xb6   : > { %25764 = vmatpush3.xpose.msk.msra.mxu1 %vm710_vm1, %v28216_v59  ;;  %6725 = vrot.lane.b32.xlu1 %v6720_v61, %s27502_s15  ;;  %s27503_s15 = smov 116   ;;  %v28707_v61 = vld [vmem:[%s27632_s12 + $0x3c] sm:$0xf] }
  0xb7   : > { %25760 = vmatprep.mubr.msk.f32.mxu0 %vm27496_vm0, %v32680_v0  ;;  %25765 = vmatprep.mubr.msk.f32.mxu1 %vm27496_vm0, %v32680_v0 }
  0xb8   : > { %25761 = vmatmul.mubr.msk.f32.vlgmr.msra.gmra.mrb[76].mxu0 %vm710_vm1, %v27788_v30  ;;  %25768 = vmatprep.subr.mxu0 %v32680_v0 }
  0xb9   : > { %25766 = vmatmul.mubr.msk.f32.vlgmr.msra.gmra.mrb[76].mxu1 %vm710_vm1, %v27791_v31  ;;  %25773 = vmatprep.subr.mxu1 %v32680_v0 }
  0xba   : > { %25769 = vmatpush3.xpose.msk.msra.mxu0 %vm710_vm1, %v28339_v62  ;;  %25774 = vmatpush3.xpose.msk.msra.mxu1 %vm710_vm1, %v28342_v63 }
  0xbb   : > { %11678 = vmax.xlane.f32.xlu0 %v32674_v46  ;;  %5541 = vrot.lane.b32.xlu1 %v5536_v1, %s27503_s15 }
  0xbc   : > { %25770 = vmatprep.mubr.msk.f32.mxu0 %vm27496_vm0, %v32680_v0  ;;  %25775 = vmatprep.mubr.msk.f32.mxu1 %vm27496_vm0, %v32680_v0 }
  0xbd   : > { %25771 = vmatmul.mubr.msk.f32.vlgmr.msra.gmra.mrb[78].mxu0 %vm710_vm1, %v27814_v34  ;;  %25776 = vmatmul.mubr.msk.f32.vlgmr.msra.gmra.mrb[78].mxu1 %vm710_vm1, %v27817_v35 }
  0xbe   : > { %25778 = vmatprep.subr.mxu0 %v32680_v0  ;;  %25783 = vmatprep.subr.mxu1 %v32680_v0 }
  0xbf   : > { %25779 = vmatpush3.xpose.msk.msra.mxu0 %vm710_vm1, %v28107_v47  ;;  %25784 = vmatpush3.xpose.msk.msra.mxu1 %vm710_vm1, %v28113_v48 }
  0xc0   : > { %10309 = vrot.lane.b32.xlu1 %v10304_v2, %s27504_s13  ;;  %25780 = vmatprep.mubr.msk.f32.mxu0 %vm27496_vm0, %v32680_v0 }
  0xc1   : > { %25785 = vmatprep.mubr.msk.f32.mxu1 %vm27496_vm0, %v32680_v0  ;;  %25788 = vmatprep.subr.mxu0 %v32680_v0 }
  0xc2   : > { %25781 = vmatmul.mubr.msk.f32.vlgmr.msra.gmra.mrb[80].mxu0 %vm710_vm1, %v27643_v8  ;;  %25786 = vmatmul.mubr.msk.f32.vlgmr.msra.gmra.mrb[80].mxu1 %vm710_vm1, %v27646_v9 }
  0xc3   : > { %25793 = vmatprep.subr.mxu1 %v32680_v0  ;;  %25789 = vmatpush3.xpose.msk.msra.mxu0 %vm710_vm1, %v28127_v49 }
  0xc4   : > { %25794 = vmatpush3.xpose.msk.msra.mxu1 %vm710_vm1, %v28133_v50  ;;  %11493 = vrot.lane.b32.xlu1 %v11488_v3, %s27505_s17 }
  0xc5   : > { %25790 = vmatprep.mubr.msk.f32.mxu0 %vm27496_vm0, %v32680_v0  ;;  %25795 = vmatprep.mubr.msk.f32.mxu1 %vm27496_vm0, %v32680_v0 }
  0xc6   : > { %25791 = vmatmul.mubr.msk.f32.vlgmr.msra.gmra.mrb[82].mxu0 %vm710_vm1, %v27658_v10  ;;  %25798 = vmatprep.subr.mxu0 %v32680_v0 }
  0xc7   : > { %25796 = vmatmul.mubr.msk.f32.vlgmr.msra.gmra.mrb[82].mxu1 %vm710_vm1, %v27661_v11  ;;  %25803 = vmatprep.subr.mxu1 %v32680_v0 }
  0xc8   : > { %25799 = vmatpush3.xpose.msk.msra.mxu0 %vm710_vm1, %v28147_v51  ;;  %25804 = vmatpush3.xpose.msk.msra.mxu1 %vm710_vm1, %v28153_v52 }
  0xc9   : > { %4313 = vrot.lane.b32.xlu1 %v4309_v4, %s32843_s23  ;;  %25800 = vmatprep.mubr.msk.f32.mxu0 %vm27496_vm0, %v32680_v0  ;;  %s27077_s23 = smul.u32 20, %s33340_s25 }
  0xca   : > { %25805 = vmatprep.mubr.msk.f32.mxu1 %vm27496_vm0, %v32680_v0  ;;  %25808 = vmatprep.subr.mxu0 %v32680_v0 }
  0xcb   : > { %25801 = vmatmul.mubr.msk.f32.vlgmr.msra.gmra.mrb[84].mxu0 %vm710_vm1, %v27684_v14  ;;  %25806 = vmatmul.mubr.msk.f32.vlgmr.msra.gmra.mrb[84].mxu1 %vm710_vm1, %v27687_v15 }
  0xcc   : > { %25813 = vmatprep.subr.mxu1 %v32680_v0  ;;  %25809 = vmatpush3.xpose.msk.msra.mxu0 %vm710_vm1, %v28167_v53 }
  0xcd   : > { %25814 = vmatpush3.xpose.msk.msra.mxu1 %vm710_vm1, %v28173_v54  ;;  %5539 = vrot.lane.b32.xlu1 %v5535_v5, %s27503_s15 }
  0xce   : > { %25810 = vmatprep.mubr.msk.f32.mxu0 %vm27496_vm0, %v32680_v0  ;;  %25815 = vmatprep.mubr.msk.f32.mxu1 %vm27496_vm0, %v32680_v0 }
  0xcf   : > { %25811 = vmatmul.mubr.msk.f32.vlgmr.msra.gmra.mrb[86].mxu0 %vm710_vm1, %v27710_v18  ;;  %25818 = vmatprep.subr.mxu0 %v32680_v0 }
  0xd0   : > { %25816 = vmatmul.mubr.msk.f32.vlgmr.msra.gmra.mrb[86].mxu1 %vm710_vm1, %v27713_v19  ;;  %25823 = vmatprep.subr.mxu1 %v32680_v0 }
  0xd1   : > { %25819 = vmatpush3.xpose.msk.msra.mxu0 %vm710_vm1, %v28187_v55  ;;  %25824 = vmatpush3.xpose.msk.msra.mxu1 %vm710_vm1, %v28193_v56 }
  0xd2   : > { %9117 = vrot.lane.b32.xlu1 %v9113_v6, %s27500_s14  ;;  %25820 = vmatprep.mubr.msk.f32.mxu0 %vm27496_vm0, %v32680_v0  ;;  %s24222_s14 = sshll.u32 %s33336_s28, 6 }
  0xd3   : > { %25825 = vmatprep.mubr.msk.f32.mxu1 %vm27496_vm0, %v32680_v0  ;;  %10307 = vrot.lane.b32.xlu0 %v10303_v7, %s27504_s13  ;;  %s28472_s13 = sadd.s32 %s27077_s23, %s27600_s16 }
  0xd4   : > { %25821 = vmatmul.mubr.msk.f32.vlgmr.msra.gmra.mrb[88].mxu0 %vm710_vm1, %v27736_v22  ;;  %25826 = vmatmul.mubr.msk.f32.vlgmr.msra.gmra.mrb[88].mxu1 %vm710_vm1, %v27739_v23  ;;  %s24217_s16 = sshll.u32 %s28472_s13, 2  ;;  %s27506_s13 = smov 8  }
  0xd5   : > { %25828 = vmatprep.subr.mxu0 %v32680_v0  ;;  %25833 = vmatprep.subr.mxu1 %v32680_v0  ;;  %s28502_s15 = scalar_lea.vmem %s32667_s4, %s24217_s16  ;;  %s31538_s23 = scalar_lea.vmem %s32670_s7, %s24217_s16 }
  0xd6   : > { %25829 = vmatpush3.xpose.msk.msra.mxu0 %vm710_vm1, %v28213_v58  ;;  %25834 = vmatpush3.xpose.msk.msra.mxu1 %vm710_vm1, %v28216_v59  ;;  %v630_v17 = vld [vmem:[%s28502_s15] sm:$0xf]  ;;  %v631_v20 = vld [vmem:[%s28502_s15 + $0x4] sm:$0xf]  ;;  %v28528_v21 = vld [vmem:[%s28502_s15 + $0x8] sm:$0xf] }
  0xd7   : > { %25830 = vmatprep.mubr.msk.f32.mxu0 %vm27496_vm0, %v32680_v0  ;;  %25835 = vmatprep.mubr.msk.f32.mxu1 %vm27496_vm0, %v32680_v0  ;;  %v28534_v24 = vld [vmem:[%s28502_s15 + $0xc] sm:$0xf]  ;;  %v28548_v25 = vld [vmem:[%s28502_s15 + $0x10] sm:$0xf]  ;;  %v28661_v43 = vld [vmem:[%s28502_s15 + $0x38] sm:$0xf] }
  0xd8   : > { %11491 = vrot.lane.b32.xlu0 %v11487_v12, %s27505_s17  ;;  %25838 = vmatprep.subr.mxu0 %v32680_v0  ;;  %v28668_v47 = vld [vmem:[%s28502_s15 + $0x3c] sm:$0xf]  ;;  %v28702_v58 = vld [vmem:[%s27632_s12 + $0x38] sm:$0xf]  ;;  %s9140_s17 = scalar_select %p9139_p11, 1, 0 }
  0xd9   : > { %25831 = vmatmul.mubr.msk.f32.vlgmr.msra.gmra.mrb[90].mxu0 %vm710_vm1, %v27762_v26  ;;  %25836 = vmatmul.mubr.msk.f32.vlgmr.msra.gmra.mrb[90].mxu1 %vm710_vm1, %v27765_v27  ;;  %s24221_s16 = sshll.u32 %s27606_s20, 3 }
  0xda   : > { %25843 = vmatprep.subr.mxu1 %v32680_v0  ;;  %25839 = vmatpush3.xpose.msk.msra.mxu0 %vm710_vm1, %v28339_v62  ;;  %s571_s22 = sadd.s32 %s24222_s14, %s24221_s16 }
  0xdb   : > { %25844 = vmatpush3.xpose.msk.msra.mxu1 %vm710_vm1, %v28342_v63  ;;  %25840 = vmatprep.mubr.msk.f32.mxu0 %vm27496_vm0, %v32680_v0 }
  0xdc   : > { %25845 = vmatprep.mubr.msk.f32.mxu1 %vm27496_vm0, %v32680_v0  ;;  %25848 = vmatprep.subr.mxu0 %v32680_v0 }
  0xdd   : > { %25841 = vmatmul.mubr.msk.f32.vlgmr.msra.gmra.mrb[92].mxu0 %vm710_vm1, %v27788_v30  ;;  %25853 = vmatprep.subr.mxu1 %v32680_v0 }
  0xde   : > { %25846 = vmatmul.mubr.msk.f32.vlgmr.msra.gmra.mrb[92].mxu1 %vm710_vm1, %v27791_v31  ;;  %25849 = vmatpush3.xpose.msk.msra.mxu0 %vm710_vm1, %v628_v13 }
  0xdf   : > { %25854 = vmatpush3.xpose.msk.msra.mxu1 %vm710_vm1, %v629_v16  ;;  %25850 = vmatprep.mubr.msk.f32.mxu0 %vm27496_vm0, %v32680_v0  ;;  %v28737_v16 = vpop.permute.xlu0 %3131 }
  0xe0   : > { %25855 = vmatprep.mubr.msk.f32.mxu1 %vm27496_vm0, %v32680_v0  ;;  %25858 = vmatprep.subr.mxu0 %v32680_v0 }
  0xe1   : > { %25851 = vmatmul.mubr.msk.f32.vlgmr.msra.gmra.mrb[94].mxu0 %vm710_vm1, %v27814_v34  ;;  %25863 = vmatprep.subr.mxu1 %v32680_v0 }
  0xe2   : > { %25856 = vmatmul.mubr.msk.f32.vlgmr.msra.gmra.mrb[94].mxu1 %vm710_vm1, %v27817_v35  ;;  %25859 = vmatpush3.xpose.msk.msra.mxu0 %vm710_vm1, %v630_v17  ;;  %v28740_v17 = vld [vmem:[%s27632_s12] sm:$0xf] }
  0xe3   : > { %25864 = vmatpush3.xpose.msk.msra.mxu1 %vm710_vm1, %v631_v20  ;;  %25860 = vmatprep.mubr.msk.f32.mxu0 %vm27496_vm0, %v32680_v0  ;;  %v28745_v20 = vld [vmem:[%s27632_s12 + $0x4] sm:$0xf] }
  0xe4   : > { %25865 = vmatprep.mubr.msk.f32.mxu1 %vm27496_vm0, %v32680_v0  ;;  %25868 = vmatprep.subr.mxu0 %v32680_v0 }
  0xe5   : > { %25861 = vmatmul.mubr.msk.f32.vlgmr.msra.gmra.mrb[96].mxu0 %vm710_vm1, %v27643_v8  ;;  %25873 = vmatprep.subr.mxu1 %v32680_v0  ;;  %v28554_v8 = vld [vmem:[%s28502_s15 + $0x14] sm:$0xf] }
  0xe6   : > { %25866 = vmatmul.mubr.msk.f32.vlgmr.msra.gmra.mrb[96].mxu1 %vm710_vm1, %v27646_v9  ;;  %25869 = vmatpush3.xpose.msk.msra.mxu0 %vm710_vm1, %v28528_v21  ;;  %v28568_v9 = vld [vmem:[%s28502_s15 + $0x18] sm:$0xf] }
  0xe7   : > { %25874 = vmatpush3.xpose.msk.msra.mxu1 %vm710_vm1, %v28534_v24  ;;  %25870 = vmatprep.mubr.msk.f32.mxu0 %vm27496_vm0, %v32680_v0 }
  0xe8   : > { %25875 = vmatprep.mubr.msk.f32.mxu1 %vm27496_vm0, %v32680_v0  ;;  %25878 = vmatprep.subr.mxu0 %v32680_v0 }
  0xe9   : > { %25871 = vmatmul.mubr.msk.f32.vlgmr.msra.gmra.mrb[98].mxu0 %vm710_vm1, %v27658_v10  ;;  %25883 = vmatprep.subr.mxu1 %v32680_v0  ;;  %v28574_v10 = vld [vmem:[%s28502_s15 + $0x1c] sm:$0xf] }
  0xea   : > { %25876 = vmatmul.mubr.msk.f32.vlgmr.msra.gmra.mrb[98].mxu1 %vm710_vm1, %v27661_v11  ;;  %25879 = vmatpush3.xpose.msk.msra.mxu0 %vm710_vm1, %v28548_v25  ;;  %v28588_v11 = vld [vmem:[%s28502_s15 + $0x20] sm:$0xf] }
  0xeb   : > { %25884 = vmatpush3.xpose.msk.msra.mxu1 %vm710_vm1, %v28554_v8  ;;  %25880 = vmatprep.mubr.msk.f32.mxu0 %vm27496_vm0, %v32680_v0 }
  0xec   : > { %25885 = vmatprep.mubr.msk.f32.mxu1 %vm27496_vm0, %v32680_v0  ;;  %25888 = vmatprep.subr.mxu0 %v32680_v0 }
  0xed   : > { %25881 = vmatmul.mubr.msk.f32.vlgmr.msra.gmra.mrb[100].mxu0 %vm710_vm1, %v27684_v14  ;;  %25893 = vmatprep.subr.mxu1 %v32680_v0  ;;  %v28594_v14 = vld [vmem:[%s28502_s15 + $0x24] sm:$0xf] }
  0xee   : > { %25886 = vmatmul.mubr.msk.f32.vlgmr.msra.gmra.mrb[100].mxu1 %vm710_vm1, %v27687_v15  ;;  %25889 = vmatpush3.xpose.msk.msra.mxu0 %vm710_vm1, %v28568_v9 }
  0xef   : > { %25894 = vmatpush3.xpose.msk.msra.mxu1 %vm710_vm1, %v28574_v10  ;;  %25890 = vmatprep.mubr.msk.f32.mxu0 %vm27496_vm0, %v32680_v0 }
  0xf0   : > { %25895 = vmatprep.mubr.msk.f32.mxu1 %vm27496_vm0, %v32680_v0  ;;  %25898 = vmatprep.subr.mxu0 %v32680_v0 }
  0xf1   : > { %25891 = vmatmul.mubr.msk.f32.vlgmr.msra.gmra.mrb[102].mxu0 %vm710_vm1, %v27710_v18  ;;  %25903 = vmatprep.subr.mxu1 %v32680_v0  ;;  %v859_v15 = vpop.f32.mrb[0].mxu1  ;;  %v783_v28 = vpop.f32.mrb[0].mxu0  ;;  %v28608_v18 = vld [vmem:[%s28502_s15 + $0x28] sm:$0xf] }
  0xf2   : > { %25896 = vmatmul.mubr.msk.f32.vlgmr.msra.gmra.mrb[102].mxu1 %vm710_vm1, %v27713_v19  ;;  %25899 = vmatpush3.xpose.msk.msra.mxu0 %vm710_vm1, %v28588_v11  ;;  %v25387_v29 = vpop.f32.mrb[1].mxu1  ;;  %v25382_v32 = vpop.f32.mrb[1].mxu0  ;;  %v28615_v19 = vld [vmem:[%s28502_s15 + $0x2c] sm:$0xf] }
  0xf3   : > { %25904 = vmatpush3.xpose.msk.msra.mxu1 %vm710_vm1, %v28594_v14  ;;  %25900 = vmatprep.mubr.msk.f32.mxu0 %vm27496_vm0, %v32680_v0 }
  0xf4   : > { %25905 = vmatprep.mubr.msk.f32.mxu1 %vm27496_vm0, %v32680_v0  ;;  %25908 = vmatprep.subr.mxu0 %v32680_v0 }
  0xf5   : > { %25901 = vmatmul.mubr.msk.f32.vlgmr.msra.gmra.mrb[104].mxu0 %vm710_vm1, %v27736_v22  ;;  %25913 = vmatprep.subr.mxu1 %v32680_v0  ;;  %v1011_v33 = vpop.f32.mrb[2].mxu1  ;;  %v935_v34 = vpop.f32.mrb[2].mxu0  ;;  %v28633_v22 = vld [vmem:[%s28502_s15 + $0x30] sm:$0xf] }
  0xf6   : > { %25906 = vmatmul.mubr.msk.f32.vlgmr.msra.gmra.mrb[104].mxu1 %vm710_vm1, %v27739_v23  ;;  %25909 = vmatpush3.xpose.msk.msra.mxu0 %vm710_vm1, %v28608_v18  ;;  %v25397_v35 = vpop.f32.mrb[3].mxu1  ;;  %v25392_v36 = vpop.f32.mrb[3].mxu0  ;;  %v28640_v23 = vld [vmem:[%s28502_s15 + $0x34] sm:$0xf]  ;;  %v1930_v37 = vmul.f32 0.35355338, %v1011_v33 }
  0xf7   : > { %25914 = vmatpush3.xpose.msk.msra.mxu1 %vm710_vm1, %v28615_v19  ;;  %11672 = vmax.xlane.f32.xlu1 %v32674_v46  ;;  %v1929_v51 = vmul.f32 0.35355338, %v935_v34 }
  0xf8   : > { %11822 = vmax.xlane.f32.xlu0 %v32674_v46  ;;  %25910 = vmatprep.mubr.msk.f32.mxu0 %vm27496_vm0, %v32680_v0 }
  0xf9   : > { %25915 = vmatprep.mubr.msk.f32.mxu1 %vm27496_vm0, %v32680_v0  ;;  %25911 = vmatmul.mubr.msk.f32.vlgmr.msra.gmra.mrb[106].mxu0 %vm710_vm1, %v27762_v26  ;;  %v1163_v38 = vpop.f32.mrb[4].mxu1  ;;  %v1087_v39 = vpop.f32.mrb[4].mxu0  ;;  %v1963_v26 = vstv %s1962_s18  ;;  %s29993_s18 = scalar_lea.vmem %s32668_s5, %s24215_s24 }
  0xfa   : > { %25916 = vmatmul.mubr.msk.f32.vlgmr.msra.gmra.mrb[106].mxu1 %vm710_vm1, %v27765_v27  ;;  %25918 = vmatprep.subr.mxu0 %v32680_v0  ;;  %v25407_v41 = vpop.f32.mrb[5].mxu1  ;;  %v25402_v42 = vpop.f32.mrb[5].mxu0  ;;  %v1948_v27 = vadd.f32 %v28648_v40, %v1930_v37  ;;  %v1932_v48 = vmul.f32 0.35355338, %v1163_v38  ;;  %vm28670_vm2 = vcmp.eq.s32.totalorder %v1963_v26, 1 }
  0xfb   : > { %25923 = vmatprep.subr.mxu1 %v32680_v0  ;;  %25919 = vmatpush3.xpose.msk.msra.mxu0 %vm710_vm1, %v28633_v22  ;;  %v1931_v63 = vmul.f32 0.35355338, %v1087_v39  ;;  %v28776_v41 = vld [vmem:[%s27632_s12 + $0x8] sm:$0xf] }
  0xfc   : > { %25924 = vmatpush3.xpose.msk.msra.mxu1 %vm710_vm1, %v28640_v23  ;;  %11816 = vmax.xlane.f32.xlu1 %v32674_v46  ;;  %v1950_v55 = vadd.f32 %v28648_v40, %v1932_v48 }
  0xfd   : > { %11960 = vmax.xlane.f32.xlu0 %v32674_v46  ;;  %25920 = vmatprep.mubr.msk.f32.mxu0 %vm27496_vm0, %v32680_v0  ;;  %v1315_v44 = vpop.f32.mrb[6].mxu1  ;;  %v1239_v45 = vpop.f32.mrb[6].mxu0 }
  0xfe   : > { %25925 = vmatprep.mubr.msk.f32.mxu1 %vm27496_vm0, %v32680_v0  ;;  %25921 = vmatmul.mubr.msk.f32.vlgmr.msra.gmra.mrb[108].mxu0 %vm710_vm1, %v27788_v30  ;;  %v25417_v50 = vpop.f32.mrb[7].mxu1  ;;  %v25412_v52 = vpop.f32.mrb[7].mxu0  ;;  %v28683_v30 = vld [vmem:[%s32663_s0] sm:$0xf]  ;;  %v1934_v59 = vmul.f32 0.35355338, %v1315_v44 }
  0xff   : > { %25926 = vmatmul.mubr.msk.f32.vlgmr.msra.gmra.mrb[108].mxu1 %vm710_vm1, %v27791_v31  ;;  %25928 = vmatprep.subr.mxu0 %v32680_v0  ;;  %v28690_v31 = vsel %vm28670_vm2, -inf, %v1948_v27  ;;  %v1947_v57 = vadd.f32 %v28683_v30, %v1929_v51  ;;  %v28724_v3 = vsel %vm28670_vm2, -inf, %v1950_v55  ;;  %v1949_v12 = vadd.f32 %v28683_v30, %v1931_v63  ;;  %v28781_v44 = vld [vmem:[%s27632_s12 + $0xc] sm:$0xf]  ;;  %v28789_v50 = vpop.permute.xlu0 %4315 }
 0x100   : > { %25933 = vmatprep.subr.mxu1 %v32680_v0  ;;  %25929 = vmatpush3.xpose.msk.msra.mxu0 %vm710_vm1, %v28661_v43  ;;  %32846 = vst [vmem:[#allocation2_spill] sm:$0xff] %v28690_v31  ;;  %v11539_v62 = vsel %vm11529_vm3, %v28690_v31, -inf  ;;  %32847 = vst [vmem:[#allocation3_spill] sm:$0xff] %v28724_v3  ;;  %v1952_v5 = vadd.f32 %v28648_v40, %v1934_v59 }
 0x101   : > { %25934 = vmatpush3.xpose.msk.msra.mxu1 %vm710_vm1, %v28668_v47  ;;  %11531 = vmax.xlane.f32.xlu1 %v32674_v46  ;;  %v1467_v53 = vpop.f32.mrb[8].mxu1  ;;  %v28692_v54 = vpop.f32.mrb[8].mxu0  ;;  %v28731_v6 = vsel %vm28670_vm2, -inf, %v1947_v57  ;;  %v28769_v37 = vsel %vm28670_vm2, -inf, %v1949_v12 }
 0x102   : > { %11675 = vmax.xlane.f32.xlu0 %v32674_v46  ;;  %25930 = vmatprep.mubr.msk.f32.mxu0 %vm27496_vm0, %v32680_v0  ;;  %v25427_v56 = vpop.f32.mrb[9].mxu1  ;;  %v25422_v60 = vpop.f32.mrb[9].mxu0  ;;  %32848 = vst [vmem:[#allocation4_spill] sm:$0xff] %v28731_v6  ;;  %v1936_v13 = vmul.f32 0.35355338, %v1467_v53  ;;  %v11536_v29 = vsel %vm11529_vm3, %v28731_v6, -inf }
 0x103   : > { %25935 = vmatprep.mubr.msk.f32.mxu1 %vm27496_vm0, %v32680_v0  ;;  %25931 = vmatmul.mubr.msk.f32.vlgmr.msra.gmra.mrb[110].mxu0 %vm710_vm1, %v28702_v58  ;;  %v28762_v34 = vsel %vm28670_vm2, -inf, %v1952_v5  ;;  %32850 = vst [vmem:[#allocation6_spill] sm:$0xff] %v28769_v37  ;;  %v1935_v48 = vmul.f32 0.35355338, %v28692_v54  ;;  %v11542_v53 = vsel %vm11529_vm3, %v28769_v37, -inf  ;;  %v32861_v6 = vmov 0.0  }
 0x104   : > { %25936 = vmatmul.mubr.msk.f32.vlgmr.msra.gmra.mrb[110].mxu1 %vm710_vm1, %v28707_v61  ;;  %25938 = vmatprep.subr.mxu0 %v32680_v0  ;;  %32849 = vst [vmem:[#allocation5_spill] sm:$0xff] %v28762_v34  ;;  %v1954_v36 = vadd.f32 %v28648_v40, %v1936_v13 }
 0x105   : > { %25943 = vmatprep.subr.mxu1 %v32680_v0  ;;  %25939 = vmatpush3.xpose.msk.msra.mxu0 %vm710_vm1, %v28528_v21  ;;  %v1619_v1 = vpop.f32.mrb[10].mxu1  ;;  %v28717_v2 = vpop.f32.mrb[10].mxu0  ;;  %v11545_v21 = vsel %vm11529_vm3, %v28724_v3, -inf  ;;  %v1953_v63 = vadd.f32 %v28683_v30, %v1935_v48 }
 0x106   : > { %25944 = vmatpush3.xpose.msk.msra.mxu1 %vm710_vm1, %v28534_v24  ;;  %11819 = vmax.xlane.f32.xlu1 %v32674_v46  ;;  %v25437_v4 = vpop.f32.mrb[11].mxu1  ;;  %v25432_v7 = vpop.f32.mrb[11].mxu0  ;;  %v1933_v24 = vmul.f32 0.35355338, %v1239_v45  ;;  %v1938_v26 = vmul.f32 0.35355338, %v1619_v1 }
 0x107   : > { %25945 = vmatprep.mubr.msk.f32.mxu1 %vm27496_vm0, %v32680_v0  ;;  %11540 = vmax.xlane.f32.xlu0 %v11539_v62  ;;  %v11551_v45 = vsel %vm11529_vm3, %v28762_v34, -inf  ;;  %v28802_v54 = vsel %vm28670_vm2, -inf, %v1954_v36  ;;  %v28818_v1 = vld [vmem:[%s27632_s12 + $0x10] sm:$0xf]  ;;  %v28823_v7 = vld [vmem:[%s27632_s12 + $0x14] sm:$0xf] }
 0x108   : > { %25940 = vmatprep.mubr.msk.f32.mxu0 %vm27496_vm0, %v32680_v0  ;;  %25948 = vmatprep.subr.mxu0 %v32680_v0  ;;  %v1951_v39 = vadd.f32 %v28683_v30, %v1933_v24  ;;  %32851 = vst [vmem:[#allocation7_spill] sm:$0xff] %v28802_v54  ;;  %v1956_v57 = vadd.f32 %v28648_v40, %v1938_v26  ;;  %v11557_v12 = vsel %vm11529_vm3, %v28802_v54, -inf  ;;  %v1937_v13 = vmul.f32 0.35355338, %v28717_v2 }
 0x109   : > { %25941 = vmatmul.mubr.msk.f32.vlgmr.msra.gmra.mrb[112].mxu0 %vm710_vm1, %v28740_v17  ;;  %25946 = vmatmul.mubr.msk.f32.vlgmr.msra.gmra.mrb[112].mxu1 %vm710_vm1, %v28745_v20  ;;  %v1771_v15 = vpop.f32.mrb[12].mxu1  ;;  %v1695_v28 = vpop.f32.mrb[12].mxu0 }
 0x10a   : > { %25953 = vmatprep.subr.mxu1 %v32680_v0  ;;  %25949 = vmatpush3.xpose.msk.msra.mxu0 %vm710_vm1, %v28548_v25  ;;  %v25447_v32 = vpop.f32.mrb[13].mxu1  ;;  %v1939_v33 = vmul.f32 0.35355338, %v1695_v28  ;;  %v25442_v35 = vpop.f32.mrb[13].mxu0  ;;  %v28812_v59 = vsel %vm28670_vm2, -inf, %v1951_v39  ;;  %v28844_v2 = vsel %vm28670_vm2, -inf, %v1956_v57  ;;  %v1955_v36 = vadd.f32 %v28683_v30, %v1937_v13 }
 0x10b   : > { %25954 = vmatpush3.xpose.msk.msra.mxu1 %vm710_vm1, %v28554_v8  ;;  %25955 = vmatprep.mubr.msk.f32.mxu1 %vm27496_vm0, %v32680_v0  ;;  %32852 = vst [vmem:[#allocation8_spill] sm:$0xff] %v28812_v59  ;;  %v1940_v4 = vmul.f32 0.35355338, %v1771_v15  ;;  %v11548_v24 = vsel %vm11529_vm3, %v28812_v59, -inf  ;;  %v28836_v15 = vpop.permute.xlu0 %7893  ;;  %32853 = vst [vmem:[#allocation9_spill] sm:$0xff] %v28844_v2  ;;  %v11563_v48 = vsel %vm11529_vm3, %v28844_v2, -inf }
 0x10c   : > { %11546 = vmax.xlane.f32.xlu1 %v11545_v21  ;;  %25950 = vmatprep.mubr.msk.f32.mxu0 %vm27496_vm0, %v32680_v0  ;;  %v28772_v38 = vadd.f32 %v28683_v30, %v1939_v33  ;;  %v28853_v33 = vsel %vm28670_vm2, -inf, %v1953_v63  ;;  %v28857_v39 = vld [vmem:[%s27632_s12 + $0x18] sm:$0xf]  ;;  %v28899_v13 = vld [vmem:[%s27632_s12 + $0x24] sm:$0xf] }
 0x10d   : > { %11537 = vmax.xlane.f32.xlu0 %v11536_v29  ;;  %25951 = vmatmul.mubr.msk.f32.vlgmr.msra.gmra.mrb[114].mxu0 %vm710_vm1, %v28776_v41  ;;  %v1923_v42 = vpop.f32.mrb[14].mxu1  ;;  %v1847_v27 = vpop.f32.mrb[14].mxu0  ;;  %v1958_v32 = vadd.f32 %v28648_v40, %v1940_v4  ;;  %32854 = vst [vmem:[#allocation10_spill] sm:$0xff] %v28853_v33  ;;  %v28891_v4 = vsel %vm28670_vm2, -inf, %v1955_v36  ;;  %v28979_v59 = vld [vmem:[%s27632_s12 + $0x34] sm:$0xf] }
 0x10e   : > { %25956 = vmatmul.mubr.msk.f32.vlgmr.msra.gmra.mrb[114].mxu1 %vm710_vm1, %v28781_v44  ;;  %25958 = vmatprep.subr.mxu0 %v32680_v0  ;;  %v25457_v51 = vpop.f32.mrb[15].mxu1  ;;  %v1941_v52 = vmul.f32 0.35355338, %v1847_v27  ;;  %v25452_v55 = vpop.f32.mrb[15].mxu0  ;;  %v1942_v26 = vmul.f32 0.35355338, %v1923_v42 }
 0x10f   : > { %25963 = vmatprep.subr.mxu1 %v32680_v0  ;;  %25959 = vmatpush3.xpose.msk.msra.mxu0 %vm710_vm1, %v28568_v9  ;;  %32856 = vst [vmem:[#allocation12_spill] sm:$0xff] %v28891_v4 }
 0x110   : > { %25964 = vmatpush3.xpose.msk.msra.mxu1 %vm710_vm1, %v28574_v10  ;;  %25960 = vmatprep.mubr.msk.f32.mxu0 %vm27496_vm0, %v32680_v0  ;;  %v28805_v56 = vadd.f32 %v28683_v30, %v1941_v52  ;;  %v11554_v30 = vsel %vm11529_vm3, %v28853_v33, -inf  ;;  %v28882_v52 = vsel %vm28670_vm2, -inf, %v1958_v32  ;;  %v1960_v57 = vadd.f32 %v28648_v40, %v1942_v26  ;;  %v28971_v33 = vld [vmem:[%s27632_s12 + $0x30] sm:$0xf] }
 0x111   : > { %25965 = vmatprep.mubr.msk.f32.mxu1 %vm27496_vm0, %v32680_v0  ;;  %11552 = vmax.xlane.f32.xlu0 %v11551_v45  ;;  %v2119_v60 = vpop.f32.mrb[16].mxu1  ;;  %v28814_v62 = vpop.f32.mrb[16].mxu0  ;;  %v28862_v45 = vld [vmem:[%s27632_s12 + $0x1c] sm:$0xf]  ;;  %32855 = vst [vmem:[#allocation11_spill] sm:$0xff] %v28882_v52  ;;  %v11569_v40 = vsel %vm11529_vm3, %v28882_v52, -inf }
 0x112   : > { %11543 = vmax.xlane.f32.xlu1 %v11542_v53  ;;  %25961 = vmatmul.mubr.msk.f32.vlgmr.msra.gmra.mrb[116].mxu0 %vm710_vm1, %v28818_v1  ;;  %v25467_v5 = vpop.f32.mrb[17].mxu1  ;;  %v25462_v21 = vpop.f32.mrb[17].mxu0  ;;  %v3110_v63 = vmul.f32 0.35355338, %v2119_v60  ;;  %v28922_v26 = vsel %vm28670_vm2, -inf, %v1960_v57 }
 0x113   : > { %25966 = vmatmul.mubr.msk.f32.vlgmr.msra.gmra.mrb[116].mxu1 %vm710_vm1, %v28823_v7  ;;  %25968 = vmatprep.subr.mxu0 %v32680_v0  ;;  %v28884_v53 = vpop.permute.xlu0 %9119  ;;  %32857 = vst [vmem:[#allocation13_spill] sm:$0xff] %v28922_v26 }
 0x114   : > { %25973 = vmatprep.subr.mxu1 %v32680_v0  ;;  %25969 = vmatpush3.xpose.msk.msra.mxu0 %vm710_vm1, %v28588_v11 }
 0x115   : > { %25974 = vmatpush3.xpose.msk.msra.mxu1 %vm710_vm1, %v28594_v14  ;;  %25970 = vmatprep.mubr.msk.f32.mxu0 %vm27496_vm0, %v32680_v0  ;;  %v2259_v28 = vpop.f32.mrb[18].mxu1  ;;  %v28846_v29 = vpop.f32.mrb[18].mxu0 }
 0x116   : > { %25975 = vmatprep.mubr.msk.f32.mxu1 %vm27496_vm0, %v32680_v0  ;;  %11558 = vmax.xlane.f32.xlu1 %v11557_v12  ;;  %v25477_v35 = vpop.f32.mrb[19].mxu1  ;;  %v25472_v27 = vpop.f32.mrb[19].mxu0  ;;  %v28894_v12 = vld [vmem:[%s27632_s12 + $0x20] sm:$0xf]  ;;  %v3112_v36 = vmul.f32 0.35355338, %v2259_v28 }
 0x117   : > { %11549 = vmax.xlane.f32.xlu0 %v11548_v24  ;;  %25971 = vmatmul.mubr.msk.f32.vlgmr.msra.gmra.mrb[118].mxu0 %vm710_vm1, %v28857_v39  ;;  %v11560_v24 = vsel %vm11529_vm3, %v28891_v4, -inf  ;;  %v3136_v35 = vadd.f32 %v28737_v16, %v3110_v63  ;;  %v28937_v63 = vld [vmem:[%s27632_s12 + $0x2c] sm:$0xf] }
 0x118   : > { %25976 = vmatmul.mubr.msk.f32.vlgmr.msra.gmra.mrb[118].mxu1 %vm710_vm1, %v28862_v45  ;;  %25978 = vmatprep.subr.mxu0 %v32680_v0 }
 0x119   : > { %25983 = vmatprep.subr.mxu1 %v32680_v0  ;;  %25979 = vmatpush3.xpose.msk.msra.mxu0 %vm710_vm1, %v28608_v18  ;;  %v2329_v42 = vpop.f32.mrb[20].mxu0  ;;  %v28874_v51 = vpop.f32.mrb[20].mxu1 }
 0x11a   : > { %25984 = vmatpush3.xpose.msk.msra.mxu1 %vm710_vm1, %v28615_v19  ;;  %25980 = vmatprep.mubr.msk.f32.mxu0 %vm27496_vm0, %v32680_v0  ;;  %v25487_v55 = vpop.f32.mrb[21].mxu1  ;;  %v25482_v5 = vpop.f32.mrb[21].mxu0 }
 0x11b   : > { %25985 = vmatprep.mubr.msk.f32.mxu1 %vm27496_vm0, %v32680_v0  ;;  %11564 = vmax.xlane.f32.xlu0 %v11563_v48  ;;  %v3109_v48 = vmul.f32 0.35355338, %v28814_v62  ;;  %v28930_v55 = vld [vmem:[%s27632_s12 + $0x28] sm:$0xf]  ;;  %v11575_v62 = vsel %vm11529_vm3, %v28922_v26, -inf }
 0x11c   : > { %11555 = vmax.xlane.f32.xlu1 %v11554_v30  ;;  %25981 = vmatmul.mubr.msk.f32.vlgmr.msra.gmra.mrb[120].mxu0 %vm710_vm1, %v28894_v12  ;;  %v28927_v30 = vpop.permute.xlu0 %3129 }
 0x11d   : > { %25986 = vmatmul.mubr.msk.f32.vlgmr.msra.gmra.mrb[120].mxu1 %vm710_vm1, %v28899_v13  ;;  %25988 = vmatprep.subr.mxu0 %v32680_v0  ;;  %v28906_v60 = vpop.f32.mrb[22].mxu1  ;;  %v28908_v21 = vpop.f32.mrb[22].mxu0  ;;  %v3135_v46 = vadd.f32 %v28927_v30, %v3109_v48 }
 0x11e   : > { %25993 = vmatprep.subr.mxu1 %v32680_v0  ;;  %25989 = vmatpush3.xpose.msk.msra.mxu0 %vm710_vm1, %v28633_v22  ;;  %v25497_v32 = vpop.f32.mrb[23].mxu1  ;;  %v25492_v27 = vpop.f32.mrb[23].mxu0 }
 0x11f   : > { %25994 = vmatpush3.xpose.msk.msra.mxu1 %vm710_vm1, %v28640_v23  ;;  %25990 = vmatprep.mubr.msk.f32.mxu0 %vm27496_vm0, %v32680_v0  ;;  %v3111_v27 = vmul.f32 0.35355338, %v28846_v29 }
 0x120   : > { %25995 = vmatprep.mubr.msk.f32.mxu1 %vm27496_vm0, %v32680_v0  ;;  %11570 = vmax.xlane.f32.xlu1 %v11569_v40  ;;  %v3138_v40 = vadd.f32 %v28737_v16, %v3112_v36  ;;  %v3113_v36 = vmul.f32 0.35355338, %v2329_v42 }
 0x121   : > { %11561 = vmax.xlane.f32.xlu0 %v11560_v24  ;;  %25991 = vmatmul.mubr.msk.f32.vlgmr.msra.gmra.mrb[122].mxu0 %vm710_vm1, %v28930_v55  ;;  %v28934_v28 = vpop.f32.mrb[24].mxu0  ;;  %v2679_v57 = vpop.f32.mrb[24].mxu1  ;;  %v28950_v24 = vsel %vm28670_vm2, -inf, %v3136_v35  ;;  %v28964_v35 = vld [vmem:[%s28502_s15 + $0x44] sm:$0xf]  ;;  %v3137_v37 = vadd.f32 %v28927_v30, %v3111_v27 }
 0x122   : > { %25996 = vmatmul.mubr.msk.f32.vlgmr.msra.gmra.mrb[122].mxu1 %vm710_vm1, %v28937_v63  ;;  %25998 = vmatprep.subr.mxu0 %v32680_v0  ;;  %v25507_v5 = vpop.f32.mrb[25].mxu1  ;;  %32858 = vst [vmem:[#allocation14_spill] sm:$0xff] %v28950_v24  ;;  %v25502_v32 = vpop.f32.mrb[25].mxu0  ;;  %v11581_v29 = vsel %vm11529_vm3, %v28950_v24, -inf  ;;  %v28986_v42 = vsel %vm28670_vm2, -inf, %v3138_v40 }
 0x123   : > { %26003 = vmatprep.subr.mxu1 %v32680_v0  ;;  %25999 = vmatpush3.xpose.msk.msra.mxu0 %vm710_vm1, %v28661_v43  ;;  %v28958_v5 = vld [vmem:[%s28502_s15 + $0x40] sm:$0xf]  ;;  %32859 = vst [vmem:[#allocation15_spill] sm:$0xff] %v28986_v42  ;;  %v11587_v27 = vsel %vm11529_vm3, %v28986_v42, -inf }
 0x124   : > { %26004 = vmatpush3.xpose.msk.msra.mxu1 %vm710_vm1, %v28668_v47  ;;  %26000 = vmatprep.mubr.msk.f32.mxu0 %vm27496_vm0, %v32680_v0 }
 0x125   : > { %26005 = vmatprep.mubr.msk.f32.mxu1 %vm27496_vm0, %v32680_v0  ;;  %11576 = vmax.xlane.f32.xlu0 %v11575_v62  ;;  %v28966_v32 = vpop.f32.mrb[26].mxu0  ;;  %v28968_v4 = vpop.f32.mrb[26].mxu1 }
 0x126   : > { %26001 = vmatmul.mubr.msk.f32.vlgmr.msra.gmra.mrb[124].mxu0 %vm710_vm1, %v28971_v33  ;;  %26008 = vmatprep.subr.mxu0 %v32680_v0  ;;  %v25517_v48 = vpop.f32.mrb[27].mxu1  ;;  %v25512_v62 = vpop.f32.mrb[27].mxu0 }
 0x127   : > { %26006 = vmatmul.mubr.msk.f32.vlgmr.msra.gmra.mrb[124].mxu1 %vm710_vm1, %v28979_v59  ;;  %26013 = vmatprep.subr.mxu1 %v32680_v0  ;;  %v28995_v48 = vsel %vm28670_vm2, -inf, %v3135_v46  ;;  %v3139_v0 = vadd.f32 %v28927_v30, %v3113_v36  ;;  %v3116_v46 = vmul.f32 0.35355338, %v28906_v60  ;;  %v3114_v36 = vmul.f32 0.35355338, %v28874_v51 }
 0x128   : > { %26009 = vmatpush3.xpose.msk.msra.mxu0 %vm710_vm1, %v28958_v5  ;;  %26014 = vmatpush3.xpose.msk.msra.mxu1 %vm710_vm1, %v28964_v35  ;;  %32860 = vst [vmem:[#allocation16_spill] sm:$0xff] %v28995_v48  ;;  %v11578_v52 = vsel %vm11529_vm3, %v28995_v48, -inf  ;;  %v29022_v60 = vsel %vm28670_vm2, -inf, %v3137_v37 }
 0x129   : > { %11582 = vmax.xlane.f32.xlu1 %v11581_v29  ;;  %26010 = vmatprep.mubr.msk.f32.mxu0 %vm27496_vm0, %v32861_v6  ;;  %v29000_v40 = vpop.f32.mrb[28].mxu0  ;;  %v29002_v62 = vpop.f32.mrb[28].mxu1  ;;  %32862 = vst [vmem:[#allocation17_spill] sm:$0xff] %v29022_v60  ;;  %v3142_v51 = vadd.f32 %v28737_v16, %v3116_v46 }
 0x12a   : > { %26015 = vmatprep.mubr.msk.f32.mxu1 %vm27496_vm0, %v32861_v6  ;;  %26018 = vmatprep.subr.mxu0 %v32861_v6  ;;  %v25527_v29 = vpop.f32.mrb[29].mxu1  ;;  %v25522_v2 = vpop.f32.mrb[29].mxu0 }
 0x12b   : > { %26011 = vmatmul.mubr.msk.f32.vlgmr.msra.gmra.mrb[126].mxu0 %vm710_vm1, %v28702_v58  ;;  %26016 = vmatmul.mubr.msk.f32.vlgmr.msra.gmra.mrb[126].mxu1 %vm710_vm1, %v28707_v61  ;;  %v29028_v58 = vsel %vm28670_vm2, -inf, %v3139_v0  ;;  %v29030_v61 = vpop.permute.xlu1 %6725  ;;  %v11584_v0 = vsel %vm11529_vm3, %v29022_v60, -inf }
 0x12c   : > { %26023 = vmatprep.subr.mxu1 %v32861_v6  ;;  %26019 = vmatpush3.xpose.msk.msra.mxu0 %vm710_vm1, %v28548_v25  ;;  %32863 = vst [vmem:[#allocation18_spill] sm:$0xff] %v29028_v58  ;;  %v3118_v25 = vmul.f32 0.35355338, %v2679_v57  ;;  %v11590_v57 = vsel %vm11529_vm3, %v29028_v58, -inf }
 0x12d   : > { %26024 = vmatpush3.xpose.msk.msra.mxu1 %vm710_vm1, %v28554_v8  ;;  %11588 = vmax.xlane.f32.xlu1 %v11587_v27  ;;  %v29032_v2 = vpop.f32.mrb[30].mxu0  ;;  %v29037_v37 = vpop.f32.mrb[30].mxu1  ;;  %v3140_v8 = vadd.f32 %v28737_v16, %v3114_v36  ;;  %v3115_v27 = vmul.f32 0.35355338, %v28908_v21  ;;  %v29064_v36 = vsel %vm28670_vm2, -inf, %v3142_v51 }
 0x12e   : > { %11579 = vmax.xlane.f32.xlu0 %v11578_v52  ;;  %26020 = vmatprep.mubr.msk.f32.mxu0 %vm27496_vm0, %v32861_v6  ;;  %v25532_v29 = vpop.f32.mrb[31].mxu0  ;;  %v25537_v52 = vpop.f32.mrb[31].mxu1  ;;  %32864 = vst [vmem:[#allocation19_spill] sm:$0xff] %v29064_v36  ;;  %v3120_v21 = vmul.f32 0.35355338, %v28968_v4 }
 0x12f   : > { %26025 = vmatprep.mubr.msk.f32.mxu1 %vm27496_vm0, %v32861_v6  ;;  %26021 = vmatmul.mubr.msk.f32.vlgmr.msra.gmra.mrb[128].mxu0 %vm710_vm1, %v28740_v17  ;;  %v29073_v52 = vpop.permute.xlu1 %5541  ;;  %v3141_v51 = vadd.f32 %v28927_v30, %v3115_v27 }
 0x130   : > { %26026 = vmatmul.mubr.msk.f32.vlgmr.msra.gmra.mrb[128].mxu1 %vm710_vm1, %v28745_v20  ;;  %26028 = vmatprep.subr.mxu0 %v32861_v6  ;;  %v3144_v20 = vadd.f32 %v28737_v16, %v3118_v25  ;;  %v11599_v25 = vsel %vm11529_vm3, %v29064_v36, -inf }
 0x131   : > { %26033 = vmatprep.subr.mxu1 %v32861_v6  ;;  %26029 = vmatpush3.xpose.msk.msra.mxu0 %vm710_vm1, %v28568_v9  ;;  %v29055_v17 = vpop.f32.mrb[32].mxu1  ;;  %v29057_v46 = vpop.f32.mrb[32].mxu0  ;;  %v29070_v9 = vsel %vm28670_vm2, -inf, %v3140_v8  ;;  %v3117_v8 = vmul.f32 0.35355338, %v28934_v28 }
 0x132   : > { %26034 = vmatpush3.xpose.msk.msra.mxu1 %vm710_vm1, %v28574_v10  ;;  %11585 = vmax.xlane.f32.xlu1 %v11584_v0  ;;  %v25547_v29 = vpop.f32.mrb[33].mxu1  ;;  %32865 = vst [vmem:[#allocation20_spill] sm:$0xff] %v29070_v9  ;;  %v25542_v10 = vpop.f32.mrb[33].mxu0 }
 0x133   : > { %11591 = vmax.xlane.f32.xlu0 %v11590_v57  ;;  %26030 = vmatprep.mubr.msk.f32.mxu0 %vm27496_vm0, %v32861_v6  ;;  %v3146_v57 = vadd.f32 %v28737_v16, %v3120_v21  ;;  %v29113_v29 = vpop.permute.xlu1 %10309  ;;  %v3143_v21 = vadd.f32 %v28927_v30, %v3117_v8 }
 0x134   : > { %26035 = vmatprep.mubr.msk.f32.mxu1 %vm27496_vm0, %v32861_v6  ;;  %26031 = vmatmul.mubr.msk.f32.vlgmr.msra.gmra.mrb[130].mxu0 %vm710_vm1, %v28776_v41  ;;  %v11593_v41 = vsel %vm11529_vm3, %v29070_v9, -inf }
 0x135   : > { %26036 = vmatmul.mubr.msk.f32.vlgmr.msra.gmra.mrb[130].mxu1 %vm710_vm1, %v28781_v44  ;;  %26038 = vmatprep.subr.mxu0 %v32861_v6  ;;  %v29085_v4 = vpop.f32.mrb[34].mxu0  ;;  %v29095_v44 = vsel %vm28670_vm2, -inf, %v3144_v20  ;;  %v29111_v20 = vsel %vm28670_vm2, -inf, %v3141_v51  ;;  %v29127_v51 = vsel %vm28670_vm2, -inf, %v3146_v57 }
 0x136   : > { %26043 = vmatprep.subr.mxu1 %v32861_v6  ;;  %26039 = vmatpush3.xpose.msk.msra.mxu0 %vm710_vm1, %v28588_v11  ;;  %32866 = vst [vmem:[#allocation21_spill] sm:$0xff] %v29095_v44  ;;  %v3443_v0 = vpop.f32.mrb[34].mxu1  ;;  %v25552_v27 = vpop.f32.mrb[35].mxu0  ;;  %v3122_v11 = vmul.f32 0.35355338, %v29002_v62  ;;  %32867 = vst [vmem:[#allocation22_spill] sm:$0xff] %v29111_v20 }
 0x137   : > { %26044 = vmatpush3.xpose.msk.msra.mxu1 %vm710_vm1, %v28594_v14  ;;  %11594 = vmax.xlane.f32.xlu1 %v11593_v41  ;;  %v25557_v28 = vpop.f32.mrb[35].mxu1  ;;  %v11605_v14 = vsel %vm11529_vm3, %v29095_v44, -inf  ;;  %32868 = vst [vmem:[#allocation23_spill] sm:$0xff] %v29127_v51  ;;  %v29145_v41 = vsel %vm28670_vm2, -inf, %v3143_v21 }
 0x138   : > { %11600 = vmax.xlane.f32.xlu0 %v11599_v25  ;;  %26040 = vmatprep.mubr.msk.f32.mxu0 %vm27496_vm0, %v32861_v6  ;;  %v3148_v8 = vadd.f32 %v28737_v16, %v3122_v11  ;;  %32869 = vst [vmem:[#allocation24_spill] sm:$0xff] %v29145_v41 }
 0x139   : > { %26045 = vmatprep.mubr.msk.f32.mxu1 %vm27496_vm0, %v32861_v6  ;;  %26041 = vmatmul.mubr.msk.f32.vlgmr.msra.gmra.mrb[132].mxu0 %vm710_vm1, %v28818_v1  ;;  %v3119_v1 = vmul.f32 0.35355338, %v28966_v32 }
 0x13a   : > { %26046 = vmatmul.mubr.msk.f32.vlgmr.msra.gmra.mrb[132].mxu1 %vm710_vm1, %v28823_v7  ;;  %26048 = vmatprep.subr.mxu0 %v32861_v6  ;;  %v3583_v62 = vpop.f32.mrb[36].mxu1  ;;  %v29119_v10 = vpop.f32.mrb[36].mxu0  ;;  %v11596_v7 = vsel %vm11529_vm3, %v29111_v20, -inf }
 0x13b   : > { %26053 = vmatprep.subr.mxu1 %v32861_v6  ;;  %26049 = vmatpush3.xpose.msk.msra.mxu0 %vm710_vm1, %v28608_v18  ;;  %v25567_v25 = vpop.f32.mrb[37].mxu1  ;;  %v25562_v32 = vpop.f32.mrb[37].mxu0  ;;  %v3124_v18 = vmul.f32 0.35355338, %v29037_v37  ;;  %v3145_v27 = vadd.f32 %v28927_v30, %v3119_v1  ;;  %v4294_v1 = vmul.f32 0.35355338, %v29055_v17 }
 0x13c   : > { %26054 = vmatpush3.xpose.msk.msra.mxu1 %vm710_vm1, %v28615_v19  ;;  %11606 = vmax.xlane.f32.xlu0 %v11605_v14  ;;  %v11611_v19 = vsel %vm11529_vm3, %v29127_v51, -inf  ;;  %v29155_v37 = vpop.permute.xlu1 %11493  ;;  %v29162_v14 = vsel %vm28670_vm2, -inf, %v3148_v8 }
 0x13d   : > { %11597 = vmax.xlane.f32.xlu1 %v11596_v7  ;;  %26050 = vmatprep.mubr.msk.f32.mxu0 %vm27496_vm0, %v32861_v6  ;;  %32870 = vst [vmem:[#allocation25_spill] sm:$0xff] %v29162_v14  ;;  %v4298_v7 = vmul.f32 0.35355338, %v3583_v62  ;;  %v4293_v62 = vmul.f32 0.35355338, %v29057_v46 }
 0x13e   : > { %26055 = vmatprep.mubr.msk.f32.mxu1 %vm27496_vm0, %v32861_v6  ;;  %26051 = vmatmul.mubr.msk.f32.vlgmr.msra.gmra.mrb[134].mxu0 %vm710_vm1, %v28857_v39  ;;  %v29147_v57 = vpop.f32.mrb[38].mxu1  ;;  %v29149_v28 = vpop.f32.mrb[38].mxu0  ;;  %v4296_v39 = vmul.f32 0.35355338, %v3443_v0  ;;  %v3150_v0 = vadd.f32 %v28737_v16, %v3124_v18  ;;  %v29180_v16 = vsel %vm28670_vm2, -inf, %v3145_v27 }
 0x13f   : > { %26056 = vmatmul.mubr.msk.f32.vlgmr.msra.gmra.mrb[134].mxu1 %vm710_vm1, %v28862_v45  ;;  %26058 = vmatprep.subr.mxu0 %v32861_v6  ;;  %v25577_v11 = vpop.f32.mrb[39].mxu1  ;;  %v25572_v21 = vpop.f32.mrb[39].mxu0  ;;  %v11602_v45 = vsel %vm11529_vm3, %v29145_v41, -inf  ;;  %32871 = vst [vmem:[#allocation26_spill] sm:$0xff] %v29180_v16 }
 0x140   : > { %26063 = vmatprep.subr.mxu1 %v32861_v6  ;;  %26059 = vmatpush3.xpose.msk.msra.mxu0 %vm710_vm1, %v28633_v22  ;;  %v4322_v17 = vadd.f32 %v28789_v50, %v4296_v39  ;;  %v29192_v18 = vsel %vm28670_vm2, -inf, %v3150_v0  ;;  %v4324_v39 = vadd.f32 %v28789_v50, %v4298_v7 }
 0x141   : > { %26064 = vmatpush3.xpose.msk.msra.mxu1 %vm710_vm1, %v28640_v23  ;;  %11612 = vmax.xlane.f32.xlu1 %v11611_v19  ;;  %v11617_v23 = vsel %vm11529_vm3, %v29162_v14, -inf  ;;  %32872 = vst [vmem:[#allocation27_spill] sm:$0xff] %v29192_v18  ;;  %v29195_v19 = vpop.permute.xlu1 %4313  ;;  %v11623_v21 = vsel %vm11529_vm3, %v29192_v18, -inf }
 0x142   : > { %11603 = vmax.xlane.f32.xlu0 %v11602_v45  ;;  %26060 = vmatprep.mubr.msk.f32.mxu0 %vm27496_vm0, %v32861_v6  ;;  %v3863_v22 = vpop.f32.mrb[40].mxu1  ;;  %v3793_v25 = vpop.f32.mrb[40].mxu0  ;;  %v29210_v46 = vsel %vm28670_vm2, -inf, %v4322_v17 }
 0x143   : > { %26065 = vmatprep.mubr.msk.f32.mxu1 %vm27496_vm0, %v32861_v6  ;;  %26061 = vmatmul.mubr.msk.f32.vlgmr.msra.gmra.mrb[136].mxu0 %vm710_vm1, %v28894_v12  ;;  %v25587_v8 = vpop.f32.mrb[41].mxu1  ;;  %v25582_v32 = vpop.f32.mrb[41].mxu0  ;;  %v4320_v12 = vadd.f32 %v28789_v50, %v4294_v1  ;;  %32873 = vst [vmem:[#allocation28_spill] sm:$0xff] %v29210_v46  ;;  %v4302_v11 = vmul.f32 0.35355338, %v3863_v22  ;;  %v4319_v22 = vadd.f32 %v29195_v19, %v4293_v62 }
 0x144   : > { %26066 = vmatmul.mubr.msk.f32.vlgmr.msra.gmra.mrb[136].mxu1 %vm710_vm1, %v28899_v13  ;;  %26068 = vmatprep.subr.mxu0 %v32861_v6  ;;  %v11608_v13 = vsel %vm11529_vm3, %v29180_v16, -inf  ;;  %v4295_v1 = vmul.f32 0.35355338, %v29085_v4  ;;  %v29238_v4 = vsel %vm28670_vm2, -inf, %v4324_v39  ;;  %v4301_v7 = vmul.f32 0.35355338, %v3793_v25 }
 0x145   : > { %26073 = vmatprep.subr.mxu1 %v32861_v6  ;;  %26069 = vmatpush3.xpose.msk.msra.mxu0 %vm710_vm1, %v28661_v43  ;;  %v29223_v0 = vsel %vm28670_vm2, -inf, %v4320_v12  ;;  %32875 = vst [vmem:[#allocation30_spill] sm:$0xff] %v29238_v4  ;;  %v4328_v17 = vadd.f32 %v28789_v50, %v4302_v11  ;;  %v29252_v25 = vsel %vm28670_vm2, -inf, %v4319_v22  ;;  %v4297_v12 = vmul.f32 0.35355338, %v29119_v10 }
 0x146   : > { %26074 = vmatpush3.xpose.msk.msra.mxu1 %vm710_vm1, %v28668_v47  ;;  %11618 = vmax.xlane.f32.xlu0 %v11617_v23  ;;  %v29201_v27 = vpop.f32.mrb[42].mxu1  ;;  %v29203_v43 = vpop.f32.mrb[42].mxu0  ;;  %32874 = vst [vmem:[#allocation29_spill] sm:$0xff] %v29223_v0  ;;  %32876 = vst [vmem:[#allocation31_spill] sm:$0xff] %v29252_v25  ;;  %v11641_v62 = vsel %vm11529_vm3, %v29238_v4, -inf }
 0x147   : > { %11609 = vmax.xlane.f32.xlu1 %v11608_v13  ;;  %26070 = vmatprep.mubr.msk.f32.mxu0 %vm27496_vm0, %v32861_v6  ;;  %v25597_v47 = vpop.f32.mrb[43].mxu1  ;;  %v25592_v45 = vpop.f32.mrb[43].mxu0  ;;  %v29263_v11 = vsel %vm28670_vm2, -inf, %v4328_v17  ;;  %v4300_v22 = vmul.f32 0.35355338, %v29147_v57 }
 0x148   : > { %26075 = vmatprep.mubr.msk.f32.mxu1 %vm27496_vm0, %v32861_v6  ;;  %26071 = vmatmul.mubr.msk.f32.vlgmr.msra.gmra.mrb[138].mxu0 %vm710_vm1, %v28930_v55  ;;  %v11635_v55 = vsel %vm11529_vm3, %v29210_v46, -inf  ;;  %32877 = vst [vmem:[#allocation32_spill] sm:$0xff] %v29263_v11  ;;  %v4323_v45 = vadd.f32 %v29195_v19, %v4297_v12 }
 0x149   : > { %26076 = vmatmul.mubr.msk.f32.vlgmr.msra.gmra.mrb[138].mxu1 %vm710_vm1, %v28937_v63  ;;  %26078 = vmatprep.subr.mxu0 %v32861_v6  ;;  %v4326_v12 = vadd.f32 %v28789_v50, %v4300_v22 }
 0x14a   : > { %26083 = vmatprep.subr.mxu1 %v32861_v6  ;;  %26079 = vmatpush3.xpose.msk.msra.mxu0 %vm710_vm1, %v28958_v5  ;;  %v4143_v23 = vpop.f32.mrb[44].mxu1  ;;  %v29232_v63 = vpop.f32.mrb[44].mxu0  ;;  %v11629_v5 = vsel %vm11529_vm3, %v29223_v0, -inf  ;;  %v29289_v57 = vsel %vm28670_vm2, -inf, %v4323_v45 }
 0x14b   : > { %26084 = vmatpush3.xpose.msk.msra.mxu1 %vm710_vm1, %v28964_v35  ;;  %11624 = vmax.xlane.f32.xlu1 %v11623_v21  ;;  %v25607_v8 = vpop.f32.mrb[45].mxu1  ;;  %v25602_v32 = vpop.f32.mrb[45].mxu0  ;;  %v4321_v35 = vadd.f32 %v29195_v19, %v4295_v1  ;;  %v4306_v47 = vmul.f32 0.35355338, %v4143_v23  ;;  %32880 = vst [vmem:[#allocation35_spill] sm:$0xff] %v29289_v57  ;;  %v29303_v45 = vsel %vm28670_vm2, -inf, %v4326_v12 }
 0x14c   : > { %26080 = vmatprep.mubr.msk.f32.mxu0 %vm27496_vm0, %v32861_v6  ;;  %26085 = vmatprep.mubr.msk.f32.mxu1 %vm27496_vm0, %v32861_v6  ;;  %32882 = vst [vmem:[#allocation37_spill] sm:$0xff] %v29303_v45  ;;  %v11647_v12 = vsel %vm11529_vm3, %v29303_v45, -inf }
 0x14d   : > { %26081 = vmatmul.mubr.msk.f32.vlgmr.msra.gmra.mrb[140].mxu0 %vm710_vm1, %v28971_v33  ;;  %11636 = vmax.xlane.f32.xlu0 %v11635_v55  ;;  %v4327_v33 = vadd.f32 %v29195_v19, %v4301_v7  ;;  %v29275_v1 = vsel %vm28670_vm2, -inf, %v4321_v35  ;;  %v11653_v55 = vsel %vm11529_vm3, %v29263_v11, -inf  ;;  %v4332_v7 = vadd.f32 %v28789_v50, %v4306_v47 }
 0x14e   : > { %26086 = vmatmul.mubr.msk.f32.vlgmr.msra.gmra.mrb[140].mxu1 %vm710_vm1, %v28979_v59  ;;  %v4289_v13 = vpop.f32.mrb[46].mxu1  ;;  %v4216_v39 = vpop.f32.mrb[46].mxu0  ;;  %26093 = vmatprep.subr.mxu1 %v32861_v6  ;;  %v11626_v59 = vsel %vm11529_vm3, %v29252_v25, -inf  ;;  %32878 = vst [vmem:[#allocation33_spill] sm:$0xff] %v29275_v1  ;;  %v11632_v35 = vsel %vm11529_vm3, %v29275_v1, -inf }
 0x14f   : > { %11630 = vmax.xlane.f32.xlu1 %v11629_v5  ;;  %v25617_v21 = vpop.f32.mrb[47].mxu1  ;;  %v25612_v10 = vpop.f32.mrb[47].mxu0  ;;  %26095 = vmatprep.mubr.msk.f32.mxu1 %vm27496_vm0, %v32861_v6  ;;  %v29283_v8 = vsel %vm28670_vm2, -inf, %v4327_v33  ;;  %v4299_v39 = vmul.f32 0.35355338, %v29149_v28  ;;  %v29297_v33 = vsel %vm28670_vm2, -inf, %v4332_v7 }
 0x150   : > { %26088 = vmatprep.subr.mxu0 %v32861_v6  ;;  %26090 = vmatprep.mubr.msk.f32.mxu0 %vm27496_vm0, %v32861_v6  ;;  %32879 = vst [vmem:[#allocation34_spill] sm:$0xff] %v29283_v8  ;;  %32881 = vst [vmem:[#allocation36_spill] sm:$0xff] %v29297_v33  ;;  %v11638_v10 = vsel %vm11529_vm3, %v29289_v57, -inf  ;;  %v11665_v22 = vsel %vm11529_vm3, %v29297_v33, -inf  ;;  %v29363_v25 = vpop.xlane.xlu0 %11534 }
 0x151   : > { %11642 = vmax.xlane.f32.xlu0 %v11641_v62  ;;  %v11650_v62 = vsel %vm11529_vm3, %v29283_v8, -inf  ;;  %v4325_v28 = vadd.f32 %v29195_v19, %v4299_v39 }
 0x152   : > { %v4493_v23 = vpop.f32.mrb[48].mxu1  ;;  %v4420_v17 = vpop.f32.mrb[48].mxu0 }
 0x153   : > { %11627 = vmax.xlane.f32.xlu1 %v11626_v59  ;;  %v25627_v32 = vpop.f32.mrb[49].mxu1  ;;  %v25622_v5 = vpop.f32.mrb[49].mxu0  ;;  %v4304_v23 = vmul.f32 0.35355338, %v29201_v27 }
 0x155   : > { %11654 = vmax.xlane.f32.xlu0 %v11653_v55  ;;  %v4330_v27 = vadd.f32 %v28789_v50, %v4304_v23 }
 0x156   : > { %v4566_v13 = vpop.f32.mrb[50].mxu0 }
 0x157   : > { %11633 = vmax.xlane.f32.xlu1 %v11632_v35  ;;  %v4639_v47 = vpop.f32.mrb[50].mxu1  ;;  %v25632_v21 = vpop.f32.mrb[51].mxu0 }
 0x158   : > { %v25637_v59 = vpop.f32.mrb[51].mxu1 }
 0x159   : > { %11651 = vmax.xlane.f32.xlu0 %v11650_v62  ;;  %v29309_v62 = vpop.permute.xlu1 %5539 }
 0x15a   : > { %v4712_v55 = vpop.f32.mrb[52].mxu0 }
 0x15b   : > { %11639 = vmax.xlane.f32.xlu1 %v11638_v10  ;;  %v4785_v17 = vpop.f32.mrb[52].mxu1  ;;  %v5523_v7 = vmul.f32 0.35355338, %v4712_v55  ;;  %v25642_v32 = vpop.f32.mrb[53].mxu0  ;;  %v29322_v10 = vsel %vm28670_vm2, -inf, %v4325_v28  ;;  %v29332_v28 = vsel %vm28670_vm2, -inf, %v4330_v27 }
 0x15c   : > { %v5524_v5 = vmul.f32 0.35355338, %v4785_v17  ;;  %v25647_v35 = vpop.f32.mrb[53].mxu1  ;;  %32885 = vst [vmem:[#allocation40_spill] sm:$0xff] %v29322_v10  ;;  %v5522_v17 = vmul.f32 0.35355338, %v4639_v47 }
 0x15d   : > { %11666 = vmax.xlane.f32.xlu0 %v11665_v22  ;;  %v29317_v39 = vadd.f32 %v29309_v62, %v5523_v7  ;;  %32886 = vst [vmem:[#allocation41_spill] sm:$0xff] %v29332_v28 }
 0x15e   : > { %v29314_v21 = vadd.f32 %v29073_v52, %v5524_v5  ;;  %v4858_v59 = vpop.f32.mrb[54].mxu0  ;;  %v11644_v5 = vsel %vm11529_vm3, %v29322_v10, -inf  ;;  %v11659_v10 = vsel %vm11529_vm3, %v29332_v28, -inf }
 0x15f   : > { %32884 = vst [vmem:[#allocation39_spill] sm:$0xff] %v29317_v39  ;;  %11648 = vmax.xlane.f32.xlu1 %v11647_v12  ;;  %v4931_v22 = vpop.f32.mrb[54].mxu1  ;;  %v25652_v55 = vpop.f32.mrb[55].mxu0  ;;  %v11686_v7 = vsel %vm11529_vm3, %v29317_v39, -inf }
 0x160   : > { %32883 = vst [vmem:[#allocation38_spill] sm:$0xff] %v29314_v21  ;;  %v25657_v32 = vpop.f32.mrb[55].mxu1  ;;  %v11689_v35 = vsel %vm11529_vm3, %v29314_v21, -inf  ;;  %v5521_v55 = vmul.f32 0.35355338, %v4566_v13 }
 0x161   : > { %11690 = vmax.xlane.f32.xlu0 %v11689_v35  ;;  %v29335_v32 = vadd.f32 %v29073_v52, %v5522_v17 }
 0x162   : > { %v5004_v50 = vpop.f32.mrb[56].mxu0 }
 0x163   : > { %11645 = vmax.xlane.f32.xlu1 %v11644_v5  ;;  %v5077_v23 = vpop.f32.mrb[56].mxu1  ;;  %v5527_v12 = vmul.f32 0.35355338, %v5004_v50  ;;  %v25662_v47 = vpop.f32.mrb[57].mxu0  ;;  %32887 = vst [vmem:[#allocation42_spill] sm:$0xff] %v29335_v32  ;;  %v11683_v17 = vsel %vm11529_vm3, %v29335_v32, -inf }
 0x164   : > { %v5528_v35 = vmul.f32 0.35355338, %v5077_v23  ;;  %v25667_v8 = vpop.f32.mrb[57].mxu1  ;;  %v5526_v23 = vmul.f32 0.35355338, %v4931_v22 }
 0x165   : > { %11687 = vmax.xlane.f32.xlu0 %v11686_v7  ;;  %v29345_v27 = vadd.f32 %v29309_v62, %v5527_v12  ;;  %v29350_v8 = vadd.f32 %v29309_v62, %v5521_v55 }
 0x166   : > { %v29340_v39 = vadd.f32 %v29073_v52, %v5528_v35  ;;  %v29342_v5 = vpop.f32.mrb[58].mxu0  ;;  %v29361_v55 = vadd.f32 %v29073_v52, %v5526_v23 }
 0x167   : > { %32889 = vst [vmem:[#allocation44_spill] sm:$0xff] %v29345_v27  ;;  %11660 = vmax.xlane.f32.xlu1 %v11659_v10  ;;  %v5223_v50 = vpop.f32.mrb[58].mxu1  ;;  %v25672_v13 = vpop.f32.mrb[59].mxu0  ;;  %32890 = vst [vmem:[#allocation45_spill] sm:$0xff] %v29350_v8  ;;  %v11698_v35 = vsel %vm11529_vm3, %v29345_v27, -inf  ;;  %v11680_v22 = vsel %vm11529_vm3, %v29350_v8, -inf }
 0x168   : > { %32888 = vst [vmem:[#allocation43_spill] sm:$0xff] %v29340_v39  ;;  %v25677_v7 = vpop.f32.mrb[59].mxu1  ;;  %v11701_v47 = vsel %vm11529_vm3, %v29340_v39, -inf  ;;  %v5525_v10 = vmul.f32 0.35355338, %v4858_v59  ;;  %32891 = vst [vmem:[#allocation46_spill] sm:$0xff] %v29361_v55 }
 0x169   : > { %11702 = vmax.xlane.f32.xlu0 %v11701_v47  ;;  %v11695_v27 = vsel %vm11529_vm3, %v29361_v55, -inf  ;;  %v5530_v23 = vmul.f32 0.35355338, %v5223_v50  ;;  %v29382_v55 = vpop.permute.xlu0 %6723 }
 0x16a   : > { %v29356_v12 = vpop.f32.mrb[60].mxu0 }
 0x16b   : > { %11684 = vmax.xlane.f32.xlu1 %v11683_v17  ;;  %v5369_v13 = vpop.f32.mrb[60].mxu1  ;;  %v25682_v57 = vpop.f32.mrb[61].mxu0  ;;  %v29369_v17 = vadd.f32 %v29309_v62, %v5525_v10  ;;  %v29380_v10 = vadd.f32 %v29073_v52, %v5530_v23 }
 0x16c   : > { %v5532_v7 = vmul.f32 0.35355338, %v5369_v13  ;;  %v25687_v1 = vpop.f32.mrb[61].mxu1 }
 0x16d   : > { %11699 = vmax.xlane.f32.xlu0 %v11698_v35  ;;  %32893 = vst [vmem:[#allocation48_spill] sm:$0xff] %v29369_v17  ;;  %v11692_v13 = vsel %vm11529_vm3, %v29369_v17, -inf  ;;  %32894 = vst [vmem:[#allocation49_spill] sm:$0xff] %v29380_v10 }
 0x16e   : > { %v29366_v47 = vadd.f32 %v29073_v52, %v5532_v7 }
 0x16f   : > { %11681 = vmax.xlane.f32.xlu1 %v11680_v22  ;;  %v5515_v59 = vpop.f32.mrb[62].mxu1  ;;  %v29371_v57 = vpop.f32.mrb[62].mxu0 }
 0x170   : > { %32892 = vst [vmem:[#allocation47_spill] sm:$0xff] %v29366_v47  ;;  %v25697_v8 = vpop.f32.mrb[63].mxu1  ;;  %v11713_v1 = vsel %vm11529_vm3, %v29366_v47, -inf  ;;  %v25692_v35 = vpop.f32.mrb[63].mxu0  ;;  %v5534_v7 = vmul.f32 0.35355338, %v5515_v59 }
 0x171   : > { %11714 = vmax.xlane.f32.xlu0 %v11713_v1  ;;  %v11707_v35 = vsel %vm11529_vm3, %v29380_v10, -inf }
 0x172   : > { %v29390_v17 = vadd.f32 %v29073_v52, %v5534_v7 }
 0x173   : > { %11696 = vmax.xlane.f32.xlu1 %v11695_v27  ;;  %v5643_v22 = vpop.f32.mrb[64].mxu0 }
 0x174   : > { %v6703_v39 = vmul.f32 0.35355338, %v5643_v22  ;;  %v5713_v21 = vpop.f32.mrb[64].mxu1  ;;  %v25702_v32 = vpop.f32.mrb[65].mxu0  ;;  %32896 = vst [vmem:[#allocation51_spill] sm:$0xff] %v29390_v17 }
 0x175   : > { %v25707_v50 = vpop.f32.mrb[65].mxu1  ;;  %v6704_v1 = vmul.f32 0.35355338, %v5713_v21 }
 0x176   : > { %v29385_v8 = vadd.f32 %v29382_v55, %v6703_v39 }
 0x177   : > { %11693 = vmax.xlane.f32.xlu1 %v11692_v13  ;;  %v5783_v27 = vpop.f32.mrb[66].mxu0  ;;  %v11719_v13 = vsel %vm11529_vm3, %v29390_v17, -inf  ;;  %v29400_v52 = vadd.f32 %v29030_v61, %v6704_v1 }
 0x178   : > { %32895 = vst [vmem:[#allocation50_spill] sm:$0xff] %v29385_v8  ;;  %v6705_v23 = vmul.f32 0.35355338, %v5783_v27  ;;  %v5853_v59 = vpop.f32.mrb[66].mxu1  ;;  %v11722_v32 = vsel %vm11529_vm3, %v29385_v8, -inf  ;;  %v25712_v22 = vpop.f32.mrb[67].mxu0 }
 0x179   : > { %v25717_v47 = vpop.f32.mrb[67].mxu1  ;;  %11723 = vmax.xlane.f32.xlu0 %v11722_v32  ;;  %v6706_v50 = vmul.f32 0.35355338, %v5853_v59  ;;  %32898 = vst [vmem:[#allocation53_spill] sm:$0xff] %v29400_v52  ;;  %v29404_v22 = vpop.permute.xlu0 %7891  ;;  %v11725_v1 = vsel %vm11529_vm3, %v29400_v52, -inf }
 0x17a   : > { %v29395_v39 = vadd.f32 %v29382_v55, %v6705_v23 }
 0x17b   : > { %11708 = vmax.xlane.f32.xlu1 %v11707_v35  ;;  %v5923_v21 = vpop.f32.mrb[68].mxu0  ;;  %v29406_v35 = vpop.permute.xlu1 %9117  ;;  %v29414_v33 = vadd.f32 %v29030_v61, %v6706_v50 }
 0x17c   : > { %32897 = vst [vmem:[#allocation52_spill] sm:$0xff] %v29395_v39  ;;  %v5993_v7 = vpop.f32.mrb[68].mxu1  ;;  %v11728_v27 = vsel %vm11529_vm3, %v29395_v39, -inf  ;;  %v25722_v8 = vpop.f32.mrb[69].mxu0  ;;  %v6707_v47 = vmul.f32 0.35355338, %v5923_v21 }
 0x17d   : > { %v6708_v32 = vmul.f32 0.35355338, %v5993_v7  ;;  %v25727_v23 = vpop.f32.mrb[69].mxu1  ;;  %11729 = vmax.xlane.f32.xlu0 %v11728_v27  ;;  %32900 = vst [vmem:[#allocation55_spill] sm:$0xff] %v29414_v33  ;;  %v29416_v28 = vpop.xlane.xlu0 %11678  ;;  %v11731_v50 = vsel %vm11529_vm3, %v29414_v33, -inf }
 0x17e   : > { %32901 = vst [vmem:[#allocation56_spill] sm:$0xff] %v29416_v28 }
 0x17f   : > { %11720 = vmax.xlane.f32.xlu1 %v11719_v13  ;;  %v6063_v10 = vpop.f32.mrb[70].mxu0  ;;  %v29409_v59 = vadd.f32 %v29030_v61, %v6708_v32  ;;  %v29421_v13 = vadd.f32 %v29382_v55, %v6707_v47 }
 0x180   : > { %v6133_v8 = vpop.f32.mrb[70].mxu1  ;;  %v25732_v39 = vpop.f32.mrb[71].mxu0  ;;  %v6709_v47 = vmul.f32 0.35355338, %v6063_v10 }
 0x181   : > { %32899 = vst [vmem:[#allocation54_spill] sm:$0xff] %v29409_v59  ;;  %v6710_v21 = vmul.f32 0.35355338, %v6133_v8  ;;  %v25737_v7 = vpop.f32.mrb[71].mxu1  ;;  %v11737_v27 = vsel %vm11529_vm3, %v29409_v59, -inf  ;;  %32902 = vst [vmem:[#allocation57_spill] sm:$0xff] %v29421_v13 }
 0x182   : > { %11738 = vmax.xlane.f32.xlu0 %v11737_v27  ;;  %v11734_v59 = vsel %vm11529_vm3, %v29421_v13, -inf }
 0x183   : > { %11726 = vmax.xlane.f32.xlu1 %v11725_v1  ;;  %v29423_v32 = vpop.f32.mrb[72].mxu0  ;;  %v29430_v52 = vadd.f32 %v29030_v61, %v6710_v21  ;;  %v29434_v1 = vpop.permute.xlu0 %10307 }
 0x184   : > { %v29427_v23 = vpop.xlane.xlu1 %11672  ;;  %v6273_v39 = vpop.f32.mrb[72].mxu1 }
 0x185   : > { %32903 = vst [vmem:[#allocation58_spill] sm:$0xff] %v29430_v52  ;;  %v6712_v8 = vmul.f32 0.35355338, %v6273_v39  ;;  %v25747_v7 = vpop.f32.mrb[73].mxu1  ;;  %v25742_v27 = vpop.f32.mrb[73].mxu0  ;;  %v11743_v21 = vsel %vm11529_vm3, %v29430_v52, -inf }
 0x186   : > { %11735 = vmax.xlane.f32.xlu0 %v11734_v59  ;;  %v29448_v59 = vadd.f32 %v29382_v55, %v6709_v47 }
 0x187   : > { %11732 = vmax.xlane.f32.xlu1 %v11731_v50  ;;  %v29436_v11 = vpop.f32.mrb[74].mxu0  ;;  %v29439_v33 = vadd.f32 %v29030_v61, %v6712_v8  ;;  %v29455_v16 = vpop.permute.xlu0 %11491 }
 0x188   : > { %v6413_v45 = vpop.f32.mrb[74].mxu1  ;;  %v25752_v39 = vpop.f32.mrb[75].mxu0  ;;  %32906 = vst [vmem:[#allocation61_spill] sm:$0xff] %v29448_v59 }
 0x189   : > { %32904 = vst [vmem:[#allocation59_spill] sm:$0xff] %v29439_v33  ;;  %v29443_v7 = vpop.xlane.xlu1 %11816  ;;  %v6714_v4 = vmul.f32 0.35355338, %v6413_v45  ;;  %v25757_v13 = vpop.f32.mrb[75].mxu1  ;;  %v11749_v10 = vsel %vm11529_vm3, %v29439_v33, -inf }
 0x18a   : > { %32905 = vst [vmem:[#allocation60_spill] sm:$0xff] %v29443_v7  ;;  %11750 = vmax.xlane.f32.xlu0 %v11749_v10  ;;  %v11740_v13 = vsel %vm11529_vm3, %v29448_v59, -inf }
 0x18b   : > { %11744 = vmax.xlane.f32.xlu1 %v11743_v21  ;;  %v29450_v50 = vpop.f32.mrb[76].mxu0  ;;  %v29453_v27 = vadd.f32 %v29030_v61, %v6714_v4 }
 0x18c   : > { %v6553_v8 = vpop.f32.mrb[76].mxu1  ;;  %v25762_v52 = vpop.f32.mrb[77].mxu0 }
 0x18d   : > { %32907 = vst [vmem:[#allocation62_spill] sm:$0xff] %v29453_v27  ;;  %v6716_v39 = vmul.f32 0.35355338, %v6553_v8  ;;  %v25767_v46 = vpop.f32.mrb[77].mxu1  ;;  %v11755_v21 = vsel %vm11529_vm3, %v29453_v27, -inf }
 0x18e   : > { %v29457_v45 = vpop.xlane.xlu1 %11531 }
 0x18f   : > { %11741 = vmax.xlane.f32.xlu1 %v11740_v13  ;;  %v29462_v47 = vadd.f32 %v29030_v61, %v6716_v39  ;;  %v29475_v39 = vpop.xlane.xlu0 %11822 }
 0x190   : > { %v29466_v10 = vpop.f32.mrb[78].mxu0  ;;  %v6699_v4 = vpop.f32.mrb[78].mxu1  ;;  %32911 = vst [vmem:[#allocation66_spill] sm:$0xff] %v29475_v39 }
 0x191   : > { %32908 = vst [vmem:[#allocation63_spill] sm:$0xff] %v29462_v47  ;;  %v6718_v52 = vmul.f32 0.35355338, %v6699_v4  ;;  %v25777_v8 = vpop.f32.mrb[79].mxu1  ;;  %v11761_v46 = vsel %vm11529_vm3, %v29462_v47, -inf  ;;  %v25772_v33 = vpop.f32.mrb[79].mxu0 }
 0x192   : > { %11762 = vmax.xlane.f32.xlu0 %v11761_v46 }
 0x193   : > { %v29470_v0 = vpop.xlane.xlu1 %11819  ;;  %11756 = vmax.xlane.f32.xlu1 %v11755_v21  ;;  %v29473_v13 = vadd.f32 %v29030_v61, %v6718_v52 }
 0x194   : > { %32909 = vst [vmem:[#allocation64_spill] sm:$0xff] %v29470_v0 }
 0x195   : > { %32910 = vst [vmem:[#allocation65_spill] sm:$0xff] %v29473_v13  ;;  %v6811_v59 = vpop.f32.mrb[80].mxu0  ;;  %v6881_v27 = vpop.f32.mrb[80].mxu1  ;;  %v11767_v41 = vsel %vm11529_vm3, %v29473_v13, -inf }
 0x196   : > { %v7871_v4 = vmul.f32 0.35355338, %v6811_v59  ;;  %v7872_v8 = vmul.f32 0.35355338, %v6881_v27  ;;  %v25787_v54 = vpop.f32.mrb[81].mxu1  ;;  %11768 = vmax.xlane.f32.xlu0 %v11767_v41  ;;  %v25782_v47 = vpop.f32.mrb[81].mxu0 }
 0x198   : > { %v29480_v33 = vadd.f32 %v28836_v15, %v7872_v8  ;;  %v29483_v21 = vadd.f32 %v29404_v22, %v7871_v4  ;;  %v29491_v8 = vpop.xlane.xlu0 %11960 }
 0x199   : > { %v29485_v61 = vpop.xlane.xlu1 %11546  ;;  %v6951_v52 = vpop.f32.mrb[82].mxu0  ;;  %32915 = vst [vmem:[#allocation70_spill] sm:$0xff] %v29491_v8 }
 0x19a   : > { %32912 = vst [vmem:[#allocation67_spill] sm:$0xff] %v29480_v33  ;;  %32913 = vst [vmem:[#allocation68_spill] sm:$0xff] %v29483_v21  ;;  %v7021_v46 = vpop.f32.mrb[82].mxu1  ;;  %v11773_v20 = vsel %vm11529_vm3, %v29480_v33, -inf  ;;  %v11770_v59 = vsel %vm11529_vm3, %v29483_v21, -inf  ;;  %v25792_v47 = vpop.f32.mrb[83].mxu0 }
 0x19b   : > { %32914 = vst [vmem:[#allocation69_spill] sm:$0xff] %v29485_v61  ;;  %v7873_v27 = vmul.f32 0.35355338, %v6951_v52  ;;  %v7874_v54 = vmul.f32 0.35355338, %v7021_v46  ;;  %v25797_v41 = vpop.f32.mrb[83].mxu1  ;;  %11774 = vmax.xlane.f32.xlu1 %v11773_v20  ;;  %11771 = vmax.xlane.f32.xlu0 %v11770_v59 }
 0x19c   : > { %v29503_v41 = vpop.xlane.xlu0 %11675 }
 0x19d   : > { %v29494_v4 = vadd.f32 %v28836_v15, %v7874_v54  ;;  %v29501_v21 = vadd.f32 %v29404_v22, %v7873_v27  ;;  %32919 = vst [vmem:[#allocation74_spill] sm:$0xff] %v29503_v41 }
 0x19e   : > { %v7091_v34 = vpop.f32.mrb[84].mxu0  ;;  %v7161_v3 = vpop.f32.mrb[84].mxu1 }
 0x19f   : > { %32916 = vst [vmem:[#allocation71_spill] sm:$0xff] %v29494_v4  ;;  %v29496_v13 = vpop.xlane.xlu1 %11543  ;;  %v11779_v33 = vsel %vm11529_vm3, %v29494_v4, -inf  ;;  %32918 = vst [vmem:[#allocation73_spill] sm:$0xff] %v29501_v21  ;;  %v7875_v52 = vmul.f32 0.35355338, %v7091_v34  ;;  %v25807_v20 = vpop.f32.mrb[85].mxu1 }
 0x1a0   : > { %32917 = vst [vmem:[#allocation72_spill] sm:$0xff] %v29496_v13  ;;  %v7876_v46 = vmul.f32 0.35355338, %v7161_v3  ;;  %11780 = vmax.xlane.f32.xlu1 %v11779_v33  ;;  %v25802_v59 = vpop.f32.mrb[85].mxu0  ;;  %v11776_v58 = vsel %vm11529_vm3, %v29501_v21, -inf  ;;  %v29524_v21 = vpop.xlane.xlu0 %11540 }
 0x1a1   : > { %v29515_v3 = vadd.f32 %v29404_v22, %v7875_v52  ;;  %32924 = vst [vmem:[#allocation79_spill] sm:$0xff] %v29524_v21 }
 0x1a2   : > { %v29505_v47 = vpop.f32.mrb[86].mxu0  ;;  %v29508_v54 = vadd.f32 %v28836_v15, %v7876_v46 }
 0x1a3   : > { %v7301_v31 = vpop.f32.mrb[86].mxu1  ;;  %32921 = vst [vmem:[#allocation76_spill] sm:$0xff] %v29515_v3  ;;  %v29517_v33 = vpop.xlane.xlu1 %11558  ;;  %v11782_v52 = vsel %vm11529_vm3, %v29515_v3, -inf }
 0x1a4   : > { %32920 = vst [vmem:[#allocation75_spill] sm:$0xff] %v29508_v54  ;;  %v7878_v4 = vmul.f32 0.35355338, %v7301_v31  ;;  %v25817_v17 = vpop.f32.mrb[87].mxu1  ;;  %v11785_v34 = vsel %vm11529_vm3, %v29508_v54, -inf  ;;  %11777 = vmax.xlane.f32.xlu1 %v11776_v58  ;;  %32922 = vst [vmem:[#allocation77_spill] sm:$0xff] %v29517_v33 }
 0x1a5   : > { %11786 = vmax.xlane.f32.xlu0 %v11785_v34  ;;  %v25812_v27 = vpop.f32.mrb[87].mxu0 }
 0x1a6   : > { %v29520_v46 = vadd.f32 %v28836_v15, %v7878_v4 }
 0x1a7   : > { %v29522_v20 = vpop.f32.mrb[88].mxu0  ;;  %v7441_v59 = vpop.f32.mrb[88].mxu1 }
 0x1a8   : > { %32923 = vst [vmem:[#allocation78_spill] sm:$0xff] %v29520_v46  ;;  %v7880_v31 = vmul.f32 0.35355338, %v7441_v59  ;;  %v25827_v17 = vpop.f32.mrb[89].mxu1  ;;  %v11791_v58 = vsel %vm11529_vm3, %v29520_v46, -inf  ;;  %v25822_v34 = vpop.f32.mrb[89].mxu0 }
 0x1a9   : > { %11792 = vmax.xlane.f32.xlu1 %v11791_v58  ;;  %11783 = vmax.xlane.f32.xlu0 %v11782_v52  ;;  %v29533_v4 = vpop.xlane.xlu1 %11555  ;;  %v29539_v46 = vpop.xlane.xlu0 %11537 }
 0x1aa   : > { %v29531_v27 = vadd.f32 %v28836_v15, %v7880_v31  ;;  %32926 = vst [vmem:[#allocation81_spill] sm:$0xff] %v29533_v4  ;;  %32927 = vst [vmem:[#allocation82_spill] sm:$0xff] %v29539_v46 }
 0x1ac   : > { %32925 = vst [vmem:[#allocation80_spill] sm:$0xff] %v29531_v27  ;;  %v7581_v54 = vpop.f32.mrb[90].mxu1  ;;  %v29535_v14 = vpop.f32.mrb[90].mxu0  ;;  %v11797_v59 = vsel %vm11529_vm3, %v29531_v27, -inf }
 0x1ad   : > { %v7882_v17 = vmul.f32 0.35355338, %v7581_v54  ;;  %v25837_v51 = vpop.f32.mrb[91].mxu1  ;;  %11798 = vmax.xlane.f32.xlu0 %v11797_v59  ;;  %v25832_v58 = vpop.f32.mrb[91].mxu0 }
 0x1ae   : > { %v29548_v13 = vpop.xlane.xlu1 %11570  ;;  %v29550_v51 = vpop.xlane.xlu0 %11552 }
 0x1af   : > { %v29542_v52 = vadd.f32 %v28836_v15, %v7882_v17  ;;  %32929 = vst [vmem:[#allocation84_spill] sm:$0xff] %v29548_v13  ;;  %32930 = vst [vmem:[#allocation85_spill] sm:$0xff] %v29550_v51 }
 0x1b0   : > { %v29544_v31 = vpop.f32.mrb[92].mxu0 }
 0x1b1   : > { %32928 = vst [vmem:[#allocation83_spill] sm:$0xff] %v29542_v52  ;;  %v7721_v34 = vpop.f32.mrb[92].mxu1  ;;  %v11803_v3 = vsel %vm11529_vm3, %v29542_v52, -inf  ;;  %v25842_v4 = vpop.f32.mrb[93].mxu0 }
 0x1b2   : > { %v7884_v27 = vmul.f32 0.35355338, %v7721_v34  ;;  %v25847_v54 = vpop.f32.mrb[93].mxu1  ;;  %11804 = vmax.xlane.f32.xlu1 %v11803_v3 }
 0x1b4   : > { %v29553_v59 = vadd.f32 %v28836_v15, %v7884_v27  ;;  %v7794_v58 = vpop.f32.mrb[94].mxu0  ;;  %v29562_v15 = vpop.xlane.xlu0 %11549 }
 0x1b5   : > { %v7867_v17 = vpop.f32.mrb[94].mxu1  ;;  %v25852_v18 = vpop.f32.mrb[95].mxu0  ;;  %32933 = vst [vmem:[#allocation88_spill] sm:$0xff] %v29562_v15  ;;  %v9141_v58 = vstv %s9140_s17  ;;  %s24223_s17 = sshll.u32 %s571_s22, 2 }
 0x1b6   : > { %32931 = vst [vmem:[#allocation86_spill] sm:$0xff] %v29553_v59  ;;  %v29556_v44 = vpop.xlane.xlu1 %11582  ;;  %v25857_v36 = vpop.f32.mrb[95].mxu1  ;;  %v11809_v4 = vsel %vm11529_vm3, %v29553_v59, -inf  ;;  %vm29566_vm4 = vcmp.eq.s32.totalorder %v9141_v58, 1  ;;  %s32604_s27 = scalar_lea.vmem %s32671_s8, %s24223_s17 }
 0x1b7   : > { %11810 = vmax.xlane.f32.xlu0 %v11809_v4 }
 0x1b8   : > { %v7998_v52 = vpop.f32.mrb[96].mxu0 }
 0x1b9   : > { %v8071_v34 = vpop.f32.mrb[96].mxu1  ;;  %v25862_v3 = vpop.f32.mrb[97].mxu0 }
 0x1ba   : > { %v29560_v54 = vpop.xlane.xlu1 %11588  ;;  %v25867_v13 = vpop.f32.mrb[97].mxu1 }
 0x1bb   : > { %32932 = vst [vmem:[#allocation87_spill] sm:$0xff] %v29560_v54 }
 0x1bc   : > { %v8144_v27 = vpop.f32.mrb[98].mxu0 }
 0x1bd   : > { %v8217_v17 = vpop.f32.mrb[98].mxu1  ;;  %v9099_v18 = vmul.f32 0.35355338, %v8144_v27  ;;  %v25872_v60 = vpop.f32.mrb[99].mxu0 }
 0x1be   : > { %v9100_v9 = vmul.f32 0.35355338, %v8217_v17  ;;  %v25877_v36 = vpop.f32.mrb[99].mxu1  ;;  %v29576_v27 = vpop.xlane.xlu0 %11564 }
 0x1bf   : > { %v29564_v33 = vpop.xlane.xlu1 %11585  ;;  %v9125_v34 = vadd.f32 %v29406_v35, %v9099_v18  ;;  %32938 = vst [vmem:[#allocation91_spill] sm:$0xff] %v29576_v27 }
 0x1c0   : > { %32934 = vst [vmem:[#allocation89_spill] sm:$0xff] %v29564_v33  ;;  %v9126_v52 = vadd.f32 %v28884_v53, %v9100_v9  ;;  %v8290_v13 = vpop.f32.mrb[100].mxu0 }
 0x1c1   : > { %v8363_v3 = vpop.f32.mrb[100].mxu1  ;;  %v9101_v59 = vmul.f32 0.35355338, %v8290_v13  ;;  %v25882_v15 = vpop.f32.mrb[101].mxu0 }
 0x1c2   : > { %v9102_v48 = vmul.f32 0.35355338, %v8363_v3  ;;  %v25887_v42 = vpop.f32.mrb[101].mxu1  ;;  %v29574_v60 = vsel %vm29566_vm4, -inf, %v9126_v52 }
 0x1c3   : > { %32937 = vst [vmem:[#allocation90_spill] sm:$0xff] %v29574_v60  ;;  %v11827_v58 = vsel %vm11529_vm3, %v29574_v60, -inf  ;;  %v9127_v18 = vadd.f32 %v29406_v35, %v9101_v59  ;;  %v29588_v42 = vsel %vm29566_vm4, -inf, %v9125_v34 }
 0x1c4   : > { %v29580_v17 = vpop.xlane.xlu1 %11594  ;;  %v9128_v9 = vadd.f32 %v28884_v53, %v9102_v48  ;;  %11828 = vmax.xlane.f32.xlu1 %v11827_v58  ;;  %v29584_v36 = vpop.f32.mrb[102].mxu0  ;;  %32940 = vst [vmem:[#allocation93_spill] sm:$0xff] %v29588_v42  ;;  %v11824_v59 = vsel %vm11529_vm3, %v29588_v42, -inf }
 0x1c5   : > { %32939 = vst [vmem:[#allocation92_spill] sm:$0xff] %v29580_v17  ;;  %v8509_v15 = vpop.f32.mrb[102].mxu1  ;;  %v25892_v60 = vpop.f32.mrb[103].mxu0 }
 0x1c6   : > { %v9104_v52 = vmul.f32 0.35355338, %v8509_v15  ;;  %v25897_v13 = vpop.f32.mrb[103].mxu1  ;;  %v29592_v3 = vsel %vm29566_vm4, -inf, %v9128_v9  ;;  %v29603_v15 = vsel %vm29566_vm4, -inf, %v9127_v18 }
 0x1c7   : > { %32941 = vst [vmem:[#allocation94_spill] sm:$0xff] %v29592_v3  ;;  %v11833_v48 = vsel %vm11529_vm3, %v29592_v3, -inf  ;;  %32942 = vst [vmem:[#allocation95_spill] sm:$0xff] %v29603_v15  ;;  %v29605_v13 = vpop.xlane.xlu0 %11561 }
 0x1c8   : > { %v9130_v58 = vadd.f32 %v28884_v53, %v9104_v52  ;;  %11834 = vmax.xlane.f32.xlu0 %v11833_v48  ;;  %11825 = vmax.xlane.f32.xlu1 %v11824_v59  ;;  %v29599_v34 = vpop.f32.mrb[104].mxu0  ;;  %32943 = vst [vmem:[#allocation96_spill] sm:$0xff] %v29605_v13  ;;  %v11830_v48 = vsel %vm11529_vm3, %v29603_v15, -inf }
 0x1c9   : > { %v8655_v9 = vpop.f32.mrb[104].mxu1  ;;  %v25902_v59 = vpop.f32.mrb[105].mxu0 }
 0x1ca   : > { %v29607_v60 = vpop.xlane.xlu1 %11597  ;;  %v9106_v27 = vmul.f32 0.35355338, %v8655_v9  ;;  %v25907_v3 = vpop.f32.mrb[105].mxu1  ;;  %v29611_v42 = vsel %vm29566_vm4, -inf, %v9130_v58 }
 0x1cb   : > { %32944 = vst [vmem:[#allocation97_spill] sm:$0xff] %v29607_v60  ;;  %32945 = vst [vmem:[#allocation98_spill] sm:$0xff] %v29611_v42  ;;  %v11839_v52 = vsel %vm11529_vm3, %v29611_v42, -inf  ;;  %v29628_v59 = vpop.xlane.xlu0 %11576 }
 0x1cc   : > { %v9132_v18 = vadd.f32 %v28884_v53, %v9106_v27  ;;  %11840 = vmax.xlane.f32.xlu1 %v11839_v52  ;;  %11831 = vmax.xlane.f32.xlu0 %v11830_v48  ;;  %v29618_v13 = vpop.f32.mrb[106].mxu0 }
 0x1cd   : > { %v8801_v60 = vpop.f32.mrb[106].mxu1  ;;  %v25912_v9 = vpop.f32.mrb[107].mxu0 }
 0x1ce   : > { %v29620_v3 = vpop.xlane.xlu1 %11612  ;;  %v9108_v51 = vmul.f32 0.35355338, %v8801_v60  ;;  %v25917_v58 = vpop.f32.mrb[107].mxu1  ;;  %v29624_v24 = vsel %vm29566_vm4, -inf, %v9132_v18 }
 0x1cf   : > { %32946 = vst [vmem:[#allocation99_spill] sm:$0xff] %v29620_v3  ;;  %32947 = vst [vmem:[#allocation100_spill] sm:$0xff] %v29624_v24  ;;  %v11845_v15 = vsel %vm11529_vm3, %v29624_v24, -inf  ;;  %v29639_v3 = vpop.xlane.xlu0 %11579 }
 0x1d0   : > { %v9134_v27 = vadd.f32 %v28884_v53, %v9108_v51  ;;  %11846 = vmax.xlane.f32.xlu0 %v11845_v15 }
 0x1d1   : > { %v29631_v52 = vpop.f32.mrb[108].mxu0 }
 0x1d2   : > { %v8947_v48 = vpop.f32.mrb[108].mxu1  ;;  %v29635_v9 = vsel %vm29566_vm4, -inf, %v9134_v27  ;;  %v25922_v60 = vpop.f32.mrb[109].mxu0 }
 0x1d3   : > { %32948 = vst [vmem:[#allocation101_spill] sm:$0xff] %v29635_v9  ;;  %v9110_v58 = vmul.f32 0.35355338, %v8947_v48  ;;  %v25927_v42 = vpop.f32.mrb[109].mxu1  ;;  %v11851_v18 = vsel %vm11529_vm3, %v29635_v9, -inf }
 0x1d4   : > { %v29641_v24 = vpop.xlane.xlu1 %11609  ;;  %11852 = vmax.xlane.f32.xlu1 %v11851_v18 }
 0x1d5   : > { %32949 = vst [vmem:[#allocation102_spill] sm:$0xff] %v29641_v24  ;;  %v9136_v51 = vadd.f32 %v28884_v53, %v9110_v58  ;;  %v29654_v24 = vpop.xlane.xlu0 %11591 }
 0x1d6   : > { %v29644_v15 = vpop.f32.mrb[110].mxu0  ;;  %32951 = vst [vmem:[#allocation104_spill] sm:$0xff] %v29654_v24 }
 0x1d7   : > { %v9093_v26 = vpop.f32.mrb[110].mxu1  ;;  %v29648_v27 = vsel %vm29566_vm4, -inf, %v9136_v51  ;;  %v25932_v60 = vpop.f32.mrb[111].mxu0 }
 0x1d8   : > { %32950 = vst [vmem:[#allocation103_spill] sm:$0xff] %v29648_v27  ;;  %v29650_v48 = vpop.xlane.xlu1 %11624  ;;  %v9112_v42 = vmul.f32 0.35355338, %v9093_v26  ;;  %v25937_v0 = vpop.f32.mrb[111].mxu1  ;;  %v11857_v9 = vsel %vm11529_vm3, %v29648_v27, -inf }
 0x1d9   : > { %11858 = vmax.xlane.f32.xlu1 %v11857_v9  ;;  %v29666_v24 = vpop.xlane.xlu0 %11600 }
 0x1da   : > { %v9138_v58 = vadd.f32 %v28884_v53, %v9112_v42  ;;  %32953 = vst [vmem:[#allocation106_spill] sm:$0xff] %v29666_v24 }
 0x1dc   : > { %v9297_v18 = vpop.f32.mrb[112].mxu1  ;;  %v29659_v46 = vsel %vm29566_vm4, -inf, %v9138_v58  ;;  %v9227_v33 = vpop.f32.mrb[112].mxu0 }
 0x1dd   : > { %32952 = vst [vmem:[#allocation105_spill] sm:$0xff] %v29659_v46  ;;  %v10288_v51 = vmul.f32 0.35355338, %v9297_v18  ;;  %v25947_v60 = vpop.f32.mrb[113].mxu1  ;;  %v11863_v26 = vsel %vm11529_vm3, %v29659_v46, -inf  ;;  %v29663_v0 = vpop.xlane.xlu1 %11630 }
 0x1de   : > { %v10287_v8 = vmul.f32 0.35355338, %v9227_v33  ;;  %11864 = vmax.xlane.f32.xlu1 %v11863_v26  ;;  %v25942_v9 = vpop.f32.mrb[113].mxu0 }
 0x1df   : > { %v10314_v27 = vadd.f32 %v29113_v29, %v10288_v51 }
 0x1e0   : > { %v10313_v53 = vadd.f32 %v29434_v1, %v10287_v8  ;;  %v9367_v42 = vpop.f32.mrb[114].mxu0 }
 0x1e1   : > { %v9437_v58 = vpop.f32.mrb[114].mxu1  ;;  %v10289_v61 = vmul.f32 0.35355338, %v9367_v42  ;;  %v29671_v18 = vsel %vm29566_vm4, -inf, %v10314_v27  ;;  %v25952_v60 = vpop.f32.mrb[115].mxu0 }
 0x1e2   : > { %32954 = vst [vmem:[#allocation107_spill] sm:$0xff] %v29671_v18  ;;  %v10290_v46 = vmul.f32 0.35355338, %v9437_v58  ;;  %v25957_v17 = vpop.f32.mrb[115].mxu1  ;;  %v11869_v33 = vsel %vm11529_vm3, %v29671_v18, -inf  ;;  %v29677_v51 = vsel %vm29566_vm4, -inf, %v10313_v53  ;;  %v29679_v26 = vpop.xlane.xlu1 %11627 }
 0x1e3   : > { %11870 = vmax.xlane.f32.xlu0 %v11869_v33  ;;  %32955 = vst [vmem:[#allocation108_spill] sm:$0xff] %v29677_v51  ;;  %v10315_v9 = vadd.f32 %v29434_v1, %v10289_v61  ;;  %v29685_v27 = vpop.xlane.xlu0 %11606  ;;  %v11866_v60 = vsel %vm11529_vm3, %v29677_v51, -inf }
 0x1e4   : > { %v10316_v8 = vadd.f32 %v29113_v29, %v10290_v46  ;;  %32956 = vst [vmem:[#allocation109_spill] sm:$0xff] %v29685_v27 }
 0x1e5   : > { %v29683_v42 = vpop.f32.mrb[116].mxu0  ;;  %v29697_v61 = vsel %vm29566_vm4, -inf, %v10315_v9 }
 0x1e6   : > { %v9577_v58 = vpop.f32.mrb[116].mxu1  ;;  %v29689_v17 = vsel %vm29566_vm4, -inf, %v10316_v8  ;;  %v25962_v46 = vpop.f32.mrb[117].mxu0  ;;  %32958 = vst [vmem:[#allocation111_spill] sm:$0xff] %v29697_v61 }
 0x1e7   : > { %32957 = vst [vmem:[#allocation110_spill] sm:$0xff] %v29689_v17  ;;  %v10292_v53 = vmul.f32 0.35355338, %v9577_v58  ;;  %v25967_v33 = vpop.f32.mrb[117].mxu1  ;;  %v11875_v18 = vsel %vm11529_vm3, %v29689_v17, -inf  ;;  %11867 = vmax.xlane.f32.xlu0 %v11866_v60  ;;  %v29700_v24 = vpop.xlane.xlu1 %11633  ;;  %v11872_v60 = vsel %vm11529_vm3, %v29697_v61, -inf }
 0x1e8   : > { %11876 = vmax.xlane.f32.xlu1 %v11875_v18  ;;  %32959 = vst [vmem:[#allocation112_spill] sm:$0xff] %v29700_v24 }
 0x1e9   : > { %v10318_v27 = vadd.f32 %v29113_v29, %v10292_v53  ;;  %v29712_v53 = vpop.xlane.xlu0 %11603 }
 0x1ea   : > { %v29702_v8 = vpop.f32.mrb[118].mxu0  ;;  %32961 = vst [vmem:[#allocation114_spill] sm:$0xff] %v29712_v53 }
 0x1eb   : > { %v9717_v39 = vpop.f32.mrb[118].mxu1  ;;  %v29706_v58 = vsel %vm29566_vm4, -inf, %v10318_v27  ;;  %v25972_v33 = vpop.f32.mrb[119].mxu0 }
 0x1ec   : > { %32960 = vst [vmem:[#allocation113_spill] sm:$0xff] %v29706_v58  ;;  %v10294_v18 = vmul.f32 0.35355338, %v9717_v39  ;;  %v25977_v46 = vpop.f32.mrb[119].mxu1  ;;  %v11881_v9 = vsel %vm11529_vm3, %v29706_v58, -inf  ;;  %11873 = vmax.xlane.f32.xlu1 %v11872_v60  ;;  %v29717_v24 = vpop.xlane.xlu1 %11639 }
 0x1ed   : > { %11882 = vmax.xlane.f32.xlu0 %v11881_v9  ;;  %32962 = vst [vmem:[#allocation115_spill] sm:$0xff] %v29717_v24  ;;  %v29725_v58 = vpop.xlane.xlu0 %11618 }
 0x1ee   : > { %v10320_v51 = vadd.f32 %v29113_v29, %v10294_v18  ;;  %32964 = vst [vmem:[#allocation117_spill] sm:$0xff] %v29725_v58 }
 0x1ef   : > { %v29715_v17 = vpop.f32.mrb[120].mxu0 }
 0x1f0   : > { %v9857_v27 = vpop.f32.mrb[120].mxu1  ;;  %v29721_v61 = vsel %vm29566_vm4, -inf, %v10320_v51  ;;  %v25982_v60 = vpop.f32.mrb[121].mxu0 }
 0x1f1   : > { %32963 = vst [vmem:[#allocation116_spill] sm:$0xff] %v29721_v61  ;;  %v10296_v39 = vmul.f32 0.35355338, %v9857_v27  ;;  %v25987_v33 = vpop.f32.mrb[121].mxu1  ;;  %v11887_v46 = vsel %vm11529_vm3, %v29721_v61, -inf  ;;  %v29736_v61 = vpop.xlane.xlu0 %11636 }
 0x1f2   : > { %11888 = vmax.xlane.f32.xlu1 %v11887_v46  ;;  %32966 = vst [vmem:[#allocation119_spill] sm:$0xff] %v29736_v61  ;;  %v29738_v46 = vpop.xlane.xlu1 %11648 }
 0x1f3   : > { %v10322_v18 = vadd.f32 %v29113_v29, %v10296_v39  ;;  %32967 = vst [vmem:[#allocation120_spill] sm:$0xff] %v29738_v46 }
 0x1f4   : > { %v29728_v9 = vpop.f32.mrb[122].mxu0 }
 0x1f5   : > { %v9997_v53 = vpop.f32.mrb[122].mxu1  ;;  %v29732_v24 = vsel %vm29566_vm4, -inf, %v10322_v18  ;;  %v25992_v51 = vpop.f32.mrb[123].mxu0 }
 0x1f6   : > { %32965 = vst [vmem:[#allocation118_spill] sm:$0xff] %v29732_v24  ;;  %v10298_v41 = vmul.f32 0.35355338, %v9997_v53  ;;  %v25997_v27 = vpop.f32.mrb[123].mxu1  ;;  %v11893_v33 = vsel %vm11529_vm3, %v29732_v24, -inf  ;;  %v29749_v61 = vpop.xlane.xlu0 %11642 }
 0x1f7   : > { %11894 = vmax.xlane.f32.xlu0 %v11893_v33  ;;  %32969 = vst [vmem:[#allocation122_spill] sm:$0xff] %v29749_v61  ;;  %v29751_v46 = vpop.xlane.xlu1 %11645 }
 0x1f8   : > { %v10324_v39 = vadd.f32 %v29113_v29, %v10298_v41  ;;  %32970 = vst [vmem:[#allocation123_spill] sm:$0xff] %v29751_v46 }
 0x1f9   : > { %v29741_v60 = vpop.f32.mrb[124].mxu0 }
 0x1fa   : > { %v10137_v58 = vpop.f32.mrb[124].mxu1  ;;  %v29745_v18 = vsel %vm29566_vm4, -inf, %v10324_v39  ;;  %v26002_v51 = vpop.f32.mrb[125].mxu0 }
 0x1fb   : > { %32968 = vst [vmem:[#allocation121_spill] sm:$0xff] %v29745_v18  ;;  %v10300_v53 = vmul.f32 0.35355338, %v10137_v58  ;;  %v26007_v27 = vpop.f32.mrb[125].mxu1  ;;  %v11899_v24 = vsel %vm11529_vm3, %v29745_v18, -inf  ;;  %v29769_v61 = vpop.xlane.xlu1 %11660 }
 0x1fc   : > { %11900 = vmax.xlane.f32.xlu1 %v11899_v24  ;;  %v29762_v24 = vpop.xlane.xlu0 %11654  ;;  %32974 = vst [vmem:[#allocation127_spill] sm:$0xff] %v29769_v61 }
 0x1fd   : > { %v10326_v41 = vadd.f32 %v29113_v29, %v10300_v53  ;;  %32972 = vst [vmem:[#allocation125_spill] sm:$0xff] %v29762_v24 }
 0x1fe   : > { %v29754_v33 = vpop.f32.mrb[126].mxu0  ;;  %v10283_v7 = vpop.f32.mrb[126].mxu1 }
 0x1ff   : > { %v10302_v21 = vmul.f32 0.35355338, %v10283_v7  ;;  %v26017_v54 = vpop.f32.mrb[127].mxu1  ;;  %v29758_v39 = vsel %vm29566_vm4, -inf, %v10326_v41  ;;  %v26012_v51 = vpop.f32.mrb[127].mxu0 }
 0x200   : > { %32971 = vst [vmem:[#allocation124_spill] sm:$0xff] %v29758_v39  ;;  %v11905_v58 = vsel %vm11529_vm3, %v29758_v39, -inf }
 0x201   : > { %v10328_v27 = vadd.f32 %v29113_v29, %v10302_v21  ;;  %11906 = vmax.xlane.f32.xlu0 %v11905_v58  ;;  %v29775_v21 = vpop.xlane.xlu0 %11651  ;;  %v29777_v58 = vpop.xlane.xlu1 %11684 }
 0x202   : > { %v10411_v18 = vpop.f32.mrb[128].mxu0  ;;  %32975 = vst [vmem:[#allocation128_spill] sm:$0xff] %v29775_v21  ;;  %32976 = vst [vmem:[#allocation129_spill] sm:$0xff] %v29777_v58  ;;  %v10291_v21 = vmul.f32 0.35355338, %v29683_v42 }
 0x203   : > { %v11471_v53 = vmul.f32 0.35355338, %v10411_v18  ;;  %v10481_v46 = vpop.f32.mrb[128].mxu1  ;;  %v29767_v7 = vsel %vm29566_vm4, -inf, %v10328_v27  ;;  %v26022_v54 = vpop.f32.mrb[129].mxu0 }
 0x204   : > { %32973 = vst [vmem:[#allocation126_spill] sm:$0xff] %v29767_v7  ;;  %v11472_v41 = vmul.f32 0.35355338, %v10481_v46  ;;  %v26027_v28 = vpop.f32.mrb[129].mxu1  ;;  %v11911_v51 = vsel %vm11529_vm3, %v29767_v7, -inf }
 0x205   : > { %11912 = vmax.xlane.f32.xlu1 %v11911_v51  ;;  %v11497_v39 = vadd.f32 %v29455_v16, %v11471_v53  ;;  %v29804_v42 = vpop.xlane.xlu0 %11666 }
 0x206   : > { %v11498_v29 = vadd.f32 %v29155_v37, %v11472_v41  ;;  %32981 = vst [vmem:[#allocation134_spill] sm:$0xff] %v29804_v42 }
 0x207   : > { %v10551_v18 = vpop.f32.mrb[130].mxu0  ;;  %v29787_v53 = vsel %vm29566_vm4, -inf, %v11497_v39 }
 0x208   : > { %v11473_v27 = vmul.f32 0.35355338, %v10551_v18  ;;  %v10621_v24 = vpop.f32.mrb[130].mxu1  ;;  %v29781_v54 = vsel %vm29566_vm4, -inf, %v11498_v29  ;;  %v26032_v7 = vpop.f32.mrb[131].mxu0  ;;  %32978 = vst [vmem:[#allocation131_spill] sm:$0xff] %v29787_v53 }
 0x209   : > { %32977 = vst [vmem:[#allocation130_spill] sm:$0xff] %v29781_v54  ;;  %v11474_v28 = vmul.f32 0.35355338, %v10621_v24  ;;  %v26037_v46 = vpop.f32.mrb[131].mxu1  ;;  %v11917_v51 = vsel %vm11529_vm3, %v29781_v54, -inf  ;;  %v11914_v7 = vsel %vm11529_vm3, %v29787_v53, -inf }
 0x20a   : > { %11918 = vmax.xlane.f32.xlu0 %v11917_v51  ;;  %v11499_v41 = vadd.f32 %v29455_v16, %v11473_v27  ;;  %v29800_v51 = vpop.xlane.xlu1 %11681 }
 0x20b   : > { %v11500_v18 = vadd.f32 %v29155_v37, %v11474_v28  ;;  %32980 = vst [vmem:[#allocation133_spill] sm:$0xff] %v29800_v51 }
 0x20c   : > { %v29792_v61 = vpop.f32.mrb[132].mxu0  ;;  %v29808_v28 = vsel %vm29566_vm4, -inf, %v11499_v41 }
 0x20d   : > { %v10761_v29 = vpop.f32.mrb[132].mxu1  ;;  %v29796_v24 = vsel %vm29566_vm4, -inf, %v11500_v18  ;;  %v26042_v46 = vpop.f32.mrb[133].mxu0  ;;  %32982 = vst [vmem:[#allocation135_spill] sm:$0xff] %v29808_v28  ;;  %v10317_v18 = vadd.f32 %v29434_v1, %v10291_v21 }
 0x20e   : > { %32979 = vst [vmem:[#allocation132_spill] sm:$0xff] %v29796_v24  ;;  %v11476_v39 = vmul.f32 0.35355338, %v10761_v29  ;;  %v26047_v54 = vpop.f32.mrb[133].mxu1  ;;  %v11923_v27 = vsel %vm11529_vm3, %v29796_v24, -inf  ;;  %11915 = vmax.xlane.f32.xlu0 %v11914_v7  ;;  %v11920_v29 = vsel %vm11529_vm3, %v29808_v28, -inf  ;;  %v29821_v24 = vpop.xlane.xlu0 %11690 }
 0x20f   : > { %11924 = vmax.xlane.f32.xlu1 %v11923_v27  ;;  %v6711_v27 = vmul.f32 0.35355338, %v29423_v32  ;;  %32984 = vst [vmem:[#allocation137_spill] sm:$0xff] %v29821_v24  ;;  %v29826_v58 = vpop.xlane.xlu1 %11696 }
 0x210   : > { %v11502_v53 = vadd.f32 %v29155_v37, %v11476_v39  ;;  %v7877_v39 = vmul.f32 0.35355338, %v29505_v47  ;;  %32985 = vst [vmem:[#allocation138_spill] sm:$0xff] %v29826_v58  ;;  %v9103_v58 = vmul.f32 0.35355338, %v29584_v36 }
 0x211   : > { %v29812_v46 = vpop.f32.mrb[134].mxu0 }
 0x212   : > { %v10901_v51 = vpop.f32.mrb[134].mxu1  ;;  %v29816_v54 = vsel %vm29566_vm4, -inf, %v11502_v53  ;;  %v26052_v7 = vpop.f32.mrb[135].mxu0  ;;  %v29830_v53 = vsel %vm29566_vm4, -inf, %v10317_v18  ;;  %v29846_v18 = vadd.f32 %v29404_v22, %v7877_v39 }
 0x213   : > { %32983 = vst [vmem:[#allocation136_spill] sm:$0xff] %v29816_v54  ;;  %v11478_v41 = vmul.f32 0.35355338, %v10901_v51  ;;  %v26057_v42 = vpop.f32.mrb[135].mxu1  ;;  %v11929_v21 = vsel %vm11529_vm3, %v29816_v54, -inf  ;;  %11921 = vmax.xlane.f32.xlu1 %v11920_v29  ;;  %32986 = vst [vmem:[#allocation139_spill] sm:$0xff] %v29830_v53  ;;  %v29837_v51 = vadd.f32 %v29382_v55, %v6711_v27  ;;  %v29852_v24 = vpop.xlane.xlu0 %11687 }
 0x214   : > { %11930 = vmax.xlane.f32.xlu0 %v11929_v21  ;;  %v4303_v7 = vmul.f32 0.35355338, %v29203_v43  ;;  %v11878_v47 = vsel %vm11529_vm3, %v29830_v53, -inf  ;;  %32989 = vst [vmem:[#allocation142_spill] sm:$0xff] %v29846_v18  ;;  %32990 = vst [vmem:[#allocation143_spill] sm:$0xff] %v29852_v24  ;;  %v29854_v53 = vpop.xlane.xlu1 %11693 }
 0x215   : > { %v11504_v32 = vadd.f32 %v29155_v37, %v11478_v41  ;;  %32987 = vst [vmem:[#allocation140_spill] sm:$0xff] %v29837_v51  ;;  %32991 = vst [vmem:[#allocation144_spill] sm:$0xff] %v29854_v53 }
 0x216   : > { %v29834_v28 = vpop.f32.mrb[136].mxu0  ;;  %v4329_v27 = vadd.f32 %v29195_v19, %v4303_v7 }
 0x217   : > { %v11041_v42 = vpop.f32.mrb[136].mxu1  ;;  %v29843_v29 = vsel %vm29566_vm4, -inf, %v11504_v32  ;;  %v26062_v21 = vpop.f32.mrb[137].mxu0 }
 0x218   : > { %32988 = vst [vmem:[#allocation141_spill] sm:$0xff] %v29843_v29  ;;  %v11480_v43 = vmul.f32 0.35355338, %v11041_v42  ;;  %v26067_v54 = vpop.f32.mrb[137].mxu1  ;;  %11879 = vmax.xlane.f32.xlu0 %v11878_v47  ;;  %v11935_v41 = vsel %vm11529_vm3, %v29843_v29, -inf  ;;  %v11788_v42 = vsel %vm11529_vm3, %v29846_v18, -inf  ;;  %v9129_v47 = vadd.f32 %v29406_v35, %v9103_v58  ;;  %v29877_v18 = vpop.xlane.xlu1 %11708 }
 0x219   : > { %11936 = vmax.xlane.f32.xlu1 %v11935_v41  ;;  %v11746_v54 = vsel %vm11529_vm3, %v29837_v51, -inf  ;;  %v29872_v51 = vpop.xlane.xlu0 %11702 }
 0x21a   : > { %v11506_v32 = vadd.f32 %v29155_v37, %v11480_v43  ;;  %v29870_v43 = vsel %vm28670_vm2, -inf, %v4329_v27 }
 0x21b   : > { %v29857_v21 = vpop.f32.mrb[138].mxu0  ;;  %32993 = vst [vmem:[#allocation146_spill] sm:$0xff] %v29870_v43  ;;  %v11656_v58 = vsel %vm11529_vm3, %v29870_v43, -inf  ;;  %v5529_v43 = vmul.f32 0.35355338, %v29342_v5 }
 0x21c   : > { %v11181_v39 = vpop.f32.mrb[138].mxu1  ;;  %11747 = vmax.xlane.f32.xlu0 %v11746_v54  ;;  %v26072_v7 = vpop.f32.mrb[139].mxu0  ;;  %v29865_v36 = vsel %vm29566_vm4, -inf, %v11506_v32  ;;  %v11475_v32 = vmul.f32 0.35355338, %v29792_v61 }
 0x21d   : > { %32992 = vst [vmem:[#allocation145_spill] sm:$0xff] %v29865_v36  ;;  %v11482_v41 = vmul.f32 0.35355338, %v11181_v39  ;;  %v26077_v29 = vpop.f32.mrb[139].mxu1  ;;  %11789 = vmax.xlane.f32.xlu1 %v11788_v42  ;;  %v11941_v7 = vsel %vm11529_vm3, %v29865_v36, -inf  ;;  %v29890_v39 = vsel %vm29566_vm4, -inf, %v9129_v47  ;;  %v29897_v24 = vpop.xlane.xlu1 %11720 }
 0x21e   : > { %32995 = vst [vmem:[#allocation148_spill] sm:$0xff] %v29890_v39  ;;  %v3121_v61 = vmul.f32 0.35355338, %v29000_v40  ;;  %v11836_v47 = vsel %vm11529_vm3, %v29890_v39, -inf  ;;  %v29908_v40 = vsel %vm28670_vm2, -inf, %v28772_v38 }
 0x21f   : > { %v11508_v54 = vadd.f32 %v29155_v37, %v11482_v41  ;;  %32996 = vst [vmem:[#allocation149_spill] sm:$0xff] %v29908_v40  ;;  %v649_v39 = vld [vmem:[%s28502_s15 + $0x4c] sm:$0xf] }
 0x220   : > { %v29880_v53 = vpop.f32.mrb[140].mxu0  ;;  %11942 = vmax.xlane.f32.xlu0 %v11941_v7  ;;  %26094 = vmatpush3.xpose.msk.msra.mxu1 %vm710_vm1, %v649_v39 }
 0x221   : > { %v11321_v29 = vpop.f32.mrb[140].mxu1  ;;  %11657 = vmax.xlane.f32.xlu1 %v11656_v58  ;;  %v29886_v27 = vsel %vm29566_vm4, -inf, %v11508_v54  ;;  %v26082_v36 = vpop.f32.mrb[141].mxu0  ;;  %v11501_v58 = vadd.f32 %v29455_v16, %v11475_v32  ;;  %v3147_v32 = vadd.f32 %v28927_v30, %v3121_v61  ;;  %v4305_v61 = vmul.f32 0.35355338, %v29232_v63  ;;  %26103 = vmatprep.subr.mxu1 %v32861_v6 }
 0x222   : > { %32994 = vst [vmem:[#allocation147_spill] sm:$0xff] %v29886_v27  ;;  %v11484_v42 = vmul.f32 0.35355338, %v11321_v29  ;;  %v26087_v41 = vpop.f32.mrb[141].mxu1  ;;  %v11947_v7 = vsel %vm11529_vm3, %v29886_v27, -inf  ;;  %v29903_v36 = vpop.xlane.xlu0 %11699 }
 0x223   : > { %v10293_v29 = vmul.f32 0.35355338, %v29702_v8  ;;  %v11566_v8 = vsel %vm11529_vm3, %v29908_v40, -inf  ;;  %v29924_v38 = vsel %vm29566_vm4, -inf, %v11501_v58 }
 0x224   : > { %v11510_v54 = vadd.f32 %v29155_v37, %v11484_v42  ;;  %11948 = vmax.xlane.f32.xlu0 %v11947_v7  ;;  %v29918_v42 = vadd.f32 %v29309_v62, %v5529_v43  ;;  %32999 = vst [vmem:[#allocation152_spill] sm:$0xff] %v29924_v38  ;;  %v29927_v7 = vpop.xlane.xlu1 %11726  ;;  %v11926_v43 = vsel %vm11529_vm3, %v29924_v38, -inf  ;;  %v4331_v38 = vadd.f32 %v29195_v19, %v4305_v61 }
 0x225   : > { %11837 = vmax.xlane.f32.xlu1 %v11836_v47  ;;  %v10319_v41 = vadd.f32 %v29434_v1, %v10293_v29  ;;  %v29940_v29 = vsel %vm28670_vm2, -inf, %v3147_v32 }
 0x226   : > { %v29912_v5 = vsel %vm29566_vm4, -inf, %v11510_v54  ;;  %32998 = vst [vmem:[#allocation151_spill] sm:$0xff] %v29918_v42  ;;  %v7879_v54 = vmul.f32 0.35355338, %v29522_v20  ;;  %v29930_v47 = vpop.xlane.xlu0 %11714  ;;  %v11704_v58 = vsel %vm11529_vm3, %v29918_v42, -inf  ;;  %33000 = vst [vmem:[#allocation153_spill] sm:$0xff] %v29940_v29  ;;  %v11962_v42 = vmax.f32 %v29457_v45, %v29639_v3 }
 0x227   : > { %32997 = vst [vmem:[#allocation150_spill] sm:$0xff] %v29912_v5  ;;  %v11953_v37 = vsel %vm11529_vm3, %v29912_v5, -inf  ;;  %v11477_v20 = vmul.f32 0.35355338, %v29812_v46  ;;  %v9105_v46 = vmul.f32 0.35355338, %v29599_v34 }
 0x228   : > { %11954 = vmax.xlane.f32.xlu0 %v11953_v37  ;;  %v6713_v37 = vmul.f32 0.35355338, %v29436_v11  ;;  %v29948_v63 = vadd.f32 %v29404_v22, %v7879_v54  ;;  %v3123_v54 = vmul.f32 0.35355338, %v29032_v2  ;;  %v29976_v2 = vsel %vm28670_vm2, -inf, %v4331_v38  ;;  %v33030_v45 = vld [vmem:[#allocation74_spill] sm:$0xff] }
 0x229   : > { %11567 = vmax.xlane.f32.xlu1 %v11566_v8  ;;  %v29945_v8 = vsel %vm29566_vm4, -inf, %v10319_v41  ;;  %v11503_v5 = vadd.f32 %v29455_v16, %v11477_v20  ;;  %v9131_v34 = vadd.f32 %v29406_v35, %v9105_v46  ;;  %33004 = vst [vmem:[#allocation157_spill] sm:$0xff] %v29976_v2  ;;  %v27450_v46 = vld [vmem:[%s27632_s12 + $0x3c] sm:$0xf]  ;;  %v7881_v38 = vmul.f32 0.35355338, %v29535_v14 }
 0x22a   : > { %33001 = vst [vmem:[#allocation154_spill] sm:$0xff] %v29945_v8  ;;  %33002 = vst [vmem:[#allocation155_spill] sm:$0xff] %v29948_v63  ;;  %v29950_v11 = vpop.xlane.xlu0 %11723  ;;  %v29956_v32 = vadd.f32 %v29382_v55, %v6713_v37  ;;  %v11884_v41 = vsel %vm11529_vm3, %v29945_v8, -inf  ;;  %v11794_v19 = vsel %vm11529_vm3, %v29948_v63, -inf  ;;  %v3149_v20 = vadd.f32 %v28927_v30, %v3123_v54  ;;  %26096 = vmatmul.mubr.msk.f32.vlgmr.msra.gmra.mrb[142].mxu1 %vm710_vm1, %v27450_v46  ;;  %v648_v54 = vld [vmem:[%s28502_s15 + $0x48] sm:$0xf]  ;;  %s30853_s15 = scalar_lea.vmem %s32669_s6, %s33134_s21 }
 0x22b   : > { %v29984_v39 = vsel %vm29566_vm4, -inf, %v11503_v5  ;;  %v11662_v30 = vsel %vm11529_vm3, %v29976_v2, -inf  ;;  %26105 = vmatprep.mubr.msk.f32.mxu1 %vm27496_vm0, %v32861_v6  ;;  %26089 = vmatpush3.xpose.msk.msra.mxu0 %vm710_vm1, %v648_v54  ;;  %v30015_v14 = vld [vmem:[%s29993_s18 + $0xc] sm:$0xf]  ;;  %v9107_v8 = vmul.f32 0.35355338, %v29618_v13 }
 0x22c   : > { %11927 = vmax.xlane.f32.xlu0 %v11926_v43  ;;  %v11614_v43 = vsel %vm11529_vm3, %v29940_v29, -inf  ;;  %33003 = vst [vmem:[#allocation156_spill] sm:$0xff] %v29956_v32  ;;  %v11752_v37 = vsel %vm11529_vm3, %v29956_v32, -inf  ;;  %33005 = vst [vmem:[#allocation158_spill] sm:$0xff] %v29984_v39  ;;  %v11932_v5 = vsel %vm11529_vm3, %v29984_v39, -inf  ;;  %26098 = vmatprep.subr.mxu0 %v32861_v6  ;;  %v33035_v29 = vld [vmem:[#allocation69_spill] sm:$0xff] }
 0x22d   : > { %11705 = vmax.xlane.f32.xlu1 %v11704_v58  ;;  %v29959_v58 = vpop.xlane.xlu1 %11732  ;;  %26104 = vmatpush3.msk.msra.mxu1 %vm12318_vm5, %v30015_v14  ;;  %v27451_v39 = vld [vmem:[%s27632_s12 + $0x38] sm:$0xf]  ;;  %v7883_v32 = vmul.f32 0.35355338, %v29544_v31  ;;  %v6717_v31 = vmul.f32 0.35355338, %v29466_v10 }
 0x22e   : > { %26091 = vmatmul.mubr.msk.f32.vlgmr.msra.gmra.mrb[142].mxu0 %vm710_vm1, %v27451_v39  ;;  %26113 = vmatprep.subr.mxu1 %v32861_v6 }
 0x22f   : > { %26100 = vmatprep.mubr.msk.f32.mxu0 %vm27496_vm0, %v32861_v6 }
 0x230   : > { %11615 = vmax.xlane.f32.xlu0 %v11614_v43  ;;  %v29980_v43 = vpop.xlane.xlu0 %11729 }
 0x231   : > { %11885 = vmax.xlane.f32.xlu1 %v11884_v41  ;;  %v29970_v61 = vpop.xlane.xlu1 %11744  ;;  %v30004_v41 = vsel %vm29566_vm4, -inf, %v9131_v34  ;;  %v5531_v34 = vmul.f32 0.35355338, %v29356_v12  ;;  %v30034_v12 = vsel %vm28670_vm2, -inf, %v28805_v56 }
 0x232   : > { %33006 = vst [vmem:[#allocation159_spill] sm:$0xff] %v30004_v41  ;;  %33009 = vst [vmem:[#allocation162_spill] sm:$0xff] %v30034_v12  ;;  %v11572_v49 = vsel %vm11529_vm3, %v30034_v12, -inf }
 0x234   : > { %11795 = vmax.xlane.f32.xlu0 %v11794_v19  ;;  %v30009_v19 = vsel %vm28670_vm2, -inf, %v3149_v20  ;;  %v30019_v46 = vpop.xlane.xlu0 %11738  ;;  %v30026_v20 = vadd.f32 %v29404_v22, %v7881_v38  ;;  %v652_v38 = vld [vmem:[%s29993_s18 + $0x8] sm:$0xf] }
 0x235   : > { %11753 = vmax.xlane.f32.xlu1 %v11752_v37  ;;  %33007 = vst [vmem:[#allocation160_spill] sm:$0xff] %v30009_v19  ;;  %v30012_v37 = vpop.xlane.xlu1 %11741  ;;  %v11620_v54 = vsel %vm11529_vm3, %v30009_v19, -inf  ;;  %26099 = vmatpush3.msk.msra.mxu0 %vm12318_vm5, %v652_v38 }
 0x236   : > { %33008 = vst [vmem:[#allocation161_spill] sm:$0xff] %v30026_v20  ;;  %v11800_v13 = vsel %vm11529_vm3, %v30026_v20, -inf  ;;  %26108 = vmatprep.subr.mxu0 %v32861_v6  ;;  %v33012_v20 = vmov -inf  }
 0x238   : > { %11663 = vmax.xlane.f32.xlu0 %v11662_v30  ;;  %v11842_v30 = vsel %vm11529_vm3, %v30004_v41, -inf  ;;  %v11479_v41 = vmul.f32 0.35355338, %v29834_v28 }
 0x239   : > { %11933 = vmax.xlane.f32.xlu1 %v11932_v5  ;;  %v10295_v5 = vmul.f32 0.35355338, %v29715_v17  ;;  %v30044_v17 = vadd.f32 %v29309_v62, %v5531_v34  ;;  %v30050_v39 = vpop.xlane.xlu1 %11756  ;;  %v6715_v34 = vmul.f32 0.35355338, %v29450_v50 }
 0x23b   : > { %33010 = vst [vmem:[#allocation163_spill] sm:$0xff] %v30044_v17  ;;  %v10321_v56 = vadd.f32 %v29434_v1, %v10295_v5  ;;  %v11710_v38 = vsel %vm11529_vm3, %v30044_v17, -inf  ;;  %v5533_v5 = vmul.f32 0.35355338, %v29371_v57 }
 0x23c   : > { %11843 = vmax.xlane.f32.xlu0 %v11842_v30  ;;  %v9133_v30 = vadd.f32 %v29406_v35, %v9107_v8  ;;  %v10297_v8 = vmul.f32 0.35355338, %v29728_v9 }
 0x23d   : > { %11621 = vmax.xlane.f32.xlu1 %v11620_v54  ;;  %v30056_v54 = vpop.xlane.xlu0 %11735  ;;  %v30067_v27 = vsel %vm29566_vm4, -inf, %v10321_v56  ;;  %v11505_v56 = vadd.f32 %v29455_v16, %v11479_v41 }
 0x23e   : > { %33011 = vst [vmem:[#allocation164_spill] sm:$0xff] %v30067_v27  ;;  %v30073_v50 = vsel %vm29566_vm4, -inf, %v9133_v30  ;;  %v11890_v28 = vsel %vm11529_vm3, %v30067_v27, -inf  ;;  %v9109_v30 = vmul.f32 0.35355338, %v29631_v52  ;;  %v10323_v63 = vadd.f32 %v29434_v1, %v10297_v8 }
 0x23f   : > { %33013 = vst [vmem:[#allocation165_spill] sm:$0xff] %v30073_v50  ;;  %v11848_v9 = vsel %vm11529_vm3, %v30073_v50, -inf }
 0x240   : > { %11573 = vmax.xlane.f32.xlu0 %v11572_v49  ;;  %v30063_v49 = vpop.xlane.xlu1 %11774  ;;  %v9135_v52 = vadd.f32 %v29406_v35, %v9109_v30  ;;  %v30106_v8 = vsel %vm29566_vm4, -inf, %v10323_v63  ;;  %v9111_v30 = vmul.f32 0.35355338, %v29644_v15 }
 0x241   : > { %11801 = vmax.xlane.f32.xlu1 %v11800_v13  ;;  %v30076_v13 = vadd.f32 %v29382_v55, %v6715_v34  ;;  %v30078_v57 = vpop.xlane.xlu0 %11750  ;;  %33017 = vst [vmem:[#allocation169_spill] sm:$0xff] %v30106_v8 }
 0x242   : > { %v30122_v10 = vsel %vm29566_vm4, -inf, %v9135_v52  ;;  %v9137_v15 = vadd.f32 %v29406_v35, %v9111_v30 }
 0x243   : > { %33014 = vst [vmem:[#allocation166_spill] sm:$0xff] %v30076_v13  ;;  %33019 = vst [vmem:[#allocation171_spill] sm:$0xff] %v30122_v10 }
 0x244   : > { %11711 = vmax.xlane.f32.xlu0 %v11710_v38  ;;  %v30083_v38 = vadd.f32 %v29309_v62, %v5533_v5  ;;  %v30090_v34 = vpop.xlane.xlu1 %11780  ;;  %v11758_v62 = vsel %vm11529_vm3, %v30076_v13, -inf  ;;  %v30101_v5 = vsel %vm29566_vm4, -inf, %v11505_v56  ;;  %v11896_v56 = vsel %vm11529_vm3, %v30106_v8, -inf }
 0x245   : > { %11669 = vmax.xlane.f32.xlu1 %v33012_v20  ;;  %v30093_v17 = vpop.xlane.xlu0 %11762  ;;  %33016 = vst [vmem:[#allocation168_spill] sm:$0xff] %v30101_v5 }
 0x246   : > { %33015 = vst [vmem:[#allocation167_spill] sm:$0xff] %v30083_v38  ;;  %v11716_v41 = vsel %vm11529_vm3, %v30083_v38, -inf }
 0x248   : > { %11891 = vmax.xlane.f32.xlu0 %v11890_v28  ;;  %v30110_v28 = vadd.f32 %v29404_v22, %v7883_v32  ;;  %v30115_v27 = vpop.xlane.xlu1 %11777  ;;  %v30125_v22 = vadd.f32 %v29382_v55, %v6717_v31  ;;  %v10299_v32 = vmul.f32 0.35355338, %v29741_v60 }
 0x249   : > { %11849 = vmax.xlane.f32.xlu1 %v11848_v9  ;;  %v11938_v9 = vsel %vm11529_vm3, %v30101_v5, -inf  ;;  %v11769_v63 = vpop.xlane.xlu0 %11768 }
 0x24a   : > { %33018 = vst [vmem:[#allocation170_spill] sm:$0xff] %v30110_v28  ;;  %33020 = vst [vmem:[#allocation172_spill] sm:$0xff] %v30125_v22  ;;  %v11764_v31 = vsel %vm11529_vm3, %v30125_v22, -inf  ;;  %v10325_v60 = vadd.f32 %v29434_v1, %v10299_v32 }
 0x24c   : > { %11759 = vmax.xlane.f32.xlu0 %v11758_v62  ;;  %v11481_v62 = vmul.f32 0.35355338, %v29857_v21  ;;  %v11806_v21 = vsel %vm11529_vm3, %v30110_v28, -inf  ;;  %v30135_v52 = vpop.xlane.xlu1 %11792 }
 0x24d   : > { %11717 = vmax.xlane.f32.xlu1 %v11716_v41  ;;  %v30137_v55 = vpop.xlane.xlu0 %11771 }
 0x24e   : > { %v11507_v41 = vadd.f32 %v29455_v16, %v11481_v62  ;;  %v11483_v62 = vmul.f32 0.35355338, %v29880_v53 }
 0x250   : > { %11939 = vmax.xlane.f32.xlu0 %v11938_v9  ;;  %v11854_v9 = vsel %vm11529_vm3, %v30122_v10, -inf  ;;  %v30153_v30 = vpop.xlane.xlu1 %11804  ;;  %v11509_v32 = vadd.f32 %v29455_v16, %v11483_v62  ;;  %v11963_v10 = vmax.f32 %v29363_v25, %v29556_v44  ;;  %v33027_v25 = vld [vmem:[#allocation87_spill] sm:$0xff] }
 0x251   : > { %11897 = vmax.xlane.f32.xlu1 %v11896_v56  ;;  %v10301_v56 = vmul.f32 0.35355338, %v29754_v33  ;;  %v30151_v33 = vsel %vm29566_vm4, -inf, %v9137_v15 }
 0x252   : > { %33022 = vst [vmem:[#allocation174_spill] sm:$0xff] %v30151_v33  ;;  %v30176_v62 = vsel %vm29566_vm4, -inf, %v11509_v32  ;;  %v11979_v28 = vmax.f32 %v11963_v10, %v29663_v0  ;;  %v33029_v10 = vld [vmem:[#allocation60_spill] sm:$0xff] }
 0x253   : > { %v10327_v35 = vadd.f32 %v29434_v1, %v10301_v56  ;;  %v30164_v1 = vsel %vm29566_vm4, -inf, %v10325_v60  ;;  %33025 = vst [vmem:[#allocation177_spill] sm:$0xff] %v30176_v62  ;;  %v11950_v60 = vsel %vm11529_vm3, %v30176_v62, -inf }
 0x254   : > { %11807 = vmax.xlane.f32.xlu0 %v11806_v21  ;;  %v30145_v21 = vsel %vm29566_vm4, -inf, %v11507_v41  ;;  %v11860_v41 = vsel %vm11529_vm3, %v30151_v33, -inf  ;;  %33023 = vst [vmem:[#allocation175_spill] sm:$0xff] %v30164_v1  ;;  %v11829_v56 = vpop.xlane.xlu1 %11828 }
 0x255   : > { %11855 = vmax.xlane.f32.xlu1 %v11854_v9  ;;  %33021 = vst [vmem:[#allocation173_spill] sm:$0xff] %v30145_v21  ;;  %v30155_v9 = vpop.xlane.xlu0 %11786  ;;  %v11944_v53 = vsel %vm11529_vm3, %v30145_v21, -inf  ;;  %v30168_v15 = vsel %vm29566_vm4, -inf, %v10327_v35 }
 0x256   : > { %33024 = vst [vmem:[#allocation176_spill] sm:$0xff] %v30168_v15  ;;  %v11908_v16 = vsel %vm11529_vm3, %v30168_v15, -inf }
 0x258   : > { %11765 = vmax.xlane.f32.xlu0 %v11764_v31  ;;  %v11902_v31 = vsel %vm11529_vm3, %v30164_v1, -inf  ;;  %v30182_v35 = vpop.xlane.xlu1 %11825 }
 0x259   : > { %11813 = vmax.xlane.f32.xlu1 %v33012_v20 }
 0x25c   : > { %11945 = vmax.xlane.f32.xlu0 %v11944_v53  ;;  %v30178_v53 = vpop.xlane.xlu0 %11783  ;;  %v30187_v5 = vpop.xlane.xlu1 %11840 }
 0x25d   : > { %11861 = vmax.xlane.f32.xlu1 %v11860_v41 }
 0x260   : > { %11903 = vmax.xlane.f32.xlu0 %v11902_v31  ;;  %v30184_v41 = vpop.xlane.xlu0 %11798 }
 0x261   : > { %11909 = vmax.xlane.f32.xlu1 %v11908_v16  ;;  %v30191_v4 = vpop.xlane.xlu1 %11852 }
 0x264   : > { %11951 = vmax.xlane.f32.xlu0 %v11950_v60  ;;  %v30189_v31 = vpop.xlane.xlu0 %11810 }
 0x266   : > { %v30195_v21 = vpop.xlane.xlu1 %11858 }
 0x268   : > { %11957 = vmax.xlane.f32.xlu0 %v33012_v20  ;;  %v30193_v32 = vpop.xlane.xlu0 %11834  ;;  %v11977_v20 = vmax.f32 %v29628_v59, %v29650_v48  ;;  %v11978_v59 = vmax.f32 %v11962_v42, %v29679_v26  ;;  %v33026_v48 = vld [vmem:[#allocation56_spill] sm:$0xff] }
 0x269   : > { %v11995_v38 = vmax.f32 %v11979_v28, %v33026_v48 }
 0x26a   : > { %v11993_v50 = vmax.f32 %v11977_v20, %v29427_v23  ;;  %v33028_v23 = vld [vmem:[#allocation79_spill] sm:$0xff]  ;;  %v11994_v3 = vmax.f32 %v11978_v59, %v33030_v45 }
 0x26b   : > { %v11865_v62 = vpop.xlane.xlu1 %11864  ;;  %v12011_v12 = vmax.f32 %v11995_v38, %v29927_v7  ;;  %v11965_v0 = vmax.f32 %v33028_v23, %v33027_v25  ;;  %v33032_v7 = vld [vmem:[#allocation129_spill] sm:$0xff] }
 0x26c   : > { %v30197_v16 = vpop.xlane.xlu0 %11831  ;;  %v12009_v13 = vmax.f32 %v11993_v50, %v29897_v24  ;;  %v12010_v42 = vmax.f32 %v11994_v3, %v29950_v11  ;;  %v33037_v11 = vld [vmem:[#allocation122_spill] sm:$0xff] }
 0x26e   : > { %v12025_v40 = vmax.f32 %v12009_v13, %v11769_v63  ;;  %v12027_v13 = vmax.f32 %v12011_v12, %v30063_v49  ;;  %v33031_v63 = vld [vmem:[#allocation119_spill] sm:$0xff]  ;;  %v12026_v25 = vmax.f32 %v12010_v42, %v30137_v55  ;;  %v33036_v49 = vld [vmem:[#allocation70_spill] sm:$0xff]  ;;  %v33040_v55 = vld [vmem:[#allocation64_spill] sm:$0xff] }
 0x26f   : > { %v11981_v20 = vmax.f32 %v11965_v0, %v33031_v63  ;;  %v33038_v63 = vld [vmem:[#allocation89_spill] sm:$0xff] }
 0x270   : > { %v30199_v15 = vpop.xlane.xlu0 %11846  ;;  %v12041_v24 = vmax.f32 %v12025_v40, %v33029_v10  ;;  %v33033_v40 = vld [vmem:[#allocation66_spill] sm:$0xff]  ;;  %v33034_v10 = vld [vmem:[#allocation92_spill] sm:$0xff]  ;;  %v12042_v42 = vmax.f32 %v12026_v25, %v33040_v55 }
 0x271   : > { %v11997_v38 = vmax.f32 %v11981_v20, %v33032_v7  ;;  %v12043_v23 = vmax.f32 %v12027_v13, %v33033_v40  ;;  %v11967_v59 = vmax.f32 %v33035_v29, %v33034_v10  ;;  %v33039_v20 = vld [vmem:[#allocation82_spill] sm:$0xff] }
 0x272   : > { %v12057_v26 = vmax.f32 %v12041_v24, %v11865_v62 }
 0x273   : > { %v12013_v12 = vmax.f32 %v11997_v38, %v29959_v58  ;;  %v11983_v24 = vmax.f32 %v11967_v59, %v33037_v11  ;;  %v33042_v58 = vld [vmem:[#allocation13_spill] sm:$0xff]  ;;  %v33043_v38 = vld [vmem:[#allocation112_spill] sm:$0xff] }
 0x274   : > { %v11871_v1 = vpop.xlane.xlu0 %11870 }
 0x275   : > { %v11877_v60 = vpop.xlane.xlu1 %11876  ;;  %v12059_v62 = vmax.f32 %v12043_v23, %v11871_v1  ;;  %v12029_v45 = vmax.f32 %v12013_v12, %v30090_v34  ;;  %v33044_v23 = vld [vmem:[#allocation14_spill] sm:$0xff] }
 0x277   : > { %v12045_v7 = vmax.f32 %v12029_v45, %v11829_v56 }
 0x278   : > { %v11868_v33 = vpop.xlane.xlu0 %11867 }
 0x279   : > { %v30203_v8 = vpop.xlane.xlu1 %11873  ;;  %v12058_v40 = vmax.f32 %v12042_v42, %v11868_v33  ;;  %v12061_v59 = vmax.f32 %v12045_v7, %v11877_v60  ;;  %v33048_v33 = vld [vmem:[#allocation85_spill] sm:$0xff]  ;;  %v33049_v60 = vld [vmem:[#allocation15_spill] sm:$0xff]  ;;  %v33050_v42 = vld [vmem:[#allocation16_spill] sm:$0xff] }
 0x27a   : > { %v33051_v7 = vld [vmem:[#allocation120_spill] sm:$0xff] }
 0x27c   : > { %v11883_v22 = vpop.xlane.xlu0 %11882 }
 0x27f   : > { %v30212_v2 = vpop.xlane.xlu1 %11888 }
 0x284   : > { %v30222_v50 = vpop.xlane.xlu0 %11894 }
 0x289   : > { %v30217_v44 = vpop.xlane.xlu1 %11900 }
 0x28e   : > { %v30229_v48 = vpop.xlane.xlu0 %11906 }
 0x292   : > { %v11913_v28 = vpop.xlane.xlu1 %11912 }
 0x293   : > { %v12073_v19 = vmax.f32 %v12057_v26, %v11913_v28  ;;  %v11964_v26 = vmax.f32 %v33039_v20, %v33038_v63  ;;  %v33041_v28 = vld [vmem:[#allocation137_spill] sm:$0xff]  ;;  %v33047_v63 = vld [vmem:[#allocation106_spill] sm:$0xff] }
 0x294   : > { %v11999_v29 = vmax.f32 %v11983_v24, %v33041_v28  ;;  %v11969_v20 = vmax.f32 %v33048_v33, %v33047_v63  ;;  %v30286_v33 = vld [vmem:[%s29993_s18 + $0x14] sm:$0xf] }
 0x295   : > { %v30237_v0 = vmax.f32 %v12073_v19, %v33036_v49  ;;  %v11980_v1 = vmax.f32 %v11964_v26, %v33043_v38  ;;  %v33045_v49 = vld [vmem:[#allocation133_spill] sm:$0xff] }
 0x296   : > { %v12015_v10 = vmax.f32 %v11999_v29, %v30019_v46 }
 0x297   : > { %v11919_v3 = vpop.xlane.xlu0 %11918  ;;  %v12105_v19 = vsub.f32 %v33042_v58, %v30237_v0  ;;  %v11996_v25 = vmax.f32 %v11980_v1, %v33045_v49  ;;  %v11985_v58 = vmax.f32 %v11969_v20, %v33051_v7  ;;  %v30313_v7 = vld [vmem:[%s29993_s18 + $0x1c] sm:$0xf] }
 0x298   : > { %v30244_v13 = vmax.f32 %v12059_v62, %v11919_v3  ;;  %v12031_v56 = vmax.f32 %v12015_v10, %v30155_v9 }
 0x299   : > { %v12136_v45 = vmul.f32 1.442695, %v12105_v19  ;;  %v12012_v26 = vmax.f32 %v11996_v25, %v29980_v43 }
 0x29a   : > { %v12203_v34 = vsub.f32 %v33044_v23, %v30244_v13  ;;  %v12047_v46 = vmax.f32 %v12031_v56, %v30193_v32  ;;  %v33056_v56 = vld [vmem:[#allocation125_spill] sm:$0xff] }
 0x29b   : > { %v11916_v12 = vpop.xlane.xlu0 %11915  ;;  %v12028_v29 = vmax.f32 %v12012_v26, %v30115_v27  ;;  %v33054_v27 = vld [vmem:[#allocation77_spill] sm:$0xff] }
 0x29c   : > { %v12220_v62 = vmul.f32 1.442695, %v12203_v34  ;;  %v11925_v11 = vpop.xlane.xlu1 %11924  ;;  %v30254_v3 = vmax.f32 %v12058_v40, %v11916_v12  ;;  %v12063_v19 = vmax.f32 %v12047_v46, %v11883_v22  ;;  %v33052_v40 = vld [vmem:[#allocation138_spill] sm:$0xff]  ;;  %v33055_v22 = vld [vmem:[#allocation20_spill] sm:$0xff] }
 0x29d   : > { %v30257_v24 = vmax.f32 %v12061_v59, %v11925_v11  ;;  %v12044_v43 = vmax.f32 %v12028_v29, %v30182_v35  ;;  %v12001_v32 = vmax.f32 %v11985_v58, %v33052_v40  ;;  %v33053_v59 = vld [vmem:[#allocation109_spill] sm:$0xff]  ;;  %v33060_v58 = vld [vmem:[#allocation91_spill] sm:$0xff] }
 0x29e   : > { %33046 = vst [vmem:[#allocation56_spill] sm:$0xff] %v30254_v3  ;;  %27130 = vpow2.f32 %v12220_v62  ;;  %v12202_v28 = vsub.f32 %v33050_v42, %v30254_v3  ;;  %v11971_v12 = vmax.f32 %v33054_v27, %v33053_v59 }
 0x29f   : > { %v12205_v55 = vsub.f32 %v33049_v60, %v30257_v24  ;;  %27132 = vpow2.f32 %v12136_v45  ;;  %v12060_v10 = vmax.f32 %v12044_v43, %v30203_v8  ;;  %v12017_v49 = vmax.f32 %v12001_v32, %v29970_v61  ;;  %v33057_v60 = vld [vmem:[#allocation17_spill] sm:$0xff] }
 0x2a0   : > { %v11922_v9 = vpop.xlane.xlu1 %11921  ;;  %v12218_v23 = vmul.f32 1.442695, %v12202_v28  ;;  %v11987_v45 = vmax.f32 %v11971_v12, %v33056_v56  ;;  %v30354_v56 = vld [vmem:[%s29993_s18 + $0x24] sm:$0xf] }
 0x2a1   : > { %v12224_v38 = vmul.f32 1.442695, %v12205_v55  ;;  %v11931_v1 = vpop.xlane.xlu0 %11930  ;;  %v30281_v35 = vmax.f32 %v12060_v10, %v11922_v9  ;;  %v12033_v63 = vmax.f32 %v12017_v49, %v30135_v52 }
 0x2a2   : > { %v30271_v34 = vmax.f32 %v12063_v19, %v11931_v1  ;;  %v12003_v61 = vmax.f32 %v11987_v45, %v29872_v51 }
 0x2a3   : > { %27134 = vpow2.f32 %v12224_v38  ;;  %v12049_v26 = vmax.f32 %v12033_v63, %v30187_v5  ;;  %v12204_v55 = vsub.f32 %v33057_v60, %v30281_v35  ;;  %v33064_v63 = vld [vmem:[#allocation117_spill] sm:$0xff] }
 0x2a4   : > { %v12207_v25 = vsub.f32 %v33055_v22, %v30271_v34  ;;  %27136 = vpow2.f32 %v12218_v23  ;;  %v12019_v28 = vmax.f32 %v12003_v61, %v30078_v57  ;;  %v30328_v23 = vld [vmem:[%s29993_s18 + $0x10] sm:$0xf] }
 0x2a5   : > { %v30279_v62 = vpop.xlane.xlu0 %11879  ;;  %v12065_v29 = vmax.f32 %v12049_v26, %v30212_v2  ;;  %v33059_v2 = vld [vmem:[#allocation99_spill] sm:$0xff]  ;;  %v12222_v38 = vmul.f32 1.442695, %v12204_v55  ;;  %v33066_v55 = vld [vmem:[#allocation21_spill] sm:$0xff] }
 0x2a6   : > { %v11937_v11 = vpop.xlane.xlu1 %11936  ;;  %v12228_v8 = vmul.f32 1.442695, %v12207_v25  ;;  %v12035_v51 = vmax.f32 %v12019_v28, %v30184_v41  ;;  %v11973_v19 = vmax.f32 %v33060_v58, %v33059_v2  ;;  %v33061_v41 = vld [vmem:[#allocation127_spill] sm:$0xff] }
 0x2a7   : > { %v30310_v5 = vmax.f32 %v12065_v29, %v11937_v11 }
 0x2a8   : > { %v30288_v20 = vpop.eup %27130  ;;  %27138 = vpow2.f32 %v12228_v8  ;;  %v12051_v40 = vmax.f32 %v12035_v51, %v30199_v15  ;;  %v11989_v32 = vmax.f32 %v11973_v19, %v33061_v41  ;;  %v33062_v15 = vld [vmem:[#allocation19_spill] sm:$0xff]  ;;  %v33065_v8 = vld [vmem:[#allocation84_spill] sm:$0xff] }
 0x2a9   : > { %v30292_v46 = vpop.xlane.xlu0 %11747  ;;  %26106 = vmatmul.mubr.msk.f32.vlgmr.msra.gmra.mrb[144].mxu1 %vm12314_vm6, %v30288_v20  ;;  %v30300_v52 = vpop.eup %27132  ;;  %v12209_v27 = vsub.f32 %v33062_v15, %v30310_v5  ;;  %27140 = vpow2.f32 %v12222_v38  ;;  %v11975_v61 = vmax.f32 %v33065_v8, %v33064_v63  ;;  %v30379_v38 = vld [vmem:[%s29993_s18 + $0x18] sm:$0xf]  ;;  %v33070_v15 = vld [vmem:[#allocation104_spill] sm:$0xff]  ;;  %v33073_v63 = vld [vmem:[#allocation115_spill] sm:$0xff] }
 0x2aa   : > { %v30296_v42 = vpop.xlane.xlu1 %11789  ;;  %26114 = vmatpush3.msk.msra.mxu1 %vm12318_vm5, %v30286_v33  ;;  %26115 = vmatprep.mubr.msk.f32.mxu1 %vm27496_vm0, %v32861_v6  ;;  %v12183_v1 = vsel %vm11529_vm3, %v30300_v52, 0.0  ;;  %v12067_v59 = vmax.f32 %v12051_v40, %v30222_v50  ;;  %v12005_v49 = vmax.f32 %v11989_v32, %v29877_v18 }
 0x2ab   : > { %26123 = vmatprep.subr.mxu1 %v32861_v6  ;;  %12184 = vadd.xlane.f32.xlu0 %v12183_v1  ;;  %v12232_v11 = vmul.f32 1.442695, %v12209_v27  ;;  %v33071_v27 = vld [vmem:[#allocation72_spill] sm:$0xff] }
 0x2ac   : > { %v12021_v50 = vmax.f32 %v12005_v49, %v30050_v39  ;;  %v33067_v39 = vld [vmem:[#allocation134_spill] sm:$0xff]  ;;  %v33072_v49 = vld [vmem:[#allocation23_spill] sm:$0xff] }
 0x2ad   : > { %v11943_v9 = vpop.xlane.xlu0 %11942  ;;  %v30315_v57 = vpop.eup %27134  ;;  %v11991_v29 = vmax.f32 %v11975_v61, %v33067_v39  ;;  %27142 = vpow2.f32 %v12232_v11 }
 0x2ae   : > { %33058 = vst [vmem:[#allocation87_spill] sm:$0xff] %v30315_v57  ;;  %v30321_v43 = vpop.xlane.xlu1 %11657  ;;  %26116 = vmatmul.mubr.msk.f32.vlgmr.msra.gmra.mrb[146].mxu1 %vm12314_vm6, %v30315_v57  ;;  %v30334_v10 = vpop.eup %27136  ;;  %v30345_v25 = vmax.f32 %v12067_v59, %v11943_v9  ;;  %v12037_v26 = vmax.f32 %v12021_v50, %v30153_v30 }
 0x2af   : > { %26124 = vmatpush3.msk.msra.mxu1 %vm12318_vm5, %v30313_v7  ;;  %26125 = vmatprep.mubr.msk.f32.mxu1 %vm27496_vm0, %v32861_v6  ;;  %v12007_v9 = vmax.f32 %v11991_v29, %v29930_v47 }
 0x2b0   : > { %26133 = vmatprep.subr.mxu1 %v32861_v6  ;;  %26101 = vmatmul.mubr.msk.f32.vlgmr.msra.gmra.mrb[144].mxu0 %vm12314_vm6, %v30334_v10  ;;  %v12211_v28 = vsub.f32 %v33066_v55, %v30345_v25  ;;  %v12053_v51 = vmax.f32 %v12037_v26, %v30191_v4  ;;  %v30411_v55 = vld [vmem:[%s29993_s18 + $0x2c] sm:$0xf] }
 0x2b1   : > { %v11949_v12 = vpop.xlane.xlu0 %11948  ;;  %26109 = vmatpush3.msk.msra.mxu0 %vm12318_vm5, %v30328_v23  ;;  %26110 = vmatprep.mubr.msk.f32.mxu0 %vm27496_vm0, %v32861_v6  ;;  %v12023_v1 = vmax.f32 %v12007_v9, %v30093_v17  ;;  %v14721_v17 = vsub.f32 -inf, %v30237_v0 }
 0x2b2   : > { %v30343_v22 = vpop.xlane.xlu1 %11837  ;;  %26118 = vmatprep.subr.mxu0 %v32861_v6  ;;  %v30356_v45 = vpop.eup %27138  ;;  %v12069_v2 = vmax.f32 %v12053_v51, %v30217_v44  ;;  %v12236_v19 = vmul.f32 1.442695, %v12211_v28  ;;  %v33069_v44 = vld [vmem:[#allocation27_spill] sm:$0xff] }
 0x2b3   : > { %33063 = vst [vmem:[#allocation79_spill] sm:$0xff] %v30356_v45  ;;  %26126 = vmatmul.mubr.msk.f32.vlgmr.msra.gmra.mrb[148].mxu1 %vm12314_vm6, %v30356_v45  ;;  %v30381_v4 = vpop.eup %27140  ;;  %v12039_v47 = vmax.f32 %v12023_v1, %v30189_v31  ;;  %v12217_v32 = vsub.f32 %v33069_v44, %v30237_v0  ;;  %v14752_v29 = vmul.f32 1.442695, %v14721_v17  ;;  %v33075_v51 = vld [vmem:[#allocation143_spill] sm:$0xff]  ;;  %v30507_v45 = vld [vmem:[%s29993_s18 + $0x44] sm:$0xf] }
 0x2b4   : > { %26134 = vmatpush3.msk.msra.mxu1 %vm12318_vm5, %v30354_v56  ;;  %26135 = vmatprep.mubr.msk.f32.mxu1 %vm27496_vm0, %v32861_v6  ;;  %33068 = vst [vmem:[#allocation60_spill] sm:$0xff] %v30381_v4  ;;  %v30384_v40 = vmax.f32 %v12069_v2, %v11949_v12  ;;  %27144 = vpow2.f32 %v12236_v19  ;;  %v11966_v12 = vmax.f32 %v33071_v27, %v33070_v15 }
 0x2b5   : > { %v11955_v18 = vpop.xlane.xlu0 %11954  ;;  %26143 = vmatprep.subr.mxu1 %v32861_v6  ;;  %26111 = vmatmul.mubr.msk.f32.vlgmr.msra.gmra.mrb[146].mxu0 %vm12314_vm6, %v30381_v4  ;;  %v12055_v31 = vmax.f32 %v12039_v47, %v30195_v21  ;;  %v12248_v26 = vmul.f32 1.442695, %v12217_v32  ;;  %v33076_v47 = vld [vmem:[#allocation25_spill] sm:$0xff]  ;;  %v30434_v32 = vld [vmem:[%s29993_s18 + $0x34] sm:$0xf] }
 0x2b6   : > { %v30361_v60 = vpop.xlane.xlu1 %11567  ;;  %26119 = vmatpush3.msk.msra.mxu0 %vm12318_vm5, %v30379_v38  ;;  %26120 = vmatprep.mubr.msk.f32.mxu0 %vm27496_vm0, %v32861_v6  ;;  %v12213_v50 = vsub.f32 %v33072_v49, %v30384_v40  ;;  %v11982_v8 = vmax.f32 %v11966_v12, %v33073_v63  ;;  %v33078_v12 = vld [vmem:[#allocation97_spill] sm:$0xff] }
 0x2b7   : > { %26128 = vmatprep.subr.mxu0 %v32861_v6  ;;  %v12071_v61 = vmax.f32 %v12055_v31, %v30229_v48  ;;  %v30415_v39 = vpop.eup %27142  ;;  %27146 = vpow2.f32 %v12248_v26  ;;  %v33079_v31 = vld [vmem:[#allocation88_spill] sm:$0xff] }
 0x2b8   : > { %33074 = vst [vmem:[#allocation74_spill] sm:$0xff] %v30415_v39  ;;  %v11998_v21 = vmax.f32 %v11982_v8, %v33075_v51  ;;  %v12240_v9 = vmul.f32 1.442695, %v12213_v50  ;;  %26136 = vmatmul.mubr.msk.f32.vlgmr.msra.gmra.mrb[150].mxu1 %vm12314_vm6, %v30415_v39  ;;  %27148 = vpow2.f32 %v14752_v29  ;;  %v33081_v29 = vld [vmem:[#allocation144_spill] sm:$0xff] }
 0x2b9   : > { %v11928_v30 = vpop.xlane.xlu0 %11927  ;;  %v30418_v2 = vmax.f32 %v12071_v61, %v11955_v18  ;;  %26144 = vmatpush3.msk.msra.mxu1 %vm12318_vm5, %v30411_v55  ;;  %26145 = vmatprep.mubr.msk.f32.mxu1 %vm27496_vm0, %v32861_v6 }
 0x2ba   : > { %v30376_v58 = vpop.xlane.xlu1 %11705  ;;  %v12014_v19 = vmax.f32 %v11998_v21, %v30056_v54  ;;  %26153 = vmatprep.subr.mxu1 %v32861_v6  ;;  %27150 = vpow2.f32 %v12240_v9  ;;  %v12091_v21 = vsub.f32 -inf, %v30244_v13 }
 0x2bb   : > { %v12215_v44 = vsub.f32 %v33076_v47, %v30418_v2 }
 0x2bc   : > { %v12030_v18 = vmax.f32 %v12014_v19, %v30178_v53  ;;  %v11968_v53 = vmax.f32 %v33079_v31, %v33078_v12  ;;  %v33082_v19 = vld [vmem:[#allocation51_spill] sm:$0xff]  ;;  %v33084_v31 = vld [vmem:[#allocation18_spill] sm:$0xff] }
 0x2bd   : > { %v30388_v41 = vpop.xlane.xlu0 %11615  ;;  %v12244_v50 = vmul.f32 1.442695, %v12215_v44 }
 0x2be   : > { %v30393_v59 = vpop.xlane.xlu1 %11885  ;;  %v30436_v17 = vpop.eup %27144  ;;  %v12046_v27 = vmax.f32 %v12030_v18, %v30197_v16  ;;  %v33080_v16 = vld [vmem:[#allocation123_spill] sm:$0xff] }
 0x2bf   : > { %33077 = vst [vmem:[#allocation119_spill] sm:$0xff] %v30436_v17  ;;  %26146 = vmatmul.mubr.msk.f32.vlgmr.msra.gmra.mrb[152].mxu1 %vm12314_vm6, %v30436_v17  ;;  %v11984_v63 = vmax.f32 %v11968_v53, %v33080_v16  ;;  %27152 = vpow2.f32 %v12244_v50  ;;  %v12108_v50 = vmul.f32 1.442695, %v12091_v21 }
 0x2c0   : > { %26154 = vmatpush3.msk.msra.mxu1 %vm12318_vm5, %v30434_v32  ;;  %26155 = vmatprep.mubr.msk.f32.mxu1 %vm27496_vm0, %v32861_v6  ;;  %v12062_v49 = vmax.f32 %v12046_v27, %v30279_v62  ;;  %v16023_v62 = vsub.f32 %v33082_v19, %v30237_v0  ;;  %v30469_v27 = vld [vmem:[%s29993_s18 + $0x3c] sm:$0xf] }
 0x2c1   : > { %v30406_v11 = vpop.xlane.xlu0 %11795  ;;  %26163 = vmatprep.subr.mxu1 %v32861_v6  ;;  %v12000_v51 = vmax.f32 %v11984_v63, %v33081_v29  ;;  %v27147_v9 = vpop.eup %27146  ;;  %v33087_v19 = vld [vmem:[#allocation81_spill] sm:$0xff]  ;;  %27154 = vpow2.f32 %v12108_v50 }
 0x2c2   : > { %v30413_v28 = vpop.xlane.xlu1 %11753  ;;  %v30456_v61 = vmax.f32 %v12062_v49, %v11928_v30  ;;  %v30464_v18 = vpop.eup %27148  ;;  %v12295_v44 = vsel %vm11529_vm3, %v27147_v9, 0.0  ;;  %v16054_v29 = vmul.f32 1.442695, %v16023_v62  ;;  %v33091_v50 = vld [vmem:[#allocation65_spill] sm:$0xff] }
 0x2c3   : > { %v12016_v47 = vmax.f32 %v12000_v51, %v30012_v37  ;;  %12296 = vadd.xlane.f32.xlu0 %v12295_v44  ;;  %v33085_v37 = vld [vmem:[#allocation2_spill] sm:$0xff] }
 0x2c4   : > { %v30473_v12 = vpop.eup %27150  ;;  %v12206_v53 = vsub.f32 %v33084_v31, %v30456_v61  ;;  %v12093_v63 = vsub.f32 %v33085_v37, %v30257_v24  ;;  %v33086_v51 = vld [vmem:[#allocation114_spill] sm:$0xff]  ;;  %v33088_v37 = vld [vmem:[#allocation128_spill] sm:$0xff]  ;;  %27156 = vpow2.f32 %v16054_v29 }
 0x2c5   : > { %v30426_v48 = vpop.xlane.xlu0 %11663  ;;  %33083 = vst [vmem:[#allocation129_spill] sm:$0xff] %v30473_v12  ;;  %v12032_v16 = vmax.f32 %v12016_v47, %v30296_v42  ;;  %26156 = vmatmul.mubr.msk.f32.vlgmr.msra.gmra.mrb[154].mxu1 %vm12314_vm6, %v30473_v12  ;;  %v11970_v44 = vmax.f32 %v33087_v19, %v33086_v51  ;;  %v30493_v42 = vsel %vm11529_vm3, %v30464_v18, 0.0 }
 0x2c6   : > { %v11934_v1 = vpop.xlane.xlu1 %11933  ;;  %26164 = vmatpush3.msk.msra.mxu1 %vm12318_vm5, %v30469_v27  ;;  %26165 = vmatprep.mubr.msk.f32.mxu1 %vm27496_vm0, %v32861_v6  ;;  %v12226_v62 = vmul.f32 1.442695, %v12206_v53  ;;  %v12112_v19 = vmul.f32 1.442695, %v12093_v63 }
 0x2c7   : > { %v12048_v21 = vmax.f32 %v12032_v16, %v30343_v22  ;;  %26173 = vmatprep.subr.mxu1 %v32861_v6  ;;  %14800 = vadd.xlane.f32.xlu0 %v30493_v42  ;;  %v11986_v12 = vmax.f32 %v11970_v44, %v33088_v37  ;;  %v33089_v22 = vld [vmem:[#allocation3_spill] sm:$0xff]  ;;  %v33094_v37 = vld [vmem:[#allocation102_spill] sm:$0xff] }
 0x2c8   : > { %v12095_v16 = vsub.f32 %v33089_v22, %v30271_v34  ;;  %27158 = vpow2.f32 %v12226_v62 }
 0x2c9   : > { %v30438_v15 = vpop.xlane.xlu0 %11843  ;;  %v12064_v51 = vmax.f32 %v12048_v21, %v30393_v59  ;;  %v12002_v17 = vmax.f32 %v11986_v12, %v29903_v36  ;;  %v30511_v4 = vpop.eup %27152  ;;  %v17367_v59 = vsub.f32 %v33091_v50, %v30237_v0  ;;  %27160 = vpow2.f32 %v12112_v19  ;;  %v33093_v21 = vld [vmem:[#allocation22_spill] sm:$0xff] }
 0x2ca   : > { %v30443_v54 = vpop.xlane.xlu1 %11621  ;;  %33090 = vst [vmem:[#allocation66_spill] sm:$0xff] %v30511_v4  ;;  %26166 = vmatmul.mubr.msk.f32.vlgmr.msra.gmra.mrb[156].mxu1 %vm12314_vm6, %v30511_v4  ;;  %v12116_v36 = vmul.f32 1.442695, %v12095_v16  ;;  %v33096_v16 = vld [vmem:[#allocation7_spill] sm:$0xff] }
 0x2cb   : > { %v30504_v39 = vmax.f32 %v12064_v51, %v11934_v1  ;;  %v12018_v44 = vmax.f32 %v12002_v17, %v30292_v46  ;;  %v33092_v1 = vld [vmem:[#allocation5_spill] sm:$0xff]  ;;  %26174 = vmatpush3.msk.msra.mxu1 %vm12318_vm5, %v30507_v45  ;;  %26175 = vmatprep.mubr.msk.f32.mxu1 %vm27496_vm0, %v32861_v6  ;;  %v651_v46 = vld [vmem:[%s29993_s18 + $0x4] sm:$0xf]  ;;  %v33095_v51 = vld [vmem:[#allocation96_spill] sm:$0xff]  ;;  %v17398_v22 = vmul.f32 1.442695, %v17367_v59  ;;  %v12099_v50 = vsub.f32 %v33096_v16, %v30345_v25  ;;  %v30545_v59 = vpop.eup %27154 }
 0x2cc   : > { %v12097_v12 = vsub.f32 %v33092_v1, %v30310_v5  ;;  %26183 = vmatprep.subr.mxu1 %v32861_v6  ;;  %v11972_v19 = vmax.f32 %v33095_v51, %v33094_v37  ;;  %v33097_v1 = vld [vmem:[#allocation105_spill] sm:$0xff]  ;;  %27162 = vpow2.f32 %v12116_v36 }
 0x2cd   : > { %v30454_v8 = vpop.xlane.xlu0 %11573  ;;  %v12034_v29 = vmax.f32 %v12018_v44, %v30406_v11  ;;  %v12208_v62 = vsub.f32 %v33093_v21, %v30504_v39  ;;  %v19971_v4 = vsub.f32 %v33097_v1, %v30237_v0  ;;  %27164 = vpow2.f32 %v17398_v22 }
 0x2ce   : > { %v30458_v26 = vpop.xlane.xlu1 %11801  ;;  %26176 = vmatmul.mubr.msk.f32.vlgmr.msra.gmra.mrb[158].mxu1 %vm12314_vm6, %v27147_v9  ;;  %v12120_v44 = vmul.f32 1.442695, %v12097_v12  ;;  %v11988_v21 = vmax.f32 %v11972_v19, %v30321_v43  ;;  %v30550_v9 = vpop.eup %27156  ;;  %v30554_v12 = vld [vmem:[%s29993_s18 + $0x20] sm:$0xf]  ;;  %v12124_v43 = vmul.f32 1.442695, %v12099_v50 }
 0x2cf   : > { %v12050_v57 = vmax.f32 %v12034_v29, %v30438_v15  ;;  %26184 = vmatpush3.msk.msra.mxu1 %vm12318_vm5, %v651_v46  ;;  %26185 = vmatprep.mubr.msk.f32.mxu1 %vm27496_vm0, %v32861_v6  ;;  %v12230_v37 = vmul.f32 1.442695, %v12208_v62  ;;  %v16101_v46 = vsel %vm11529_vm3, %v30550_v9, 0.0  ;;  %v20002_v51 = vmul.f32 1.442695, %v19971_v4  ;;  %v33099_v4 = vld [vmem:[#allocation126_spill] sm:$0xff] }
 0x2d0   : > { %26193 = vmatprep.subr.mxu1 %v32861_v6  ;;  %v12004_v36 = vmax.f32 %v11988_v21, %v30376_v58  ;;  %27166 = vpow2.f32 %v12120_v44  ;;  %16102 = vadd.xlane.f32.xlu0 %v16101_v46  ;;  %v11974_v58 = vmax.f32 %v30361_v60, %v30388_v41 }
 0x2d1   : > { %v30471_v30 = vpop.xlane.xlu0 %11711  ;;  %27168 = vpow2.f32 %v12230_v37 }
 0x2d2   : > { %v30477_v49 = vpop.xlane.xlu1 %11669  ;;  %26186 = vmatmul.mubr.msk.f32.vlgmr.msra.gmra.mrb[144].mxu1 %vm12314_vm6, %v30545_v59  ;;  %v12020_v22 = vmax.f32 %v12004_v36, %v30413_v28  ;;  %v11990_v60 = vmax.f32 %v11974_v58, %v30426_v48  ;;  %27170 = vpow2.f32 %v12124_v43  ;;  %v33101_v28 = vld [vmem:[#allocation24_spill] sm:$0xff]  ;;  %v11976_v43 = vmax.f32 %v30454_v8, %v30443_v54 }
 0x2d3   : > { %26194 = vmatpush3.msk.msra.mxu1 %vm12318_vm5, %v30015_v14  ;;  %26195 = vmatprep.mubr.msk.f32.mxu1 %vm27496_vm0, %v32861_v6  ;;  %v33100_v14 = vld [vmem:[#allocation11_spill] sm:$0xff]  ;;  %27172 = vpow2.f32 %v20002_v51 }
 0x2d4   : > { %v12036_v41 = vmax.f32 %v12020_v22, %v30458_v26  ;;  %26203 = vmatprep.subr.mxu1 %v32861_v6  ;;  %v12006_v26 = vmax.f32 %v11990_v60, %v30471_v30  ;;  %v11992_v58 = vmax.f32 %v11976_v43, %v30477_v49 }
 0x2d5   : > { %v11892_v47 = vpop.xlane.xlu0 %11891 }
 0x2d6   : > { %v30497_v31 = vpop.xlane.xlu1 %11849  ;;  %v12066_v15 = vmax.f32 %v12050_v57, %v11892_v47  ;;  %v30562_v57 = vpop.eup %27158  ;;  %v33098_v47 = vld [vmem:[#allocation9_spill] sm:$0xff] }
 0x2d7   : > { %v12101_v19 = vsub.f32 %v33098_v47, %v30384_v40  ;;  %26121 = vmatmul.mubr.msk.f32.vlgmr.msra.gmra.mrb[148].mxu0 %vm12314_vm6, %v30562_v57  ;;  %v30577_v1 = vpop.eup %27160  ;;  %v12052_v21 = vmax.f32 %v12036_v41, %v30497_v31 }
 0x2d8   : > { %26129 = vmatpush3.msk.msra.mxu0 %vm12318_vm5, %v30554_v12  ;;  %26196 = vmatmul.mubr.msk.f32.vlgmr.msra.gmra.mrb[146].mxu1 %vm12314_vm6, %v30577_v1  ;;  %v30600_v36 = vpop.eup %27162 }
 0x2d9   : > { %v30509_v53 = vpop.xlane.xlu0 %11759  ;;  %26130 = vmatprep.mubr.msk.f32.mxu0 %vm27496_vm0, %v32861_v6  ;;  %v12128_v44 = vmul.f32 1.442695, %v12101_v19  ;;  %26204 = vmatpush3.msk.msra.mxu1 %vm12318_vm5, %v30286_v33  ;;  %v30608_v19 = vpop.eup %27164 }
 0x2da   : > { %v30515_v63 = vpop.xlane.xlu1 %11717  ;;  %26205 = vmatprep.mubr.msk.f32.mxu1 %vm27496_vm0, %v32861_v6  ;;  %26213 = vmatprep.subr.mxu1 %v32861_v6  ;;  %v12022_v30 = vmax.f32 %v12006_v26, %v30509_v53  ;;  %v17445_v53 = vsel %vm11529_vm3, %v30608_v19, 0.0  ;;  %v30621_v22 = vpop.eup %27166 }
 0x2db   : > { %26138 = vmatprep.subr.mxu0 %v32861_v6  ;;  %27174 = vpow2.f32 %v12128_v44  ;;  %17446 = vadd.xlane.f32.xlu0 %v17445_v53  ;;  %v12008_v49 = vmax.f32 %v11992_v58, %v30515_v63  ;;  %v33103_v63 = vld [vmem:[#allocation26_spill] sm:$0xff] }
 0x2dc   : > { %26206 = vmatmul.mubr.msk.f32.vlgmr.msra.gmra.mrb[148].mxu1 %vm12314_vm6, %v30600_v36  ;;  %v33109_v58 = vld [vmem:[#allocation30_spill] sm:$0xff] }
 0x2dd   : > { %v11940_v17 = vpop.xlane.xlu0 %11939  ;;  %26214 = vmatpush3.msk.msra.mxu1 %vm12318_vm5, %v30313_v7  ;;  %26215 = vmatprep.mubr.msk.f32.mxu1 %vm27496_vm0, %v32861_v6 }
 0x2de   : > { %v30539_v11 = vpop.xlane.xlu1 %11897  ;;  %v30560_v62 = vmax.f32 %v12066_v15, %v11940_v17  ;;  %v21315_v17 = vsub.f32 %v33099_v4, %v30237_v0  ;;  %v12103_v0 = vsub.f32 %v33100_v14, %v30418_v2  ;;  %26223 = vmatprep.subr.mxu1 %v32861_v6  ;;  %v30624_v4 = vpop.eup %27168 }
 0x2df   : > { %v12068_v46 = vmax.f32 %v12052_v21, %v30539_v11  ;;  %26131 = vmatmul.mubr.msk.f32.vlgmr.msra.gmra.mrb[150].mxu0 %vm12314_vm6, %v30624_v4  ;;  %18748 = vadd.xlane.f32.xlu0 %v30493_v42 }
 0x2e0   : > { %v12210_v48 = vsub.f32 %v33101_v28, %v30560_v62  ;;  %v21346_v37 = vmul.f32 1.442695, %v21315_v17  ;;  %v12132_v51 = vmul.f32 1.442695, %v12103_v0  ;;  %v33102_v17 = vld [vmem:[#allocation29_spill] sm:$0xff]  ;;  %26216 = vmatmul.mubr.msk.f32.vlgmr.msra.gmra.mrb[150].mxu1 %vm12314_vm6, %v30621_v22  ;;  %v30639_v28 = vpop.eup %27170  ;;  %26140 = vmatprep.mubr.msk.f32.mxu0 %vm27496_vm0, %v32861_v6 }
 0x2e1   : > { %v30548_v29 = vpop.xlane.xlu0 %11807  ;;  %v14707_v60 = vsub.f32 %v33102_v17, %v30244_v13  ;;  %26224 = vmatpush3.msk.msra.mxu1 %vm12318_vm5, %v30354_v56  ;;  %33104 = vst [vmem:[#allocation92_spill] sm:$0xff] %v30639_v28  ;;  %26225 = vmatprep.mubr.msk.f32.mxu1 %vm27496_vm0, %v32861_v6  ;;  %v30644_v26 = vpop.eup %27172 }
 0x2e2   : > { %v11856_v16 = vpop.xlane.xlu1 %11855  ;;  %v12234_v31 = vmul.f32 1.442695, %v12210_v48  ;;  %v12038_v54 = vmax.f32 %v12022_v30, %v30548_v29  ;;  %27176 = vpow2.f32 %v21346_v37  ;;  %v30631_v29 = vld [vmem:[%s29993_s18 + $0x28] sm:$0xf]  ;;  %26233 = vmatprep.subr.mxu1 %v32861_v6  ;;  %33105 = vst [vmem:[#allocation69_spill] sm:$0xff] %v30644_v26 }
 0x2e3   : > { %26139 = vmatpush3.msk.msra.mxu0 %vm12318_vm5, %v30631_v29 }
 0x2e4   : > { %27178 = vpow2.f32 %v12234_v31  ;;  %v12054_v0 = vmax.f32 %v12038_v54, %v11856_v16  ;;  %26226 = vmatmul.mubr.msk.f32.vlgmr.msra.gmra.mrb[152].mxu1 %vm12314_vm6, %v30639_v28  ;;  %v33106_v16 = vld [vmem:[#allocation28_spill] sm:$0xff]  ;;  %26148 = vmatprep.subr.mxu0 %v32861_v6 }
 0x2e5   : > { %v11766_v50 = vpop.xlane.xlu0 %11765  ;;  %27180 = vpow2.f32 %v12132_v51  ;;  %v14709_v37 = vsub.f32 %v33106_v16, %v30257_v24  ;;  %26234 = vmatpush3.msk.msra.mxu1 %vm12318_vm5, %v30411_v55  ;;  %26235 = vmatprep.mubr.msk.f32.mxu1 %vm27496_vm0, %v32861_v6  ;;  %v30665_v51 = vpop.eup %27174 }
 0x2e6   : > { %v11814_v47 = vpop.xlane.xlu1 %11813  ;;  %v12024_v41 = vmax.f32 %v12008_v49, %v11766_v50  ;;  %v14724_v50 = vmul.f32 1.442695, %v14707_v60  ;;  %26243 = vmatprep.subr.mxu1 %v32861_v6  ;;  %33107 = vst [vmem:[#allocation70_spill] sm:$0xff] %v30665_v51  ;;  %v33110_v49 = vld [vmem:[#allocation153_spill] sm:$0xff]  ;;  %v30680_v60 = vld [vmem:[%s29993_s18 + $0x30] sm:$0xf] }
 0x2e7   : > { %v14728_v53 = vmul.f32 1.442695, %v14709_v37 }
 0x2e8   : > { %27182 = vpow2.f32 %v14724_v50  ;;  %26236 = vmatmul.mubr.msk.f32.vlgmr.msra.gmra.mrb[154].mxu1 %vm12314_vm6, %v30665_v51 }
 0x2e9   : > { %v11946_v15 = vpop.xlane.xlu0 %11945  ;;  %26244 = vmatpush3.msk.msra.mxu1 %vm12318_vm5, %v30434_v32  ;;  %26245 = vmatprep.mubr.msk.f32.mxu1 %vm27496_vm0, %v32861_v6 }
 0x2ea   : > { %v30616_v8 = vmax.f32 %v12068_v46, %v11946_v15  ;;  %v11862_v48 = vpop.xlane.xlu1 %11861  ;;  %v12040_v15 = vmax.f32 %v12024_v41, %v11814_v47  ;;  %v20049_v46 = vsel %vm11529_vm3, %v30644_v26, 0.0  ;;  %v14711_v47 = vsub.f32 %v33109_v58, %v30271_v34  ;;  %26253 = vmatprep.subr.mxu1 %v32861_v6  ;;  %v33116_v58 = vld [vmem:[#allocation160_spill] sm:$0xff] }
 0x2eb   : > { %20050 = vadd.xlane.f32.xlu0 %v20049_v46 }
 0x2ec   : > { %v12212_v14 = vsub.f32 %v33103_v63, %v30616_v8  ;;  %v30667_v31 = vpop.eup %27176 }
 0x2ed   : > { %v11904_v11 = vpop.xlane.xlu0 %11903  ;;  %33108 = vst [vmem:[#allocation122_spill] sm:$0xff] %v30667_v31  ;;  %v21393_v63 = vsel %vm11529_vm3, %v30667_v31, 0.0 }
 0x2ee   : > { %v12070_v21 = vmax.f32 %v12054_v0, %v11904_v11  ;;  %v12238_v43 = vmul.f32 1.442695, %v12212_v14  ;;  %v11910_v54 = vpop.xlane.xlu1 %11909  ;;  %v12056_v11 = vmax.f32 %v12040_v15, %v11862_v48  ;;  %v30682_v41 = vpop.eup %27178  ;;  %v14732_v48 = vmul.f32 1.442695, %v14711_v47  ;;  %v33115_v15 = vld [vmem:[#allocation32_spill] sm:$0xff] }
 0x2ef   : > { %33111 = vst [vmem:[#allocation89_spill] sm:$0xff] %v30682_v41  ;;  %v30687_v0 = vpop.eup %27180  ;;  %21394 = vadd.xlane.f32.xlu0 %v21393_v63  ;;  %26141 = vmatmul.mubr.msk.f32.vlgmr.msra.gmra.mrb[152].mxu0 %vm12314_vm6, %v30682_v41  ;;  %v33152_v41 = vld [vmem:[#allocation130_spill] sm:$0xff] }
 0x2f0   : > { %27184 = vpow2.f32 %v12238_v43  ;;  %33112 = vst [vmem:[#allocation82_spill] sm:$0xff] %v30687_v0  ;;  %26246 = vmatmul.mubr.msk.f32.vlgmr.msra.gmra.mrb[156].mxu1 %vm12314_vm6, %v30687_v0  ;;  %26149 = vmatpush3.msk.msra.mxu0 %vm12318_vm5, %v30680_v60  ;;  %v14715_v43 = vsub.f32 %v33115_v15, %v30345_v25  ;;  %v33136_v0 = vld [vmem:[#allocation10_spill] sm:$0xff] }
 0x2f1   : > { %v11952_v44 = vpop.xlane.xlu0 %11951  ;;  %27186 = vpow2.f32 %v14728_v53  ;;  %26254 = vmatpush3.msk.msra.mxu1 %vm12318_vm5, %v30469_v27  ;;  %26255 = vmatprep.mubr.msk.f32.mxu1 %vm27496_vm0, %v32861_v6 }
 0x2f2   : > { %v30659_v30 = vmax.f32 %v12070_v21, %v11952_v44  ;;  %v12072_v44 = vmax.f32 %v12056_v11, %v11910_v54  ;;  %v33113_v21 = vld [vmem:[#allocation37_spill] sm:$0xff]  ;;  %26263 = vmatprep.subr.mxu1 %v32861_v6  ;;  %26150 = vmatprep.mubr.msk.f32.mxu0 %vm27496_vm0, %v32861_v6  ;;  %27188 = vpow2.f32 %v14732_v48  ;;  %v30718_v47 = vpop.eup %27182 }
 0x2f3   : > { %v14713_v50 = vsub.f32 %v33113_v21, %v30310_v5  ;;  %22696 = vadd.xlane.f32.xlu0 %v30493_v42  ;;  %26158 = vmatprep.subr.mxu0 %v32861_v6  ;;  %v30726_v11 = vld [vmem:[%s29993_s18 + $0x38] sm:$0xf]  ;;  %v33120_v21 = vld [vmem:[#allocation167_spill] sm:$0xff] }
 0x2f4   : > { %v12214_v17 = vsub.f32 %v33110_v49, %v30659_v30  ;;  %26256 = vmatmul.mubr.msk.f32.vlgmr.msra.gmra.mrb[158].mxu1 %vm12314_vm6, %v30300_v52  ;;  %v12090_v52 = vsub.f32 -inf, %v30254_v3  ;;  %v33118_v49 = vld [vmem:[#allocation41_spill] sm:$0xff] }
 0x2f5   : > { %v11958_v14 = vpop.xlane.xlu0 %11957  ;;  %v14736_v46 = vmul.f32 1.442695, %v14713_v50  ;;  %26264 = vmatpush3.msk.msra.mxu1 %vm12318_vm5, %v30286_v33  ;;  %26265 = vmatprep.mubr.msk.f32.mxu1 %vm27496_vm0, %v32861_v6  ;;  %v14740_v33 = vmul.f32 1.442695, %v14715_v43  ;;  %v33121_v43 = vld [vmem:[#allocation36_spill] sm:$0xff] }
 0x2f6   : > { %v12242_v16 = vmul.f32 1.442695, %v12214_v17  ;;  %v30701_v37 = vmax.f32 %v12072_v44, %v11958_v14  ;;  %26273 = vmatprep.subr.mxu1 %v32861_v6  ;;  %v14717_v17 = vsub.f32 %v33118_v49, %v30384_v40  ;;  %v33119_v14 = vld [vmem:[#allocation162_spill] sm:$0xff]  ;;  %v12106_v15 = vmul.f32 1.442695, %v12090_v52 }
 0x2f8   : > { %33114 = vst [vmem:[#allocation64_spill] sm:$0xff] %v30701_v37  ;;  %27190 = vpow2.f32 %v12242_v16  ;;  %v12216_v42 = vsub.f32 %v33116_v58, %v30701_v37  ;;  %v14720_v54 = vsub.f32 -inf, %v30701_v37  ;;  %26266 = vmatmul.mubr.msk.f32.vlgmr.msra.gmra.mrb[144].mxu1 %vm12314_vm6, %v30718_v47  ;;  %v12104_v44 = vsub.f32 %v33119_v14, %v30701_v37  ;;  %v30766_v14 = vld [vmem:[%s29993_s18 + $0x40] sm:$0xf] }
 0x2f9   : > { %27192 = vpow2.f32 %v14736_v46  ;;  %26274 = vmatpush3.msk.msra.mxu1 %vm12318_vm5, %v30313_v7  ;;  %26275 = vmatprep.mubr.msk.f32.mxu1 %vm27496_vm0, %v32861_v6  ;;  %v16022_v50 = vsub.f32 %v33120_v21, %v30701_v37  ;;  %v14744_v7 = vmul.f32 1.442695, %v14717_v17  ;;  %v14719_v46 = vsub.f32 %v33121_v43, %v30418_v2 }
 0x2fa   : > { %v30722_v53 = vpop.eup %27184  ;;  %v12246_v63 = vmul.f32 1.442695, %v12216_v42  ;;  %26283 = vmatprep.subr.mxu1 %v32861_v6  ;;  %v14750_v48 = vmul.f32 1.442695, %v14720_v54  ;;  %27194 = vpow2.f32 %v14740_v33  ;;  %v12134_v58 = vmul.f32 1.442695, %v12104_v44 }
 0x2fb   : > { %33117 = vst [vmem:[#allocation137_spill] sm:$0xff] %v30722_v53  ;;  %26151 = vmatmul.mubr.msk.f32.vlgmr.msra.gmra.mrb[154].mxu0 %vm12314_vm6, %v30722_v53  ;;  %v30745_v16 = vpop.eup %27186  ;;  %v33122_v42 = vld [vmem:[#allocation172_spill] sm:$0xff]  ;;  %v16052_v33 = vmul.f32 1.442695, %v16022_v50 }
 0x2fc   : > { %26159 = vmatpush3.msk.msra.mxu0 %vm12318_vm5, %v30726_v11  ;;  %26160 = vmatprep.mubr.msk.f32.mxu0 %vm27496_vm0, %v32861_v6  ;;  %27196 = vpow2.f32 %v12246_v63  ;;  %v17366_v54 = vsub.f32 %v33122_v42, %v30701_v37  ;;  %v30760_v52 = vpop.eup %27188  ;;  %v14748_v63 = vmul.f32 1.442695, %v14719_v46  ;;  %v33124_v44 = vld [vmem:[#allocation4_spill] sm:$0xff]  ;;  %v12098_v37 = vsub.f32 %v33136_v0, %v30560_v62 }
 0x2fd   : > { %26168 = vmatprep.subr.mxu0 %v32861_v6  ;;  %26276 = vmatmul.mubr.msk.f32.vlgmr.msra.gmra.mrb[146].mxu1 %vm12314_vm6, %v30745_v16  ;;  %27198 = vpow2.f32 %v14750_v48  ;;  %v11467_v49 = vpop.f32.mrb[142].mxu1  ;;  %v12092_v48 = vsub.f32 %v33124_v44, %v30281_v35 }
 0x2fe   : > { %26284 = vmatpush3.msk.msra.mxu1 %vm12318_vm5, %v30354_v56  ;;  %26285 = vmatprep.mubr.msk.f32.mxu1 %vm27496_vm0, %v32861_v6  ;;  %27200 = vpow2.f32 %v12106_v15  ;;  %v26097_v56 = vpop.f32.mrb[143].mxu1  ;;  %v17396_v21 = vmul.f32 1.442695, %v17366_v54  ;;  %v33127_v49 = vld [vmem:[#allocation42_spill] sm:$0xff] }
 0x2ff   : > { %26293 = vmatprep.subr.mxu1 %v32861_v6  ;;  %27202 = vpow2.f32 %v14744_v7  ;;  %v16011_v56 = vsub.f32 %v33127_v49, %v30257_v24 }
 0x300   : > { %27204 = vpow2.f32 %v12134_v58  ;;  %v33126_v58 = vld [vmem:[#allocation6_spill] sm:$0xff] }
 0x301   : > { %26286 = vmatmul.mubr.msk.f32.vlgmr.msra.gmra.mrb[148].mxu1 %vm12314_vm6, %v30760_v52  ;;  %27206 = vpow2.f32 %v16052_v33  ;;  %v11394_v15 = vpop.f32.mrb[142].mxu0  ;;  %v12094_v42 = vsub.f32 %v33126_v58, %v30456_v61  ;;  %v16030_v58 = vmul.f32 1.442695, %v16011_v56 }
 0x302   : > { %v30763_v17 = vpop.eup %27190  ;;  %26294 = vmatpush3.msk.msra.mxu1 %vm12318_vm5, %v30411_v55  ;;  %26295 = vmatprep.mubr.msk.f32.mxu1 %vm27496_vm0, %v32861_v6  ;;  %27208 = vpow2.f32 %v14748_v63  ;;  %v12110_v55 = vmul.f32 1.442695, %v12092_v48  ;;  %v26092_v43 = vpop.f32.mrb[143].mxu0 }
 0x303   : > { %33123 = vst [vmem:[#allocation13_spill] sm:$0xff] %v30763_v17  ;;  %26161 = vmatmul.mubr.msk.f32.vlgmr.msra.gmra.mrb[156].mxu0 %vm12314_vm6, %v30763_v17  ;;  %26303 = vmatprep.subr.mxu1 %v32861_v6  ;;  %v30781_v50 = vpop.eup %27192  ;;  %27210 = vpow2.f32 %v17396_v21  ;;  %v12114_v21 = vmul.f32 1.442695, %v12094_v42  ;;  %v33131_v42 = vld [vmem:[#allocation38_spill] sm:$0xff]  ;;  %v27452_v17 = vld [vmem:[%s29993_s18 + $0x8] sm:$0xf] }
 0x304   : > { %26169 = vmatpush3.msk.msra.mxu0 %vm12318_vm5, %v30766_v14  ;;  %26170 = vmatprep.mubr.msk.f32.mxu0 %vm27496_vm0, %v32861_v6  ;;  %v30792_v7 = vpop.eup %27194  ;;  %27212 = vpow2.f32 %v12110_v55  ;;  %v33130_v55 = vld [vmem:[#allocation8_spill] sm:$0xff] }
 0x305   : > { %26178 = vmatprep.subr.mxu0 %v32861_v6  ;;  %26296 = vmatmul.mubr.msk.f32.vlgmr.msra.gmra.mrb[150].mxu1 %vm12314_vm6, %v30781_v50  ;;  %33125 = vst [vmem:[#allocation112_spill] sm:$0xff] %v30792_v7  ;;  %v12096_v15 = vsub.f32 %v33130_v55, %v30504_v39  ;;  %v669_v55 = vld [vmem:[%s29993_s18 + $0x4c] sm:$0xf]  ;;  %27214 = vpow2.f32 %v12114_v21 }
 0x306   : > { %26304 = vmatpush3.msk.msra.mxu1 %vm12318_vm5, %v30434_v32  ;;  %26305 = vmatprep.mubr.msk.f32.mxu1 %vm27496_vm0, %v32861_v6  ;;  %v27197_v46 = vpop.eup %27196  ;;  %v650_v32 = vld [vmem:[%s29993_s18] sm:$0xf]  ;;  %27216 = vpow2.f32 %v16030_v58  ;;  %v33137_v58 = vld [vmem:[#allocation43_spill] sm:$0xff] }
 0x307   : > { %26313 = vmatprep.subr.mxu1 %v32861_v6  ;;  %v30797_v54 = vpop.eup %27198  ;;  %26171 = vmatmul.mubr.msk.f32.vlgmr.msra.gmra.mrb[158].mxu0 %vm12314_vm6, %v27197_v46 }
 0x308   : > { %v30803_v33 = vpop.eup %27200  ;;  %v30813_v63 = vsel %vm11529_vm3, %v30797_v54, 0.0  ;;  %26179 = vmatpush3.msk.msra.mxu0 %vm12318_vm5, %v650_v32  ;;  %26180 = vmatprep.mubr.msk.f32.mxu0 %vm27496_vm0, %v32861_v6  ;;  %v16013_v32 = vsub.f32 %v33131_v42, %v30271_v34 }
 0x309   : > { %26306 = vmatmul.mubr.msk.f32.vlgmr.msra.gmra.mrb[152].mxu1 %vm12314_vm6, %v30792_v7  ;;  %33128 = vst [vmem:[#allocation14_spill] sm:$0xff] %v30813_v63  ;;  %v30815_v44 = vpop.eup %27202  ;;  %14797 = vadd.xlane.f32.xlu0 %v30813_v63  ;;  %v33150_v7 = vld [vmem:[#allocation71_spill] sm:$0xff] }
 0x30a   : > { %26314 = vmatpush3.msk.msra.mxu1 %vm12318_vm5, %v30469_v27  ;;  %26315 = vmatprep.mubr.msk.f32.mxu1 %vm27496_vm0, %v32861_v6  ;;  %33129 = vst [vmem:[#allocation133_spill] sm:$0xff] %v30815_v44  ;;  %v30819_v48 = vpop.eup %27204  ;;  %v16034_v21 = vmul.f32 1.442695, %v16013_v32  ;;  %v16017_v32 = vsub.f32 %v33137_v58, %v30345_v25  ;;  %v30895_v58 = vld [vmem:[%s30853_s15 + $0xc] sm:$0xf]  ;;  %v18657_v51 = vsub.f32 %v33150_v7, %v30257_v24 }
 0x30b   : > { %26323 = vmatprep.subr.mxu1 %v32861_v6  ;;  %v30824_v27 = vpop.eup %27206  ;;  %v12180_v43 = vsel %vm11529_vm3, %v30819_v48, 0.0  ;;  %26181 = vmatmul.mubr.msk.f32.vlgmr.msra.gmra.mrb[144].mxu0 %vm12314_vm6, %v30803_v33 }
 0x30c   : > { %v30840_v49 = vpop.eup %27208  ;;  %12181 = vadd.xlane.f32.xlu1 %v12180_v43  ;;  %v16098_v63 = vsel %vm11529_vm3, %v30824_v27, 0.0  ;;  %26188 = vmatprep.subr.mxu0 %v32861_v6  ;;  %v12118_v43 = vmul.f32 1.442695, %v12096_v15  ;;  %v671_v15 = vld [vmem:[%s30853_s15 + $0x4] sm:$0xf] }
 0x30d   : > { %26316 = vmatmul.mubr.msk.f32.vlgmr.msra.gmra.mrb[154].mxu1 %vm12314_vm6, %v30815_v44  ;;  %33132 = vst [vmem:[#allocation106_spill] sm:$0xff] %v30840_v49  ;;  %v30846_v56 = vpop.eup %27210  ;;  %16099 = vadd.xlane.f32.xlu0 %v16098_v63  ;;  %v12292_v63 = vsel %vm11529_vm3, %v27197_v46, 0.0  ;;  %v12122_v46 = vmul.f32 1.442695, %v12098_v37  ;;  %v16042_v37 = vmul.f32 1.442695, %v16017_v32 }
 0x30e   : > { %26324 = vmatpush3.msk.msra.mxu1 %vm12318_vm5, %v30507_v45  ;;  %26325 = vmatprep.mubr.msk.f32.mxu1 %vm27496_vm0, %v32861_v6  ;;  %33133 = vst [vmem:[#allocation85_spill] sm:$0xff] %v30846_v56  ;;  %v33135_v45 = vld [vmem:[#allocation46_spill] sm:$0xff]  ;;  %27218 = vpow2.f32 %v12118_v43 }
 0x30f   : > { %26333 = vmatprep.subr.mxu1 %v32861_v6  ;;  %v16015_v42 = vsub.f32 %v33135_v45, %v30310_v5  ;;  %26189 = vmatpush3.msk.msra.mxu0 %vm12318_vm5, %v27452_v17  ;;  %v17442_v45 = vsel %vm11529_vm3, %v30846_v56, 0.0  ;;  %v30872_v17 = vpop.eup %27212  ;;  %27220 = vpow2.f32 %v16034_v21  ;;  %v22603_v56 = vsub.f32 %v33152_v41, %v30244_v13 }
 0x310   : > { %12293 = vadd.xlane.f32.xlu1 %v12292_v63  ;;  %26190 = vmatprep.mubr.msk.f32.mxu0 %vm27496_vm0, %v32861_v6  ;;  %v33140_v63 = vld [vmem:[#allocation12_spill] sm:$0xff]  ;;  %v30905_v21 = vpop.eup %27214 }
 0x311   : > { %26326 = vmatmul.mubr.msk.f32.vlgmr.msra.gmra.mrb[156].mxu1 %vm12314_vm6, %v30840_v49  ;;  %17443 = vadd.xlane.f32.xlu0 %v17442_v45  ;;  %v16038_v0 = vmul.f32 1.442695, %v16015_v42  ;;  %v33139_v42 = vld [vmem:[#allocation53_spill] sm:$0xff]  ;;  %v12100_v45 = vsub.f32 %v33140_v63, %v30616_v8  ;;  %v30921_v63 = vsel %vm11529_vm3, %v30545_v59, 0.0 }
 0x312   : > { %26334 = vmatpush3.msk.msra.mxu1 %vm12318_vm5, %v669_v55  ;;  %26335 = vmatprep.mubr.msk.f32.mxu1 %vm27496_vm0, %v32861_v6  ;;  %v30887_v55 = vsel %vm11529_vm3, %v30803_v33, 0.0  ;;  %v17353_v43 = vsub.f32 %v33139_v42, %v30244_v13 }
 0x313   : > { %26343 = vmatprep.subr.mxu1 %v32861_v6  ;;  %26191 = vmatmul.mubr.msk.f32.vlgmr.msra.gmra.mrb[146].mxu0 %vm12314_vm6, %v30872_v17  ;;  %33138 = vst [vmem:[#allocation15_spill] sm:$0xff] %v30887_v55  ;;  %27222 = vpow2.f32 %v16038_v0  ;;  %v12126_v32 = vmul.f32 1.442695, %v12100_v45  ;;  %v33143_v45 = vld [vmem:[#allocation149_spill] sm:$0xff] }
 0x314   : > { %12139 = vadd.xlane.f32.xlu1 %v30887_v55  ;;  %26198 = vmatprep.subr.mxu0 %v32861_v6  ;;  %27224 = vpow2.f32 %v12122_v46  ;;  %v17370_v0 = vmul.f32 1.442695, %v17353_v43  ;;  %v12250_v46 = vsel %vm11529_vm3, %v30334_v10, 0.0  ;;  %v30927_v43 = vpop.eup %27216  ;;  %v12102_v53 = vsub.f32 %v33143_v45, %v30659_v30 }
 0x315   : > { %26336 = vmatmul.mubr.msk.f32.vlgmr.msra.gmra.mrb[158].mxu1 %vm12314_vm6, %v30464_v18  ;;  %26200 = vmatprep.mubr.msk.f32.mxu0 %vm27496_vm0, %v32861_v6  ;;  %27226 = vpow2.f32 %v16042_v37  ;;  %v30946_v37 = vld [vmem:[%s30853_s15 + $0x1c] sm:$0xf] }
 0x316   : > { %26344 = vmatpush3.msk.msra.mxu1 %vm12318_vm5, %v671_v15  ;;  %26345 = vmatprep.mubr.msk.f32.mxu1 %vm27496_vm0, %v32861_v6  ;;  %v33141_v15 = vld [vmem:[#allocation49_spill] sm:$0xff]  ;;  %27228 = vpow2.f32 %v17370_v0  ;;  %v33144_v0 = vld [vmem:[#allocation47_spill] sm:$0xff] }
 0x317   : > { %26353 = vmatprep.subr.mxu1 %v32861_v6  ;;  %26199 = vmatpush3.msk.msra.mxu0 %vm12318_vm5, %v30328_v23  ;;  %v16019_v42 = vsub.f32 %v33141_v15, %v30384_v40  ;;  %v30917_v23 = vld [vmem:[%s30853_s15 + $0x14] sm:$0xf]  ;;  %v33142_v15 = vld [vmem:[#allocation67_spill] sm:$0xff]  ;;  %27230 = vpow2.f32 %v12126_v32  ;;  %v16021_v32 = vsub.f32 %v33144_v0, %v30418_v2 }
 0x318   : > { %26201 = vmatmul.mubr.msk.f32.vlgmr.msra.gmra.mrb[148].mxu0 %vm12314_vm6, %v30905_v21  ;;  %v18655_v49 = vsub.f32 %v33142_v15, %v30244_v13  ;;  %12142 = vadd.xlane.f32.xlu0 %v30921_v63  ;;  %v30939_v10 = vpop.eup %27218  ;;  %v12130_v15 = vmul.f32 1.442695, %v12102_v53 }
 0x319   : > { %26346 = vmatmul.mubr.msk.f32.vlgmr.msra.gmra.mrb[144].mxu1 %vm12314_vm6, %v30545_v59  ;;  %12251 = vadd.xlane.f32.xlu1 %v12250_v46  ;;  %v16046_v31 = vmul.f32 1.442695, %v16019_v42  ;;  %v30948_v42 = vpop.eup %27220 }
 0x31a   : > { %26354 = vmatpush3.msk.msra.mxu1 %vm12318_vm5, %v30895_v58  ;;  %26355 = vmatprep.mubr.msk.f32.mxu1 %vm27496_vm0, %v32861_v6  ;;  %v18672_v46 = vmul.f32 1.442695, %v18655_v49  ;;  %v14757_v49 = vsel %vm11529_vm3, %v30718_v47, 0.0  ;;  %v33146_v47 = vld [vmem:[#allocation55_spill] sm:$0xff] }
 0x31b   : > { %26363 = vmatprep.subr.mxu1 %v32861_v6  ;;  %26208 = vmatprep.subr.mxu0 %v32861_v6  ;;  %27232 = vpow2.f32 %v16046_v31  ;;  %v30975_v31 = vld [vmem:[%s30853_s15 + $0x24] sm:$0xf]  ;;  %v17355_v45 = vsub.f32 %v33146_v47, %v30257_v24 }
 0x31c   : > { %26209 = vmatpush3.msk.msra.mxu0 %vm12318_vm5, %v30379_v38  ;;  %26210 = vmatprep.mubr.msk.f32.mxu0 %vm27496_vm0, %v32861_v6  ;;  %v12253_v38 = vsel %vm11529_vm3, %v30288_v20, 0.0  ;;  %27234 = vpow2.f32 %v18672_v46  ;;  %v12147_v46 = vsel %vm11529_vm3, %v30577_v1, 0.0 }
 0x31d   : > { %26356 = vmatmul.mubr.msk.f32.vlgmr.msra.gmra.mrb[146].mxu1 %vm12314_vm6, %v30927_v43  ;;  %26211 = vmatmul.mubr.msk.f32.vlgmr.msra.gmra.mrb[150].mxu0 %vm12314_vm6, %v30939_v10  ;;  %v30963_v53 = vpop.eup %27222  ;;  %27236 = vpow2.f32 %v12130_v15  ;;  %v33147_v15 = vld [vmem:[#allocation107_spill] sm:$0xff]  ;;  %v17374_v1 = vmul.f32 1.442695, %v17355_v45 }
 0x31e   : > { %26364 = vmatpush3.msk.msra.mxu1 %vm12318_vm5, %v30917_v23  ;;  %26365 = vmatprep.mubr.msk.f32.mxu1 %vm27496_vm0, %v32861_v6  ;;  %v30968_v20 = vpop.eup %27224  ;;  %v21301_v0 = vsub.f32 %v33147_v15, %v30244_v13  ;;  %v33151_v45 = vld [vmem:[#allocation87_spill] sm:$0xff]  ;;  %v18676_v13 = vmul.f32 1.442695, %v18657_v51 }
 0x31f   : > { %26373 = vmatprep.subr.mxu1 %v32861_v6  ;;  %12254 = vadd.xlane.f32.xlu0 %v12253_v38  ;;  %33145 = vst [vmem:[#allocation16_spill] sm:$0xff] %v30968_v20  ;;  %v16050_v38 = vmul.f32 1.442695, %v16021_v32  ;;  %v30990_v32 = vpop.eup %27226  ;;  %v33157_v51 = vld [vmem:[#allocation35_spill] sm:$0xff] }
 0x320   : > { %14758 = vadd.xlane.f32.xlu1 %v14757_v49  ;;  %26218 = vmatprep.subr.mxu0 %v32861_v6  ;;  %v33148_v49 = vld [vmem:[#allocation31_spill] sm:$0xff]  ;;  %v30995_v47 = vpop.eup %27228 }
 0x321   : > { %26366 = vmatmul.mubr.msk.f32.vlgmr.msra.gmra.mrb[148].mxu1 %vm12314_vm6, %v30948_v42  ;;  %26220 = vmatprep.mubr.msk.f32.mxu0 %vm27496_vm0, %v32861_v6  ;;  %v14706_v44 = vsub.f32 %v33148_v49, %v30254_v3  ;;  %v31000_v15 = vpop.eup %27230  ;;  %27238 = vpow2.f32 %v16050_v38  ;;  %v21318_v49 = vmul.f32 1.442695, %v21301_v0  ;;  %v12259_v38 = vsel %vm11529_vm3, %v33151_v45, 0.0  ;;  %v33156_v45 = vld [vmem:[#allocation90_spill] sm:$0xff] }
 0x322   : > { %26374 = vmatpush3.msk.msra.mxu1 %vm12318_vm5, %v30946_v37  ;;  %26219 = vmatpush3.msk.msra.mxu0 %vm12318_vm5, %v30554_v12  ;;  %33149 = vst [vmem:[#allocation120_spill] sm:$0xff] %v31000_v15  ;;  %v17403_v7 = vsel %vm11529_vm3, %v30995_v47, 0.0  ;;  %27240 = vpow2.f32 %v17374_v1  ;;  %v22620_v1 = vmul.f32 1.442695, %v22603_v56 }
 0x323   : > { %26375 = vmatprep.mubr.msk.f32.mxu1 %vm27496_vm0, %v32861_v6  ;;  %26221 = vmatmul.mubr.msk.f32.vlgmr.msra.gmra.mrb[152].mxu0 %vm12314_vm6, %v30968_v20  ;;  %v14722_v26 = vmul.f32 1.442695, %v14706_v44  ;;  %v33153_v20 = vld [vmem:[#allocation33_spill] sm:$0xff]  ;;  %27242 = vpow2.f32 %v21318_v49  ;;  %v14710_v49 = vsub.f32 %v33157_v51, %v30456_v61  ;;  %v33160_v51 = vld [vmem:[#allocation54_spill] sm:$0xff] }
 0x324   : > { %26383 = vmatprep.subr.mxu1 %v32861_v6  ;;  %12148 = vadd.xlane.f32.xlu0 %v12147_v46  ;;  %v31007_v46 = vld [vmem:[%s30853_s15 + $0x2c] sm:$0xf]  ;;  %v14708_v28 = vsub.f32 %v33153_v20, %v30281_v35  ;;  %v31040_v20 = vld [vmem:[%s30853_s15 + $0x34] sm:$0xf] }
 0x325   : > { %26376 = vmatmul.mubr.msk.f32.vlgmr.msra.gmra.mrb[150].mxu1 %vm12314_vm6, %v30963_v53  ;;  %16060 = vadd.xlane.f32.xlu1 %v30921_v63  ;;  %v31024_v44 = vpop.eup %27232  ;;  %27244 = vpow2.f32 %v14722_v26  ;;  %v14763_v26 = vsel %vm11529_vm3, %v30745_v16, 0.0 }
 0x326   : > { %26384 = vmatpush3.msk.msra.mxu1 %vm12318_vm5, %v30975_v31  ;;  %26228 = vmatprep.subr.mxu0 %v32861_v6  ;;  %33154 = vst [vmem:[#allocation138_spill] sm:$0xff] %v31024_v44  ;;  %v31028_v0 = vpop.eup %27234  ;;  %27246 = vpow2.f32 %v18676_v13  ;;  %v33159_v13 = vld [vmem:[#allocation110_spill] sm:$0xff] }
 0x327   : > { %26230 = vmatprep.mubr.msk.f32.mxu0 %vm27496_vm0, %v32861_v6  ;;  %26229 = vmatpush3.msk.msra.mxu0 %vm12318_vm5, %v30631_v29  ;;  %v31033_v41 = vpop.eup %27236  ;;  %v18705_v56 = vsel %vm11529_vm3, %v31028_v0, 0.0  ;;  %27248 = vpow2.f32 %v22620_v1  ;;  %v16065_v1 = vsel %vm11529_vm3, %v30927_v43, 0.0 }
 0x328   : > { %26385 = vmatprep.mubr.msk.f32.mxu1 %vm27496_vm0, %v32861_v6  ;;  %26231 = vmatmul.mubr.msk.f32.vlgmr.msra.gmra.mrb[154].mxu0 %vm12314_vm6, %v31000_v15  ;;  %33155 = vst [vmem:[#allocation109_spill] sm:$0xff] %v31033_v41 }
 0x329   : > { %26386 = vmatmul.mubr.msk.f32.vlgmr.msra.gmra.mrb[152].mxu1 %vm12314_vm6, %v30990_v32  ;;  %26393 = vmatprep.subr.mxu1 %v32861_v6 }
 0x32a   : > { %12260 = vadd.xlane.f32.xlu0 %v12259_v38  ;;  %26394 = vmatpush3.msk.msra.mxu1 %vm12318_vm5, %v31007_v46  ;;  %v19959_v38 = vsub.f32 %v33156_v45, %v30257_v24  ;;  %v31067_v45 = vld [vmem:[%s30853_s15 + $0x3c] sm:$0xf] }
 0x32b   : > { %17404 = vadd.xlane.f32.xlu1 %v17403_v7  ;;  %26238 = vmatprep.subr.mxu0 %v32861_v6  ;;  %v14726_v7 = vmul.f32 1.442695, %v14708_v28  ;;  %v31060_v16 = vpop.eup %27238 }
 0x32c   : > { %26240 = vmatprep.mubr.msk.f32.mxu0 %vm27496_vm0, %v32861_v6  ;;  %26239 = vmatpush3.msk.msra.mxu0 %vm12318_vm5, %v30680_v60  ;;  %v19978_v28 = vmul.f32 1.442695, %v19959_v38  ;;  %33158 = vst [vmem:[#allocation77_spill] sm:$0xff] %v31060_v16  ;;  %v33161_v38 = vld [vmem:[#allocation40_spill] sm:$0xff] }
 0x32d   : > { %26395 = vmatprep.mubr.msk.f32.mxu1 %vm27496_vm0, %v32861_v6  ;;  %26241 = vmatmul.mubr.msk.f32.vlgmr.msra.gmra.mrb[156].mxu0 %vm12314_vm6, %v31033_v41  ;;  %27250 = vpow2.f32 %v14726_v7  ;;  %v14730_v41 = vmul.f32 1.442695, %v14710_v49  ;;  %v14712_v7 = vsub.f32 %v33161_v38, %v30504_v39  ;;  %v33162_v49 = vld [vmem:[#allocation58_spill] sm:$0xff] }
 0x32e   : > { %26396 = vmatmul.mubr.msk.f32.vlgmr.msra.gmra.mrb[154].mxu1 %vm12314_vm6, %v31024_v44  ;;  %26403 = vmatprep.subr.mxu1 %v32861_v6  ;;  %27252 = vpow2.f32 %v19978_v28  ;;  %v17359_v43 = vsub.f32 %v33162_v49, %v30310_v5 }
 0x32f   : > { %14764 = vadd.xlane.f32.xlu0 %v14763_v26  ;;  %26404 = vmatpush3.msk.msra.mxu1 %vm12318_vm5, %v31040_v20  ;;  %v21303_v26 = vsub.f32 %v33159_v13, %v30257_v24  ;;  %v31082_v13 = vpop.eup %27240  ;;  %27254 = vpow2.f32 %v14730_v41  ;;  %v14734_v49 = vmul.f32 1.442695, %v14712_v7  ;;  %v33164_v41 = vld [vmem:[#allocation50_spill] sm:$0xff] }
 0x330   : > { %18706 = vadd.xlane.f32.xlu1 %v18705_v56  ;;  %26248 = vmatprep.subr.mxu0 %v32861_v6  ;;  %v17357_v56 = vsub.f32 %v33160_v51, %v30271_v34 }
 0x331   : > { %26250 = vmatprep.mubr.msk.f32.mxu0 %vm27496_vm0, %v32861_v6  ;;  %26249 = vmatpush3.msk.msra.mxu0 %vm12318_vm5, %v30726_v11  ;;  %v21322_v51 = vmul.f32 1.442695, %v21303_v26  ;;  %v17409_v26 = vsel %vm11529_vm3, %v31082_v13, 0.0 }
 0x332   : > { %26405 = vmatprep.mubr.msk.f32.mxu1 %vm27496_vm0, %v32861_v6  ;;  %26251 = vmatmul.mubr.msk.f32.vlgmr.msra.gmra.mrb[158].mxu0 %vm12314_vm6, %v30819_v48  ;;  %v31087_v48 = vpop.eup %27242  ;;  %v17378_v38 = vmul.f32 1.442695, %v17357_v56  ;;  %v17352_v56 = vsub.f32 %v33164_v41, %v30254_v3 }
 0x333   : > { %26406 = vmatmul.mubr.msk.f32.vlgmr.msra.gmra.mrb[156].mxu1 %vm12314_vm6, %v31060_v16  ;;  %26413 = vmatprep.subr.mxu1 %v32861_v6  ;;  %v27453_v16 = vld [vmem:[%s29993_s18 + $0x10] sm:$0xf]  ;;  %27256 = vpow2.f32 %v21322_v51 }
 0x334   : > { %16066 = vadd.xlane.f32.xlu0 %v16065_v1  ;;  %26414 = vmatpush3.msk.msra.mxu1 %vm12318_vm5, %v31067_v45  ;;  %v31094_v1 = vpop.eup %27244  ;;  %27258 = vpow2.f32 %v17378_v38 }
 0x335   : > { %20008 = vadd.xlane.f32.xlu1 %v30921_v63  ;;  %26258 = vmatprep.subr.mxu0 %v32861_v6  ;;  %v33163_v63 = vld [vmem:[#allocation132_spill] sm:$0xff]  ;;  %v31115_v7 = vpop.eup %27246  ;;  %27260 = vpow2.f32 %v14734_v49 }
 0x336   : > { %26260 = vmatprep.mubr.msk.f32.mxu0 %vm27496_vm0, %v32861_v6  ;;  %26259 = vmatpush3.msk.msra.mxu0 %vm12318_vm5, %v27453_v16  ;;  %v22605_v28 = vsub.f32 %v33163_v63, %v30257_v24  ;;  %v33165_v16 = vld [vmem:[#allocation34_spill] sm:$0xff]  ;;  %v21351_v24 = vsel %vm11529_vm3, %v31087_v48, 0.0  ;;  %v17382_v63 = vmul.f32 1.442695, %v17359_v43  ;;  %v27454_v43 = vld [vmem:[%s29993_s18 + $0x18] sm:$0xf] }
 0x337   : > { %26415 = vmatprep.mubr.msk.f32.mxu1 %vm27496_vm0, %v32861_v6  ;;  %26261 = vmatmul.mubr.msk.f32.vlgmr.msra.gmra.mrb[144].mxu0 %vm12314_vm6, %v31094_v1  ;;  %v14714_v15 = vsub.f32 %v33165_v16, %v30560_v62  ;;  %v33166_v16 = vld [vmem:[#allocation59_spill] sm:$0xff]  ;;  %v18711_v38 = vsel %vm11529_vm3, %v31115_v7, 0.0 }
 0x338   : > { %26416 = vmatmul.mubr.msk.f32.vlgmr.msra.gmra.mrb[158].mxu1 %vm12314_vm6, %v30550_v9  ;;  %26423 = vmatprep.subr.mxu1 %v32861_v6  ;;  %v31119_v9 = vpop.eup %27248  ;;  %v17361_v44 = vsub.f32 %v33166_v16, %v30345_v25  ;;  %27262 = vpow2.f32 %v17382_v63 }
 0x339   : > { %17410 = vadd.xlane.f32.xlu0 %v17409_v26  ;;  %26424 = vmatpush3.msk.msra.mxu1 %vm12318_vm5, %v30895_v58  ;;  %v22624_v26 = vmul.f32 1.442695, %v22605_v28  ;;  %v31124_v41 = vpop.eup %27250  ;;  %v17368_v58 = vmul.f32 1.442695, %v17352_v56  ;;  %v14738_v51 = vmul.f32 1.442695, %v14714_v15 }
 0x33a   : > { %21352 = vadd.xlane.f32.xlu1 %v21351_v24  ;;  %26268 = vmatprep.subr.mxu0 %v32861_v6  ;;  %v33167_v28 = vld [vmem:[#allocation68_spill] sm:$0xff]  ;;  %v33168_v24 = vld [vmem:[#allocation146_spill] sm:$0xff]  ;;  %v22653_v15 = vsel %vm11529_vm3, %v31119_v9, 0.0  ;;  %v31145_v56 = vpop.eup %27252 }
 0x33b   : > { %26270 = vmatprep.mubr.msk.f32.mxu0 %vm27496_vm0, %v32861_v6  ;;  %26269 = vmatpush3.msk.msra.mxu0 %vm12318_vm5, %v27454_v43  ;;  %v18654_v49 = vsub.f32 %v33167_v28, %v30254_v3  ;;  %v14716_v16 = vsub.f32 %v33168_v24, %v30616_v8  ;;  %27264 = vpow2.f32 %v22624_v26  ;;  %v31152_v63 = vpop.eup %27254  ;;  %v33179_v3 = vld [vmem:[#allocation60_spill] sm:$0xff] }
 0x33c   : > { %26425 = vmatprep.mubr.msk.f32.mxu1 %vm27496_vm0, %v32861_v6  ;;  %26271 = vmatmul.mubr.msk.f32.vlgmr.msra.gmra.mrb[146].mxu0 %vm12314_vm6, %v31124_v41  ;;  %27266 = vpow2.f32 %v17368_v58  ;;  %v33171_v58 = vld [vmem:[#allocation157_spill] sm:$0xff] }
 0x33d   : > { %26426 = vmatmul.mubr.msk.f32.vlgmr.msra.gmra.mrb[144].mxu1 %vm12314_vm6, %v30995_v47  ;;  %26433 = vmatprep.subr.mxu1 %v32861_v6  ;;  %v17386_v47 = vmul.f32 1.442695, %v17361_v44  ;;  %27268 = vpow2.f32 %v14738_v51  ;;  %v18670_v43 = vmul.f32 1.442695, %v18654_v49  ;;  %v33170_v44 = vld [vmem:[#allocation62_spill] sm:$0xff]  ;;  %v14718_v51 = vsub.f32 %v33171_v58, %v30659_v30 }
 0x33e   : > { %18712 = vadd.xlane.f32.xlu0 %v18711_v38  ;;  %26434 = vmatpush3.msk.msra.mxu1 %vm12318_vm5, %v30917_v23  ;;  %v33169_v38 = vld [vmem:[#allocation45_spill] sm:$0xff]  ;;  %v17363_v28 = vsub.f32 %v33170_v44, %v30384_v40  ;;  %v14742_v24 = vmul.f32 1.442695, %v14716_v16  ;;  %v14754_v49 = vsel %vm11529_vm3, %v31094_v1, 0.0  ;;  %v33172_v1 = vld [vmem:[#allocation52_spill] sm:$0xff] }
 0x33f   : > { %22654 = vadd.xlane.f32.xlu1 %v22653_v15  ;;  %26278 = vmatprep.subr.mxu0 %v32861_v6  ;;  %v16010_v26 = vsub.f32 %v33169_v38, %v30281_v35  ;;  %v31173_v15 = vpop.eup %27256  ;;  %27270 = vpow2.f32 %v17386_v47  ;;  %v17354_v47 = vsub.f32 %v33172_v1, %v30281_v35 }
 0x340   : > { %26280 = vmatprep.mubr.msk.f32.mxu0 %vm27496_vm0, %v32861_v6  ;;  %26279 = vmatpush3.msk.msra.mxu0 %vm12318_vm5, %v30554_v12  ;;  %v20013_v12 = vsel %vm11529_vm3, %v31145_v56, 0.0  ;;  %27272 = vpow2.f32 %v18670_v43  ;;  %v17390_v44 = vmul.f32 1.442695, %v17363_v28  ;;  %v21357_v43 = vsel %vm11529_vm3, %v31173_v15, 0.0 }
 0x341   : > { %26435 = vmatprep.mubr.msk.f32.mxu1 %vm27496_vm0, %v32861_v6  ;;  %26281 = vmatmul.mubr.msk.f32.vlgmr.msra.gmra.mrb[148].mxu0 %vm12314_vm6, %v31152_v63  ;;  %v16028_v16 = vmul.f32 1.442695, %v16010_v26  ;;  %27274 = vpow2.f32 %v14742_v24 }
 0x342   : > { %26436 = vmatmul.mubr.msk.f32.vlgmr.msra.gmra.mrb[146].mxu1 %vm12314_vm6, %v31082_v13  ;;  %26443 = vmatprep.subr.mxu1 %v32861_v6  ;;  %v31177_v13 = vpop.eup %27258 }
 0x343   : > { %20014 = vadd.xlane.f32.xlu0 %v20013_v12  ;;  %26444 = vmatpush3.msk.msra.mxu1 %vm12318_vm5, %v30946_v37  ;;  %v31182_v38 = vpop.eup %27260  ;;  %v14746_v12 = vmul.f32 1.442695, %v14718_v51  ;;  %27276 = vpow2.f32 %v16028_v16  ;;  %v17372_v51 = vmul.f32 1.442695, %v17354_v47 }
 0x344   : > { %14755 = vadd.xlane.f32.xlu1 %v14754_v49  ;;  %26288 = vmatprep.subr.mxu0 %v32861_v6  ;;  %v31196_v26 = vpop.eup %27262  ;;  %27278 = vpow2.f32 %v17390_v44 }
 0x345   : > { %26290 = vmatprep.mubr.msk.f32.mxu0 %vm27496_vm0, %v32861_v6  ;;  %26289 = vmatpush3.msk.msra.mxu0 %vm12318_vm5, %v30631_v29  ;;  %v33173_v29 = vld [vmem:[#allocation63_spill] sm:$0xff]  ;;  %v31201_v24 = vpop.eup %27264  ;;  %27280 = vpow2.f32 %v14746_v12 }
 0x346   : > { %26445 = vmatprep.mubr.msk.f32.mxu1 %vm27496_vm0, %v32861_v6  ;;  %26291 = vmatmul.mubr.msk.f32.vlgmr.msra.gmra.mrb[150].mxu0 %vm12314_vm6, %v31182_v38  ;;  %v17365_v28 = vsub.f32 %v33173_v29, %v30418_v2  ;;  %33174 = vst [vmem:[#allocation20_spill] sm:$0xff] %v31201_v24  ;;  %v31206_v58 = vpop.eup %27266  ;;  %v22659_v16 = vsel %vm11529_vm3, %v31201_v24, 0.0  ;;  %27282 = vpow2.f32 %v17372_v51  ;;  %v12256_v24 = vsel %vm11529_vm3, %v33179_v3, 0.0  ;;  %v33180_v3 = vld [vmem:[#allocation78_spill] sm:$0xff] }
 0x347   : > { %26446 = vmatmul.mubr.msk.f32.vlgmr.msra.gmra.mrb[148].mxu1 %vm12314_vm6, %v31177_v13  ;;  %26453 = vmatprep.subr.mxu1 %v32861_v6  ;;  %v31211_v49 = vpop.eup %27268  ;;  %v17400_v44 = vsel %vm11529_vm3, %v31206_v58, 0.0 }
 0x348   : > { %21358 = vadd.xlane.f32.xlu0 %v21357_v43  ;;  %26454 = vmatpush3.msk.msra.mxu1 %vm12318_vm5, %v30975_v31  ;;  %v17394_v1 = vmul.f32 1.442695, %v17365_v28  ;;  %v14760_v43 = vsel %vm11529_vm3, %v31124_v41, 0.0 }
 0x349   : > { %16057 = vadd.xlane.f32.xlu1 %v30887_v55  ;;  %26298 = vmatprep.subr.mxu0 %v32861_v6 }
 0x34a   : > { %26300 = vmatprep.mubr.msk.f32.mxu0 %vm27496_vm0, %v32861_v6  ;;  %26299 = vmatpush3.msk.msra.mxu0 %vm12318_vm5, %v30680_v60  ;;  %v31226_v60 = vpop.eup %27270  ;;  %27284 = vpow2.f32 %v17394_v1  ;;  %v33176_v1 = vld [vmem:[#allocation39_spill] sm:$0xff] }
 0x34b   : > { %26455 = vmatprep.mubr.msk.f32.mxu1 %vm27496_vm0, %v32861_v6  ;;  %26301 = vmatmul.mubr.msk.f32.vlgmr.msra.gmra.mrb[152].mxu0 %vm12314_vm6, %v31211_v49  ;;  %v31230_v47 = vpop.eup %27272 }
 0x34c   : > { %26456 = vmatmul.mubr.msk.f32.vlgmr.msra.gmra.mrb[150].mxu1 %vm12314_vm6, %v31196_v26  ;;  %26463 = vmatprep.subr.mxu1 %v32861_v6  ;;  %v31235_v12 = vpop.eup %27274  ;;  %v18702_v29 = vsel %vm11529_vm3, %v31230_v47, 0.0 }
 0x34d   : > { %22660 = vadd.xlane.f32.xlu0 %v22659_v16  ;;  %26464 = vmatpush3.msk.msra.mxu1 %vm12318_vm5, %v31007_v46  ;;  %v31250_v28 = vpop.eup %27276  ;;  %v16012_v16 = vsub.f32 %v33176_v1, %v30456_v61 }
 0x34e   : > { %17401 = vadd.xlane.f32.xlu1 %v17400_v44  ;;  %26308 = vmatprep.subr.mxu0 %v32861_v6  ;;  %v16062_v51 = vsel %vm11529_vm3, %v31250_v28, 0.0  ;;  %v668_v44 = vld [vmem:[%s29993_s18 + $0x48] sm:$0xf] }
 0x34f   : > { %26310 = vmatprep.mubr.msk.f32.mxu0 %vm27496_vm0, %v32861_v6  ;;  %26309 = vmatpush3.msk.msra.mxu0 %vm12318_vm5, %v30726_v11  ;;  %v31254_v11 = vpop.eup %27278  ;;  %v16032_v55 = vmul.f32 1.442695, %v16012_v16 }
 0x350   : > { %26465 = vmatprep.mubr.msk.f32.mxu1 %vm27496_vm0, %v32861_v6  ;;  %26311 = vmatmul.mubr.msk.f32.vlgmr.msra.gmra.mrb[154].mxu0 %vm12314_vm6, %v31235_v12  ;;  %v31259_v41 = vpop.eup %27280 }
 0x351   : > { %26466 = vmatmul.mubr.msk.f32.vlgmr.msra.gmra.mrb[152].mxu1 %vm12314_vm6, %v31226_v60  ;;  %26473 = vmatprep.subr.mxu1 %v32861_v6  ;;  %33175 = vst [vmem:[#allocation125_spill] sm:$0xff] %v31259_v41  ;;  %27286 = vpow2.f32 %v16032_v55  ;;  %v33181_v55 = vld [vmem:[#allocation44_spill] sm:$0xff] }
 0x352   : > { %14761 = vadd.xlane.f32.xlu0 %v14760_v43  ;;  %26474 = vmatpush3.msk.msra.mxu1 %vm12318_vm5, %v31040_v20  ;;  %v31277_v43 = vpop.eup %27282 }
 0x353   : > { %18703 = vadd.xlane.f32.xlu1 %v18702_v29  ;;  %26318 = vmatprep.subr.mxu0 %v32861_v6 }
 0x354   : > { %26320 = vmatprep.mubr.msk.f32.mxu0 %vm27496_vm0, %v32861_v6  ;;  %26319 = vmatpush3.msk.msra.mxu0 %vm12318_vm5, %v30766_v14  ;;  %v12144_v14 = vsel %vm11529_vm3, %v30872_v17, 0.0  ;;  %v31284_v29 = vpop.eup %27284  ;;  %v31290_v17 = vld [vmem:[%s30853_s15 + $0x44] sm:$0xf] }
 0x355   : > { %26475 = vmatprep.mubr.msk.f32.mxu1 %vm27496_vm0, %v32861_v6  ;;  %26321 = vmatmul.mubr.msk.f32.vlgmr.msra.gmra.mrb[156].mxu0 %vm12314_vm6, %v31259_v41 }
 0x356   : > { %26476 = vmatmul.mubr.msk.f32.vlgmr.msra.gmra.mrb[154].mxu1 %vm12314_vm6, %v31254_v11  ;;  %26483 = vmatprep.subr.mxu1 %v32861_v6 }
 0x357   : > { %16063 = vadd.xlane.f32.xlu0 %v16062_v51  ;;  %26484 = vmatpush3.msk.msra.mxu1 %vm12318_vm5, %v31067_v45  ;;  %v33177_v51 = vld [vmem:[#allocation75_spill] sm:$0xff] }
 0x358   : > { %12145 = vadd.xlane.f32.xlu1 %v12144_v14  ;;  %26328 = vmatprep.subr.mxu0 %v32861_v6  ;;  %v18659_v1 = vsub.f32 %v33177_v51, %v30271_v34  ;;  %v17406_v14 = vsel %vm11529_vm3, %v31277_v43, 0.0  ;;  %v670_v51 = vld [vmem:[%s30853_s15] sm:$0xf] }
 0x359   : > { %26330 = vmatprep.mubr.msk.f32.mxu0 %vm27496_vm0, %v32861_v6  ;;  %26329 = vmatpush3.msk.msra.mxu0 %vm12318_vm5, %v668_v44  ;;  %v33178_v44 = vld [vmem:[#allocation48_spill] sm:$0xff] }
 0x35a   : > { %26485 = vmatprep.mubr.msk.f32.mxu1 %vm27496_vm0, %v32861_v6  ;;  %26331 = vmatmul.mubr.msk.f32.vlgmr.msra.gmra.mrb[158].mxu0 %vm12314_vm6, %v30797_v54  ;;  %v16014_v41 = vsub.f32 %v33178_v44, %v30504_v39  ;;  %v18680_v16 = vmul.f32 1.442695, %v18659_v1  ;;  %v16016_v1 = vsub.f32 %v33181_v55, %v30560_v62  ;;  %v12262_v55 = vsel %vm11529_vm3, %v30562_v57, 0.0 }
 0x35b   : > { %26486 = vmatmul.mubr.msk.f32.vlgmr.msra.gmra.mrb[156].mxu1 %vm12314_vm6, %v31284_v29  ;;  %26493 = vmatprep.subr.mxu1 %v32861_v6 }
 0x35c   : > { %17407 = vadd.xlane.f32.xlu0 %v17406_v14  ;;  %26494 = vmatpush3.msk.msra.mxu1 %vm12318_vm5, %v31290_v17  ;;  %v18661_v14 = vsub.f32 %v33180_v3, %v30310_v5  ;;  %v16036_v44 = vmul.f32 1.442695, %v16014_v41  ;;  %v31328_v3 = vld [vmem:[%s30853_s15 + $0x8] sm:$0xf]  ;;  %27288 = vpow2.f32 %v18680_v16  ;;  %v16040_v41 = vmul.f32 1.442695, %v16016_v1 }
 0x35d   : > { %12257 = vadd.xlane.f32.xlu1 %v12256_v24  ;;  %26338 = vmatprep.subr.mxu0 %v32861_v6  ;;  %v12153_v24 = vsel %vm11529_vm3, %v30600_v36, 0.0  ;;  %v33184_v16 = vld [vmem:[#allocation79_spill] sm:$0xff] }
 0x35e   : > { %26340 = vmatprep.mubr.msk.f32.mxu0 %vm27496_vm0, %v32861_v6  ;;  %26339 = vmatpush3.msk.msra.mxu0 %vm12318_vm5, %v670_v51  ;;  %v12150_v51 = vsel %vm11529_vm3, %v30905_v21, 0.0  ;;  %v18684_v36 = vmul.f32 1.442695, %v18661_v14  ;;  %27290 = vpow2.f32 %v16036_v44  ;;  %v33183_v21 = vld [vmem:[#allocation80_spill] sm:$0xff]  ;;  %v12265_v14 = vsel %vm11529_vm3, %v33184_v16, 0.0  ;;  %v33185_v44 = vld [vmem:[#allocation151_spill] sm:$0xff] }
 0x35f   : > { %26495 = vmatprep.mubr.msk.f32.mxu1 %vm27496_vm0, %v32861_v6  ;;  %26341 = vmatmul.mubr.msk.f32.vlgmr.msra.gmra.mrb[144].mxu0 %vm12314_vm6, %v30803_v33  ;;  %v33186_v1 = vld [vmem:[#allocation83_spill] sm:$0xff] }
 0x360   : > { %26496 = vmatmul.mubr.msk.f32.vlgmr.msra.gmra.mrb[158].mxu1 %vm12314_vm6, %v30608_v19  ;;  %26503 = vmatprep.subr.mxu1 %v32861_v6  ;;  %v31332_v19 = vpop.xlane.xlu0 %12184  ;;  %27292 = vpow2.f32 %v18684_v36  ;;  %v12159_v36 = vsel %vm11529_vm3, %v30621_v22, 0.0  ;;  %v33189_v16 = vld [vmem:[#allocation163_spill] sm:$0xff] }
 0x361   : > { %12154 = vadd.xlane.f32.xlu0 %v12153_v24  ;;  %26504 = vmatpush3.msk.msra.mxu1 %vm12318_vm5, %v30917_v23  ;;  %33182 = vst [vmem:[#allocation17_spill] sm:$0xff] %v31332_v19  ;;  %v18663_v23 = vsub.f32 %v33183_v21, %v30345_v25  ;;  %v16018_v24 = vsub.f32 %v33185_v44, %v30616_v8  ;;  %27294 = vpow2.f32 %v16040_v41  ;;  %v14769_v44 = vsel %vm11529_vm3, %v30760_v52, 0.0 }
 0x362   : > { %12151 = vadd.xlane.f32.xlu1 %v12150_v51  ;;  %26348 = vmatprep.subr.mxu0 %v32861_v6  ;;  %v31355_v51 = vld [vmem:[%s30853_s15 + $0x10] sm:$0xf]  ;;  %v18665_v21 = vsub.f32 %v33186_v1, %v30384_v40 }
 0x363   : > { %26350 = vmatprep.mubr.msk.f32.mxu0 %vm27496_vm0, %v32861_v6  ;;  %26349 = vmatpush3.msk.msra.mxu0 %vm12318_vm5, %v31328_v3 }
 0x364   : > { %26505 = vmatprep.mubr.msk.f32.mxu1 %vm27496_vm0, %v32861_v6  ;;  %26351 = vmatmul.mubr.msk.f32.vlgmr.msra.gmra.mrb[146].mxu0 %vm12314_vm6, %v31250_v28  ;;  %v18688_v28 = vmul.f32 1.442695, %v18663_v23  ;;  %v31366_v57 = vpop.xlane.xlu0 %12296  ;;  %v33188_v23 = vld [vmem:[#allocation94_spill] sm:$0xff]  ;;  %v18692_v22 = vmul.f32 1.442695, %v18665_v21 }
 0x365   : > { %26506 = vmatmul.mubr.msk.f32.vlgmr.msra.gmra.mrb[144].mxu1 %vm12314_vm6, %v31028_v0  ;;  %26513 = vmatprep.subr.mxu1 %v32861_v6  ;;  %v31362_v0 = vpop.eup %27286  ;;  %33187 = vst [vmem:[#allocation99_spill] sm:$0xff] %v31366_v57  ;;  %v19961_v41 = vsub.f32 %v33188_v23, %v30271_v34  ;;  %v33193_v23 = vld [vmem:[#allocation86_spill] sm:$0xff] }
 0x366   : > { %12266 = vadd.xlane.f32.xlu0 %v12265_v14  ;;  %26514 = vmatpush3.msk.msra.mxu1 %vm12318_vm5, %v30946_v37  ;;  %v16044_v37 = vmul.f32 1.442695, %v16018_v24  ;;  %v16020_v14 = vsub.f32 %v33189_v16, %v30659_v30  ;;  %v31386_v24 = vld [vmem:[%s30853_s15 + $0x18] sm:$0xf]  ;;  %27296 = vpow2.f32 %v18688_v28  ;;  %v33191_v28 = vld [vmem:[#allocation74_spill] sm:$0xff]  ;;  %v18667_v16 = vsub.f32 %v33193_v23, %v30418_v2 }
 0x367   : > { %12263 = vadd.xlane.f32.xlu1 %v12262_v55  ;;  %26358 = vmatprep.subr.mxu0 %v32861_v6  ;;  %v19982_v52 = vmul.f32 1.442695, %v19961_v41  ;;  %v12271_v21 = vsel %vm11529_vm3, %v33191_v28, 0.0  ;;  %v16071_v41 = vsel %vm11529_vm3, %v30948_v42, 0.0 }
 0x368   : > { %26360 = vmatprep.mubr.msk.f32.mxu0 %vm27496_vm0, %v32861_v6  ;;  %26359 = vmatpush3.msk.msra.mxu0 %vm12318_vm5, %v31355_v51  ;;  %27298 = vpow2.f32 %v16044_v37  ;;  %v31399_v1 = vpop.xlane.xlu0 %14800  ;;  %v33192_v37 = vld [vmem:[#allocation113_spill] sm:$0xff] }
 0x369   : > { %26515 = vmatprep.mubr.msk.f32.mxu1 %vm27496_vm0, %v32861_v6  ;;  %26361 = vmatmul.mubr.msk.f32.vlgmr.msra.gmra.mrb[148].mxu0 %vm12314_vm6, %v31362_v0  ;;  %33190 = vst [vmem:[#allocation91_spill] sm:$0xff] %v31399_v1  ;;  %27300 = vpow2.f32 %v18692_v22  ;;  %v33226_v1 = vld [vmem:[#allocation89_spill] sm:$0xff] }
 0x36a   : > { %26516 = vmatmul.mubr.msk.f32.vlgmr.msra.gmra.mrb[146].mxu1 %vm12314_vm6, %v31115_v7  ;;  %26523 = vmatprep.subr.mxu1 %v32861_v6  ;;  %v27289_v7 = vpop.eup %27288  ;;  %27302 = vpow2.f32 %v19982_v52  ;;  %v14775_v52 = vsel %vm11529_vm3, %v30781_v50, 0.0  ;;  %v12274_v57 = vsel %vm11529_vm3, %v33226_v1, 0.0 }
 0x36b   : > { %12160 = vadd.xlane.f32.xlu0 %v12159_v36  ;;  %26524 = vmatpush3.msk.msra.mxu1 %vm12318_vm5, %v30975_v31  ;;  %v31393_v55 = vpop.eup %27290  ;;  %v16048_v31 = vmul.f32 1.442695, %v16020_v14  ;;  %v21305_v36 = vsub.f32 %v33192_v37, %v30271_v34  ;;  %v31414_v14 = vld [vmem:[%s30853_s15 + $0x20] sm:$0xf] }
 0x36c   : > { %14770 = vadd.xlane.f32.xlu1 %v14769_v44  ;;  %26368 = vmatprep.subr.mxu0 %v32861_v6  ;;  %v31418_v44 = vpop.eup %27292  ;;  %v31439_v23 = vpop.xlane.xlu0 %16102 }
 0x36d   : > { %26370 = vmatprep.mubr.msk.f32.mxu0 %vm27496_vm0, %v32861_v6  ;;  %26369 = vmatpush3.msk.msra.mxu0 %vm12318_vm5, %v31386_v24  ;;  %v31423_v28 = vpop.eup %27294  ;;  %27304 = vpow2.f32 %v16048_v31  ;;  %v21326_v42 = vmul.f32 1.442695, %v21305_v36  ;;  %v33195_v31 = vld [vmem:[#allocation136_spill] sm:$0xff]  ;;  %33196 = vst [vmem:[#allocation127_spill] sm:$0xff] %v31439_v23  ;;  %v17415_v36 = vsel %vm11529_vm3, %v31177_v13, 0.0 }
 0x36e   : > { %26525 = vmatprep.mubr.msk.f32.mxu1 %vm27496_vm0, %v32861_v6  ;;  %26371 = vmatmul.mubr.msk.f32.vlgmr.msra.gmra.mrb[150].mxu0 %vm12314_vm6, %v31393_v55  ;;  %v22607_v37 = vsub.f32 %v33195_v31, %v30271_v34  ;;  %v33197_v13 = vld [vmem:[#allocation116_spill] sm:$0xff] }
 0x36f   : > { %26526 = vmatmul.mubr.msk.f32.vlgmr.msra.gmra.mrb[148].mxu1 %vm12314_vm6, %v27289_v7  ;;  %26533 = vmatprep.subr.mxu1 %v32861_v6  ;;  %27306 = vpow2.f32 %v21326_v42  ;;  %v16077_v42 = vsel %vm11529_vm3, %v30963_v53, 0.0 }
 0x370   : > { %12272 = vadd.xlane.f32.xlu0 %v12271_v21  ;;  %26534 = vmatpush3.msk.msra.mxu1 %vm12318_vm5, %v31007_v46  ;;  %v33194_v46 = vld [vmem:[#allocation98_spill] sm:$0xff]  ;;  %v18696_v21 = vmul.f32 1.442695, %v18667_v16  ;;  %v31445_v16 = vld [vmem:[%s30853_s15 + $0x28] sm:$0xf]  ;;  %v31475_v31 = vpop.xlane.xlu0 %17446 }
 0x371   : > { %16072 = vadd.xlane.f32.xlu1 %v16071_v41  ;;  %26378 = vmatprep.subr.mxu0 %v32861_v6  ;;  %v19963_v22 = vsub.f32 %v33194_v46, %v30310_v5  ;;  %v31449_v41 = vpop.eup %27296  ;;  %v21307_v46 = vsub.f32 %v33197_v13, %v30310_v5  ;;  %33198 = vst [vmem:[#allocation19_spill] sm:$0xff] %v31475_v31 }
 0x372   : > { %26380 = vmatprep.mubr.msk.f32.mxu0 %vm27496_vm0, %v32861_v6  ;;  %26379 = vmatpush3.msk.msra.mxu0 %vm12318_vm5, %v31414_v14  ;;  %v31454_v50 = vpop.eup %27298  ;;  %27308 = vpow2.f32 %v18696_v21  ;;  %v31471_v21 = vld [vmem:[%s30853_s15 + $0x30] sm:$0xf] }
 0x373   : > { %26535 = vmatprep.mubr.msk.f32.mxu1 %vm27496_vm0, %v32861_v6  ;;  %26381 = vmatmul.mubr.msk.f32.vlgmr.msra.gmra.mrb[152].mxu0 %vm12314_vm6, %v31423_v28  ;;  %v19986_v34 = vmul.f32 1.442695, %v19963_v22  ;;  %v18717_v22 = vsel %vm11529_vm3, %v27289_v7, 0.0  ;;  %v21330_v53 = vmul.f32 1.442695, %v21307_v46 }
 0x374   : > { %26536 = vmatmul.mubr.msk.f32.vlgmr.msra.gmra.mrb[150].mxu1 %vm12314_vm6, %v31418_v44  ;;  %26543 = vmatprep.subr.mxu1 %v32861_v6 }
 0x375   : > { %14776 = vadd.xlane.f32.xlu0 %v14775_v52  ;;  %26544 = vmatpush3.msk.msra.mxu1 %vm12318_vm5, %v31040_v20  ;;  %v22628_v20 = vmul.f32 1.442695, %v22607_v37  ;;  %v31473_v52 = vpop.eup %27300  ;;  %27310 = vpow2.f32 %v19986_v34  ;;  %v17421_v34 = vsel %vm11529_vm3, %v31196_v26, 0.0  ;;  %v31510_v26 = vpop.xlane.xlu0 %18748 }
 0x376   : > { %17416 = vadd.xlane.f32.xlu1 %v17415_v36  ;;  %26388 = vmatprep.subr.mxu0 %v32861_v6  ;;  %v31479_v37 = vpop.eup %27302  ;;  %33201 = vst [vmem:[#allocation117_spill] sm:$0xff] %v31510_v26 }
 0x377   : > { %26390 = vmatprep.mubr.msk.f32.mxu0 %vm27496_vm0, %v32861_v6  ;;  %26389 = vmatpush3.msk.msra.mxu0 %vm12318_vm5, %v31445_v16  ;;  %27312 = vpow2.f32 %v22628_v20  ;;  %v31484_v7 = vpop.eup %27304  ;;  %v33200_v20 = vld [vmem:[#allocation57_spill] sm:$0xff]  ;;  %v20019_v46 = vsel %vm11529_vm3, %v31479_v37, 0.0 }
 0x378   : > { %26545 = vmatprep.mubr.msk.f32.mxu1 %vm27496_vm0, %v32861_v6  ;;  %26391 = vmatmul.mubr.msk.f32.vlgmr.msra.gmra.mrb[154].mxu0 %vm12314_vm6, %v31454_v50  ;;  %v17356_v13 = vsub.f32 %v33200_v20, %v30456_v61  ;;  %27314 = vpow2.f32 %v21330_v53 }
 0x379   : > { %26546 = vmatmul.mubr.msk.f32.vlgmr.msra.gmra.mrb[152].mxu1 %vm12314_vm6, %v31449_v41  ;;  %26553 = vmatprep.subr.mxu1 %v32861_v6 }
 0x37a   : > { %16078 = vadd.xlane.f32.xlu0 %v16077_v42  ;;  %26554 = vmatpush3.msk.msra.mxu1 %vm12318_vm5, %v31067_v45  ;;  %v33199_v45 = vld [vmem:[#allocation141_spill] sm:$0xff]  ;;  %v31508_v42 = vpop.eup %27306  ;;  %v17376_v53 = vmul.f32 1.442695, %v17356_v13  ;;  %v31548_v13 = vpop.xlane.xlu0 %20050 }
 0x37b   : > { %18718 = vadd.xlane.f32.xlu1 %v18717_v22  ;;  %26398 = vmatprep.subr.mxu0 %v32861_v6  ;;  %v22609_v36 = vsub.f32 %v33199_v45, %v30310_v5  ;;  %v31504_v5 = vld [vmem:[%s30853_s15 + $0x38] sm:$0xf]  ;;  %33203 = vst [vmem:[#allocation84_spill] sm:$0xff] %v31548_v13 }
 0x37c   : > { %26400 = vmatprep.mubr.msk.f32.mxu0 %vm27496_vm0, %v32861_v6  ;;  %26399 = vmatpush3.msk.msra.mxu0 %vm12318_vm5, %v31471_v21  ;;  %v31515_v45 = vpop.eup %27308 }
 0x37d   : > { %26555 = vmatprep.mubr.msk.f32.mxu1 %vm27496_vm0, %v32861_v6  ;;  %26401 = vmatmul.mubr.msk.f32.vlgmr.msra.gmra.mrb[156].mxu0 %vm12314_vm6, %v31484_v7  ;;  %v22632_v22 = vmul.f32 1.442695, %v22609_v36  ;;  %v33202_v36 = vld [vmem:[#allocation61_spill] sm:$0xff] }
 0x37e   : > { %26556 = vmatmul.mubr.msk.f32.vlgmr.msra.gmra.mrb[154].mxu1 %vm12314_vm6, %v31473_v52  ;;  %26563 = vmatprep.subr.mxu1 %v32861_v6  ;;  %v17358_v20 = vsub.f32 %v33202_v36, %v30504_v39 }
 0x37f   : > { %17422 = vadd.xlane.f32.xlu0 %v17421_v34  ;;  %26564 = vmatpush3.msk.msra.mxu1 %vm12318_vm5, %v31290_v17  ;;  %v689_v17 = vld [vmem:[%s30853_s15 + $0x4c] sm:$0xf]  ;;  %v18723_v34 = vsel %vm11529_vm3, %v31418_v44, 0.0  ;;  %27316 = vpow2.f32 %v22632_v22 }
 0x380   : > { %20020 = vadd.xlane.f32.xlu1 %v20019_v46  ;;  %26408 = vmatprep.subr.mxu0 %v32861_v6  ;;  %v21363_v46 = vsel %vm11529_vm3, %v31508_v42, 0.0  ;;  %27318 = vpow2.f32 %v17376_v53  ;;  %v33204_v53 = vld [vmem:[#allocation140_spill] sm:$0xff] }
 0x381   : > { %26410 = vmatprep.mubr.msk.f32.mxu0 %vm27496_vm0, %v32861_v6  ;;  %26409 = vmatpush3.msk.msra.mxu0 %vm12318_vm5, %v31504_v5  ;;  %v17360_v36 = vsub.f32 %v33204_v53, %v30560_v62 }
 0x382   : > { %26565 = vmatprep.mubr.msk.f32.mxu1 %vm27496_vm0, %v32861_v6  ;;  %26411 = vmatmul.mubr.msk.f32.vlgmr.msra.gmra.mrb[158].mxu0 %vm12314_vm6, %v30824_v27  ;;  %v31540_v27 = vpop.eup %27310 }
 0x383   : > { %26566 = vmatmul.mubr.msk.f32.vlgmr.msra.gmra.mrb[156].mxu1 %vm12314_vm6, %v31515_v45  ;;  %26573 = vmatprep.subr.mxu1 %v32861_v6  ;;  %v31543_v44 = vpop.eup %27312  ;;  %v20025_v22 = vsel %vm11529_vm3, %v31540_v27, 0.0  ;;  %v17384_v53 = vmul.f32 1.442695, %v17360_v36  ;;  %v14766_v36 = vsel %vm11529_vm3, %v31152_v63, 0.0  ;;  %v31606_v63 = vld [vmem:[%s31538_s23 + $0x14] sm:$0xf] }
 0x384   : > { %18724 = vadd.xlane.f32.xlu0 %v18723_v34  ;;  %26574 = vmatpush3.msk.msra.mxu1 %vm12318_vm5, %v689_v17  ;;  %v691_v34 = vld [vmem:[%s31538_s23 + $0x4] sm:$0xf]  ;;  %v17380_v17 = vmul.f32 1.442695, %v17358_v20  ;;  %v31566_v20 = vpop.eup %27314 }
 0x385   : > { %21364 = vadd.xlane.f32.xlu1 %v21363_v46  ;;  %26418 = vmatprep.subr.mxu0 %v32861_v6  ;;  %v33205_v46 = vld [vmem:[#allocation100_spill] sm:$0xff] }
 0x386   : > { %26420 = vmatprep.mubr.msk.f32.mxu0 %vm27496_vm0, %v32861_v6  ;;  %26419 = vmatpush3.msk.msra.mxu0 %vm12318_vm5, %v31328_v3  ;;  %v22665_v3 = vsel %vm11529_vm3, %v31543_v44, 0.0  ;;  %27320 = vpow2.f32 %v17380_v17  ;;  %v21369_v17 = vsel %vm11529_vm3, %v31566_v20, 0.0 }
 0x387   : > { %26575 = vmatprep.mubr.msk.f32.mxu1 %vm27496_vm0, %v32861_v6  ;;  %26421 = vmatmul.mubr.msk.f32.vlgmr.msra.gmra.mrb[144].mxu0 %vm12314_vm6, %v31206_v58  ;;  %v31577_v58 = vld [vmem:[%s31538_s23 + $0xc] sm:$0xf]  ;;  %27322 = vpow2.f32 %v17384_v53  ;;  %v33209_v53 = vld [vmem:[#allocation166_spill] sm:$0xff] }
 0x388   : > { %26576 = vmatmul.mubr.msk.f32.vlgmr.msra.gmra.mrb[158].mxu1 %vm12314_vm6, %v30464_v18  ;;  %26583 = vmatprep.subr.mxu1 %v32861_v6 }
 0x389   : > { %20026 = vadd.xlane.f32.xlu0 %v20025_v22  ;;  %26584 = vmatpush3.msk.msra.mxu1 %vm12318_vm5, %v691_v34  ;;  %v19965_v22 = vsub.f32 %v33205_v46, %v30345_v25  ;;  %v31581_v34 = vpop.xlane.xlu0 %21394  ;;  %v31594_v46 = vpop.eup %27316 }
 0x38a   : > { %22666 = vadd.xlane.f32.xlu1 %v22665_v3  ;;  %26428 = vmatprep.subr.mxu0 %v32861_v6  ;;  %33206 = vst [vmem:[#allocation21_spill] sm:$0xff] %v31581_v34  ;;  %v33207_v3 = vld [vmem:[#allocation156_spill] sm:$0xff]  ;;  %v17364_v34 = vsub.f32 %v33209_v53, %v30659_v30 }
 0x38b   : > { %26430 = vmatprep.mubr.msk.f32.mxu0 %vm27496_vm0, %v32861_v6  ;;  %26429 = vmatpush3.msk.msra.mxu0 %vm12318_vm5, %v31355_v51  ;;  %v17362_v13 = vsub.f32 %v33207_v3, %v30616_v8 }
 0x38c   : > { %26585 = vmatprep.mubr.msk.f32.mxu1 %vm27496_vm0, %v32861_v6  ;;  %26431 = vmatmul.mubr.msk.f32.vlgmr.msra.gmra.mrb[146].mxu0 %vm12314_vm6, %v31277_v43  ;;  %v19990_v43 = vmul.f32 1.442695, %v19965_v22  ;;  %v22671_v22 = vsel %vm11529_vm3, %v31594_v46, 0.0 }
 0x38d   : > { %26586 = vmatmul.mubr.msk.f32.vlgmr.msra.gmra.mrb[144].mxu1 %vm12314_vm6, %v30545_v59  ;;  %26593 = vmatprep.subr.mxu1 %v32861_v6  ;;  %v27319_v59 = vpop.eup %27318  ;;  %v31617_v26 = vpop.xlane.xlu0 %22696 }
 0x38e   : > { %21370 = vadd.xlane.f32.xlu0 %v21369_v17  ;;  %26594 = vmatpush3.msk.msra.mxu1 %vm12318_vm5, %v31577_v58  ;;  %v33208_v17 = vld [vmem:[#allocation101_spill] sm:$0xff]  ;;  %33210 = vst [vmem:[#allocation134_spill] sm:$0xff] %v31617_v26  ;;  %27324 = vpow2.f32 %v19990_v43  ;;  %v14772_v43 = vsel %vm11529_vm3, %v31182_v38, 0.0 }
 0x38f   : > { %14767 = vadd.xlane.f32.xlu1 %v14766_v36  ;;  %26438 = vmatprep.subr.mxu0 %v32861_v6  ;;  %v19967_v3 = vsub.f32 %v33208_v17, %v30384_v40  ;;  %v17388_v36 = vmul.f32 1.442695, %v17362_v13  ;;  %v16068_v13 = vsel %vm11529_vm3, %v31362_v0, 0.0  ;;  %v31632_v0 = vld [vmem:[%s31538_s23 + $0x1c] sm:$0xf] }
 0x390   : > { %26440 = vmatprep.mubr.msk.f32.mxu0 %vm27496_vm0, %v32861_v6  ;;  %26439 = vmatpush3.msk.msra.mxu0 %vm12318_vm5, %v31386_v24 }
 0x391   : > { %26595 = vmatprep.mubr.msk.f32.mxu1 %vm27496_vm0, %v32861_v6  ;;  %26441 = vmatmul.mubr.msk.f32.vlgmr.msra.gmra.mrb[148].mxu0 %vm12314_vm6, %v27319_v59  ;;  %v19994_v17 = vmul.f32 1.442695, %v19967_v3  ;;  %27326 = vpow2.f32 %v17388_v36  ;;  %v33212_v36 = vld [vmem:[#allocation103_spill] sm:$0xff] }
 0x392   : > { %26596 = vmatmul.mubr.msk.f32.vlgmr.msra.gmra.mrb[146].mxu1 %vm12314_vm6, %v31145_v56  ;;  %26603 = vmatprep.subr.mxu1 %v32861_v6  ;;  %v27321_v56 = vpop.eup %27320  ;;  %v19969_v53 = vsub.f32 %v33212_v36, %v30418_v2 }
 0x393   : > { %22672 = vadd.xlane.f32.xlu0 %v22671_v22  ;;  %26604 = vmatpush3.msk.msra.mxu1 %vm12318_vm5, %v31606_v63  ;;  %v17392_v22 = vmul.f32 1.442695, %v17364_v34  ;;  %27328 = vpow2.f32 %v19994_v17  ;;  %v31650_v38 = vpop.eup %27322  ;;  %v16074_v17 = vsel %vm11529_vm3, %v31393_v55, 0.0 }
 0x394   : > { %16069 = vadd.xlane.f32.xlu1 %v16068_v13  ;;  %26448 = vmatprep.subr.mxu0 %v32861_v6  ;;  %v17412_v13 = vsel %vm11529_vm3, %v27319_v59, 0.0  ;;  %v19998_v59 = vmul.f32 1.442695, %v19969_v53  ;;  %v17418_v53 = vsel %vm11529_vm3, %v27321_v56, 0.0 }
 0x395   : > { %26450 = vmatprep.mubr.msk.f32.mxu0 %vm27496_vm0, %v32861_v6  ;;  %26449 = vmatpush3.msk.msra.mxu0 %vm12318_vm5, %v31414_v14  ;;  %27330 = vpow2.f32 %v17392_v22 }
 0x396   : > { %26605 = vmatprep.mubr.msk.f32.mxu1 %vm27496_vm0, %v32861_v6  ;;  %26451 = vmatmul.mubr.msk.f32.vlgmr.msra.gmra.mrb[150].mxu0 %vm12314_vm6, %v27321_v56  ;;  %v31639_v3 = vpop.xlane.xlu0 %14797  ;;  %27332 = vpow2.f32 %v19998_v59 }
 0x397   : > { %26606 = vmatmul.mubr.msk.f32.vlgmr.msra.gmra.mrb[148].mxu1 %vm12314_vm6, %v31479_v37  ;;  %33211 = vst [vmem:[#allocation27_spill] sm:$0xff] %v31639_v3  ;;  %26613 = vmatprep.subr.mxu1 %v32861_v6  ;;  %v31657_v37 = vld [vmem:[%s31538_s23 + $0x24] sm:$0xf] }
 0x398   : > { %14773 = vadd.xlane.f32.xlu0 %v14772_v43  ;;  %26614 = vmatpush3.msk.msra.mxu1 %vm12318_vm5, %v31632_v0  ;;  %v12156_v43 = vsel %vm11529_vm3, %v30939_v10, 0.0  ;;  %v31674_v36 = vpop.eup %27324  ;;  %v31688_v10 = vld [vmem:[%s31538_s23 + $0x2c] sm:$0xf] }
 0x399   : > { %17413 = vadd.xlane.f32.xlu1 %v17412_v13  ;;  %26458 = vmatprep.subr.mxu0 %v32861_v6  ;;  %v31659_v34 = vpop.xlane.xlu1 %12181  ;;  %v33216_v13 = vld [vmem:[#allocation73_spill] sm:$0xff] }
 0x39a   : > { %26460 = vmatprep.mubr.msk.f32.mxu0 %vm27496_vm0, %v32861_v6  ;;  %26459 = vmatpush3.msk.msra.mxu0 %vm12318_vm5, %v31445_v16  ;;  %33213 = vst [vmem:[#allocation104_spill] sm:$0xff] %v31659_v34  ;;  %v31667_v22 = vpop.xlane.xlu0 %16099  ;;  %v18656_v59 = vsub.f32 %v33216_v13, %v30281_v35  ;;  %v33219_v13 = vld [vmem:[#allocation92_spill] sm:$0xff] }
 0x39b   : > { %26615 = vmatprep.mubr.msk.f32.mxu1 %vm27496_vm0, %v32861_v6  ;;  %26461 = vmatmul.mubr.msk.f32.vlgmr.msra.gmra.mrb[152].mxu0 %vm12314_vm6, %v31650_v38  ;;  %33214 = vst [vmem:[#allocation72_spill] sm:$0xff] %v31667_v22  ;;  %v33221_v34 = vld [vmem:[#allocation16_spill] sm:$0xff] }
 0x39c   : > { %26616 = vmatmul.mubr.msk.f32.vlgmr.msra.gmra.mrb[150].mxu1 %vm12314_vm6, %v31540_v27  ;;  %26623 = vmatprep.subr.mxu1 %v32861_v6  ;;  %v31681_v27 = vpop.eup %27326 }
 0x39d   : > { %16075 = vadd.xlane.f32.xlu0 %v16074_v17  ;;  %26624 = vmatpush3.msk.msra.mxu1 %vm12318_vm5, %v31657_v37  ;;  %v31679_v55 = vpop.xlane.xlu1 %12293  ;;  %v12268_v17 = vsel %vm11529_vm3, %v30624_v4, 0.0  ;;  %v31706_v3 = vpop.eup %27328  ;;  %v31718_v4 = vld [vmem:[%s31538_s23 + $0x34] sm:$0xf] }
 0x39e   : > { %12157 = vadd.xlane.f32.xlu1 %v12156_v43  ;;  %26468 = vmatprep.subr.mxu0 %v32861_v6  ;;  %33215 = vst [vmem:[#allocation23_spill] sm:$0xff] %v31679_v55  ;;  %v31700_v43 = vpop.xlane.xlu0 %17443 }
 0x39f   : > { %26470 = vmatprep.mubr.msk.f32.mxu0 %vm27496_vm0, %v32861_v6  ;;  %26469 = vmatpush3.msk.msra.mxu0 %vm12318_vm5, %v31471_v21  ;;  %33217 = vst [vmem:[#allocation115_spill] sm:$0xff] %v31700_v43  ;;  %v31711_v56 = vpop.eup %27330  ;;  %v33220_v43 = vld [vmem:[#allocation76_spill] sm:$0xff] }
 0x3a0   : > { %26625 = vmatprep.mubr.msk.f32.mxu1 %vm27496_vm0, %v32861_v6  ;;  %26471 = vmatmul.mubr.msk.f32.vlgmr.msra.gmra.mrb[154].mxu0 %vm12314_vm6, %v31681_v27  ;;  %v18658_v55 = vsub.f32 %v33220_v43, %v30456_v61  ;;  %v31743_v43 = vpop.eup %27332 }
 0x3a1   : > { %26626 = vmatmul.mubr.msk.f32.vlgmr.msra.gmra.mrb[152].mxu1 %vm12314_vm6, %v31674_v36  ;;  %26633 = vmatprep.subr.mxu1 %v32861_v6  ;;  %v31704_v22 = vpop.xlane.xlu1 %12139 }
 0x3a2   : > { %17419 = vadd.xlane.f32.xlu0 %v17418_v53  ;;  %26634 = vmatpush3.msk.msra.mxu1 %vm12318_vm5, %v31688_v10  ;;  %33218 = vst [vmem:[#allocation143_spill] sm:$0xff] %v31704_v22  ;;  %v18674_v53 = vmul.f32 1.442695, %v18656_v59  ;;  %v12162_v22 = vsel %vm11529_vm3, %v33221_v34, 0.0  ;;  %v31732_v59 = vld [vmem:[%s30853_s15 + $0x40] sm:$0xf] }
 0x3a3   : > { %12269 = vadd.xlane.f32.xlu1 %v12268_v17  ;;  %26478 = vmatprep.subr.mxu0 %v32861_v6  ;;  %v12165_v17 = vsel %vm11529_vm3, %v33219_v13, 0.0  ;;  %v31750_v34 = vld [vmem:[%s31538_s23 + $0x3c] sm:$0xf] }
 0x3a4   : > { %26480 = vmatprep.mubr.msk.f32.mxu0 %vm27496_vm0, %v32861_v6  ;;  %26479 = vmatpush3.msk.msra.mxu0 %vm12318_vm5, %v31504_v5  ;;  %27334 = vpow2.f32 %v18674_v53  ;;  %v33223_v13 = vld [vmem:[#allocation85_spill] sm:$0xff]  ;;  %v33225_v53 = vld [vmem:[#allocation142_spill] sm:$0xff] }
 0x3a5   : > { %26635 = vmatprep.mubr.msk.f32.mxu1 %vm27496_vm0, %v32861_v6  ;;  %26481 = vmatmul.mubr.msk.f32.vlgmr.msra.gmra.mrb[156].mxu0 %vm12314_vm6, %v31711_v56  ;;  %v31738_v31 = vpop.xlane.xlu0 %12142  ;;  %v18660_v23 = vsub.f32 %v33225_v53, %v30504_v39  ;;  %v33229_v53 = vld [vmem:[#allocation155_spill] sm:$0xff] }
 0x3a6   : > { %26636 = vmatmul.mubr.msk.f32.vlgmr.msra.gmra.mrb[154].mxu1 %vm12314_vm6, %v31706_v3  ;;  %26643 = vmatprep.subr.mxu1 %v32861_v6  ;;  %v31736_v26 = vpop.xlane.xlu1 %12251  ;;  %v18662_v19 = vsub.f32 %v33229_v53, %v30560_v62  ;;  %v33232_v53 = vld [vmem:[#allocation129_spill] sm:$0xff] }
 0x3a7   : > { %12166 = vadd.xlane.f32.xlu0 %v12165_v17  ;;  %26644 = vmatpush3.msk.msra.mxu1 %vm12318_vm5, %v31718_v4  ;;  %33222 = vst [vmem:[#allocation25_spill] sm:$0xff] %v31736_v26  ;;  %v33224_v17 = vld [vmem:[#allocation119_spill] sm:$0xff]  ;;  %v18682_v1 = vmul.f32 1.442695, %v18660_v23 }
 0x3a8   : > { %12163 = vadd.xlane.f32.xlu1 %v12162_v22  ;;  %26488 = vmatprep.subr.mxu0 %v32861_v6  ;;  %v18678_v22 = vmul.f32 1.442695, %v18658_v55  ;;  %v12277_v26 = vsel %vm11529_vm3, %v33224_v17, 0.0 }
 0x3a9   : > { %26490 = vmatprep.mubr.msk.f32.mxu0 %vm27496_vm0, %v32861_v6  ;;  %26489 = vmatpush3.msk.msra.mxu0 %vm12318_vm5, %v31732_v59 }
 0x3aa   : > { %26645 = vmatprep.mubr.msk.f32.mxu1 %vm27496_vm0, %v32861_v6  ;;  %26491 = vmatmul.mubr.msk.f32.vlgmr.msra.gmra.mrb[158].mxu0 %vm12314_vm6, %v33223_v13  ;;  %27336 = vpow2.f32 %v18678_v22 }
 0x3ab   : > { %26646 = vmatmul.mubr.msk.f32.vlgmr.msra.gmra.mrb[156].mxu1 %vm12314_vm6, %v31743_v43  ;;  %26653 = vmatprep.subr.mxu1 %v32861_v6  ;;  %27338 = vpow2.f32 %v18682_v1  ;;  %v33233_v1 = vld [vmem:[#allocation161_spill] sm:$0xff] }
 0x3ac   : > { %12278 = vadd.xlane.f32.xlu0 %v12277_v26  ;;  %26654 = vmatpush3.msk.msra.mxu1 %vm12318_vm5, %v31750_v34  ;;  %v31765_v55 = vpop.xlane.xlu0 %12254  ;;  %v33228_v26 = vld [vmem:[#allocation70_spill] sm:$0xff] }
 0x3ad   : > { %12275 = vadd.xlane.f32.xlu1 %v12274_v57  ;;  %26498 = vmatprep.subr.mxu0 %v32861_v6  ;;  %v31770_v13 = vpop.xlane.xlu1 %14758  ;;  %v33227_v57 = vld [vmem:[#allocation69_spill] sm:$0xff]  ;;  %v12171_v17 = vsel %vm11529_vm3, %v33228_v26, 0.0 }
 0x3ae   : > { %26500 = vmatprep.mubr.msk.f32.mxu0 %vm27496_vm0, %v32861_v6  ;;  %26499 = vmatpush3.msk.msra.mxu0 %vm12318_vm5, %v31355_v51  ;;  %v33230_v51 = vld [vmem:[#allocation112_spill] sm:$0xff] }
 0x3af   : > { %26655 = vmatprep.mubr.msk.f32.mxu1 %vm27496_vm0, %v32861_v6  ;;  %26501 = vmatmul.mubr.msk.f32.vlgmr.msra.gmra.mrb[144].mxu0 %vm12314_vm6, %v31230_v47  ;;  %v14781_v22 = vsel %vm11529_vm3, %v33230_v51, 0.0  ;;  %v12283_v51 = vsel %vm11529_vm3, %v33232_v53, 0.0 }
 0x3b0   : > { %26656 = vmatmul.mubr.msk.f32.vlgmr.msra.gmra.mrb[158].mxu1 %vm12314_vm6, %v33227_v57  ;;  %26663 = vmatprep.subr.mxu1 %v32861_v6  ;;  %v31796_v57 = vpop.eup %27334 }
 0x3b1   : > { %12172 = vadd.xlane.f32.xlu0 %v12171_v17  ;;  %26664 = vmatpush3.msk.msra.mxu1 %vm12318_vm5, %v31577_v58  ;;  %v31789_v47 = vpop.xlane.xlu0 %12148  ;;  %v33231_v58 = vld [vmem:[#allocation118_spill] sm:$0xff]  ;;  %v18686_v17 = vmul.f32 1.442695, %v18662_v19 }
 0x3b2   : > { %14782 = vadd.xlane.f32.xlu1 %v14781_v22  ;;  %26508 = vmatprep.subr.mxu0 %v32861_v6  ;;  %v31794_v23 = vpop.xlane.xlu1 %16060  ;;  %v21309_v26 = vsub.f32 %v33231_v58, %v30345_v25  ;;  %v18664_v22 = vsub.f32 %v33233_v1, %v30616_v8 }
 0x3b3   : > { %26510 = vmatprep.mubr.msk.f32.mxu0 %vm27496_vm0, %v32861_v6  ;;  %26509 = vmatpush3.msk.msra.mxu0 %vm12318_vm5, %v31386_v24  ;;  %v16083_v24 = vsel %vm11529_vm3, %v30990_v32, 0.0  ;;  %27340 = vpow2.f32 %v18686_v17  ;;  %v33239_v17 = vld [vmem:[#allocation170_spill] sm:$0xff] }
 0x3b4   : > { %26665 = vmatprep.mubr.msk.f32.mxu1 %vm27496_vm0, %v32861_v6  ;;  %26511 = vmatmul.mubr.msk.f32.vlgmr.msra.gmra.mrb[146].mxu0 %vm12314_vm6, %v31796_v57  ;;  %v31824_v58 = vpop.eup %27336  ;;  %v21334_v53 = vmul.f32 1.442695, %v21309_v26  ;;  %v18690_v32 = vmul.f32 1.442695, %v18664_v22 }
 0x3b5   : > { %26666 = vmatmul.mubr.msk.f32.vlgmr.msra.gmra.mrb[144].mxu1 %vm12314_vm6, %v31087_v48  ;;  %26673 = vmatprep.subr.mxu1 %v32861_v6 }
 0x3b6   : > { %12284 = vadd.xlane.f32.xlu0 %v12283_v51  ;;  %26674 = vmatpush3.msk.msra.mxu1 %vm12318_vm5, %v31606_v63  ;;  %v33236_v51 = vld [vmem:[#allocation121_spill] sm:$0xff]  ;;  %27342 = vpow2.f32 %v21334_v53  ;;  %v33240_v53 = vld [vmem:[#allocation138_spill] sm:$0xff] }
 0x3b7   : > { %16084 = vadd.xlane.f32.xlu1 %v16083_v24  ;;  %v31817_v19 = vpop.xlane.xlu0 %12260  ;;  %26518 = vmatprep.subr.mxu0 %v32861_v6  ;;  %v21311_v1 = vsub.f32 %v33236_v51, %v30384_v40  ;;  %v33237_v24 = vld [vmem:[#allocation133_spill] sm:$0xff]  ;;  %27344 = vpow2.f32 %v18690_v32 }
 0x3b8   : > { %33234 = vst [vmem:[#allocation97_spill] sm:$0xff] %v31817_v19  ;;  %26520 = vmatprep.mubr.msk.f32.mxu0 %vm27496_vm0, %v32861_v6  ;;  %v31822_v48 = vpop.xlane.xlu1 %17404  ;;  %26519 = vmatpush3.msk.msra.mxu0 %vm12318_vm5, %v31414_v14  ;;  %v14787_v26 = vsel %vm11529_vm3, %v33237_v24, 0.0  ;;  %v18666_v19 = vsub.f32 %v33239_v17, %v30659_v30  ;;  %v17427_v14 = vsel %vm11529_vm3, %v31226_v60, 0.0  ;;  %v17433_v17 = vsel %vm11529_vm3, %v31254_v11, 0.0 }
 0x3b9   : > { %33235 = vst [vmem:[#allocation88_spill] sm:$0xff] %v31822_v48  ;;  %26675 = vmatprep.mubr.msk.f32.mxu1 %vm27496_vm0, %v32861_v6  ;;  %26521 = vmatmul.mubr.msk.f32.vlgmr.msra.gmra.mrb[148].mxu0 %vm12314_vm6, %v31824_v58  ;;  %v33238_v48 = vld [vmem:[#allocation145_spill] sm:$0xff]  ;;  %v21338_v22 = vmul.f32 1.442695, %v21311_v1  ;;  %v16089_v1 = vsel %vm11529_vm3, %v33240_v53, 0.0 }
 0x3ba   : > { %26676 = vmatmul.mubr.msk.f32.vlgmr.msra.gmra.mrb[146].mxu1 %vm12314_vm6, %v31173_v15  ;;  %v22611_v51 = vsub.f32 %v33238_v48, %v30345_v25  ;;  %26683 = vmatprep.subr.mxu1 %v32861_v6  ;;  %v31854_v48 = vpop.eup %27338  ;;  %v18694_v24 = vmul.f32 1.442695, %v18666_v19  ;;  %v33243_v53 = vld [vmem:[#allocation93_spill] sm:$0xff] }
 0x3bb   : > { %14788 = vadd.xlane.f32.xlu0 %v14787_v26  ;;  %26684 = vmatpush3.msk.msra.mxu1 %vm12318_vm5, %v31632_v0  ;;  %v33241_v26 = vld [vmem:[#allocation124_spill] sm:$0xff]  ;;  %27346 = vpow2.f32 %v21338_v22 }
 0x3bc   : > { %17428 = vadd.xlane.f32.xlu1 %v17427_v14  ;;  %v31847_v15 = vpop.xlane.xlu0 %14764  ;;  %26528 = vmatprep.subr.mxu0 %v32861_v6  ;;  %v22636_v60 = vmul.f32 1.442695, %v22611_v51  ;;  %v21313_v32 = vsub.f32 %v33241_v26, %v30418_v2  ;;  %v33242_v14 = vld [vmem:[#allocation147_spill] sm:$0xff] }
 0x3bd   : > { %26530 = vmatprep.mubr.msk.f32.mxu0 %vm27496_vm0, %v32861_v6  ;;  %v31852_v25 = vpop.xlane.xlu1 %18706  ;;  %26529 = vmatpush3.msk.msra.mxu0 %vm12318_vm5, %v31445_v16  ;;  %v18729_v16 = vsel %vm11529_vm3, %v31449_v41, 0.0  ;;  %v31880_v51 = vpop.eup %27340  ;;  %v22613_v22 = vsub.f32 %v33242_v14, %v30384_v40  ;;  %v20037_v14 = vsel %vm11529_vm3, %v31706_v3, 0.0 }
 0x3be   : > { %26685 = vmatprep.mubr.msk.f32.mxu1 %vm27496_vm0, %v32861_v6  ;;  %26531 = vmatmul.mubr.msk.f32.vlgmr.msra.gmra.mrb[150].mxu0 %vm12314_vm6, %v31854_v48  ;;  %27348 = vpow2.f32 %v22636_v60  ;;  %v21342_v41 = vmul.f32 1.442695, %v21313_v32 }
 0x3bf   : > { %26686 = vmatmul.mubr.msk.f32.vlgmr.msra.gmra.mrb[148].mxu1 %vm12314_vm6, %v31508_v42  ;;  %26693 = vmatprep.subr.mxu1 %v32861_v6  ;;  %27350 = vpow2.f32 %v18694_v24 }
 0x3c0   : > { %16090 = vadd.xlane.f32.xlu0 %v16089_v1  ;;  %26694 = vmatpush3.msk.msra.mxu1 %vm12318_vm5, %v31657_v37  ;;  %v27343_v24 = vpop.eup %27342  ;;  %27352 = vpow2.f32 %v21342_v41  ;;  %v19958_v1 = vsub.f32 %v33243_v53, %v30281_v35  ;;  %v31964_v53 = vld [vmem:[%s31538_s23 + $0x44] sm:$0xf] }
 0x3c1   : > { %18730 = vadd.xlane.f32.xlu1 %v18729_v16  ;;  %v31873_v19 = vpop.xlane.xlu0 %16066  ;;  %26538 = vmatprep.subr.mxu0 %v32861_v6  ;;  %v31906_v40 = vpop.eup %27344 }
 0x3c2   : > { %26540 = vmatprep.mubr.msk.f32.mxu0 %vm27496_vm0, %v32861_v6  ;;  %v31878_v42 = vpop.xlane.xlu1 %20008  ;;  %26539 = vmatpush3.msk.msra.mxu0 %vm12318_vm5, %v31471_v21  ;;  %v20031_v21 = vsel %vm11529_vm3, %v31674_v36, 0.0  ;;  %v18735_v36 = vsel %vm11529_vm3, %v31473_v52, 0.0 }
 0x3c3   : > { %26695 = vmatprep.mubr.msk.f32.mxu1 %vm27496_vm0, %v32861_v6  ;;  %26541 = vmatmul.mubr.msk.f32.vlgmr.msra.gmra.mrb[152].mxu0 %vm12314_vm6, %v31880_v51 }
 0x3c4   : > { %26696 = vmatmul.mubr.msk.f32.vlgmr.msra.gmra.mrb[150].mxu1 %vm12314_vm6, %v31566_v20  ;;  %26703 = vmatprep.subr.mxu1 %v32861_v6  ;;  %v22640_v20 = vmul.f32 1.442695, %v22613_v22  ;;  %v33244_v22 = vld [vmem:[#allocation95_spill] sm:$0xff] }
 0x3c5   : > { %17434 = vadd.xlane.f32.xlu0 %v17433_v17  ;;  %26704 = vmatpush3.msk.msra.mxu1 %vm12318_vm5, %v31688_v10  ;;  %v27347_v26 = vpop.eup %27346  ;;  %v19976_v17 = vmul.f32 1.442695, %v19958_v1 }
 0x3c6   : > { %20032 = vadd.xlane.f32.xlu1 %v20031_v21  ;;  %v31899_v60 = vpop.xlane.xlu0 %17410  ;;  %26548 = vmatprep.subr.mxu0 %v32861_v6  ;;  %27354 = vpow2.f32 %v22640_v20  ;;  %v19960_v21 = vsub.f32 %v33244_v22, %v30456_v61  ;;  %v21381_v22 = vsel %vm11529_vm3, %v27347_v26, 0.0 }
 0x3c7   : > { %26550 = vmatprep.mubr.msk.f32.mxu0 %vm27496_vm0, %v32861_v6  ;;  %v31904_v11 = vpop.xlane.xlu1 %21352  ;;  %26549 = vmatpush3.msk.msra.mxu0 %vm12318_vm5, %v31504_v5  ;;  %v21375_v5 = vsel %vm11529_vm3, %v27343_v24, 0.0  ;;  %27356 = vpow2.f32 %v19976_v17 }
 0x3c8   : > { %26705 = vmatprep.mubr.msk.f32.mxu1 %vm27496_vm0, %v32861_v6  ;;  %26551 = vmatmul.mubr.msk.f32.vlgmr.msra.gmra.mrb[154].mxu0 %vm12314_vm6, %v31906_v40  ;;  %v31925_v16 = vpop.eup %27348  ;;  %v19980_v1 = vmul.f32 1.442695, %v19960_v21 }
 0x3c9   : > { %26706 = vmatmul.mubr.msk.f32.vlgmr.msra.gmra.mrb[152].mxu1 %vm12314_vm6, %v27343_v24  ;;  %26713 = vmatprep.subr.mxu1 %v32861_v6  ;;  %v31932_v41 = vpop.eup %27350  ;;  %v688_v24 = vld [vmem:[%s30853_s15 + $0x48] sm:$0xf] }
 0x3ca   : > { %18736 = vadd.xlane.f32.xlu0 %v18735_v36  ;;  %26714 = vmatpush3.msk.msra.mxu1 %vm12318_vm5, %v31718_v4  ;;  %v31958_v36 = vpop.eup %27352  ;;  %27358 = vpow2.f32 %v19980_v1 }
 0x3cb   : > { %21376 = vadd.xlane.f32.xlu1 %v21375_v5  ;;  %v31923_v32 = vpop.xlane.xlu0 %18712  ;;  %26558 = vmatprep.subr.mxu0 %v32861_v6  ;;  %v14778_v5 = vsel %vm11529_vm3, %v31211_v49, 0.0 }
 0x3cc   : > { %26560 = vmatprep.mubr.msk.f32.mxu0 %vm27496_vm0, %v32861_v6  ;;  %v31930_v52 = vpop.xlane.xlu1 %22654  ;;  %26559 = vmatpush3.msk.msra.mxu0 %vm12318_vm5, %v31732_v59  ;;  %v22677_v59 = vsel %vm11529_vm3, %v31925_v16, 0.0 }
 0x3cd   : > { %26715 = vmatprep.mubr.msk.f32.mxu1 %vm27496_vm0, %v32861_v6  ;;  %26561 = vmatmul.mubr.msk.f32.vlgmr.msra.gmra.mrb[156].mxu0 %vm12314_vm6, %v31932_v41 }
 0x3ce   : > { %26716 = vmatmul.mubr.msk.f32.vlgmr.msra.gmra.mrb[154].mxu1 %vm12314_vm6, %v27347_v26  ;;  %26723 = vmatprep.subr.mxu1 %v32861_v6 }
 0x3cf   : > { %20038 = vadd.xlane.f32.xlu0 %v20037_v14  ;;  %26724 = vmatpush3.msk.msra.mxu1 %vm12318_vm5, %v31750_v34  ;;  %v33247_v14 = vld [vmem:[#allocation148_spill] sm:$0xff] }
 0x3d0   : > { %22678 = vadd.xlane.f32.xlu1 %v22677_v59  ;;  %v31951_v20 = vpop.xlane.xlu0 %20014  ;;  %26568 = vmatprep.subr.mxu0 %v32861_v6  ;;  %v19962_v17 = vsub.f32 %v33247_v14, %v30504_v39  ;;  %v690_v59 = vld [vmem:[%s31538_s23] sm:$0xf]  ;;  %v16080_v14 = vsel %vm11529_vm3, %v31423_v28, 0.0 }
 0x3d1   : > { %33245 = vst [vmem:[#allocation123_spill] sm:$0xff] %v31951_v20  ;;  %26570 = vmatprep.mubr.msk.f32.mxu0 %vm27496_vm0, %v32861_v6  ;;  %v31956_v3 = vpop.xlane.xlu1 %14755  ;;  %26569 = vmatpush3.msk.msra.mxu0 %vm12318_vm5, %v688_v24  ;;  %v31981_v24 = vpop.eup %27354 }
 0x3d2   : > { %33246 = vst [vmem:[#allocation144_spill] sm:$0xff] %v31956_v3  ;;  %26725 = vmatprep.mubr.msk.f32.mxu1 %vm27496_vm0, %v32861_v6  ;;  %26571 = vmatmul.mubr.msk.f32.vlgmr.msra.gmra.mrb[158].mxu0 %vm12314_vm6, %v30797_v54  ;;  %v19984_v26 = vmul.f32 1.442695, %v19962_v17  ;;  %v22683_v1 = vsel %vm11529_vm3, %v31981_v24, 0.0  ;;  %v32014_v17 = vpop.eup %27356 }
 0x3d3   : > { %26726 = vmatmul.mubr.msk.f32.vlgmr.msra.gmra.mrb[156].mxu1 %vm12314_vm6, %v31958_v36  ;;  %26733 = vmatprep.subr.mxu1 %v32861_v6 }
 0x3d4   : > { %14779 = vadd.xlane.f32.xlu1 %v14778_v5  ;;  %26734 = vmatpush3.msk.msra.mxu1 %vm12318_vm5, %v31964_v53  ;;  %v33250_v5 = vld [vmem:[#allocation122_spill] sm:$0xff]  ;;  %27360 = vpow2.f32 %v19984_v26  ;;  %v14784_v26 = vsel %vm11529_vm3, %v31235_v12, 0.0 }
 0x3d5   : > { %21382 = vadd.xlane.f32.xlu0 %v21381_v22  ;;  %v31979_v21 = vpop.xlane.xlu0 %21358  ;;  %26578 = vmatprep.subr.mxu0 %v32861_v6  ;;  %v33251_v22 = vld [vmem:[#allocation159_spill] sm:$0xff] }
 0x3d6   : > { %33248 = vst [vmem:[#allocation51_spill] sm:$0xff] %v31979_v21  ;;  %26580 = vmatprep.mubr.msk.f32.mxu0 %vm27496_vm0, %v32861_v6  ;;  %v31986_v49 = vpop.xlane.xlu1 %16057  ;;  %26579 = vmatpush3.msk.msra.mxu0 %vm12318_vm5, %v690_v59  ;;  %v19964_v3 = vsub.f32 %v33251_v22, %v30560_v62  ;;  %v32003_v59 = vld [vmem:[%s31538_s23 + $0x8] sm:$0xf] }
 0x3d7   : > { %33249 = vst [vmem:[#allocation18_spill] sm:$0xff] %v31986_v49  ;;  %26735 = vmatprep.mubr.msk.f32.mxu1 %vm27496_vm0, %v32861_v6  ;;  %26581 = vmatmul.mubr.msk.f32.vlgmr.msra.gmra.mrb[144].mxu0 %vm12314_vm6, %v30803_v33 }
 0x3d8   : > { %26736 = vmatmul.mubr.msk.f32.vlgmr.msra.gmra.mrb[158].mxu1 %vm12314_vm6, %v33250_v5  ;;  %26743 = vmatprep.subr.mxu1 %v32861_v6  ;;  %v17424_v5 = vsel %vm11529_vm3, %v31650_v38, 0.0  ;;  %v32043_v38 = vpop.eup %27358 }
 0x3d9   : > { %16081 = vadd.xlane.f32.xlu1 %v16080_v14  ;;  %26744 = vmatpush3.msk.msra.mxu1 %vm12318_vm5, %v31606_v63  ;;  %v19988_v63 = vmul.f32 1.442695, %v19964_v3  ;;  %v33254_v14 = vld [vmem:[#allocation165_spill] sm:$0xff] }
 0x3da   : > { %22684 = vadd.xlane.f32.xlu0 %v22683_v1  ;;  %v32007_v33 = vpop.xlane.xlu0 %22660  ;;  %26588 = vmatprep.subr.mxu0 %v32861_v6  ;;  %v19966_v22 = vsub.f32 %v33254_v14, %v30616_v8  ;;  %v32032_v1 = vld [vmem:[%s31538_s23 + $0x10] sm:$0xf] }
 0x3db   : > { %33252 = vst [vmem:[#allocation2_spill] sm:$0xff] %v32007_v33  ;;  %26590 = vmatprep.mubr.msk.f32.mxu0 %vm27496_vm0, %v32861_v6  ;;  %v32012_v28 = vpop.xlane.xlu1 %17401  ;;  %26589 = vmatpush3.msk.msra.mxu0 %vm12318_vm5, %v32003_v59  ;;  %27362 = vpow2.f32 %v19988_v63  ;;  %v16086_v63 = vsel %vm11529_vm3, %v31454_v50, 0.0  ;;  %v33262_v50 = vld [vmem:[#allocation150_spill] sm:$0xff] }
 0x3dc   : > { %33253 = vst [vmem:[#allocation114_spill] sm:$0xff] %v32012_v28  ;;  %26745 = vmatprep.mubr.msk.f32.mxu1 %vm27496_vm0, %v32861_v6  ;;  %26591 = vmatmul.mubr.msk.f32.vlgmr.msra.gmra.mrb[146].mxu0 %vm12314_vm6, %v32014_v17  ;;  %v19992_v12 = vmul.f32 1.442695, %v19966_v22  ;;  %v32061_v28 = vld [vmem:[%s31538_s23 + $0x18] sm:$0xf] }
 0x3dd   : > { %26746 = vmatmul.mubr.msk.f32.vlgmr.msra.gmra.mrb[144].mxu1 %vm12314_vm6, %v31119_v9  ;;  %26753 = vmatprep.subr.mxu1 %v32861_v6 }
 0x3de   : > { %17425 = vadd.xlane.f32.xlu1 %v17424_v5  ;;  %26754 = vmatpush3.msk.msra.mxu1 %vm12318_vm5, %v31632_v0  ;;  %v33257_v0 = vld [vmem:[#allocation20_spill] sm:$0xff]  ;;  %27364 = vpow2.f32 %v19992_v12 }
 0x3df   : > { %14785 = vadd.xlane.f32.xlu0 %v14784_v26  ;;  %v32036_v3 = vpop.xlane.xlu0 %14761  ;;  %26598 = vmatprep.subr.mxu0 %v32861_v6  ;;  %v33258_v5 = vld [vmem:[#allocation120_spill] sm:$0xff]  ;;  %v33259_v26 = vld [vmem:[#allocation171_spill] sm:$0xff] }
 0x3e0   : > { %33255 = vst [vmem:[#allocation81_spill] sm:$0xff] %v32036_v3  ;;  %26600 = vmatprep.mubr.msk.f32.mxu0 %vm27496_vm0, %v32861_v6  ;;  %v32041_v9 = vpop.xlane.xlu1 %18703  ;;  %26599 = vmatpush3.msk.msra.mxu0 %vm12318_vm5, %v32032_v1  ;;  %v12168_v14 = vsel %vm11529_vm3, %v33258_v5, 0.0  ;;  %v32072_v5 = vpop.eup %27360  ;;  %v33264_v12 = vld [vmem:[#allocation64_spill] sm:$0xff]  ;;  %v17430_v3 = vsel %vm11529_vm3, %v31681_v27, 0.0 }
 0x3e1   : > { %33256 = vst [vmem:[#allocation128_spill] sm:$0xff] %v32041_v9  ;;  %26755 = vmatprep.mubr.msk.f32.mxu1 %vm27496_vm0, %v32861_v6  ;;  %26601 = vmatmul.mubr.msk.f32.vlgmr.msra.gmra.mrb[148].mxu0 %vm12314_vm6, %v32043_v38  ;;  %v19968_v9 = vsub.f32 %v33259_v26, %v30659_v30  ;;  %v33263_v26 = vld [vmem:[#allocation137_spill] sm:$0xff] }
 0x3e2   : > { %26756 = vmatmul.mubr.msk.f32.vlgmr.msra.gmra.mrb[146].mxu1 %vm12314_vm6, %v33257_v0  ;;  %26763 = vmatprep.subr.mxu1 %v32861_v6 }
 0x3e3   : > { %12169 = vadd.xlane.f32.xlu1 %v12168_v14  ;;  %26764 = vmatpush3.msk.msra.mxu1 %vm12318_vm5, %v31657_v37  ;;  %v22615_v37 = vsub.f32 %v33262_v50, %v30418_v2  ;;  %v19996_v14 = vmul.f32 1.442695, %v19968_v9  ;;  %v32092_v2 = vld [vmem:[%s31538_s23 + $0x20] sm:$0xf] }
 0x3e4   : > { %16087 = vadd.xlane.f32.xlu0 %v16086_v63  ;;  %v32065_v22 = vpop.xlane.xlu0 %16063  ;;  %26608 = vmatprep.subr.mxu0 %v32861_v6  ;;  %v12280_v63 = vsel %vm11529_vm3, %v33263_v26, 0.0  ;;  %v33269_v26 = vld [vmem:[#allocation56_spill] sm:$0xff] }
 0x3e5   : > { %33260 = vst [vmem:[#allocation3_spill] sm:$0xff] %v32065_v22  ;;  %26610 = vmatprep.mubr.msk.f32.mxu0 %vm27496_vm0, %v32861_v6  ;;  %v32070_v0 = vpop.xlane.xlu1 %12145  ;;  %26609 = vmatpush3.msk.msra.mxu0 %vm12318_vm5, %v32061_v28  ;;  %v33265_v22 = vld [vmem:[#allocation174_spill] sm:$0xff]  ;;  %v22644_v50 = vmul.f32 1.442695, %v22615_v37  ;;  %27366 = vpow2.f32 %v19996_v14 }
 0x3e6   : > { %33261 = vst [vmem:[#allocation65_spill] sm:$0xff] %v32070_v0  ;;  %26765 = vmatprep.mubr.msk.f32.mxu1 %vm27496_vm0, %v32861_v6  ;;  %26611 = vmatmul.mubr.msk.f32.vlgmr.msra.gmra.mrb[150].mxu0 %vm12314_vm6, %v32072_v5  ;;  %v19970_v49 = vsub.f32 %v33265_v22, %v33264_v12  ;;  %v32103_v22 = vpop.eup %27362  ;;  %v33271_v14 = vld [vmem:[#allocation82_spill] sm:$0xff]  ;;  %v32148_v0 = vld [vmem:[%s31538_s23 + $0x30] sm:$0xf] }
 0x3e7   : > { %26766 = vmatmul.mubr.msk.f32.vlgmr.msra.gmra.mrb[148].mxu1 %vm12314_vm6, %v31543_v44  ;;  %26773 = vmatprep.subr.mxu1 %v32861_v6  ;;  %27368 = vpow2.f32 %v22644_v50 }
 0x3e8   : > { %12281 = vadd.xlane.f32.xlu1 %v12280_v63  ;;  %26774 = vmatpush3.msk.msra.mxu1 %vm12318_vm5, %v31688_v10  ;;  %v20000_v27 = vmul.f32 1.442695, %v19970_v49  ;;  %v33268_v10 = vld [vmem:[#allocation109_spill] sm:$0xff]  ;;  %v33270_v63 = vld [vmem:[#allocation108_spill] sm:$0xff] }
 0x3e9   : > { %17431 = vadd.xlane.f32.xlu0 %v17430_v3  ;;  %v32096_v9 = vpop.xlane.xlu0 %17407  ;;  %26618 = vmatprep.subr.mxu0 %v32861_v6  ;;  %v12174_v3 = vsel %vm11529_vm3, %v33268_v10, 0.0  ;;  %v21300_v37 = vsub.f32 %v33270_v63, %v33269_v26  ;;  %v32130_v10 = vpop.eup %27364 }
 0x3ea   : > { %33266 = vst [vmem:[#allocation5_spill] sm:$0xff] %v32096_v9  ;;  %26620 = vmatprep.mubr.msk.f32.mxu0 %vm27496_vm0, %v32861_v6  ;;  %v32101_v44 = vpop.xlane.xlu1 %12257  ;;  %26619 = vmatpush3.msk.msra.mxu0 %vm12318_vm5, %v32092_v2  ;;  %v12177_v9 = vsel %vm11529_vm3, %v33271_v14, 0.0  ;;  %27370 = vpow2.f32 %v20000_v27  ;;  %v33274_v27 = vld [vmem:[#allocation66_spill] sm:$0xff] }
 0x3eb   : > { %33267 = vst [vmem:[#allocation22_spill] sm:$0xff] %v32101_v44  ;;  %26775 = vmatprep.mubr.msk.f32.mxu1 %vm27496_vm0, %v32861_v6  ;;  %26621 = vmatmul.mubr.msk.f32.vlgmr.msra.gmra.mrb[152].mxu0 %vm12314_vm6, %v32103_v22  ;;  %v32121_v44 = vld [vmem:[%s31538_s23 + $0x28] sm:$0xf]  ;;  %v12289_v14 = vsel %vm11529_vm3, %v33274_v27, 0.0 }
 0x3ec   : > { %26776 = vmatmul.mubr.msk.f32.vlgmr.msra.gmra.mrb[150].mxu1 %vm12314_vm6, %v31594_v46  ;;  %26783 = vmatprep.subr.mxu1 %v32861_v6  ;;  %v33275_v27 = vld [vmem:[#allocation139_spill] sm:$0xff] }
 0x3ed   : > { %12175 = vadd.xlane.f32.xlu1 %v12174_v3  ;;  %26784 = vmatpush3.msk.msra.mxu1 %vm12318_vm5, %v31718_v4  ;;  %v21316_v4 = vmul.f32 1.442695, %v21300_v37  ;;  %v33273_v3 = vld [vmem:[#allocation13_spill] sm:$0xff]  ;;  %v21304_v33 = vsub.f32 %v33275_v27, %v30456_v61 }
 0x3ee   : > { %12178 = vadd.xlane.f32.xlu0 %v12177_v9  ;;  %v12155_v49 = vpop.xlane.xlu0 %12154  ;;  %26628 = vmatprep.subr.mxu0 %v32861_v6  ;;  %v33272_v9 = vld [vmem:[#allocation111_spill] sm:$0xff]  ;;  %v12286_v63 = vsel %vm11529_vm3, %v33273_v3, 0.0 }
 0x3ef   : > { %26630 = vmatprep.mubr.msk.f32.mxu0 %vm27496_vm0, %v32861_v6  ;;  %v32128_v46 = vpop.xlane.xlu1 %12151  ;;  %26629 = vmatpush3.msk.msra.mxu0 %vm12318_vm5, %v32121_v44  ;;  %v21302_v50 = vsub.f32 %v33272_v9, %v30281_v35  ;;  %v32159_v3 = vpop.eup %27366  ;;  %27372 = vpow2.f32 %v21316_v4  ;;  %v32177_v4 = vld [vmem:[%s31538_s23 + $0x38] sm:$0xf] }
 0x3f0   : > { %26785 = vmatprep.mubr.msk.f32.mxu1 %vm27496_vm0, %v32861_v6  ;;  %26631 = vmatmul.mubr.msk.f32.vlgmr.msra.gmra.mrb[154].mxu0 %vm12314_vm6, %v32130_v10 }
 0x3f1   : > { %26786 = vmatmul.mubr.msk.f32.vlgmr.msra.gmra.mrb[152].mxu1 %vm12314_vm6, %v31925_v16  ;;  %26793 = vmatprep.subr.mxu1 %v32861_v6 }
 0x3f2   : > { %12287 = vadd.xlane.f32.xlu1 %v12286_v63  ;;  %26794 = vmatpush3.msk.msra.mxu1 %vm12318_vm5, %v31750_v34  ;;  %v21320_v63 = vmul.f32 1.442695, %v21302_v50  ;;  %v18714_v34 = vsel %vm11529_vm3, %v31824_v58, 0.0  ;;  %v33276_v58 = vld [vmem:[#allocation154_spill] sm:$0xff] }
 0x3f3   : > { %12290 = vadd.xlane.f32.xlu0 %v12289_v14  ;;  %v12267_v37 = vpop.xlane.xlu0 %12266  ;;  %26638 = vmatprep.subr.mxu0 %v32861_v6  ;;  %v32181_v14 = vpop.eup %27368 }
 0x3f4   : > { %26640 = vmatprep.mubr.msk.f32.mxu0 %vm27496_vm0, %v32861_v6  ;;  %v32155_v16 = vpop.xlane.xlu1 %12263  ;;  %v32157_v9 = vadd.f32 %v12267_v37, %v12155_v49  ;;  %26639 = vmatpush3.msk.msra.mxu0 %vm12318_vm5, %v32148_v0  ;;  %v18708_v49 = vsel %vm11529_vm3, %v31796_v57, 0.0  ;;  %27374 = vpow2.f32 %v21320_v63  ;;  %v21306_v37 = vsub.f32 %v33276_v58, %v30504_v39  ;;  %v32190_v27 = vpop.eup %27370 }
 0x3f5   : > { %26795 = vmatprep.mubr.msk.f32.mxu1 %vm27496_vm0, %v32861_v6  ;;  %26641 = vmatmul.mubr.msk.f32.vlgmr.msra.gmra.mrb[156].mxu0 %vm12314_vm6, %v32159_v3  ;;  %v18720_v63 = vsel %vm11529_vm3, %v31854_v48, 0.0  ;;  %v33278_v48 = vld [vmem:[#allocation106_spill] sm:$0xff] }
 0x3f6   : > { %26796 = vmatmul.mubr.msk.f32.vlgmr.msra.gmra.mrb[154].mxu1 %vm12314_vm6, %v31981_v24  ;;  %26803 = vmatprep.subr.mxu1 %v32861_v6  ;;  %v21324_v24 = vmul.f32 1.442695, %v21304_v33  ;;  %v18726_v33 = vsel %vm11529_vm3, %v31880_v51, 0.0 }
 0x3f7   : > { %18715 = vadd.xlane.f32.xlu1 %v18714_v34  ;;  %26804 = vmatpush3.msk.msra.mxu1 %vm12318_vm5, %v31964_v53  ;;  %v709_v53 = vld [vmem:[%s31538_s23 + $0x4c] sm:$0xf]  ;;  %v21328_v34 = vmul.f32 1.442695, %v21306_v37  ;;  %v33279_v37 = vld [vmem:[#allocation169_spill] sm:$0xff] }
 0x3f8   : > { %18709 = vadd.xlane.f32.xlu0 %v18708_v49  ;;  %v12161_v50 = vpop.xlane.xlu0 %12160  ;;  %26648 = vmatprep.subr.mxu0 %v32861_v6  ;;  %27376 = vpow2.f32 %v21324_v24  ;;  %v33277_v49 = vld [vmem:[#allocation164_spill] sm:$0xff]  ;;  %v14793_v24 = vsel %vm11529_vm3, %v33278_v48, 0.0  ;;  %v33282_v48 = vld [vmem:[#allocation175_spill] sm:$0xff] }
 0x3f9   : > { %26650 = vmatprep.mubr.msk.f32.mxu0 %vm27496_vm0, %v32861_v6  ;;  %v32188_v57 = vpop.xlane.xlu1 %14770  ;;  %26649 = vmatpush3.msk.msra.mxu0 %vm12318_vm5, %v32177_v4  ;;  %v21308_v58 = vsub.f32 %v33277_v49, %v30560_v62  ;;  %v32214_v20 = vpop.eup %27372  ;;  %27378 = vpow2.f32 %v21328_v34  ;;  %v33281_v34 = vld [vmem:[#allocation77_spill] sm:$0xff] }
 0x3fa   : > { %26805 = vmatprep.mubr.msk.f32.mxu1 %vm27496_vm0, %v32861_v6  ;;  %26651 = vmatmul.mubr.msk.f32.vlgmr.msra.gmra.mrb[158].mxu0 %vm12314_vm6, %v32190_v27  ;;  %v16095_v49 = vsel %vm11529_vm3, %v33281_v34, 0.0 }
 0x3fb   : > { %26806 = vmatmul.mubr.msk.f32.vlgmr.msra.gmra.mrb[156].mxu1 %vm12314_vm6, %v32181_v14  ;;  %26813 = vmatprep.subr.mxu1 %v32861_v6 }
 0x3fc   : > { %18727 = vadd.xlane.f32.xlu1 %v18726_v33  ;;  %26814 = vmatpush3.msk.msra.mxu1 %vm12318_vm5, %v709_v53 }
 0x3fd   : > { %18721 = vadd.xlane.f32.xlu0 %v18720_v63  ;;  %v12273_v21 = vpop.xlane.xlu0 %12272  ;;  %26658 = vmatprep.subr.mxu0 %v32861_v6 }
 0x3fe   : > { %26660 = vmatprep.mubr.msk.f32.mxu0 %vm27496_vm0, %v32861_v6  ;;  %v32212_v51 = vpop.xlane.xlu1 %16072  ;;  %v12305_v33 = vadd.f32 %v12273_v21, %v12161_v50  ;;  %26659 = vmatpush3.msk.msra.mxu0 %vm12318_vm5, %v32003_v59  ;;  %v18732_v21 = vsel %vm11529_vm3, %v31906_v40, 0.0  ;;  %v21332_v50 = vmul.f32 1.442695, %v21308_v58  ;;  %v21310_v59 = vsub.f32 %v33279_v37, %v30616_v8 }
 0x3ff   : > { %26815 = vmatprep.mubr.msk.f32.mxu1 %vm27496_vm0, %v32861_v6  ;;  %26661 = vmatmul.mubr.msk.f32.vlgmr.msra.gmra.mrb[144].mxu0 %vm12314_vm6, %v32214_v20 }
 0x400   : > { %26816 = vmatmul.mubr.msk.f32.vlgmr.msra.gmra.mrb[158].mxu1 %vm12314_vm6, %v30464_v18  ;;  %14794 = vadd.xlane.f32.xlu1 %v14793_v24  ;;  %v32233_v18 = vpop.eup %27374  ;;  %27380 = vpow2.f32 %v21332_v50  ;;  %v21336_v58 = vmul.f32 1.442695, %v21310_v59  ;;  %v21312_v24 = vsub.f32 %v33282_v48, %v30659_v30  ;;  %v17439_v50 = vsel %vm11529_vm3, %v31284_v29, 0.0  ;;  %v33284_v48 = vld [vmem:[#allocation176_spill] sm:$0xff] }
 0x401   : > { %18733 = vadd.xlane.f32.xlu0 %v18732_v21  ;;  %26668 = vmatprep.subr.mxu0 %v32861_v6  ;;  %v33283_v21 = vld [vmem:[#allocation14_spill] sm:$0xff]  ;;  %v20010_v59 = vsel %vm11529_vm3, %v32014_v17, 0.0  ;;  %v18741_v17 = vsel %vm11529_vm3, %v31515_v45, 0.0 }
 0x402   : > { %26670 = vmatprep.mubr.msk.f32.mxu0 %vm27496_vm0, %v32861_v6  ;;  %v14777_v53 = vpop.xlane.xlu0 %14776  ;;  %26669 = vmatpush3.msk.msra.mxu0 %vm12318_vm5, %v32032_v1  ;;  %27382 = vpow2.f32 %v21336_v58  ;;  %v33285_v58 = vld [vmem:[#allocation131_spill] sm:$0xff] }
 0x403   : > { %v32237_v63 = vpop.xlane.xlu1 %17416  ;;  %v14809_v40 = vadd.f32 %v14777_v53, %v12305_v33  ;;  %26671 = vmatmul.mubr.msk.f32.vlgmr.msra.gmra.mrb[146].mxu0 %vm12314_vm6, %v32233_v18  ;;  %26678 = vmatprep.subr.mxu0 %v32861_v6  ;;  %v32251_v33 = vpop.eup %27376 }
 0x404   : > { %33280 = vst [vmem:[#allocation102_spill] sm:$0xff] %v32237_v63  ;;  %16096 = vadd.xlane.f32.xlu1 %v16095_v49  ;;  %26679 = vmatpush3.msk.msra.mxu0 %vm12318_vm5, %v32061_v28  ;;  %v21340_v49 = vmul.f32 1.442695, %v21312_v24  ;;  %v21314_v63 = vsub.f32 %v33284_v48, %v33264_v12  ;;  %v32268_v29 = vpop.eup %27378  ;;  %v20022_v12 = vsel %vm11529_vm3, %v32072_v5, 0.0  ;;  %v22602_v24 = vsub.f32 %v33285_v58, %v33269_v26  ;;  %v33287_v58 = vld [vmem:[#allocation152_spill] sm:$0xff] }
 0x405   : > { %18745 = vadd.xlane.f32.xlu0 %v33283_v21  ;;  %26680 = vmatprep.mubr.msk.f32.mxu0 %vm27496_vm0, %v32861_v6  ;;  %v20043_v5 = vsel %vm11529_vm3, %v31743_v43, 0.0  ;;  %v20034_v26 = vsel %vm11529_vm3, %v32130_v10, 0.0  ;;  %v20046_v10 = vsel %vm11529_vm3, %v32190_v27, 0.0  ;;  %v32320_v27 = vld [vmem:[%s31538_s23 + $0x40] sm:$0xf] }
 0x406   : > { %26688 = vmatprep.subr.mxu0 %v32861_v6  ;;  %27384 = vpow2.f32 %v21340_v49 }
 0x407   : > { %v16079_v37 = vpop.xlane.xlu0 %16078  ;;  %26681 = vmatmul.mubr.msk.f32.vlgmr.msra.gmra.mrb[148].mxu0 %vm12314_vm6, %v32251_v33 }
 0x408   : > { %v32260_v53 = vpop.xlane.xlu1 %18718  ;;  %v16111_v34 = vadd.f32 %v16079_v37, %v14809_v40  ;;  %17440 = vadd.xlane.f32.xlu1 %v17439_v50  ;;  %26689 = vmatpush3.msk.msra.mxu0 %vm12318_vm5, %v32092_v2  ;;  %v21344_v37 = vmul.f32 1.442695, %v21314_v63  ;;  %v22618_v63 = vmul.f32 1.442695, %v22602_v24  ;;  %v22606_v24 = vsub.f32 %v33287_v58, %v30456_v61 }
 0x409   : > { %20011 = vadd.xlane.f32.xlu0 %v20010_v59  ;;  %26690 = vmatprep.mubr.msk.f32.mxu0 %vm27496_vm0, %v32861_v6 }
 0x40a   : > { %26698 = vmatprep.subr.mxu0 %v32861_v6  ;;  %v32285_v45 = vpop.eup %27380  ;;  %27386 = vpow2.f32 %v21344_v37 }
 0x40b   : > { %26691 = vmatmul.mubr.msk.f32.vlgmr.msra.gmra.mrb[150].mxu0 %vm12314_vm6, %v32268_v29  ;;  %27388 = vpow2.f32 %v22618_v63  ;;  %v22689_v63 = vsel %vm11529_vm3, %v32181_v14, 0.0 }
 0x40c   : > { %v17423_v40 = vpop.xlane.xlu0 %17422  ;;  %18742 = vadd.xlane.f32.xlu1 %v18741_v17  ;;  %26699 = vmatpush3.msk.msra.mxu0 %vm12318_vm5, %v32121_v44 }
 0x40d   : > { %20023 = vadd.xlane.f32.xlu0 %v20022_v12  ;;  %v32279_v50 = vpop.xlane.xlu1 %20020  ;;  %v17455_v59 = vadd.f32 %v17423_v40, %v16111_v34  ;;  %26700 = vmatprep.mubr.msk.f32.mxu0 %vm27496_vm0, %v32861_v6  ;;  %v33286_v34 = vld [vmem:[#allocation135_spill] sm:$0xff]  ;;  %v27383_v12 = vpop.eup %27382 }
 0x40e   : > { %26708 = vmatprep.subr.mxu0 %v32861_v6  ;;  %v22604_v49 = vsub.f32 %v33286_v34, %v30281_v35  ;;  %v21387_v35 = vsel %vm11529_vm3, %v31958_v36, 0.0  ;;  %v33288_v36 = vld [vmem:[#allocation158_spill] sm:$0xff]  ;;  %v21354_v34 = vsel %vm11529_vm3, %v32233_v18, 0.0  ;;  %v33290_v18 = vld [vmem:[#allocation125_spill] sm:$0xff] }
 0x40f   : > { %26701 = vmatmul.mubr.msk.f32.vlgmr.msra.gmra.mrb[152].mxu0 %vm12314_vm6, %v32285_v45 }
 0x410   : > { %20044 = vadd.xlane.f32.xlu1 %v20043_v5  ;;  %26709 = vmatpush3.msk.msra.mxu0 %vm12318_vm5, %v32148_v0  ;;  %v22622_v40 = vmul.f32 1.442695, %v22604_v49  ;;  %v22608_v5 = vsub.f32 %v33288_v36, %v30504_v39  ;;  %v22626_v49 = vmul.f32 1.442695, %v22606_v24 }
 0x411   : > { %20035 = vadd.xlane.f32.xlu0 %v20034_v26  ;;  %v18725_v48 = vpop.xlane.xlu0 %18724  ;;  %26710 = vmatprep.mubr.msk.f32.mxu0 %vm27496_vm0, %v32861_v6 }
 0x412   : > { %v32300_v17 = vpop.xlane.xlu1 %21364  ;;  %v18757_v43 = vadd.f32 %v18725_v48, %v17455_v59  ;;  %26718 = vmatprep.subr.mxu0 %v32861_v6  ;;  %v32314_v59 = vpop.eup %27384  ;;  %27390 = vpow2.f32 %v22622_v40  ;;  %v22630_v48 = vmul.f32 1.442695, %v22608_v5  ;;  %v21366_v40 = vsel %vm11529_vm3, %v32268_v29, 0.0 }
 0x413   : > { %26711 = vmatmul.mubr.msk.f32.vlgmr.msra.gmra.mrb[154].mxu0 %vm12314_vm6, %v27383_v12  ;;  %27392 = vpow2.f32 %v22626_v49  ;;  %v21378_v5 = vsel %vm11529_vm3, %v27383_v12, 0.0 }
 0x414   : > { %21388 = vadd.xlane.f32.xlu1 %v21387_v35  ;;  %26719 = vmatpush3.msk.msra.mxu0 %vm12318_vm5, %v32177_v4  ;;  %v27387_v39 = vpop.eup %27386  ;;  %27394 = vpow2.f32 %v22630_v48  ;;  %v33292_v48 = vld [vmem:[#allocation177_spill] sm:$0xff] }
 0x415   : > { %20047 = vadd.xlane.f32.xlu0 %v20046_v10  ;;  %26720 = vmatprep.mubr.msk.f32.mxu0 %vm27496_vm0, %v32861_v6  ;;  %v14790_v10 = vsel %vm11529_vm3, %v33290_v18, 0.0  ;;  %v21390_v12 = vsel %vm11529_vm3, %v27387_v39, 0.0 }
 0x416   : > { %v20027_v37 = vpop.xlane.xlu0 %20026  ;;  %26728 = vmatprep.subr.mxu0 %v32861_v6 }
 0x417   : > { %v32322_v26 = vpop.xlane.xlu1 %22666  ;;  %v20059_v61 = vadd.f32 %v20027_v37, %v18757_v43  ;;  %26721 = vmatmul.mubr.msk.f32.vlgmr.msra.gmra.mrb[156].mxu0 %vm12314_vm6, %v32314_v59  ;;  %v33289_v43 = vld [vmem:[#allocation173_spill] sm:$0xff]  ;;  %v33291_v37 = vld [vmem:[#allocation168_spill] sm:$0xff] }
 0x418   : > { %22690 = vadd.xlane.f32.xlu1 %v22689_v63  ;;  %26729 = vmatpush3.msk.msra.mxu0 %vm12318_vm5, %v32320_v27  ;;  %v22612_v14 = vsub.f32 %v33289_v43, %v30616_v8  ;;  %v22610_v36 = vsub.f32 %v33291_v37, %v30560_v62  ;;  %v32350_v8 = vpop.eup %27388  ;;  %v16092_v62 = vsel %vm11529_vm3, %v31484_v7, 0.0  ;;  %v17436_v7 = vsel %vm11529_vm3, %v31711_v56, 0.0 }
 0x419   : > { %21355 = vadd.xlane.f32.xlu0 %v21354_v34  ;;  %26730 = vmatprep.mubr.msk.f32.mxu0 %vm27496_vm0, %v32861_v6  ;;  %v22614_v43 = vsub.f32 %v33292_v48, %v30659_v30  ;;  %v18738_v30 = vsel %vm11529_vm3, %v31932_v41, 0.0 }
 0x41a   : > { %26738 = vmatprep.subr.mxu0 %v32861_v6  ;;  %v22638_v29 = vmul.f32 1.442695, %v22612_v14  ;;  %v22634_v63 = vmul.f32 1.442695, %v22610_v36  ;;  %v20016_v36 = vsel %vm11529_vm3, %v32043_v38, 0.0  ;;  %v20028_v38 = vsel %vm11529_vm3, %v32103_v22, 0.0 }
 0x41b   : > { %v21371_v35 = vpop.xlane.xlu0 %21370  ;;  %26731 = vmatmul.mubr.msk.f32.vlgmr.msra.gmra.mrb[158].mxu0 %vm12314_vm6, %v27387_v39  ;;  %v22642_v18 = vmul.f32 1.442695, %v22614_v43  ;;  %v20040_v22 = vsel %vm11529_vm3, %v32159_v3, 0.0  ;;  %v21348_v43 = vsel %vm11529_vm3, %v32214_v20, 0.0  ;;  %v21360_v3 = vsel %vm11529_vm3, %v32251_v33, 0.0 }
 0x41c   : > { %v32342_v58 = vpop.xlane.xlu1 %14767  ;;  %v21403_v24 = vadd.f32 %v21371_v35, %v20059_v61  ;;  %14791 = vadd.xlane.f32.xlu1 %v14790_v10  ;;  %26739 = vmatpush3.msk.msra.mxu0 %vm12318_vm5, %v32032_v1  ;;  %v27391_v49 = vpop.eup %27390  ;;  %27396 = vpow2.f32 %v22638_v29  ;;  %v21384_v20 = vsel %vm11529_vm3, %v32314_v59, 0.0  ;;  %v22650_v33 = vsel %vm11529_vm3, %v32350_v8, 0.0 }
 0x41d   : > { %21367 = vadd.xlane.f32.xlu0 %v21366_v40  ;;  %26740 = vmatprep.mubr.msk.f32.mxu0 %vm27496_vm0, %v32861_v6  ;;  %27398 = vpow2.f32 %v22634_v63  ;;  %v32379_v35 = vpop.eup %27392  ;;  %v22656_v56 = vsel %vm11529_vm3, %v27391_v49, 0.0 }
 0x41e   : > { %26748 = vmatprep.subr.mxu0 %v32861_v6  ;;  %v27395_v39 = vpop.eup %27394  ;;  %27400 = vpow2.f32 %v22642_v18 }
 0x41f   : > { %26741 = vmatmul.mubr.msk.f32.vlgmr.msra.gmra.mrb[144].mxu0 %vm12314_vm6, %v32350_v8  ;;  %v22668_v41 = vsel %vm11529_vm3, %v27395_v39, 0.0 }
 0x420   : > { %v22673_v61 = vpop.xlane.xlu0 %22672  ;;  %16093 = vadd.xlane.f32.xlu1 %v16092_v62  ;;  %26749 = vmatpush3.msk.msra.mxu0 %vm12318_vm5, %v32061_v28 }
 0x421   : > { %21379 = vadd.xlane.f32.xlu0 %v21378_v5  ;;  %v32358_v1 = vpop.xlane.xlu1 %16069  ;;  %v32360_v34 = vadd.f32 %v22673_v61, %v21403_v24  ;;  %26750 = vmatprep.mubr.msk.f32.mxu0 %vm27496_vm0, %v32861_v6  ;;  %v33293_v24 = vld [vmem:[#allocation15_spill] sm:$0xff] }
 0x422   : > { %26758 = vmatprep.subr.mxu0 %v32861_v6 }
 0x423   : > { %26751 = vmatmul.mubr.msk.f32.vlgmr.msra.gmra.mrb[146].mxu0 %vm12314_vm6, %v27391_v49 }
 0x424   : > { %17437 = vadd.xlane.f32.xlu1 %v17436_v7  ;;  %26759 = vmatpush3.msk.msra.mxu0 %vm12318_vm5, %v32092_v2 }
 0x425   : > { %21391 = vadd.xlane.f32.xlu0 %v21390_v12  ;;  %v14774_v28 = vpop.xlane.xlu0 %14773  ;;  %26760 = vmatprep.mubr.msk.f32.mxu0 %vm27496_vm0, %v32861_v6 }
 0x426   : > { %v32377_v14 = vpop.xlane.xlu1 %17413  ;;  %26768 = vmatprep.subr.mxu0 %v32861_v6  ;;  %v27397_v40 = vpop.eup %27396 }
 0x427   : > { %26761 = vmatmul.mubr.msk.f32.vlgmr.msra.gmra.mrb[148].mxu0 %vm12314_vm6, %v32379_v35  ;;  %v22680_v29 = vsel %vm11529_vm3, %v27397_v40, 0.0 }
 0x428   : > { %18739 = vadd.xlane.f32.xlu1 %v18738_v30  ;;  %26769 = vmatpush3.msk.msra.mxu0 %vm12318_vm5, %v32121_v44  ;;  %v32399_v44 = vpop.eup %27398 }
 0x429   : > { %22657 = vadd.xlane.f32.xlu0 %v22656_v56  ;;  %26770 = vmatprep.mubr.msk.f32.mxu0 %vm27496_vm0, %v32861_v6  ;;  %v27401_v7 = vpop.eup %27400 }
 0x42a   : > { %v16076_v2 = vpop.xlane.xlu0 %16075  ;;  %26778 = vmatprep.subr.mxu0 %v32861_v6  ;;  %v22686_v8 = vsel %vm11529_vm3, %v27401_v7, 0.0 }
 0x42b   : > { %v12158_v10 = vpop.xlane.xlu1 %12157  ;;  %26771 = vmatmul.mubr.msk.f32.vlgmr.msra.gmra.mrb[150].mxu0 %vm12314_vm6, %v27395_v39 }
 0x42c   : > { %20005 = vadd.xlane.f32.xlu1 %v33293_v24  ;;  %26779 = vmatpush3.msk.msra.mxu0 %vm12318_vm5, %v32148_v0 }
 0x42d   : > { %22669 = vadd.xlane.f32.xlu0 %v22668_v41  ;;  %26780 = vmatprep.mubr.msk.f32.mxu0 %vm27496_vm0, %v32861_v6 }
 0x42e   : > { %26788 = vmatprep.subr.mxu0 %v32861_v6 }
 0x42f   : > { %v17420_v37 = vpop.xlane.xlu0 %17419  ;;  %26781 = vmatmul.mubr.msk.f32.vlgmr.msra.gmra.mrb[152].mxu0 %vm12314_vm6, %v32399_v44 }
 0x430   : > { %v12270_v62 = vpop.xlane.xlu1 %12269  ;;  %20017 = vadd.xlane.f32.xlu1 %v20016_v36  ;;  %26789 = vmatpush3.msk.msra.mxu0 %vm12318_vm5, %v32177_v4  ;;  %v708_v4 = vld [vmem:[%s31538_s23 + $0x48] sm:$0xf] }
 0x431   : > { %22681 = vadd.xlane.f32.xlu0 %v22680_v29  ;;  %v12304_v0 = vadd.f32 %v12270_v62, %v12158_v10  ;;  %26790 = vmatprep.mubr.msk.f32.mxu0 %vm27496_vm0, %v32861_v6  ;;  %v22674_v62 = vsel %vm11529_vm3, %v32399_v44, 0.0 }
 0x432   : > { %26798 = vmatprep.subr.mxu0 %v32861_v6 }
 0x433   : > { %v14808_v5 = vadd.f32 %v14774_v28, %v12304_v0  ;;  %26791 = vmatmul.mubr.msk.f32.vlgmr.msra.gmra.mrb[154].mxu0 %vm12314_vm6, %v27397_v40 }
 0x434   : > { %v12167_v61 = vpop.xlane.xlu0 %12166  ;;  %20029 = vadd.xlane.f32.xlu1 %v20028_v38  ;;  %26799 = vmatpush3.msk.msra.mxu0 %vm12318_vm5, %v32320_v27 }
 0x435   : > { %22693 = vadd.xlane.f32.xlu0 %v33283_v21  ;;  %v16110_v63 = vadd.f32 %v16076_v2, %v14808_v5  ;;  %v12164_v49 = vpop.xlane.xlu1 %12163  ;;  %26800 = vmatprep.mubr.msk.f32.mxu0 %vm27496_vm0, %v32861_v6 }
 0x436   : > { %26808 = vmatprep.subr.mxu0 %v32861_v6 }
 0x437   : > { %v32422_v12 = vadd.f32 %v17420_v37, %v16110_v63  ;;  %26801 = vmatmul.mubr.msk.f32.vlgmr.msra.gmra.mrb[156].mxu0 %vm12314_vm6, %v27401_v7 }
 0x438   : > { %20041 = vadd.xlane.f32.xlu1 %v20040_v22  ;;  %26809 = vmatpush3.msk.msra.mxu0 %vm12318_vm5, %v708_v4 }
 0x439   : > { %v12279_v21 = vpop.xlane.xlu0 %12278  ;;  %26810 = vmatprep.mubr.msk.f32.mxu0 %vm27496_vm0, %v32861_v6  ;;  %v21372_v6 = vsel %vm11529_vm3, %v32285_v45, 0.0  ;;  %v22662_v45 = vsel %vm11529_vm3, %v32379_v35, 0.0 }
 0x43a   : > { %v12276_v27 = vpop.xlane.xlu1 %12275  ;;  %v12307_v56 = vadd.f32 %v12279_v21, %v12167_v61 }
 0x43b   : > { %v12306_v48 = vadd.f32 %v12276_v27, %v12164_v49  ;;  %26811 = vmatmul.mubr.msk.f32.vlgmr.msra.gmra.mrb[158].mxu0 %vm12314_vm6, %v30797_v54 }
 0x43c   : > { %21349 = vadd.xlane.f32.xlu1 %v21348_v43 }
 0x43e   : > { %v32434_v28 = vpop.xlane.xlu0 %12172 }
 0x43f   : > { %v14783_v30 = vpop.xlane.xlu1 %14782 }
 0x440   : > { %21361 = vadd.xlane.f32.xlu1 %v21360_v3  ;;  %v14811_v39 = vadd.f32 %v14783_v30, %v12307_v56 }
 0x443   : > { %v32438_v18 = vpop.xlane.xlu0 %12284 }
 0x444   : > { %v16085_v2 = vpop.xlane.xlu1 %16084  ;;  %21373 = vadd.xlane.f32.xlu1 %v21372_v6 }
 0x445   : > { %v16113_v54 = vadd.f32 %v16085_v2, %v14811_v39 }
 0x448   : > { %v32444_v10 = vpop.xlane.xlu0 %14788  ;;  %21385 = vadd.xlane.f32.xlu1 %v21384_v20 }
 0x449   : > { %v17429_v41 = vpop.xlane.xlu1 %17428 }
 0x44a   : > { %v17457_v40 = vadd.f32 %v17429_v41, %v16113_v54 }
 0x44c   : > { %22651 = vadd.xlane.f32.xlu1 %v22650_v33 }
 0x44d   : > { %v32448_v24 = vpop.xlane.xlu0 %16090 }
 0x44e   : > { %v18731_v37 = vpop.xlane.xlu1 %18730 }
 0x44f   : > { %v18759_v36 = vadd.f32 %v18731_v37, %v17457_v40 }
 0x450   : > { %22663 = vadd.xlane.f32.xlu1 %v22662_v45 }
 0x452   : > { %v32452_v29 = vpop.xlane.xlu0 %17434 }
 0x453   : > { %v20033_v59 = vpop.xlane.xlu1 %20032 }
 0x454   : > { %v20061_v0 = vadd.f32 %v20033_v59, %v18759_v36  ;;  %22675 = vadd.xlane.f32.xlu1 %v22674_v62 }
 0x457   : > { %v32456_v5 = vpop.xlane.xlu0 %18736 }
 0x458   : > { %v21377_v38 = vpop.xlane.xlu1 %21376  ;;  %22687 = vadd.xlane.f32.xlu1 %v22686_v8 }
 0x459   : > { %v21405_v61 = vadd.f32 %v21377_v38, %v20061_v0 }
 0x45c   : > { %v32459_v49 = vpop.xlane.xlu0 %20038 }
 0x45d   : > { %v22679_v63 = vpop.xlane.xlu1 %22678 }
 0x45e   : > { %v32461_v35 = vadd.f32 %v22679_v63, %v21405_v61 }
 0x461   : > { %v14780_v4 = vpop.xlane.xlu1 %14779 }
 0x462   : > { %v14810_v22 = vadd.f32 %v14780_v4, %v12306_v48  ;;  %v32463_v21 = vpop.xlane.xlu0 %21382  ;;  %v12302_v48 = vadd.f32 %v32155_v16, %v32128_v46  ;;  %v12299_v4 = vadd.f32 %v31765_v55, %v31738_v31 }
 0x464   : > { %v14806_v37 = vadd.f32 %v32342_v58, %v12302_v48  ;;  %v14803_v58 = vadd.f32 %v31770_v13, %v12299_v4 }
 0x466   : > { %v16082_v27 = vpop.xlane.xlu1 %16081  ;;  %v16108_v59 = vadd.f32 %v32358_v1, %v14806_v37  ;;  %v33298_v37 = vld [vmem:[#allocation102_spill] sm:$0xff] }
 0x467   : > { %v16112_v44 = vadd.f32 %v16082_v27, %v14810_v22  ;;  %v32465_v43 = vpop.xlane.xlu0 %22684  ;;  %v16105_v27 = vadd.f32 %v31794_v23, %v14803_v58 }
 0x468   : > { %v17452_v62 = vadd.f32 %v32377_v14, %v16108_v59  ;;  %v33294_v14 = vld [vmem:[#allocation97_spill] sm:$0xff] }
 0x46b   : > { %v17426_v30 = vpop.xlane.xlu1 %17425 }
 0x46c   : > { %v17456_v3 = vadd.f32 %v17426_v30, %v16112_v44  ;;  %v14786_v56 = vpop.xlane.xlu0 %14785  ;;  %v12301_v44 = vadd.f32 %v33294_v14, %v31789_v47  ;;  %v33295_v30 = vld [vmem:[#allocation88_spill] sm:$0xff] }
 0x470   : > { %v12170_v7 = vpop.xlane.xlu1 %12169 }
 0x471   : > { %v16088_v39 = vpop.xlane.xlu0 %16087 }
 0x475   : > { %v12282_v6 = vpop.xlane.xlu1 %12281 }
 0x476   : > { %v12308_v2 = vadd.f32 %v12282_v6, %v12170_v7  ;;  %v17432_v40 = vpop.xlane.xlu0 %17431 }
 0x478   : > { %v14812_v54 = vadd.f32 %v14786_v56, %v12308_v2  ;;  %v17449_v56 = vadd.f32 %v33295_v30, %v16105_v27 }
 0x47a   : > { %v16114_v20 = vadd.f32 %v16088_v39, %v14812_v54  ;;  %v12176_v41 = vpop.xlane.xlu1 %12175  ;;  %v18751_v39 = vadd.f32 %v31852_v25, %v17449_v56  ;;  %v14807_v54 = vadd.f32 %v32188_v57, %v32157_v9  ;;  %v33296_v25 = vld [vmem:[#allocation123_spill] sm:$0xff] }
 0x47b   : > { %v12179_v46 = vpop.xlane.xlu0 %12178 }
 0x47c   : > { %v32467_v33 = vadd.f32 %v17432_v40, %v16114_v20  ;;  %v20053_v55 = vadd.f32 %v31878_v42, %v18751_v39  ;;  %v33297_v40 = vld [vmem:[#allocation51_spill] sm:$0xff] }
 0x47e   : > { %v21397_v2 = vadd.f32 %v31904_v11, %v20053_v55 }
 0x47f   : > { %v12288_v36 = vpop.xlane.xlu1 %12287 }
 0x480   : > { %v32472_v45 = vadd.f32 %v12288_v36, %v12176_v41  ;;  %v12291_v1 = vpop.xlane.xlu0 %12290  ;;  %v33299_v36 = vld [vmem:[#allocation2_spill] sm:$0xff] }
 0x481   : > { %v12311_v30 = vadd.f32 %v12291_v1, %v12179_v46  ;;  %v33300_v1 = vld [vmem:[#allocation17_spill] sm:$0xff] }
 0x484   : > { %v18716_v0 = vpop.xlane.xlu1 %18715 }
 0x485   : > { %v32476_v8 = vadd.f32 %v18716_v0, %v17452_v62  ;;  %v32491_v6 = vpop.xlane.xlu0 %18709  ;;  %v12309_v0 = vadd.f32 %v32438_v18, %v32434_v28 }
 0x487   : > { %v14813_v4 = vadd.f32 %v32444_v10, %v12309_v0 }
 0x489   : > { %v18728_v38 = vpop.xlane.xlu1 %18727  ;;  %v16115_v27 = vadd.f32 %v32448_v24, %v14813_v4 }
 0x48a   : > { %v32478_v61 = vadd.f32 %v18728_v38, %v17456_v3  ;;  %v14805_v3 = vadd.f32 %v31847_v15, %v12301_v44  ;;  %v22699_v15 = vadd.f32 %v31930_v52, %v21397_v2  ;;  %v32501_v42 = vpop.xlane.xlu0 %18721 }
 0x48c   : > { %v16107_v31 = vadd.f32 %v31873_v19, %v14805_v3  ;;  %v16109_v19 = vadd.f32 %v32212_v51, %v14807_v54  ;;  %27402 = vrcp.f32 %v22699_v15  ;;  %v33303_v15 = vld [vmem:[#allocation127_spill] sm:$0xff] }
 0x48d   : > { %v14795_v63 = vpop.xlane.xlu1 %14794 }
 0x48e   : > { %v17451_v23 = vadd.f32 %v31899_v60, %v16107_v31  ;;  %v17453_v60 = vadd.f32 %v33298_v37, %v16109_v19  ;;  %v32508_v52 = vpop.xlane.xlu0 %18733  ;;  %v14815_v28 = vadd.f32 %v14795_v63, %v12311_v30  ;;  %v33301_v31 = vld [vmem:[#allocation99_spill] sm:$0xff] }
 0x48f   : > { %v12313_v55 = vadd.f32 %v33301_v31, %v33300_v1  ;;  %v33302_v63 = vld [vmem:[#allocation91_spill] sm:$0xff] }
 0x490   : > { %v18753_v47 = vadd.f32 %v31923_v32, %v17451_v23  ;;  %v18755_v59 = vadd.f32 %v32260_v53, %v17453_v60  ;;  %v33304_v37 = vld [vmem:[#allocation19_spill] sm:$0xff] }
 0x491   : > { %v16097_v16 = vpop.xlane.xlu1 %16096 }
 0x492   : > { %v20055_v41 = vadd.f32 %v33296_v25, %v18753_v47  ;;  %v20057_v9 = vadd.f32 %v32279_v50, %v18755_v59  ;;  %v32519_v53 = vpop.xlane.xlu0 %18745  ;;  %v16117_v3 = vadd.f32 %v16097_v16, %v14815_v28 }
 0x494   : > { %v21399_v48 = vadd.f32 %v33297_v40, %v20055_v41  ;;  %v21401_v51 = vadd.f32 %v32300_v17, %v20057_v9 }
 0x495   : > { %v17441_v22 = vpop.xlane.xlu1 %17440 }
 0x496   : > { %v22701_v32 = vadd.f32 %v33299_v36, %v21399_v48  ;;  %v22703_v62 = vadd.f32 %v32322_v26, %v21401_v51  ;;  %v27403_v58 = vpop.eup %27402  ;;  %v17459_v26 = vadd.f32 %v32452_v29, %v16115_v27  ;;  %v32528_v39 = vpop.xlane.xlu0 %20011  ;;  %v17461_v2 = vadd.f32 %v17441_v22, %v16117_v3 }
 0x498   : > { %27404 = vrcp.f32 %v22701_v32  ;;  %v18761_v10 = vadd.f32 %v32456_v5, %v17459_v26 }
 0x499   : > { %v18743_v7 = vpop.xlane.xlu1 %18742  ;;  %27406 = vrcp.f32 %v22703_v62  ;;  %v33306_v62 = vld [vmem:[#allocation84_spill] sm:$0xff] }
 0x49a   : > { %27408 = vrcp.f32 %v32360_v34  ;;  %v20063_v29 = vadd.f32 %v32459_v49, %v18761_v10  ;;  %v14817_v34 = vadd.f32 %v33302_v63, %v12313_v55  ;;  %v18763_v16 = vadd.f32 %v18743_v7, %v17461_v2  ;;  %v32543_v49 = vpop.xlane.xlu0 %20023  ;;  %v33305_v7 = vld [vmem:[#allocation117_spill] sm:$0xff] }
 0x49b   : > { %27410 = vrcp.f32 %v32461_v35 }
 0x49c   : > { %v21407_v5 = vadd.f32 %v32463_v21, %v20063_v29  ;;  %v16119_v25 = vadd.f32 %v33303_v15, %v14817_v34  ;;  %v33309_v15 = vld [vmem:[#allocation65_spill] sm:$0xff] }
 0x49d   : > { %v20045_v13 = vpop.xlane.xlu1 %20044 }
 0x49e   : > { %v22709_v41 = vadd.f32 %v32465_v43, %v21407_v5  ;;  %v20065_v22 = vadd.f32 %v20045_v13, %v18763_v16  ;;  %v17463_v60 = vadd.f32 %v33304_v37, %v16119_v25  ;;  %v32551_v13 = vpop.xlane.xlu0 %20035  ;;  %v33310_v25 = vld [vmem:[#allocation22_spill] sm:$0xff]  ;;  %v33313_v37 = vld [vmem:[#allocation144_spill] sm:$0xff] }
 0x4a0   : > { %v18765_v32 = vadd.f32 %v33305_v7, %v17463_v60  ;;  %27412 = vrcp.f32 %v22709_v41  ;;  %v12300_v41 = vadd.f32 %v33310_v25, %v33309_v15  ;;  %v33322_v15 = vld [vmem:[#allocation27_spill] sm:$0xff] }
 0x4a1   : > { %v21389_v20 = vpop.xlane.xlu1 %21388 }
 0x4a2   : > { %v27405_v18 = vpop.eup %27404  ;;  %v21409_v36 = vadd.f32 %v21389_v20, %v20065_v22  ;;  %v20067_v0 = vadd.f32 %v33306_v62, %v18765_v32  ;;  %v33307_v20 = vld [vmem:[#allocation21_spill] sm:$0xff]  ;;  %v32561_v28 = vpop.xlane.xlu0 %20047  ;;  %v33311_v22 = vld [vmem:[#allocation143_spill] sm:$0xff]  ;;  %v33315_v32 = vld [vmem:[#allocation18_spill] sm:$0xff] }
 0x4a3   : > { %v27407_v54 = vpop.eup %27406  ;;  %v33317_v62 = vld [vmem:[#allocation3_spill] sm:$0xff] }
 0x4a4   : > { %v27409_v35 = vpop.eup %27408 }
 0x4a5   : > { %v22691_v11 = vpop.xlane.xlu1 %22690 }
 0x4a6   : > { %v22711_v9 = vadd.f32 %v22691_v11, %v21409_v36  ;;  %v21356_v31 = vpop.xlane.xlu0 %21355  ;;  %v33314_v36 = vld [vmem:[#allocation81_spill] sm:$0xff] }
 0x4a8   : > { %27414 = vrcp.f32 %v22711_v9 }
 0x4a9   : > { %v32510_v57 = vpop.xlane.xlu1 %14791 }
 0x4aa   : > { %v21368_v5 = vpop.xlane.xlu0 %21367 }
 0x4ad   : > { %v32516_v38 = vpop.xlane.xlu1 %16093 }
 0x4ae   : > { %v21380_v7 = vpop.xlane.xlu0 %21379 }
 0x4b0   : > { %v22856_v50 = vpop.f32.mrb[144].mxu1 }
 0x4b1   : > { %v23921_v14 = vmul.f32 %v27403_v58, %v22856_v50  ;;  %v26747_v44 = vpop.f32.mrb[145].mxu1  ;;  %v32522_v17 = vpop.xlane.xlu1 %17437  ;;  %v21411_v58 = vadd.f32 %v33307_v20, %v20067_v0  ;;  %v33318_v20 = vld [vmem:[#allocation128_spill] sm:$0xff] }
 0x4b2   : > { %v27411_v50 = vpop.eup %27410 }
 0x4b3   : > { %23953 = vrot.lane.b32.xlu1 %v23921_v14, %s27506_s13  ;;  %v33308_v14 = vld [vmem:[#allocation134_spill] sm:$0xff] }
 0x4b4   : > { %v22713_v44 = vadd.f32 %v33308_v14, %v21411_v58 }
 0x4b5   : > { %v23002_v56 = vpop.f32.mrb[146].mxu1  ;;  %v32530_v24 = vpop.xlane.xlu1 %18739 }
 0x4b6   : > { %v23923_v46 = vmul.f32 %v27405_v18, %v23002_v56  ;;  %v26757_v23 = vpop.f32.mrb[147].mxu1  ;;  %v27413_v18 = vpop.eup %27412  ;;  %27416 = vrcp.f32 %v22713_v44 }
 0x4b7   : > { %v27415_v1 = vpop.eup %27414 }
 0x4b8   : > { %23955 = vrot.lane.b32.xlu0 %v23923_v46, %s27506_s13 }
 0x4b9   : > { %v32539_v47 = vpop.xlane.xlu1 %20005 }
 0x4ba   : > { %v23148_v19 = vpop.f32.mrb[148].mxu1 }
 0x4bb   : > { %v23925_v40 = vmul.f32 %v27407_v54, %v23148_v19  ;;  %v26767_v48 = vpop.f32.mrb[149].mxu1 }
 0x4bd   : > { %v32546_v21 = vpop.xlane.xlu1 %20017  ;;  %23957 = vrot.lane.b32.xlu1 %v23925_v40, %s27506_s13  ;;  %v33312_v40 = vld [vmem:[#allocation25_spill] sm:$0xff] }
 0x4be   : > { %v12298_v48 = vadd.f32 %v33312_v40, %v33311_v22 }
 0x4bf   : > { %v23294_v59 = vpop.f32.mrb[150].mxu1 }
 0x4c0   : > { %v23927_v43 = vmul.f32 %v27409_v35, %v23294_v59  ;;  %v26777_v51 = vpop.f32.mrb[151].mxu1  ;;  %v27417_v63 = vpop.eup %27416  ;;  %v14802_v60 = vadd.f32 %v33313_v37, %v12298_v48  ;;  %v14804_v35 = vadd.f32 %v33314_v36, %v12300_v41 }
 0x4c1   : > { %v32553_v4 = vpop.xlane.xlu1 %20029 }
 0x4c2   : > { %23959 = vrot.lane.b32.xlu1 %v23927_v43, %s27506_s13  ;;  %v16104_v59 = vadd.f32 %v33315_v32, %v14802_v60  ;;  %v33316_v43 = vld [vmem:[#allocation114_spill] sm:$0xff]  ;;  %v16106_v0 = vadd.f32 %v33317_v62, %v14804_v35  ;;  %v33324_v32 = vld [vmem:[#allocation115_spill] sm:$0xff] }
 0x4c4   : > { %v23440_v27 = vpop.f32.mrb[152].mxu1  ;;  %v17448_v51 = vadd.f32 %v33316_v43, %v16104_v59 }
 0x4c5   : > { %v23929_v30 = vmul.f32 %v27411_v50, %v23440_v27  ;;  %v26787_v26 = vpop.f32.mrb[153].mxu1  ;;  %v32558_v11 = vpop.xlane.xlu1 %20041  ;;  %v33319_v27 = vld [vmem:[#allocation5_spill] sm:$0xff] }
 0x4c6   : > { %v18750_v58 = vadd.f32 %v33318_v20, %v17448_v51  ;;  %v32578_v50 = vpop.xlane.xlu0 %21391  ;;  %v17450_v14 = vadd.f32 %v33319_v27, %v16106_v0 }
 0x4c7   : > { %23961 = vrot.lane.b32.xlu0 %v23929_v30, %s27506_s13 }
 0x4c8   : > { %v20052_v44 = vadd.f32 %v32539_v47, %v18750_v58  ;;  %v18752_v26 = vadd.f32 %v32491_v6, %v17450_v14  ;;  %v18756_v47 = vadd.f32 %v32501_v42, %v32422_v12  ;;  %v33321_v6 = vld [vmem:[#allocation23_spill] sm:$0xff]  ;;  %v20060_v12 = vadd.f32 %v32553_v4, %v32478_v61 }
 0x4c9   : > { %v23586_v10 = vpop.f32.mrb[154].mxu1  ;;  %v21350_v56 = vpop.xlane.xlu1 %21349 }
 0x4ca   : > { %v23931_v3 = vmul.f32 %v27413_v18, %v23586_v10  ;;  %v26797_v46 = vpop.f32.mrb[155].mxu1  ;;  %v21396_v18 = vadd.f32 %v21350_v56, %v20052_v44  ;;  %v20054_v10 = vadd.f32 %v32528_v39, %v18752_v26  ;;  %v20058_v39 = vadd.f32 %v32543_v49, %v18756_v47 }
 0x4cb   : > { %v22658_v46 = vpop.xlane.xlu0 %22657  ;;  %v18760_v49 = vadd.f32 %v32508_v52, %v32467_v33 }
 0x4cc   : > { %23963 = vrot.lane.b32.xlu1 %v23931_v3, %s27506_s13 }
 0x4cd   : > { %v21362_v2 = vpop.xlane.xlu1 %21361  ;;  %v20062_v40 = vadd.f32 %v32551_v13, %v18760_v49 }
 0x4ce   : > { %v23732_v55 = vpop.f32.mrb[156].mxu1 }
 0x4cf   : > { %v23933_v29 = vmul.f32 %v27415_v1, %v23732_v55  ;;  %v26807_v23 = vpop.f32.mrb[157].mxu1  ;;  %v21398_v1 = vadd.f32 %v21356_v31, %v20054_v10  ;;  %v22670_v31 = vpop.xlane.xlu0 %22669 }
 0x4d1   : > { %23965 = vrot.lane.b32.xlu0 %v23933_v29, %s27506_s13  ;;  %v21374_v19 = vpop.xlane.xlu1 %21373  ;;  %v22700_v55 = vadd.f32 %v22658_v46, %v21398_v1  ;;  %v20056_v29 = vadd.f32 %v32546_v21, %v32476_v8  ;;  %v14814_v21 = vadd.f32 %v32510_v57, %v32472_v45  ;;  %v33323_v57 = vld [vmem:[#allocation72_spill] sm:$0xff] }
 0x4d2   : > { %v21404_v22 = vadd.f32 %v21374_v19, %v20060_v12  ;;  %v21406_v19 = vadd.f32 %v21380_v7, %v20062_v40 }
 0x4d3   : > { %v23884_v34 = vpop.f32.mrb[158].mxu1  ;;  %v16116_v41 = vadd.f32 %v32516_v38, %v14814_v21  ;;  %v22682_v52 = vpop.xlane.xlu0 %22681 }
 0x4d4   : > { %v23935_v16 = vmul.f32 %v27417_v63, %v23884_v34  ;;  %v26817_v54 = vpop.f32.mrb[159].mxu1  ;;  %v21400_v63 = vadd.f32 %v21362_v2, %v20056_v29  ;;  %v33320_v34 = vld [vmem:[#allocation104_spill] sm:$0xff]  ;;  %v22708_v43 = vadd.f32 %v22682_v52, %v21406_v19 }
 0x4d5   : > { %v32573_v9 = vpop.xlane.xlu1 %21385  ;;  %v12312_v56 = vadd.f32 %v33321_v6, %v33320_v34  ;;  %v21402_v54 = vadd.f32 %v21368_v5, %v20058_v39  ;;  %v17460_v48 = vadd.f32 %v32522_v17, %v16116_v41 }
 0x4d6   : > { %23967 = vrot.lane.b32.xlu1 %v23935_v16, %s27506_s13 }
 0x4d7   : > { %v14816_v8 = vadd.f32 %v33322_v15, %v12312_v56  ;;  %v22704_v25 = vadd.f32 %v22670_v31, %v21402_v54  ;;  %v18762_v37 = vadd.f32 %v32530_v24, %v17460_v48  ;;  %v22694_v14 = vpop.xlane.xlu0 %22693 }
 0x4d9   : > { %v22652_v30 = vpop.xlane.xlu1 %22651  ;;  %v16118_v5 = vadd.f32 %v33323_v57, %v14816_v8  ;;  %v20064_v13 = vadd.f32 %v32558_v11, %v18762_v37 }
 0x4da   : > { %v22698_v3 = vadd.f32 %v22652_v30, %v21396_v18 }
 0x4db   : > { %v17462_v59 = vadd.f32 %v33324_v32, %v16118_v5  ;;  %v21408_v7 = vadd.f32 %v32573_v9, %v20064_v13 }
 0x4dc   : > { %27418 = vrcp.f32 %v22698_v3 }
 0x4dd   : > { %v22664_v23 = vpop.xlane.xlu1 %22663  ;;  %27420 = vrcp.f32 %v22700_v55  ;;  %v18764_v62 = vadd.f32 %v32519_v53, %v17462_v59 }
 0x4de   : > { %v22702_v16 = vadd.f32 %v22664_v23, %v21400_v63 }
 0x4df   : > { %v20066_v58 = vadd.f32 %v32561_v28, %v18764_v62 }
 0x4e0   : > { %27422 = vrcp.f32 %v22702_v16 }
 0x4e1   : > { %v22676_v42 = vpop.xlane.xlu1 %22675  ;;  %27424 = vrcp.f32 %v22704_v25  ;;  %v21410_v44 = vadd.f32 %v32578_v50, %v20066_v58 }
 0x4e2   : > { %v22706_v33 = vadd.f32 %v22676_v42, %v21404_v22 }
 0x4e3   : > { %v22712_v9 = vadd.f32 %v22694_v14, %v21410_v44 }
 0x4e4   : > { %27426 = vrcp.f32 %v22706_v33 }
 0x4e5   : > { %v22688_v17 = vpop.xlane.xlu1 %22687  ;;  %27428 = vrcp.f32 %v22708_v43 }
 0x4e6   : > { %v27419_v2 = vpop.eup %27418  ;;  %v22710_v27 = vadd.f32 %v22688_v17, %v21408_v7 }
 0x4e7   : > { %v27421_v38 = vpop.eup %27420 }
 0x4e8   : > { %27430 = vrcp.f32 %v22710_v27 }
 0x4e9   : > { %27432 = vrcp.f32 %v22712_v9 }
 0x4ea   : > { %v27423_v51 = vpop.eup %27422 }
 0x4eb   : > { %v27425_v11 = vpop.eup %27424 }
 0x4ee   : > { %v27427_v18 = vpop.eup %27426 }
 0x4ef   : > { %v27429_v46 = vpop.eup %27428 }
 0x4f2   : > { %v22783_v45 = vpop.f32.mrb[144].mxu0  ;;  %v27431_v29 = vpop.eup %27430 }
 0x4f3   : > { %v23920_v61 = vmul.f32 %v27419_v2, %v22783_v45  ;;  %v26742_v4 = vpop.f32.mrb[145].mxu0  ;;  %v27433_v34 = vpop.eup %27432 }
 0x4f5   : > { %23937 = vst.msk [vmem:[%s32604_s27] sm:$0xf] %vm23936_vm7, %v23920_v61 }
 0x4f6   : > { %v22929_v60 = vpop.f32.mrb[146].mxu0 }
 0x4f7   : > { %v23922_v36 = vmul.f32 %v27421_v38, %v22929_v60  ;;  %v26752_v35 = vpop.f32.mrb[147].mxu0 }
 0x4f9   : > { %23938 = vst.msk [vmem:[%s32604_s27 + $0x4] sm:$0xf] %vm23936_vm7, %v23922_v36 }
 0x4fa   : > { %v23075_v24 = vpop.f32.mrb[148].mxu0 }
 0x4fb   : > { %v23924_v0 = vmul.f32 %v27423_v51, %v23075_v24  ;;  %v26762_v20 = vpop.f32.mrb[149].mxu0 }
 0x4fd   : > { %23939 = vst.msk [vmem:[%s32604_s27 + $0x8] sm:$0xf] %vm23936_vm7, %v23924_v0 }
 0x4fe   : > { %v23221_v30 = vpop.f32.mrb[150].mxu0 }
 0x4ff   : > { %v23926_v53 = vmul.f32 %v27425_v11, %v23221_v30  ;;  %v26772_v26 = vpop.f32.mrb[151].mxu0 }
 0x501   : > { %23940 = vst.msk [vmem:[%s32604_s27 + $0xc] sm:$0xf] %vm23936_vm7, %v23926_v53 }
 0x502   : > { %v23367_v28 = vpop.f32.mrb[152].mxu0 }
 0x503   : > { %v23928_v10 = vmul.f32 %v27427_v18, %v23367_v28  ;;  %v26782_v3 = vpop.f32.mrb[153].mxu0 }
 0x505   : > { %23941 = vst.msk [vmem:[%s32604_s27 + $0x10] sm:$0xf] %vm23936_vm7, %v23928_v10 }
 0x506   : > { %v23513_v1 = vpop.f32.mrb[154].mxu0 }
 0x507   : > { %v23930_v50 = vmul.f32 %v27429_v46, %v23513_v1  ;;  %v26792_v55 = vpop.f32.mrb[155].mxu0 }
 0x509   : > { %23942 = vst.msk [vmem:[%s32604_s27 + $0x14] sm:$0xf] %vm23936_vm7, %v23930_v50 }
 0x50a   : > { %v23659_v23 = vpop.f32.mrb[156].mxu0 }
 0x50b   : > { %v23932_v47 = vmul.f32 %v27431_v29, %v23659_v23  ;;  %v26802_v63 = vpop.f32.mrb[157].mxu0 }
 0x50d   : > { %23943 = vst.msk [vmem:[%s32604_s27 + $0x18] sm:$0xf] %vm23936_vm7, %v23932_v47 }
 0x50e   : > { %v23808_v6 = vpop.f32.mrb[158].mxu0 }
 0x50f   : > { %v23934_v56 = vmul.f32 %v27433_v34, %v23808_v6  ;;  %v26812_v39 = vpop.f32.mrb[159].mxu0 }
 0x511   : > { %23944 = vst.msk [vmem:[%s32604_s27 + $0x1c] sm:$0xf] %vm23936_vm7, %v23934_v56 }
 0x525   : > { %v23954_v16 = vpop.permute.xlu1 %23953 }
 0x526   : > { %23978 = vst.msk [vmem:[%s32604_s27] sm:$0xf] %vm23977_vm8, %v23954_v16 }
 0x52a   : > { %v23956_v31 = vpop.permute.xlu0 %23955 }
 0x52b   : > { %23979 = vst.msk [vmem:[%s32604_s27 + $0x4] sm:$0xf] %vm23977_vm8, %v23956_v31 }
 0x52f   : > { %v23958_v54 = vpop.permute.xlu1 %23957 }
 0x530   : > { %23980 = vst.msk [vmem:[%s32604_s27 + $0x8] sm:$0xf] %vm23977_vm8, %v23958_v54 }
 0x534   : > { %v23960_v15 = vpop.permute.xlu1 %23959 }
 0x535   : > { %23981 = vst.msk [vmem:[%s32604_s27 + $0xc] sm:$0xf] %vm23977_vm8, %v23960_v15 }
 0x539   : > { %v23962_v8 = vpop.permute.xlu0 %23961 }
 0x53a   : > { %23982 = vst.msk [vmem:[%s32604_s27 + $0x10] sm:$0xf] %vm23977_vm8, %v23962_v8 }
 0x53e   : > { %v23964_v21 = vpop.permute.xlu1 %23963 }
 0x53f   : > { %23983 = vst.msk [vmem:[%s32604_s27 + $0x14] sm:$0xf] %vm23977_vm8, %v23964_v21 }
 0x543   : > { %v23966_v25 = vpop.permute.xlu0 %23965 }
 0x544   : > { %23984 = vst.msk [vmem:[%s32604_s27 + $0x18] sm:$0xf] %vm23977_vm8, %v23966_v25 }
 0x548   : > { %v23968_v12 = vpop.permute.xlu1 %23967 }
 0x549   : > { %23985 = vst.msk [vmem:[%s32604_s27 + $0x1c] sm:$0xf] %vm23977_vm8, %v23968_v12 }
 0x54a PF: > { %s18_s9 = sadd.s32 1, %s27493_s9   ;;  %s33325_s27 = smov %s27485_s29 }
 0x54b   : > { %p15_p12 = scmp.ge.s32.totalorder %s18_s9, 18   ;;  %s33326_s28 = smov %s27489_s30 }
 0x54c   : > { %s33327_s29 = smov %s33330_s10  ;;  %s33328_s30 = smov %s33334_s11 }
 0x54d   :  { %17 = sbr.rel (!%p15_p12) target bundleno = 3 (0x3), region = 100 }

</bundles_post_ra>
